<compile_context>
chip_gen: v5e
topology: v5e:2x2
jax: 0.10.0
libtpu: 0.0.40
codegen_flags: <defaults>
</compile_context>

<pallas_src>
import functools

import jax
import jax.numpy as jnp
from jax.experimental import pallas as pl
from jax.experimental.pallas import tpu as pltpu

IN_EPS = 1e-3           # InstanceNorm2d eps used by the torch module
BN_EPS = 1e-5           # BatchNorm2d default eps (folded into scale/bias)
MATMUL_DTYPE = jnp.bfloat16   # MXU input dtype for 1x1-conv dots (None -> f32)


def _mm(a):
  """Cast an activation to the MXU input dtype at a weight-dot boundary."""
  return a if MATMUL_DTYPE is None else a.astype(MATMUL_DTYPE)


def _wcast(w):
  """Cast a 1x1-conv weight to the MXU input dtype at pack time."""
  return w if MATMUL_DTYPE is None else w.astype(MATMUL_DTYPE)


# ----------------------------------------------------------------------------
# In-kernel building blocks
# ----------------------------------------------------------------------------
def _in_stats(x, eps):
  """Single-pass InstanceNorm moments over the last axis: (mu, rsqrt(var+eps))."""
  inv_n = 1.0 / x.shape[1]
  mu = jnp.sum(x, axis=1, keepdims=True) * inv_n
  var = jnp.maximum(jnp.sum(x * x, axis=1, keepdims=True) * inv_n - mu * mu, 0.0)
  return mu, jax.lax.rsqrt(var + eps)


def _bn_relu_from_stats(x, mu, rstd, scale, bias):
  """relu(IN(x) * scale + bias) given precomputed IN stats (shared across users)."""
  s = scale * rstd
  b = bias - mu * s
  return jnp.maximum(x * s + b, 0.0)


def _in_bn_relu(x, scale, bias, eps):
  """InstanceNorm (last axis) fused with folded-BN affine + ReLU."""
  mu, rstd = _in_stats(x, eps)
  return _bn_relu_from_stats(x, mu, rstd, scale, bias)


def _pointcn(x, nxt, eps):
  """PointCN residual block in (C, N) layout (identity shortcut).

  The first conv bias is an exact no-op (its output feeds an InstanceNorm) and
  is not materialized.
  """
  s1, b1, w1 = nxt(), nxt(), nxt()
  h = _in_bn_relu(x, s1, b1, eps)
  h = jnp.dot(w1, _mm(h), preferred_element_type=jnp.float32)
  s2, b2, w2, c2 = nxt(), nxt(), nxt(), nxt()
  h = _in_bn_relu(h, s2, b2, eps)
  h = jnp.dot(w2, _mm(h), preferred_element_type=jnp.float32) + c2
  return h + x


def _oafilter(x, nxt, eps):
  """OAFilter block in (C, M) cluster layout (identity shortcut)."""
  s1, b1, w1, c1 = nxt(), nxt(), nxt(), nxt()
  h = _in_bn_relu(x, s1, b1, eps)
  h = jnp.dot(w1, _mm(h), preferred_element_type=jnp.float32) + c1
  # torch transposes to (M, C) and applies BN(points)+ReLU+1x1 conv over the
  # cluster dim.  In (C, M) layout that is a per-cluster affine followed by a
  # right-multiplication with W2^T.
  s2, b2, w2, c2 = nxt(), nxt(), nxt(), nxt()
  g = jnp.maximum(h * s2 + b2, 0.0)
  r = jax.lax.dot_general(_mm(g), w2, (((1,), (1,)), ((), ())),
                          preferred_element_type=jnp.float32) + c2
  h = h + r                                                   # out + conv2(out)
  s3, b3, w3, c3 = nxt(), nxt(), nxt(), nxt()
  h = _in_bn_relu(h, s3, b3, eps)
  h = jnp.dot(w3, _mm(h), preferred_element_type=jnp.float32) + c3
  return h + x


# ----------------------------------------------------------------------------
# Fused OANBlock kernel (one grid step == one batch element)
# ----------------------------------------------------------------------------
def _fused_oan_kernel(*refs, layout, n_groups, n_l1_1, n_l2, n_l1_2, eps):
  data_ref, xs_ref = refs[0], refs[1]                         # (Cin, N), (4, N)
  group_refs = refs[2:2 + n_groups]
  logits_ref, xwx_ref = refs[2 + n_groups:]

  pos = [0]

  def nxt():
    g, i = layout[pos[0]]
    pos[0] += 1
    return group_refs[g][i]                                   # static index load

  # conv1: 1x1 conv lifting input_channel -> C (bias kept: survives residual).
  w, c = nxt(), nxt()
  x = jnp.dot(w, _mm(data_ref[...]), preferred_element_type=jnp.float32) + c

  # l1_1: PointCN stack.
  for _ in range(n_l1_1):
    x = _pointcn(x, nxt, eps)
  x1_1 = x                                                    # (C, N)

  # x1_1's InstanceNorm stats are shared by diff_pool, diff_unpool and l1_2[0].
  mu11, rstd11 = _in_stats(x1_1, eps)

  # diff_pool: softmax over points, pool N points into M clusters.
  # Conv bias dropped: row softmax over N is shift-invariant per row (exact).
  s, b, w = nxt(), nxt(), nxt()
  e = _bn_relu_from_stats(x1_1, mu11, rstd11, s, b)
  e = jnp.dot(w, _mm(e), preferred_element_type=jnp.float32)  # (M, N)
  p = jnp.exp(e - jnp.max(e, axis=1, keepdims=True))
  sm = p / jnp.sum(p, axis=1, keepdims=True)                  # exact softmax
  x2 = jax.lax.dot_general(x1_1, sm, (((1,), (1,)), ((), ())),
                           preferred_element_type=jnp.float32)  # (C, M)

  # l2: OAFilter stack in cluster space.
  for _ in range(n_l2):
    x2 = _oafilter(x2, nxt, eps)

  # diff_unpool: softmax over clusters (bias kept: not shift-invariant per column).
  s, b, w, c = nxt(), nxt(), nxt(), nxt()
  e = _bn_relu_from_stats(x1_1, mu11, rstd11, s, b)
  e = jnp.dot(w, _mm(e), preferred_element_type=jnp.float32) + c   # (M, N)
  p = jnp.exp(e - jnp.max(e, axis=0, keepdims=True))
  sm = p / jnp.sum(p, axis=0, keepdims=True)                  # exact softmax
  x_up = jnp.dot(x2, sm, preferred_element_type=jnp.float32)  # (C, N)

  # l1_2[0]: PointCN(2C -> C) with conv shortcut.  The two halves are normalized
  # separately (IN/BN are per-channel, so this equals IN/BN of the concat) and
  # fused into single K=2C contractions.  First-conv bias dropped (feeds IN).
  s1a, b1a = nxt(), nxt()
  s1b, b1b = nxt(), nxt()
  w1 = nxt()
  cat_n = jnp.concatenate(
      [_bn_relu_from_stats(x1_1, mu11, rstd11, s1a, b1a),
       _in_bn_relu(x_up, s1b, b1b, eps)], axis=0)             # (2C, N)
  h = jnp.dot(w1, _mm(cat_n), preferred_element_type=jnp.float32)
  s2, b2, w2, c2 = nxt(), nxt(), nxt(), nxt()
  h = _in_bn_relu(h, s2, b2, eps)
  h = jnp.dot(w2, _mm(h), preferred_element_type=jnp.float32) + c2
  ws, cs = nxt(), nxt()
  cat_r = jnp.concatenate([x1_1, x_up], axis=0)               # (2C, N)
  out = h + jnp.dot(ws, _mm(cat_r), preferred_element_type=jnp.float32) + cs

  # Remaining l1_2 PointCN layers.
  for _ in range(n_l1_2 - 1):
    out = _pointcn(out, nxt, eps)

  # Output 1x1 conv (1 row) as a VPU multiply + sublane reduce (no MXU push).
  wcol, c = nxt(), nxt()                                      # (C,1), (1,1)
  logits = jnp.sum(out * wcol, axis=0, keepdims=True) + c     # (1, N)
  logits_ref[...] = logits

  assert pos[0] == len(layout), "parameter layout / consumption mismatch"

  # weighted_8points Gram matrix: XwX = (X * relu(tanh(logits))) @ X^T.
  # The 9xN feature matrix stays in vregs (no scratch stores / reload).
  xyt = xs_ref[...]                                           # (4, N): x1,y1,x2,y2
  x1r = xyt[0:1, :]; y1r = xyt[1:2, :]
  x2r = xyt[2:3, :]; y2r = xyt[3:4, :]
  xr = jnp.concatenate(
      [x2r * x1r, x2r * y1r, x2r,
       y2r * x1r, y2r * y1r, y2r,
       x1r, y1r, jnp.ones_like(x1r)], axis=0)                 # (9, N)
  wgt = jnp.maximum(jnp.tanh(logits), 0.0)                    # relu(tanh(logits))
  xwx_ref[...] = jax.lax.dot_general(xr * wgt, xr, (((1,), (1,)), ((), ())),
                                     preferred_element_type=jnp.float32)


# ----------------------------------------------------------------------------
# Epipolar symmetric distance kernel (needs e_hat, hence a second small call).
# e_hat is passed through SMEM and read as 9 scalars (no lane extracts).
# ----------------------------------------------------------------------------
def _episym_kernel(xs_ref, e_ref, o_ref):
  b = pl.program_id(0)
  xyt = xs_ref[...]                                           # (4, N)
  x1 = xyt[0:1, :]; y1 = xyt[1:2, :]
  x2 = xyt[2:3, :]; y2 = xyt[3:4, :]
  f = [e_ref[b, k] for k in range(9)]                         # SMEM scalar reads
  fx1_0 = f[0] * x1 + f[1] * y1 + f[2]
  fx1_1 = f[3] * x1 + f[4] * y1 + f[5]
  fx1_2 = f[6] * x1 + f[7] * y1 + f[8]
  ftx2_0 = f[0] * x2 + f[3] * y2 + f[6]
  ftx2_1 = f[1] * x2 + f[4] * y2 + f[7]
  x2fx1 = x2 * fx1_0 + y2 * fx1_1 + fx1_2
  den_a = jnp.square(fx1_0) + jnp.square(fx1_1) + 1e-15
  den_b = jnp.square(ftx2_0) + jnp.square(ftx2_1) + 1e-15
  o_ref[...] = jnp.square(x2fx1) * (1.0 / den_a + 1.0 / den_b)   # (1, N)


# ----------------------------------------------------------------------------
# Parameter flattening / packing
# ----------------------------------------------------------------------------
def _flatten_params(params):
  """Flat list of folded parameters in exact kernel-consumption order.

  Matmul weights are cast to the MXU input dtype here; algebraic no-op biases
  (PointCN/l1_2[0] first-conv bias, diff_pool conv bias) are not passed in.
  """
  W = _wcast
  flat = [W(params["conv1"]["w"]), params["conv1"]["c"]]
  for p in params["l1_1"]:
    flat += [p["s1"], p["b1"], W(p["w1"]),
             p["s2"], p["b2"], W(p["w2"]), p["c2"]]
  d = params["down1"]
  flat += [d["s"], d["b"], W(d["w"])]
  for p in params["l2"]:
    flat += [p["s1"], p["b1"], W(p["w1"]), p["c1"],
             p["s2"], p["b2"], W(p["w2"]), p["c2"],
             p["s3"], p["b3"], W(p["w3"]), p["c3"]]
  u = params["up1"]
  flat += [u["s"], u["b"], W(u["w"]), u["c"]]
  p0 = params["l1_2"][0]
  flat += [p0["s1a"], p0["b1a"], p0["s1b"], p0["b1b"], W(p0["w1"]),
           p0["s2"], p0["b2"], W(p0["w2"]), p0["c2"],
           W(p0["ws"]), p0["cs"]]
  for p in params["l1_2"][1:]:
    flat += [p["s1"], p["b1"], W(p["w1"]),
             p["s2"], p["b2"], W(p["w2"]), p["c2"]]
  o = params["out"]
  flat += [o["wcol"], o["c"]]
  return flat


def _pack_params(flat):
  """Group the flat parameter list by (shape, dtype) into a few stacked arrays.

  Keeps the fused kernel's operand count small (one resident DMA per class)
  while preserving consumption order via a static (group, index) table.
  """
  order, buckets, layout = [], {}, []
  for a in flat:
    key = (tuple(a.shape), a.dtype.name)
    if key not in buckets:
      buckets[key] = []
      order.append(key)
    layout.append((order.index(key), len(buckets[key])))
    buckets[key].append(a)
  packed = [jnp.stack(buckets[k], axis=0) for k in order]
  return packed, tuple(layout)


# ----------------------------------------------------------------------------
# Full OANBlock forward
# ----------------------------------------------------------------------------
def oan_block_forward(params, data, xs, *, depth):
  """data: (B, input_channel, N, 1) NCHW; xs: (B, 1, N, 4)."""
  B, _, N, _ = data.shape
  L = depth // 2
  x = data[..., 0]                                            # (B, Cin, N)
  xs_t = jnp.transpose(xs[:, 0, :, :], (0, 2, 1))             # (B, 4, N)

  flat = _flatten_params(params)
  packed, layout = _pack_params(flat)
  n_groups = len(packed)

  kernel = functools.partial(
      _fused_oan_kernel, layout=layout, n_groups=n_groups,
      n_l1_1=L, n_l2=L, n_l1_2=L, eps=IN_EPS)

  def batched_spec(a):
    nt = a.ndim - 1
    return pl.BlockSpec((None,) + a.shape[1:],
                        lambda i, _nt=nt: (i,) + (0,) * _nt)

  def const_spec(a):
    nd = a.ndim
    return pl.BlockSpec(a.shape, lambda i, _nd=nd: (0,) * _nd)

  # NOTE: grid=(B,) marked "parallel" -> on v7x each TensorCore takes one batch
  # element (B>=2 here); on v5e/v6e it is a no-op.  vmem_limit is left at the
  # default (live footprint at these sizes is <1 MiB).
  logits_row, xwx = pl.pallas_call(
      kernel,
      out_shape=(jax.ShapeDtypeStruct((B, 1, N), jnp.float32),
                 jax.ShapeDtypeStruct((B, 9, 9), jnp.float32)),
      grid=(B,),
      in_specs=[batched_spec(x), batched_spec(xs_t)]
               + [const_spec(a) for a in packed],
      out_specs=(pl.BlockSpec((None, 1, N), lambda i: (i, 0, 0)),
                 pl.BlockSpec((None, 9, 9), lambda i: (i, 0, 0))),
      compiler_params=pltpu.CompilerParams(
          dimension_semantics=("parallel",)),
  )(x, xs_t, *packed)

  logits = logits_row[:, 0, :]                                # (B, N)

  # TODO(synk): torch.linalg.eigh (batch_symeig) has no Pallas TPU equivalent;
  # the 9x9 symmetric eigendecomposition is done with jnp.linalg.eigh (eigvec
  # sign may differ from torch; residual is sign-invariant).
  _, v = jnp.linalg.eigh(xwx)                                 # ascending eigenvalues
  e_hat = v[:, :, 0]                                          # smallest-eigenvalue vec
  e_hat = e_hat / jnp.maximum(
      jnp.linalg.norm(e_hat, axis=1, keepdims=True), 1e-12)

  residual = pl.pallas_call(
      _episym_kernel,
      out_shape=jax.ShapeDtypeStruct((B, 1, N), jnp.float32),
      grid=(B,),
      in_specs=[pl.BlockSpec((None, 4, N), lambda i: (i, 0, 0)),
                pl.BlockSpec(memory_space=pltpu.MemorySpace.SMEM)],
      out_specs=pl.BlockSpec((None, 1, N), lambda i: (i, 0, 0)),
      compiler_params=pltpu.CompilerParams(dimension_semantics=("parallel",)),
  )(xs_t, e_hat)

  return logits, e_hat, residual.reshape(B, 1, N, 1)


# ----------------------------------------------------------------------------
# Deterministic parameter construction (folded BN, fused concat weights)
# ----------------------------------------------------------------------------
def _fold_bn(key, c):
  k1, k2, k3, k4 = jax.random.split(key, 4)
  gamma = 1.0 + 0.1 * jax.random.normal(k1, (c,), jnp.float32)
  beta = 0.1 * jax.random.normal(k2, (c,), jnp.float32)
  rmean = 0.1 * jax.random.normal(k3, (c,), jnp.float32)
  rvar = 1.0 + 0.2 * jax.random.uniform(k4, (c,), jnp.float32)
  scale = gamma * jax.lax.rsqrt(rvar + BN_EPS)
  bias = beta - rmean * scale
  return scale, bias


def _conv(key, cout, cin):
  k1, k2 = jax.random.split(key)
  w = jax.random.normal(k1, (cout, cin), jnp.float32) / jnp.sqrt(float(cin))
  b = 0.05 * jax.random.normal(k2, (cout,), jnp.float32)
  return w, b.reshape(cout, 1)


def init_params(key, channels, input_channel, depth, clusters):
  C, M, L = channels, clusters, depth // 2
  keys = iter(jax.random.split(key, 512))
  nk = lambda: next(keys)

  def bn_col(c):
    s, b = _fold_bn(nk(), c)
    return s.reshape(c, 1), b.reshape(c, 1)

  def bn_row(c):
    s, b = _fold_bn(nk(), c)
    return s.reshape(1, c), b.reshape(1, c)

  def pointcn_p(cin, cout):
    p = {}
    p["s1"], p["b1"] = bn_col(cin)
    p["w1"], p["c1"] = _conv(nk(), cout, cin)   # c1 unused: exact no-op before IN
    p["s2"], p["b2"] = bn_col(cout)
    p["w2"], p["c2"] = _conv(nk(), cout, cout)
    return p

  def pointcn_sc_p(ca, cb, cout):
    # PointCN(ca+cb -> cout) with conv shortcut; the first-layer IN/BN params are
    # split per input half (IN/BN are per-channel so this equals norm of the
    # concat); the conv weights are kept whole for a single K=ca+cb contraction.
    p = {}
    s1, b1 = bn_col(ca + cb)
    p["s1a"], p["b1a"] = s1[:ca], b1[:ca]
    p["s1b"], p["b1b"] = s1[ca:], b1[ca:]
    p["w1"], p["c1"] = _conv(nk(), cout, ca + cb)  # c1 unused: no-op before IN
    p["s2"], p["b2"] = bn_col(cout)
    p["w2"], p["c2"] = _conv(nk(), cout, cout)
    p["ws"], p["cs"] = _conv(nk(), cout, ca + cb)
    return p

  def oafilter_p(c, m):
    p = {}
    p["s1"], p["b1"] = bn_col(c)
    p["w1"], p["c1"] = _conv(nk(), c, c)
    p["s2"], p["b2"] = bn_row(m)
    w2, c2 = _conv(nk(), m, m)
    p["w2"], p["c2"] = w2, c2.reshape(1, m)
    p["s3"], p["b3"] = bn_col(c)
    p["w3"], p["c3"] = _conv(nk(), c, c)
    return p

  def pool_p(c, m):
    s, b = bn_col(c)
    w, cb = _conv(nk(), m, c)
    return {"s": s, "b": b, "w": w, "c": cb}

  params = {}
  w, cb = _conv(nk(), C, input_channel)
  params["conv1"] = {"w": w, "c": cb}
  params["l1_1"] = [pointcn_p(C, C) for _ in range(L)]
  params["down1"] = pool_p(C, M)          # conv bias unused (row-softmax no-op)
  params["l2"] = [oafilter_p(C, M) for _ in range(L)]
  params["up1"] = pool_p(C, M)
  params["l1_2"] = ([pointcn_sc_p(C, C, C)]
                    + [pointcn_p(C, C) for _ in range(L - 1)])
  w, cb = _conv(nk(), 1, C)
  params["out"] = {"wcol": w.reshape(C, 1), "c": cb.reshape(1, 1)}
  return params


# ----------------------------------------------------------------------------
if __name__ == "__main__":
  B, N = 2, 128                     # N multiple of 128 -> lane-dense point tiles
  NET_CHANNELS, INPUT_CHANNEL, DEPTH, CLUSTERS = 32, 4, 4, 8

  key = jax.random.PRNGKey(0)
  kp, kx = jax.random.split(key)
  params = init_params(kp, NET_CHANNELS, INPUT_CHANNEL, DEPTH, CLUSTERS)

  xs = jax.random.normal(kx, (B, 1, N, 4), jnp.float32)       # correspondences
  data = jnp.transpose(xs, (0, 3, 2, 1))                      # (B, 4, N, 1) NCHW

  fwd = jax.jit(functools.partial(oan_block_forward, params, depth=DEPTH))
  logits, e_hat, residual = fwd(data, xs)
  jax.block_until_ready((logits, e_hat, residual))

  assert logits.shape == (B, N)
  assert e_hat.shape == (B, 9)
  assert residual.shape == (B, 1, N, 1)
  assert bool(jnp.all(jnp.isfinite(logits)))
  assert bool(jnp.all(jnp.isfinite(e_hat)))
  assert bool(jnp.all(jnp.isfinite(residual)))
  print("KERNEL_OK")
</pallas_src>

<mosaic_0001>
module attributes {stable_mosaic.version = 11 : i64} {
  func.func @_fused_oan_kernel(%arg0: i32, %arg1: memref<1x4x128xf32, #tpu.memory_space<vmem>>, %arg2: memref<1x4x128xf32, #tpu.memory_space<vmem>>, %arg3: memref<1x32x4xbf16, #tpu.memory_space<vmem>>, %arg4: memref<41x32x1xf32, #tpu.memory_space<vmem>>, %arg5: memref<11x32x32xbf16, #tpu.memory_space<vmem>>, %arg6: memref<2x8x32xbf16, #tpu.memory_space<vmem>>, %arg7: memref<6x1x8xf32, #tpu.memory_space<vmem>>, %arg8: memref<2x8x8xbf16, #tpu.memory_space<vmem>>, %arg9: memref<1x8x1xf32, #tpu.memory_space<vmem>>, %arg10: memref<2x32x64xbf16, #tpu.memory_space<vmem>>, %arg11: memref<1x1x1xf32, #tpu.memory_space<vmem>>, %arg12: memref<1x1x128xf32, #tpu.memory_space<vmem>>, %arg13: memref<1x9x9xf32, #tpu.memory_space<vmem>>) attributes {dimension_semantics = [#tpu.dimension_semantics<parallel>], iteration_bounds = array<i64: 2>, scalar_prefetch = 0 : i64, scratch_operands = 0 : i64, tpu.core_type = #tpu.core_type<tc>, window_params = [{transform_indices = @transform_0, window_bounds = array<i64: 1, 4, 128>}, {transform_indices = @transform_1, window_bounds = array<i64: 1, 4, 128>}, {pipeline_mode = #tpu.pipeline_mode<synchronous>, transform_indices = @transform_2, window_bounds = array<i64: 1, 32, 4>}, {pipeline_mode = #tpu.pipeline_mode<synchronous>, transform_indices = @transform_3, window_bounds = array<i64: 41, 32, 1>}, {pipeline_mode = #tpu.pipeline_mode<synchronous>, transform_indices = @transform_4, window_bounds = array<i64: 11, 32, 32>}, {pipeline_mode = #tpu.pipeline_mode<synchronous>, transform_indices = @transform_5, window_bounds = array<i64: 2, 8, 32>}, {pipeline_mode = #tpu.pipeline_mode<synchronous>, transform_indices = @transform_6, window_bounds = array<i64: 6, 1, 8>}, {pipeline_mode = #tpu.pipeline_mode<synchronous>, transform_indices = @transform_7, window_bounds = array<i64: 2, 8, 8>}, {pipeline_mode = #tpu.pipeline_mode<synchronous>, transform_indices = @transform_8, window_bounds = array<i64: 1, 8, 1>}, {pipeline_mode = #tpu.pipeline_mode<synchronous>, transform_indices = @transform_9, window_bounds = array<i64: 2, 32, 64>}, {pipeline_mode = #tpu.pipeline_mode<synchronous>, transform_indices = @transform_10, window_bounds = array<i64: 1, 1, 1>}, {transform_indices = @transform_11, window_bounds = array<i64: 1, 1, 128>}, {transform_indices = @transform_12, window_bounds = array<i64: 1, 9, 9>}]} {
    %c0 = arith.constant 0 : index
    %c0_0 = arith.constant 0 : index
    %c0_1 = arith.constant 0 : index
    %0 = vector.load %arg3[%c0, %c0_0, %c0_1] : memref<1x32x4xbf16, #tpu.memory_space<vmem>>, vector<1x32x4xbf16>
    %1 = vector.shape_cast %0 : vector<1x32x4xbf16> to vector<32x4xbf16>
    %c0_2 = arith.constant 0 : index
    %c0_3 = arith.constant 0 : index
    %c0_4 = arith.constant 0 : index
    %2 = vector.load %arg4[%c0_2, %c0_3, %c0_4] : memref<41x32x1xf32, #tpu.memory_space<vmem>>, vector<1x32x1xf32>
    %3 = vector.shape_cast %2 : vector<1x32x1xf32> to vector<32x1xf32>
    %c0_5 = arith.constant 0 : index
    %c0_6 = arith.constant 0 : index
    %c0_7 = arith.constant 0 : index
    %4 = vector.load %arg1[%c0_5, %c0_6, %c0_7] : memref<1x4x128xf32, #tpu.memory_space<vmem>>, vector<1x4x128xf32>
    %5 = vector.shape_cast %4 : vector<1x4x128xf32> to vector<4x128xf32>
    %6 = arith.truncf %5 : vector<4x128xf32> to vector<4x128xbf16>
    %cst = arith.constant dense<0.000000e+00> : vector<32x128xf32>
    %7 = tpu.matmul %1, %6, %cst {dimension_numbers = #tpu.dot_dimension_numbers<[1], [0], [0], [1], [0, 0, 1, 1], [], []>} : vector<32x4xbf16>, vector<4x128xbf16>, vector<32x128xf32> -> vector<32x128xf32>
    %8 = vector.broadcast %3 : vector<32x1xf32> to vector<32x128xf32>
    %9 = arith.addf %7, %8 : vector<32x128xf32>
    %c1 = arith.constant 1 : index
    %c0_8 = arith.constant 0 : index
    %c0_9 = arith.constant 0 : index
    %10 = vector.load %arg4[%c1, %c0_8, %c0_9] : memref<41x32x1xf32, #tpu.memory_space<vmem>>, vector<1x32x1xf32>
    %11 = vector.shape_cast %10 : vector<1x32x1xf32> to vector<32x1xf32>
    %c2 = arith.constant 2 : index
    %c0_10 = arith.constant 0 : index
    %c0_11 = arith.constant 0 : index
    %12 = vector.load %arg4[%c2, %c0_10, %c0_11] : memref<41x32x1xf32, #tpu.memory_space<vmem>>, vector<1x32x1xf32>
    %13 = vector.shape_cast %12 : vector<1x32x1xf32> to vector<32x1xf32>
    %c0_12 = arith.constant 0 : index
    %c0_13 = arith.constant 0 : index
    %c0_14 = arith.constant 0 : index
    %14 = vector.load %arg5[%c0_12, %c0_13, %c0_14] : memref<11x32x32xbf16, #tpu.memory_space<vmem>>, vector<1x32x32xbf16>
    %15 = vector.shape_cast %14 : vector<1x32x32xbf16> to vector<32x32xbf16>
    %cst_15 = arith.constant dense<0.000000e+00> : vector<32xf32>
    %16 = vector.multi_reduction <add>, %9, %cst_15 [1] : vector<32x128xf32> to vector<32xf32>
    %17 = vector.shape_cast %16 : vector<32xf32> to vector<32x1xf32>
    %cst_16 = arith.constant 7.812500e-03 : f32
    %18 = vector.broadcast %cst_16 : f32 to vector<32x1xf32>
    %19 = arith.mulf %17, %18 : vector<32x1xf32>
    %20 = arith.mulf %9, %9 : vector<32x128xf32>
    %cst_17 = arith.constant dense<0.000000e+00> : vector<32xf32>
    %21 = vector.multi_reduction <add>, %20, %cst_17 [1] : vector<32x128xf32> to vector<32xf32>
    %22 = vector.shape_cast %21 : vector<32xf32> to vector<32x1xf32>
    %cst_18 = arith.constant 7.812500e-03 : f32
    %23 = vector.broadcast %cst_18 : f32 to vector<32x1xf32>
    %24 = arith.mulf %22, %23 : vector<32x1xf32>
    %25 = arith.mulf %19, %19 : vector<32x1xf32>
    %26 = arith.subf %24, %25 : vector<32x1xf32>
    %cst_19 = arith.constant 0.000000e+00 : f32
    %27 = vector.broadcast %cst_19 : f32 to vector<32x1xf32>
    %28 = arith.maximumf %26, %27 : vector<32x1xf32>
    %cst_20 = arith.constant 1.000000e-03 : f32
    %29 = vector.broadcast %cst_20 : f32 to vector<32x1xf32>
    %30 = arith.addf %28, %29 : vector<32x1xf32>
    %31 = math.rsqrt %30 : vector<32x1xf32>
    %32 = arith.mulf %11, %31 : vector<32x1xf32>
    %33 = arith.mulf %19, %32 : vector<32x1xf32>
    %34 = arith.subf %13, %33 : vector<32x1xf32>
    %35 = vector.broadcast %32 : vector<32x1xf32> to vector<32x128xf32>
    %36 = arith.mulf %9, %35 : vector<32x128xf32>
    %37 = vector.broadcast %34 : vector<32x1xf32> to vector<32x128xf32>
    %38 = arith.addf %36, %37 : vector<32x128xf32>
    %cst_21 = arith.constant 0.000000e+00 : f32
    %39 = vector.broadcast %cst_21 : f32 to vector<32x128xf32>
    %40 = arith.maximumf %38, %39 : vector<32x128xf32>
    %41 = arith.truncf %40 : vector<32x128xf32> to vector<32x128xbf16>
    %cst_22 = arith.constant dense<0.000000e+00> : vector<32x128xf32>
    %42 = tpu.matmul %15, %41, %cst_22 {dimension_numbers = #tpu.dot_dimension_numbers<[1], [0], [0], [1], [0, 0, 1, 1], [], []>} : vector<32x32xbf16>, vector<32x128xbf16>, vector<32x128xf32> -> vector<32x128xf32>
    %c3 = arith.constant 3 : index
    %c0_23 = arith.constant 0 : index
    %c0_24 = arith.constant 0 : index
    %43 = vector.load %arg4[%c3, %c0_23, %c0_24] : memref<41x32x1xf32, #tpu.memory_space<vmem>>, vector<1x32x1xf32>
    %44 = vector.shape_cast %43 : vector<1x32x1xf32> to vector<32x1xf32>
    %c4 = arith.constant 4 : index
    %c0_25 = arith.constant 0 : index
    %c0_26 = arith.constant 0 : index
    %45 = vector.load %arg4[%c4, %c0_25, %c0_26] : memref<41x32x1xf32, #tpu.memory_space<vmem>>, vector<1x32x1xf32>
    %46 = vector.shape_cast %45 : vector<1x32x1xf32> to vector<32x1xf32>
    %c1_27 = arith.constant 1 : index
    %c0_28 = arith.constant 0 : index
    %c0_29 = arith.constant 0 : index
    %47 = vector.load %arg5[%c1_27, %c0_28, %c0_29] : memref<11x32x32xbf16, #tpu.memory_space<vmem>>, vector<1x32x32xbf16>
    %48 = vector.shape_cast %47 : vector<1x32x32xbf16> to vector<32x32xbf16>
    %c5 = arith.constant 5 : index
    %c0_30 = arith.constant 0 : index
    %c0_31 = arith.constant 0 : index
    %49 = vector.load %arg4[%c5, %c0_30, %c0_31] : memref<41x32x1xf32, #tpu.memory_space<vmem>>, vector<1x32x1xf32>
    %50 = vector.shape_cast %49 : vector<1x32x1xf32> to vector<32x1xf32>
    %cst_32 = arith.constant dense<0.000000e+00> : vector<32xf32>
    %51 = vector.multi_reduction <add>, %42, %cst_32 [1] : vector<32x128xf32> to vector<32xf32>
    %52 = vector.shape_cast %51 : vector<32xf32> to vector<32x1xf32>
    %cst_33 = arith.constant 7.812500e-03 : f32
    %53 = vector.broadcast %cst_33 : f32 to vector<32x1xf32>
    %54 = arith.mulf %52, %53 : vector<32x1xf32>
    %55 = arith.mulf %42, %42 : vector<32x128xf32>
    %cst_34 = arith.constant dense<0.000000e+00> : vector<32xf32>
    %56 = vector.multi_reduction <add>, %55, %cst_34 [1] : vector<32x128xf32> to vector<32xf32>
    %57 = vector.shape_cast %56 : vector<32xf32> to vector<32x1xf32>
    %cst_35 = arith.constant 7.812500e-03 : f32
    %58 = vector.broadcast %cst_35 : f32 to vector<32x1xf32>
    %59 = arith.mulf %57, %58 : vector<32x1xf32>
    %60 = arith.mulf %54, %54 : vector<32x1xf32>
    %61 = arith.subf %59, %60 : vector<32x1xf32>
    %cst_36 = arith.constant 0.000000e+00 : f32
    %62 = vector.broadcast %cst_36 : f32 to vector<32x1xf32>
    %63 = arith.maximumf %61, %62 : vector<32x1xf32>
    %cst_37 = arith.constant 1.000000e-03 : f32
    %64 = vector.broadcast %cst_37 : f32 to vector<32x1xf32>
    %65 = arith.addf %63, %64 : vector<32x1xf32>
    %66 = math.rsqrt %65 : vector<32x1xf32>
    %67 = arith.mulf %44, %66 : vector<32x1xf32>
    %68 = arith.mulf %54, %67 : vector<32x1xf32>
    %69 = arith.subf %46, %68 : vector<32x1xf32>
    %70 = vector.broadcast %67 : vector<32x1xf32> to vector<32x128xf32>
    %71 = arith.mulf %42, %70 : vector<32x128xf32>
    %72 = vector.broadcast %69 : vector<32x1xf32> to vector<32x128xf32>
    %73 = arith.addf %71, %72 : vector<32x128xf32>
    %cst_38 = arith.constant 0.000000e+00 : f32
    %74 = vector.broadcast %cst_38 : f32 to vector<32x128xf32>
    %75 = arith.maximumf %73, %74 : vector<32x128xf32>
    %76 = arith.truncf %75 : vector<32x128xf32> to vector<32x128xbf16>
    %cst_39 = arith.constant dense<0.000000e+00> : vector<32x128xf32>
    %77 = tpu.matmul %48, %76, %cst_39 {dimension_numbers = #tpu.dot_dimension_numbers<[1], [0], [0], [1], [0, 0, 1, 1], [], []>} : vector<32x32xbf16>, vector<32x128xbf16>, vector<32x128xf32> -> vector<32x128xf32>
    %78 = vector.broadcast %50 : vector<32x1xf32> to vector<32x128xf32>
    %79 = arith.addf %77, %78 : vector<32x128xf32>
    %80 = arith.addf %79, %9 : vector<32x128xf32>
    %c6 = arith.constant 6 : index
    %c0_40 = arith.constant 0 : index
    %c0_41 = arith.constant 0 : index
    %81 = vector.load %arg4[%c6, %c0_40, %c0_41] : memref<41x32x1xf32, #tpu.memory_space<vmem>>, vector<1x32x1xf32>
    %82 = vector.shape_cast %81 : vector<1x32x1xf32> to vector<32x1xf32>
    %c7 = arith.constant 7 : index
    %c0_42 = arith.constant 0 : index
    %c0_43 = arith.constant 0 : index
    %83 = vector.load %arg4[%c7, %c0_42, %c0_43] : memref<41x32x1xf32, #tpu.memory_space<vmem>>, vector<1x32x1xf32>
    %84 = vector.shape_cast %83 : vector<1x32x1xf32> to vector<32x1xf32>
    %c2_44 = arith.constant 2 : index
    %c0_45 = arith.constant 0 : index
    %c0_46 = arith.constant 0 : index
    %85 = vector.load %arg5[%c2_44, %c0_45, %c0_46] : memref<11x32x32xbf16, #tpu.memory_space<vmem>>, vector<1x32x32xbf16>
    %86 = vector.shape_cast %85 : vector<1x32x32xbf16> to vector<32x32xbf16>
    %cst_47 = arith.constant dense<0.000000e+00> : vector<32xf32>
    %87 = vector.multi_reduction <add>, %80, %cst_47 [1] : vector<32x128xf32> to vector<32xf32>
    %88 = vector.shape_cast %87 : vector<32xf32> to vector<32x1xf32>
    %cst_48 = arith.constant 7.812500e-03 : f32
    %89 = vector.broadcast %cst_48 : f32 to vector<32x1xf32>
    %90 = arith.mulf %88, %89 : vector<32x1xf32>
    %91 = arith.mulf %80, %80 : vector<32x128xf32>
    %cst_49 = arith.constant dense<0.000000e+00> : vector<32xf32>
    %92 = vector.multi_reduction <add>, %91, %cst_49 [1] : vector<32x128xf32> to vector<32xf32>
    %93 = vector.shape_cast %92 : vector<32xf32> to vector<32x1xf32>
    %cst_50 = arith.constant 7.812500e-03 : f32
    %94 = vector.broadcast %cst_50 : f32 to vector<32x1xf32>
    %95 = arith.mulf %93, %94 : vector<32x1xf32>
    %96 = arith.mulf %90, %90 : vector<32x1xf32>
    %97 = arith.subf %95, %96 : vector<32x1xf32>
    %cst_51 = arith.constant 0.000000e+00 : f32
    %98 = vector.broadcast %cst_51 : f32 to vector<32x1xf32>
    %99 = arith.maximumf %97, %98 : vector<32x1xf32>
    %cst_52 = arith.constant 1.000000e-03 : f32
    %100 = vector.broadcast %cst_52 : f32 to vector<32x1xf32>
    %101 = arith.addf %99, %100 : vector<32x1xf32>
    %102 = math.rsqrt %101 : vector<32x1xf32>
    %103 = arith.mulf %82, %102 : vector<32x1xf32>
    %104 = arith.mulf %90, %103 : vector<32x1xf32>
    %105 = arith.subf %84, %104 : vector<32x1xf32>
    %106 = vector.broadcast %103 : vector<32x1xf32> to vector<32x128xf32>
    %107 = arith.mulf %80, %106 : vector<32x128xf32>
    %108 = vector.broadcast %105 : vector<32x1xf32> to vector<32x128xf32>
    %109 = arith.addf %107, %108 : vector<32x128xf32>
    %cst_53 = arith.constant 0.000000e+00 : f32
    %110 = vector.broadcast %cst_53 : f32 to vector<32x128xf32>
    %111 = arith.maximumf %109, %110 : vector<32x128xf32>
    %112 = arith.truncf %111 : vector<32x128xf32> to vector<32x128xbf16>
    %cst_54 = arith.constant dense<0.000000e+00> : vector<32x128xf32>
    %113 = tpu.matmul %86, %112, %cst_54 {dimension_numbers = #tpu.dot_dimension_numbers<[1], [0], [0], [1], [0, 0, 1, 1], [], []>} : vector<32x32xbf16>, vector<32x128xbf16>, vector<32x128xf32> -> vector<32x128xf32>
    %c8 = arith.constant 8 : index
    %c0_55 = arith.constant 0 : index
    %c0_56 = arith.constant 0 : index
    %114 = vector.load %arg4[%c8, %c0_55, %c0_56] : memref<41x32x1xf32, #tpu.memory_space<vmem>>, vector<1x32x1xf32>
    %115 = vector.shape_cast %114 : vector<1x32x1xf32> to vector<32x1xf32>
    %c9 = arith.constant 9 : index
    %c0_57 = arith.constant 0 : index
    %c0_58 = arith.constant 0 : index
    %116 = vector.load %arg4[%c9, %c0_57, %c0_58] : memref<41x32x1xf32, #tpu.memory_space<vmem>>, vector<1x32x1xf32>
    %117 = vector.shape_cast %116 : vector<1x32x1xf32> to vector<32x1xf32>
    %c3_59 = arith.constant 3 : index
    %c0_60 = arith.constant 0 : index
    %c0_61 = arith.constant 0 : index
    %118 = vector.load %arg5[%c3_59, %c0_60, %c0_61] : memref<11x32x32xbf16, #tpu.memory_space<vmem>>, vector<1x32x32xbf16>
    %119 = vector.shape_cast %118 : vector<1x32x32xbf16> to vector<32x32xbf16>
    %c10 = arith.constant 10 : index
    %c0_62 = arith.constant 0 : index
    %c0_63 = arith.constant 0 : index
    %120 = vector.load %arg4[%c10, %c0_62, %c0_63] : memref<41x32x1xf32, #tpu.memory_space<vmem>>, vector<1x32x1xf32>
    %121 = vector.shape_cast %120 : vector<1x32x1xf32> to vector<32x1xf32>
    %cst_64 = arith.constant dense<0.000000e+00> : vector<32xf32>
    %122 = vector.multi_reduction <add>, %113, %cst_64 [1] : vector<32x128xf32> to vector<32xf32>
    %123 = vector.shape_cast %122 : vector<32xf32> to vector<32x1xf32>
    %cst_65 = arith.constant 7.812500e-03 : f32
    %124 = vector.broadcast %cst_65 : f32 to vector<32x1xf32>
    %125 = arith.mulf %123, %124 : vector<32x1xf32>
    %126 = arith.mulf %113, %113 : vector<32x128xf32>
    %cst_66 = arith.constant dense<0.000000e+00> : vector<32xf32>
    %127 = vector.multi_reduction <add>, %126, %cst_66 [1] : vector<32x128xf32> to vector<32xf32>
    %128 = vector.shape_cast %127 : vector<32xf32> to vector<32x1xf32>
    %cst_67 = arith.constant 7.812500e-03 : f32
    %129 = vector.broadcast %cst_67 : f32 to vector<32x1xf32>
    %130 = arith.mulf %128, %129 : vector<32x1xf32>
    %131 = arith.mulf %125, %125 : vector<32x1xf32>
    %132 = arith.subf %130, %131 : vector<32x1xf32>
    %cst_68 = arith.constant 0.000000e+00 : f32
    %133 = vector.broadcast %cst_68 : f32 to vector<32x1xf32>
    %134 = arith.maximumf %132, %133 : vector<32x1xf32>
    %cst_69 = arith.constant 1.000000e-03 : f32
    %135 = vector.broadcast %cst_69 : f32 to vector<32x1xf32>
    %136 = arith.addf %134, %135 : vector<32x1xf32>
    %137 = math.rsqrt %136 : vector<32x1xf32>
    %138 = arith.mulf %115, %137 : vector<32x1xf32>
    %139 = arith.mulf %125, %138 : vector<32x1xf32>
    %140 = arith.subf %117, %139 : vector<32x1xf32>
    %141 = vector.broadcast %138 : vector<32x1xf32> to vector<32x128xf32>
    %142 = arith.mulf %113, %141 : vector<32x128xf32>
    %143 = vector.broadcast %140 : vector<32x1xf32> to vector<32x128xf32>
    %144 = arith.addf %142, %143 : vector<32x128xf32>
    %cst_70 = arith.constant 0.000000e+00 : f32
    %145 = vector.broadcast %cst_70 : f32 to vector<32x128xf32>
    %146 = arith.maximumf %144, %145 : vector<32x128xf32>
    %147 = arith.truncf %146 : vector<32x128xf32> to vector<32x128xbf16>
    %cst_71 = arith.constant dense<0.000000e+00> : vector<32x128xf32>
    %148 = tpu.matmul %119, %147, %cst_71 {dimension_numbers = #tpu.dot_dimension_numbers<[1], [0], [0], [1], [0, 0, 1, 1], [], []>} : vector<32x32xbf16>, vector<32x128xbf16>, vector<32x128xf32> -> vector<32x128xf32>
    %149 = vector.broadcast %121 : vector<32x1xf32> to vector<32x128xf32>
    %150 = arith.addf %148, %149 : vector<32x128xf32>
    %151 = arith.addf %150, %80 : vector<32x128xf32>
    %cst_72 = arith.constant dense<0.000000e+00> : vector<32xf32>
    %152 = vector.multi_reduction <add>, %151, %cst_72 [1] : vector<32x128xf32> to vector<32xf32>
    %153 = vector.shape_cast %152 : vector<32xf32> to vector<32x1xf32>
    %cst_73 = arith.constant 7.812500e-03 : f32
    %154 = vector.broadcast %cst_73 : f32 to vector<32x1xf32>
    %155 = arith.mulf %153, %154 : vector<32x1xf32>
    %156 = arith.mulf %151, %151 : vector<32x128xf32>
    %cst_74 = arith.constant dense<0.000000e+00> : vector<32xf32>
    %157 = vector.multi_reduction <add>, %156, %cst_74 [1] : vector<32x128xf32> to vector<32xf32>
    %158 = vector.shape_cast %157 : vector<32xf32> to vector<32x1xf32>
    %cst_75 = arith.constant 7.812500e-03 : f32
    %159 = vector.broadcast %cst_75 : f32 to vector<32x1xf32>
    %160 = arith.mulf %158, %159 : vector<32x1xf32>
    %161 = arith.mulf %155, %155 : vector<32x1xf32>
    %162 = arith.subf %160, %161 : vector<32x1xf32>
    %cst_76 = arith.constant 0.000000e+00 : f32
    %163 = vector.broadcast %cst_76 : f32 to vector<32x1xf32>
    %164 = arith.maximumf %162, %163 : vector<32x1xf32>
    %cst_77 = arith.constant 1.000000e-03 : f32
    %165 = vector.broadcast %cst_77 : f32 to vector<32x1xf32>
    %166 = arith.addf %164, %165 : vector<32x1xf32>
    %167 = math.rsqrt %166 : vector<32x1xf32>
    %c11 = arith.constant 11 : index
    %c0_78 = arith.constant 0 : index
    %c0_79 = arith.constant 0 : index
    %168 = vector.load %arg4[%c11, %c0_78, %c0_79] : memref<41x32x1xf32, #tpu.memory_space<vmem>>, vector<1x32x1xf32>
    %169 = vector.shape_cast %168 : vector<1x32x1xf32> to vector<32x1xf32>
    %c12 = arith.constant 12 : index
    %c0_80 = arith.constant 0 : index
    %c0_81 = arith.constant 0 : index
    %170 = vector.load %arg4[%c12, %c0_80, %c0_81] : memref<41x32x1xf32, #tpu.memory_space<vmem>>, vector<1x32x1xf32>
    %171 = vector.shape_cast %170 : vector<1x32x1xf32> to vector<32x1xf32>
    %c0_82 = arith.constant 0 : index
    %c0_83 = arith.constant 0 : index
    %c0_84 = arith.constant 0 : index
    %172 = vector.load %arg6[%c0_82, %c0_83, %c0_84] : memref<2x8x32xbf16, #tpu.memory_space<vmem>>, vector<1x8x32xbf16>
    %173 = vector.shape_cast %172 : vector<1x8x32xbf16> to vector<8x32xbf16>
    %174 = arith.mulf %169, %167 : vector<32x1xf32>
    %175 = arith.mulf %155, %174 : vector<32x1xf32>
    %176 = arith.subf %171, %175 : vector<32x1xf32>
    %177 = vector.broadcast %174 : vector<32x1xf32> to vector<32x128xf32>
    %178 = arith.mulf %151, %177 : vector<32x128xf32>
    %179 = vector.broadcast %176 : vector<32x1xf32> to vector<32x128xf32>
    %180 = arith.addf %178, %179 : vector<32x128xf32>
    %cst_85 = arith.constant 0.000000e+00 : f32
    %181 = vector.broadcast %cst_85 : f32 to vector<32x128xf32>
    %182 = arith.maximumf %180, %181 : vector<32x128xf32>
    %183 = arith.truncf %182 : vector<32x128xf32> to vector<32x128xbf16>
    %cst_86 = arith.constant dense<0.000000e+00> : vector<8x128xf32>
    %184 = tpu.matmul %173, %183, %cst_86 {dimension_numbers = #tpu.dot_dimension_numbers<[1], [0], [0], [1], [0, 0, 1, 1], [], []>} : vector<8x32xbf16>, vector<32x128xbf16>, vector<8x128xf32> -> vector<8x128xf32>
    %cst_87 = arith.constant dense<0xFF800000> : vector<8xf32>
    %185 = vector.multi_reduction <maximumf>, %184, %cst_87 [1] : vector<8x128xf32> to vector<8xf32>
    %186 = vector.shape_cast %185 : vector<8xf32> to vector<8x1xf32>
    %187 = vector.broadcast %186 : vector<8x1xf32> to vector<8x128xf32>
    %188 = arith.subf %184, %187 : vector<8x128xf32>
    %189 = math.exp %188 : vector<8x128xf32>
    %cst_88 = arith.constant dense<0.000000e+00> : vector<8xf32>
    %190 = vector.multi_reduction <add>, %189, %cst_88 [1] : vector<8x128xf32> to vector<8xf32>
    %191 = vector.shape_cast %190 : vector<8xf32> to vector<8x1xf32>
    %192 = vector.broadcast %191 : vector<8x1xf32> to vector<8x128xf32>
    %193 = arith.divf %189, %192 : vector<8x128xf32>
    %cst_89 = arith.constant dense<0.000000e+00> : vector<32x8xf32>
    %194 = tpu.matmul %151, %193, %cst_89 {dimension_numbers = #tpu.dot_dimension_numbers<[1], [1], [0], [0], [0, 0, 1, 0], [], []>} : vector<32x128xf32>, vector<8x128xf32>, vector<32x8xf32> -> vector<32x8xf32>
    %c13 = arith.constant 13 : index
    %c0_90 = arith.constant 0 : index
    %c0_91 = arith.constant 0 : index
    %195 = vector.load %arg4[%c13, %c0_90, %c0_91] : memref<41x32x1xf32, #tpu.memory_space<vmem>>, vector<1x32x1xf32>
    %196 = vector.shape_cast %195 : vector<1x32x1xf32> to vector<32x1xf32>
    %c14 = arith.constant 14 : index
    %c0_92 = arith.constant 0 : index
    %c0_93 = arith.constant 0 : index
    %197 = vector.load %arg4[%c14, %c0_92, %c0_93] : memref<41x32x1xf32, #tpu.memory_space<vmem>>, vector<1x32x1xf32>
    %198 = vector.shape_cast %197 : vector<1x32x1xf32> to vector<32x1xf32>
    %c4_94 = arith.constant 4 : index
    %c0_95 = arith.constant 0 : index
    %c0_96 = arith.constant 0 : index
    %199 = vector.load %arg5[%c4_94, %c0_95, %c0_96] : memref<11x32x32xbf16, #tpu.memory_space<vmem>>, vector<1x32x32xbf16>
    %200 = vector.shape_cast %199 : vector<1x32x32xbf16> to vector<32x32xbf16>
    %c15 = arith.constant 15 : index
    %c0_97 = arith.constant 0 : index
    %c0_98 = arith.constant 0 : index
    %201 = vector.load %arg4[%c15, %c0_97, %c0_98] : memref<41x32x1xf32, #tpu.memory_space<vmem>>, vector<1x32x1xf32>
    %202 = vector.shape_cast %201 : vector<1x32x1xf32> to vector<32x1xf32>
    %cst_99 = arith.constant dense<0.000000e+00> : vector<32xf32>
    %203 = vector.multi_reduction <add>, %194, %cst_99 [1] : vector<32x8xf32> to vector<32xf32>
    %204 = vector.shape_cast %203 : vector<32xf32> to vector<32x1xf32>
    %cst_100 = arith.constant 1.250000e-01 : f32
    %205 = vector.broadcast %cst_100 : f32 to vector<32x1xf32>
    %206 = arith.mulf %204, %205 : vector<32x1xf32>
    %207 = arith.mulf %194, %194 : vector<32x8xf32>
    %cst_101 = arith.constant dense<0.000000e+00> : vector<32xf32>
    %208 = vector.multi_reduction <add>, %207, %cst_101 [1] : vector<32x8xf32> to vector<32xf32>
    %209 = vector.shape_cast %208 : vector<32xf32> to vector<32x1xf32>
    %cst_102 = arith.constant 1.250000e-01 : f32
    %210 = vector.broadcast %cst_102 : f32 to vector<32x1xf32>
    %211 = arith.mulf %209, %210 : vector<32x1xf32>
    %212 = arith.mulf %206, %206 : vector<32x1xf32>
    %213 = arith.subf %211, %212 : vector<32x1xf32>
    %cst_103 = arith.constant 0.000000e+00 : f32
    %214 = vector.broadcast %cst_103 : f32 to vector<32x1xf32>
    %215 = arith.maximumf %213, %214 : vector<32x1xf32>
    %cst_104 = arith.constant 1.000000e-03 : f32
    %216 = vector.broadcast %cst_104 : f32 to vector<32x1xf32>
    %217 = arith.addf %215, %216 : vector<32x1xf32>
    %218 = math.rsqrt %217 : vector<32x1xf32>
    %219 = arith.mulf %196, %218 : vector<32x1xf32>
    %220 = arith.mulf %206, %219 : vector<32x1xf32>
    %221 = arith.subf %198, %220 : vector<32x1xf32>
    %222 = vector.broadcast %219 : vector<32x1xf32> to vector<32x8xf32>
    %223 = arith.mulf %194, %222 : vector<32x8xf32>
    %224 = vector.broadcast %221 : vector<32x1xf32> to vector<32x8xf32>
    %225 = arith.addf %223, %224 : vector<32x8xf32>
    %cst_105 = arith.constant 0.000000e+00 : f32
    %226 = vector.broadcast %cst_105 : f32 to vector<32x8xf32>
    %227 = arith.maximumf %225, %226 : vector<32x8xf32>
    %228 = arith.truncf %227 : vector<32x8xf32> to vector<32x8xbf16>
    %cst_106 = arith.constant dense<0.000000e+00> : vector<32x8xf32>
    %229 = tpu.matmul %200, %228, %cst_106 {dimension_numbers = #tpu.dot_dimension_numbers<[1], [0], [0], [1], [0, 0, 1, 1], [], []>} : vector<32x32xbf16>, vector<32x8xbf16>, vector<32x8xf32> -> vector<32x8xf32>
    %230 = vector.broadcast %202 : vector<32x1xf32> to vector<32x8xf32>
    %231 = arith.addf %229, %230 : vector<32x8xf32>
    %c0_107 = arith.constant 0 : index
    %c0_108 = arith.constant 0 : index
    %c0_109 = arith.constant 0 : index
    %232 = vector.load %arg7[%c0_107, %c0_108, %c0_109] : memref<6x1x8xf32, #tpu.memory_space<vmem>>, vector<1x1x8xf32>
    %233 = vector.shape_cast %232 : vector<1x1x8xf32> to vector<1x8xf32>
    %c1_110 = arith.constant 1 : index
    %c0_111 = arith.constant 0 : index
    %c0_112 = arith.constant 0 : index
    %234 = vector.load %arg7[%c1_110, %c0_111, %c0_112] : memref<6x1x8xf32, #tpu.memory_space<vmem>>, vector<1x1x8xf32>
    %235 = vector.shape_cast %234 : vector<1x1x8xf32> to vector<1x8xf32>
    %c0_113 = arith.constant 0 : index
    %c0_114 = arith.constant 0 : index
    %c0_115 = arith.constant 0 : index
    %236 = vector.load %arg8[%c0_113, %c0_114, %c0_115] : memref<2x8x8xbf16, #tpu.memory_space<vmem>>, vector<1x8x8xbf16>
    %237 = vector.shape_cast %236 : vector<1x8x8xbf16> to vector<8x8xbf16>
    %c2_116 = arith.constant 2 : index
    %c0_117 = arith.constant 0 : index
    %c0_118 = arith.constant 0 : index
    %238 = vector.load %arg7[%c2_116, %c0_117, %c0_118] : memref<6x1x8xf32, #tpu.memory_space<vmem>>, vector<1x1x8xf32>
    %239 = vector.shape_cast %238 : vector<1x1x8xf32> to vector<1x8xf32>
    %240 = vector.broadcast %233 : vector<1x8xf32> to vector<32x8xf32>
    %241 = arith.mulf %231, %240 : vector<32x8xf32>
    %242 = vector.broadcast %235 : vector<1x8xf32> to vector<32x8xf32>
    %243 = arith.addf %241, %242 : vector<32x8xf32>
    %cst_119 = arith.constant 0.000000e+00 : f32
    %244 = vector.broadcast %cst_119 : f32 to vector<32x8xf32>
    %245 = arith.maximumf %243, %244 : vector<32x8xf32>
    %246 = arith.truncf %245 : vector<32x8xf32> to vector<32x8xbf16>
    %cst_120 = arith.constant dense<0.000000e+00> : vector<32x8xf32>
    %247 = tpu.matmul %246, %237, %cst_120 {dimension_numbers = #tpu.dot_dimension_numbers<[1], [1], [0], [0], [0, 0, 1, 0], [], []>} : vector<32x8xbf16>, vector<8x8xbf16>, vector<32x8xf32> -> vector<32x8xf32>
    %248 = vector.broadcast %239 : vector<1x8xf32> to vector<32x8xf32>
    %249 = arith.addf %247, %248 : vector<32x8xf32>
    %250 = arith.addf %231, %249 : vector<32x8xf32>
    %c16 = arith.constant 16 : index
    %c0_121 = arith.constant 0 : index
    %c0_122 = arith.constant 0 : index
    %251 = vector.load %arg4[%c16, %c0_121, %c0_122] : memref<41x32x1xf32, #tpu.memory_space<vmem>>, vector<1x32x1xf32>
    %252 = vector.shape_cast %251 : vector<1x32x1xf32> to vector<32x1xf32>
    %c17 = arith.constant 17 : index
    %c0_123 = arith.constant 0 : index
    %c0_124 = arith.constant 0 : index
    %253 = vector.load %arg4[%c17, %c0_123, %c0_124] : memref<41x32x1xf32, #tpu.memory_space<vmem>>, vector<1x32x1xf32>
    %254 = vector.shape_cast %253 : vector<1x32x1xf32> to vector<32x1xf32>
    %c5_125 = arith.constant 5 : index
    %c0_126 = arith.constant 0 : index
    %c0_127 = arith.constant 0 : index
    %255 = vector.load %arg5[%c5_125, %c0_126, %c0_127] : memref<11x32x32xbf16, #tpu.memory_space<vmem>>, vector<1x32x32xbf16>
    %256 = vector.shape_cast %255 : vector<1x32x32xbf16> to vector<32x32xbf16>
    %c18 = arith.constant 18 : index
    %c0_128 = arith.constant 0 : index
    %c0_129 = arith.constant 0 : index
    %257 = vector.load %arg4[%c18, %c0_128, %c0_129] : memref<41x32x1xf32, #tpu.memory_space<vmem>>, vector<1x32x1xf32>
    %258 = vector.shape_cast %257 : vector<1x32x1xf32> to vector<32x1xf32>
    %cst_130 = arith.constant dense<0.000000e+00> : vector<32xf32>
    %259 = vector.multi_reduction <add>, %250, %cst_130 [1] : vector<32x8xf32> to vector<32xf32>
    %260 = vector.shape_cast %259 : vector<32xf32> to vector<32x1xf32>
    %cst_131 = arith.constant 1.250000e-01 : f32
    %261 = vector.broadcast %cst_131 : f32 to vector<32x1xf32>
    %262 = arith.mulf %260, %261 : vector<32x1xf32>
    %263 = arith.mulf %250, %250 : vector<32x8xf32>
    %cst_132 = arith.constant dense<0.000000e+00> : vector<32xf32>
    %264 = vector.multi_reduction <add>, %263, %cst_132 [1] : vector<32x8xf32> to vector<32xf32>
    %265 = vector.shape_cast %264 : vector<32xf32> to vector<32x1xf32>
    %cst_133 = arith.constant 1.250000e-01 : f32
    %266 = vector.broadcast %cst_133 : f32 to vector<32x1xf32>
    %267 = arith.mulf %265, %266 : vector<32x1xf32>
    %268 = arith.mulf %262, %262 : vector<32x1xf32>
    %269 = arith.subf %267, %268 : vector<32x1xf32>
    %cst_134 = arith.constant 0.000000e+00 : f32
    %270 = vector.broadcast %cst_134 : f32 to vector<32x1xf32>
    %271 = arith.maximumf %269, %270 : vector<32x1xf32>
    %cst_135 = arith.constant 1.000000e-03 : f32
    %272 = vector.broadcast %cst_135 : f32 to vector<32x1xf32>
    %273 = arith.addf %271, %272 : vector<32x1xf32>
    %274 = math.rsqrt %273 : vector<32x1xf32>
    %275 = arith.mulf %252, %274 : vector<32x1xf32>
    %276 = arith.mulf %262, %275 : vector<32x1xf32>
    %277 = arith.subf %254, %276 : vector<32x1xf32>
    %278 = vector.broadcast %275 : vector<32x1xf32> to vector<32x8xf32>
    %279 = arith.mulf %250, %278 : vector<32x8xf32>
    %280 = vector.broadcast %277 : vector<32x1xf32> to vector<32x8xf32>
    %281 = arith.addf %279, %280 : vector<32x8xf32>
    %cst_136 = arith.constant 0.000000e+00 : f32
    %282 = vector.broadcast %cst_136 : f32 to vector<32x8xf32>
    %283 = arith.maximumf %281, %282 : vector<32x8xf32>
    %284 = arith.truncf %283 : vector<32x8xf32> to vector<32x8xbf16>
    %cst_137 = arith.constant dense<0.000000e+00> : vector<32x8xf32>
    %285 = tpu.matmul %256, %284, %cst_137 {dimension_numbers = #tpu.dot_dimension_numbers<[1], [0], [0], [1], [0, 0, 1, 1], [], []>} : vector<32x32xbf16>, vector<32x8xbf16>, vector<32x8xf32> -> vector<32x8xf32>
    %286 = vector.broadcast %258 : vector<32x1xf32> to vector<32x8xf32>
    %287 = arith.addf %285, %286 : vector<32x8xf32>
    %288 = arith.addf %287, %194 : vector<32x8xf32>
    %c19 = arith.constant 19 : index
    %c0_138 = arith.constant 0 : index
    %c0_139 = arith.constant 0 : index
    %289 = vector.load %arg4[%c19, %c0_138, %c0_139] : memref<41x32x1xf32, #tpu.memory_space<vmem>>, vector<1x32x1xf32>
    %290 = vector.shape_cast %289 : vector<1x32x1xf32> to vector<32x1xf32>
    %c20 = arith.constant 20 : index
    %c0_140 = arith.constant 0 : index
    %c0_141 = arith.constant 0 : index
    %291 = vector.load %arg4[%c20, %c0_140, %c0_141] : memref<41x32x1xf32, #tpu.memory_space<vmem>>, vector<1x32x1xf32>
    %292 = vector.shape_cast %291 : vector<1x32x1xf32> to vector<32x1xf32>
    %c6_142 = arith.constant 6 : index
    %c0_143 = arith.constant 0 : index
    %c0_144 = arith.constant 0 : index
    %293 = vector.load %arg5[%c6_142, %c0_143, %c0_144] : memref<11x32x32xbf16, #tpu.memory_space<vmem>>, vector<1x32x32xbf16>
    %294 = vector.shape_cast %293 : vector<1x32x32xbf16> to vector<32x32xbf16>
    %c21 = arith.constant 21 : index
    %c0_145 = arith.constant 0 : index
    %c0_146 = arith.constant 0 : index
    %295 = vector.load %arg4[%c21, %c0_145, %c0_146] : memref<41x32x1xf32, #tpu.memory_space<vmem>>, vector<1x32x1xf32>
    %296 = vector.shape_cast %295 : vector<1x32x1xf32> to vector<32x1xf32>
    %cst_147 = arith.constant dense<0.000000e+00> : vector<32xf32>
    %297 = vector.multi_reduction <add>, %288, %cst_147 [1] : vector<32x8xf32> to vector<32xf32>
    %298 = vector.shape_cast %297 : vector<32xf32> to vector<32x1xf32>
    %cst_148 = arith.constant 1.250000e-01 : f32
    %299 = vector.broadcast %cst_148 : f32 to vector<32x1xf32>
    %300 = arith.mulf %298, %299 : vector<32x1xf32>
    %301 = arith.mulf %288, %288 : vector<32x8xf32>
    %cst_149 = arith.constant dense<0.000000e+00> : vector<32xf32>
    %302 = vector.multi_reduction <add>, %301, %cst_149 [1] : vector<32x8xf32> to vector<32xf32>
    %303 = vector.shape_cast %302 : vector<32xf32> to vector<32x1xf32>
    %cst_150 = arith.constant 1.250000e-01 : f32
    %304 = vector.broadcast %cst_150 : f32 to vector<32x1xf32>
    %305 = arith.mulf %303, %304 : vector<32x1xf32>
    %306 = arith.mulf %300, %300 : vector<32x1xf32>
    %307 = arith.subf %305, %306 : vector<32x1xf32>
    %cst_151 = arith.constant 0.000000e+00 : f32
    %308 = vector.broadcast %cst_151 : f32 to vector<32x1xf32>
    %309 = arith.maximumf %307, %308 : vector<32x1xf32>
    %cst_152 = arith.constant 1.000000e-03 : f32
    %310 = vector.broadcast %cst_152 : f32 to vector<32x1xf32>
    %311 = arith.addf %309, %310 : vector<32x1xf32>
    %312 = math.rsqrt %311 : vector<32x1xf32>
    %313 = arith.mulf %290, %312 : vector<32x1xf32>
    %314 = arith.mulf %300, %313 : vector<32x1xf32>
    %315 = arith.subf %292, %314 : vector<32x1xf32>
    %316 = vector.broadcast %313 : vector<32x1xf32> to vector<32x8xf32>
    %317 = arith.mulf %288, %316 : vector<32x8xf32>
    %318 = vector.broadcast %315 : vector<32x1xf32> to vector<32x8xf32>
    %319 = arith.addf %317, %318 : vector<32x8xf32>
    %cst_153 = arith.constant 0.000000e+00 : f32
    %320 = vector.broadcast %cst_153 : f32 to vector<32x8xf32>
    %321 = arith.maximumf %319, %320 : vector<32x8xf32>
    %322 = arith.truncf %321 : vector<32x8xf32> to vector<32x8xbf16>
    %cst_154 = arith.constant dense<0.000000e+00> : vector<32x8xf32>
    %323 = tpu.matmul %294, %322, %cst_154 {dimension_numbers = #tpu.dot_dimension_numbers<[1], [0], [0], [1], [0, 0, 1, 1], [], []>} : vector<32x32xbf16>, vector<32x8xbf16>, vector<32x8xf32> -> vector<32x8xf32>
    %324 = vector.broadcast %296 : vector<32x1xf32> to vector<32x8xf32>
    %325 = arith.addf %323, %324 : vector<32x8xf32>
    %c3_155 = arith.constant 3 : index
    %c0_156 = arith.constant 0 : index
    %c0_157 = arith.constant 0 : index
    %326 = vector.load %arg7[%c3_155, %c0_156, %c0_157] : memref<6x1x8xf32, #tpu.memory_space<vmem>>, vector<1x1x8xf32>
    %327 = vector.shape_cast %326 : vector<1x1x8xf32> to vector<1x8xf32>
    %c4_158 = arith.constant 4 : index
    %c0_159 = arith.constant 0 : index
    %c0_160 = arith.constant 0 : index
    %328 = vector.load %arg7[%c4_158, %c0_159, %c0_160] : memref<6x1x8xf32, #tpu.memory_space<vmem>>, vector<1x1x8xf32>
    %329 = vector.shape_cast %328 : vector<1x1x8xf32> to vector<1x8xf32>
    %c1_161 = arith.constant 1 : index
    %c0_162 = arith.constant 0 : index
    %c0_163 = arith.constant 0 : index
    %330 = vector.load %arg8[%c1_161, %c0_162, %c0_163] : memref<2x8x8xbf16, #tpu.memory_space<vmem>>, vector<1x8x8xbf16>
    %331 = vector.shape_cast %330 : vector<1x8x8xbf16> to vector<8x8xbf16>
    %c5_164 = arith.constant 5 : index
    %c0_165 = arith.constant 0 : index
    %c0_166 = arith.constant 0 : index
    %332 = vector.load %arg7[%c5_164, %c0_165, %c0_166] : memref<6x1x8xf32, #tpu.memory_space<vmem>>, vector<1x1x8xf32>
    %333 = vector.shape_cast %332 : vector<1x1x8xf32> to vector<1x8xf32>
    %334 = vector.broadcast %327 : vector<1x8xf32> to vector<32x8xf32>
    %335 = arith.mulf %325, %334 : vector<32x8xf32>
    %336 = vector.broadcast %329 : vector<1x8xf32> to vector<32x8xf32>
    %337 = arith.addf %335, %336 : vector<32x8xf32>
    %cst_167 = arith.constant 0.000000e+00 : f32
    %338 = vector.broadcast %cst_167 : f32 to vector<32x8xf32>
    %339 = arith.maximumf %337, %338 : vector<32x8xf32>
    %340 = arith.truncf %339 : vector<32x8xf32> to vector<32x8xbf16>
    %cst_168 = arith.constant dense<0.000000e+00> : vector<32x8xf32>
    %341 = tpu.matmul %340, %331, %cst_168 {dimension_numbers = #tpu.dot_dimension_numbers<[1], [1], [0], [0], [0, 0, 1, 0], [], []>} : vector<32x8xbf16>, vector<8x8xbf16>, vector<32x8xf32> -> vector<32x8xf32>
    %342 = vector.broadcast %333 : vector<1x8xf32> to vector<32x8xf32>
    %343 = arith.addf %341, %342 : vector<32x8xf32>
    %344 = arith.addf %325, %343 : vector<32x8xf32>
    %c22 = arith.constant 22 : index
    %c0_169 = arith.constant 0 : index
    %c0_170 = arith.constant 0 : index
    %345 = vector.load %arg4[%c22, %c0_169, %c0_170] : memref<41x32x1xf32, #tpu.memory_space<vmem>>, vector<1x32x1xf32>
    %346 = vector.shape_cast %345 : vector<1x32x1xf32> to vector<32x1xf32>
    %c23 = arith.constant 23 : index
    %c0_171 = arith.constant 0 : index
    %c0_172 = arith.constant 0 : index
    %347 = vector.load %arg4[%c23, %c0_171, %c0_172] : memref<41x32x1xf32, #tpu.memory_space<vmem>>, vector<1x32x1xf32>
    %348 = vector.shape_cast %347 : vector<1x32x1xf32> to vector<32x1xf32>
    %c7_173 = arith.constant 7 : index
    %c0_174 = arith.constant 0 : index
    %c0_175 = arith.constant 0 : index
    %349 = vector.load %arg5[%c7_173, %c0_174, %c0_175] : memref<11x32x32xbf16, #tpu.memory_space<vmem>>, vector<1x32x32xbf16>
    %350 = vector.shape_cast %349 : vector<1x32x32xbf16> to vector<32x32xbf16>
    %c24 = arith.constant 24 : index
    %c0_176 = arith.constant 0 : index
    %c0_177 = arith.constant 0 : index
    %351 = vector.load %arg4[%c24, %c0_176, %c0_177] : memref<41x32x1xf32, #tpu.memory_space<vmem>>, vector<1x32x1xf32>
    %352 = vector.shape_cast %351 : vector<1x32x1xf32> to vector<32x1xf32>
    %cst_178 = arith.constant dense<0.000000e+00> : vector<32xf32>
    %353 = vector.multi_reduction <add>, %344, %cst_178 [1] : vector<32x8xf32> to vector<32xf32>
    %354 = vector.shape_cast %353 : vector<32xf32> to vector<32x1xf32>
    %cst_179 = arith.constant 1.250000e-01 : f32
    %355 = vector.broadcast %cst_179 : f32 to vector<32x1xf32>
    %356 = arith.mulf %354, %355 : vector<32x1xf32>
    %357 = arith.mulf %344, %344 : vector<32x8xf32>
    %cst_180 = arith.constant dense<0.000000e+00> : vector<32xf32>
    %358 = vector.multi_reduction <add>, %357, %cst_180 [1] : vector<32x8xf32> to vector<32xf32>
    %359 = vector.shape_cast %358 : vector<32xf32> to vector<32x1xf32>
    %cst_181 = arith.constant 1.250000e-01 : f32
    %360 = vector.broadcast %cst_181 : f32 to vector<32x1xf32>
    %361 = arith.mulf %359, %360 : vector<32x1xf32>
    %362 = arith.mulf %356, %356 : vector<32x1xf32>
    %363 = arith.subf %361, %362 : vector<32x1xf32>
    %cst_182 = arith.constant 0.000000e+00 : f32
    %364 = vector.broadcast %cst_182 : f32 to vector<32x1xf32>
    %365 = arith.maximumf %363, %364 : vector<32x1xf32>
    %cst_183 = arith.constant 1.000000e-03 : f32
    %366 = vector.broadcast %cst_183 : f32 to vector<32x1xf32>
    %367 = arith.addf %365, %366 : vector<32x1xf32>
    %368 = math.rsqrt %367 : vector<32x1xf32>
    %369 = arith.mulf %346, %368 : vector<32x1xf32>
    %370 = arith.mulf %356, %369 : vector<32x1xf32>
    %371 = arith.subf %348, %370 : vector<32x1xf32>
    %372 = vector.broadcast %369 : vector<32x1xf32> to vector<32x8xf32>
    %373 = arith.mulf %344, %372 : vector<32x8xf32>
    %374 = vector.broadcast %371 : vector<32x1xf32> to vector<32x8xf32>
    %375 = arith.addf %373, %374 : vector<32x8xf32>
    %cst_184 = arith.constant 0.000000e+00 : f32
    %376 = vector.broadcast %cst_184 : f32 to vector<32x8xf32>
    %377 = arith.maximumf %375, %376 : vector<32x8xf32>
    %378 = arith.truncf %377 : vector<32x8xf32> to vector<32x8xbf16>
    %cst_185 = arith.constant dense<0.000000e+00> : vector<32x8xf32>
    %379 = tpu.matmul %350, %378, %cst_185 {dimension_numbers = #tpu.dot_dimension_numbers<[1], [0], [0], [1], [0, 0, 1, 1], [], []>} : vector<32x32xbf16>, vector<32x8xbf16>, vector<32x8xf32> -> vector<32x8xf32>
    %380 = vector.broadcast %352 : vector<32x1xf32> to vector<32x8xf32>
    %381 = arith.addf %379, %380 : vector<32x8xf32>
    %382 = arith.addf %381, %288 : vector<32x8xf32>
    %c25 = arith.constant 25 : index
    %c0_186 = arith.constant 0 : index
    %c0_187 = arith.constant 0 : index
    %383 = vector.load %arg4[%c25, %c0_186, %c0_187] : memref<41x32x1xf32, #tpu.memory_space<vmem>>, vector<1x32x1xf32>
    %384 = vector.shape_cast %383 : vector<1x32x1xf32> to vector<32x1xf32>
    %c26 = arith.constant 26 : index
    %c0_188 = arith.constant 0 : index
    %c0_189 = arith.constant 0 : index
    %385 = vector.load %arg4[%c26, %c0_188, %c0_189] : memref<41x32x1xf32, #tpu.memory_space<vmem>>, vector<1x32x1xf32>
    %386 = vector.shape_cast %385 : vector<1x32x1xf32> to vector<32x1xf32>
    %c1_190 = arith.constant 1 : index
    %c0_191 = arith.constant 0 : index
    %c0_192 = arith.constant 0 : index
    %387 = vector.load %arg6[%c1_190, %c0_191, %c0_192] : memref<2x8x32xbf16, #tpu.memory_space<vmem>>, vector<1x8x32xbf16>
    %388 = vector.shape_cast %387 : vector<1x8x32xbf16> to vector<8x32xbf16>
    %c0_193 = arith.constant 0 : index
    %c0_194 = arith.constant 0 : index
    %c0_195 = arith.constant 0 : index
    %389 = vector.load %arg9[%c0_193, %c0_194, %c0_195] : memref<1x8x1xf32, #tpu.memory_space<vmem>>, vector<1x8x1xf32>
    %390 = vector.shape_cast %389 : vector<1x8x1xf32> to vector<8x1xf32>
    %391 = arith.mulf %384, %167 : vector<32x1xf32>
    %392 = arith.mulf %155, %391 : vector<32x1xf32>
    %393 = arith.subf %386, %392 : vector<32x1xf32>
    %394 = vector.broadcast %391 : vector<32x1xf32> to vector<32x128xf32>
    %395 = arith.mulf %151, %394 : vector<32x128xf32>
    %396 = vector.broadcast %393 : vector<32x1xf32> to vector<32x128xf32>
    %397 = arith.addf %395, %396 : vector<32x128xf32>
    %cst_196 = arith.constant 0.000000e+00 : f32
    %398 = vector.broadcast %cst_196 : f32 to vector<32x128xf32>
    %399 = arith.maximumf %397, %398 : vector<32x128xf32>
    %400 = arith.truncf %399 : vector<32x128xf32> to vector<32x128xbf16>
    %cst_197 = arith.constant dense<0.000000e+00> : vector<8x128xf32>
    %401 = tpu.matmul %388, %400, %cst_197 {dimension_numbers = #tpu.dot_dimension_numbers<[1], [0], [0], [1], [0, 0, 1, 1], [], []>} : vector<8x32xbf16>, vector<32x128xbf16>, vector<8x128xf32> -> vector<8x128xf32>
    %402 = vector.broadcast %390 : vector<8x1xf32> to vector<8x128xf32>
    %403 = arith.addf %401, %402 : vector<8x128xf32>
    %cst_198 = arith.constant dense<0xFF800000> : vector<128xf32>
    %404 = vector.multi_reduction <maximumf>, %403, %cst_198 [0] : vector<8x128xf32> to vector<128xf32>
    %405 = vector.shape_cast %404 : vector<128xf32> to vector<1x128xf32>
    %406 = vector.broadcast %405 : vector<1x128xf32> to vector<8x128xf32>
    %407 = arith.subf %403, %406 : vector<8x128xf32>
    %408 = math.exp %407 : vector<8x128xf32>
    %cst_199 = arith.constant dense<0.000000e+00> : vector<128xf32>
    %409 = vector.multi_reduction <add>, %408, %cst_199 [0] : vector<8x128xf32> to vector<128xf32>
    %410 = vector.shape_cast %409 : vector<128xf32> to vector<1x128xf32>
    %411 = vector.broadcast %410 : vector<1x128xf32> to vector<8x128xf32>
    %412 = arith.divf %408, %411 : vector<8x128xf32>
    %cst_200 = arith.constant dense<0.000000e+00> : vector<32x128xf32>
    %413 = tpu.matmul %382, %412, %cst_200 {dimension_numbers = #tpu.dot_dimension_numbers<[1], [0], [0], [1], [0, 0, 1, 1], [], []>} : vector<32x8xf32>, vector<8x128xf32>, vector<32x128xf32> -> vector<32x128xf32>
    %c27 = arith.constant 27 : index
    %c0_201 = arith.constant 0 : index
    %c0_202 = arith.constant 0 : index
    %414 = vector.load %arg4[%c27, %c0_201, %c0_202] : memref<41x32x1xf32, #tpu.memory_space<vmem>>, vector<1x32x1xf32>
    %415 = vector.shape_cast %414 : vector<1x32x1xf32> to vector<32x1xf32>
    %c28 = arith.constant 28 : index
    %c0_203 = arith.constant 0 : index
    %c0_204 = arith.constant 0 : index
    %416 = vector.load %arg4[%c28, %c0_203, %c0_204] : memref<41x32x1xf32, #tpu.memory_space<vmem>>, vector<1x32x1xf32>
    %417 = vector.shape_cast %416 : vector<1x32x1xf32> to vector<32x1xf32>
    %c29 = arith.constant 29 : index
    %c0_205 = arith.constant 0 : index
    %c0_206 = arith.constant 0 : index
    %418 = vector.load %arg4[%c29, %c0_205, %c0_206] : memref<41x32x1xf32, #tpu.memory_space<vmem>>, vector<1x32x1xf32>
    %419 = vector.shape_cast %418 : vector<1x32x1xf32> to vector<32x1xf32>
    %c30 = arith.constant 30 : index
    %c0_207 = arith.constant 0 : index
    %c0_208 = arith.constant 0 : index
    %420 = vector.load %arg4[%c30, %c0_207, %c0_208] : memref<41x32x1xf32, #tpu.memory_space<vmem>>, vector<1x32x1xf32>
    %421 = vector.shape_cast %420 : vector<1x32x1xf32> to vector<32x1xf32>
    %c0_209 = arith.constant 0 : index
    %c0_210 = arith.constant 0 : index
    %c0_211 = arith.constant 0 : index
    %422 = vector.load %arg10[%c0_209, %c0_210, %c0_211] : memref<2x32x64xbf16, #tpu.memory_space<vmem>>, vector<1x32x64xbf16>
    %423 = vector.shape_cast %422 : vector<1x32x64xbf16> to vector<32x64xbf16>
    %424 = arith.mulf %415, %167 : vector<32x1xf32>
    %425 = arith.mulf %155, %424 : vector<32x1xf32>
    %426 = arith.subf %417, %425 : vector<32x1xf32>
    %427 = vector.broadcast %424 : vector<32x1xf32> to vector<32x128xf32>
    %428 = arith.mulf %151, %427 : vector<32x128xf32>
    %429 = vector.broadcast %426 : vector<32x1xf32> to vector<32x128xf32>
    %430 = arith.addf %428, %429 : vector<32x128xf32>
    %cst_212 = arith.constant 0.000000e+00 : f32
    %431 = vector.broadcast %cst_212 : f32 to vector<32x128xf32>
    %432 = arith.maximumf %430, %431 : vector<32x128xf32>
    %cst_213 = arith.constant dense<0.000000e+00> : vector<32xf32>
    %433 = vector.multi_reduction <add>, %413, %cst_213 [1] : vector<32x128xf32> to vector<32xf32>
    %434 = vector.shape_cast %433 : vector<32xf32> to vector<32x1xf32>
    %cst_214 = arith.constant 7.812500e-03 : f32
    %435 = vector.broadcast %cst_214 : f32 to vector<32x1xf32>
    %436 = arith.mulf %434, %435 : vector<32x1xf32>
    %437 = arith.mulf %413, %413 : vector<32x128xf32>
    %cst_215 = arith.constant dense<0.000000e+00> : vector<32xf32>
    %438 = vector.multi_reduction <add>, %437, %cst_215 [1] : vector<32x128xf32> to vector<32xf32>
    %439 = vector.shape_cast %438 : vector<32xf32> to vector<32x1xf32>
    %cst_216 = arith.constant 7.812500e-03 : f32
    %440 = vector.broadcast %cst_216 : f32 to vector<32x1xf32>
    %441 = arith.mulf %439, %440 : vector<32x1xf32>
    %442 = arith.mulf %436, %436 : vector<32x1xf32>
    %443 = arith.subf %441, %442 : vector<32x1xf32>
    %cst_217 = arith.constant 0.000000e+00 : f32
    %444 = vector.broadcast %cst_217 : f32 to vector<32x1xf32>
    %445 = arith.maximumf %443, %444 : vector<32x1xf32>
    %cst_218 = arith.constant 1.000000e-03 : f32
    %446 = vector.broadcast %cst_218 : f32 to vector<32x1xf32>
    %447 = arith.addf %445, %446 : vector<32x1xf32>
    %448 = math.rsqrt %447 : vector<32x1xf32>
    %449 = arith.mulf %419, %448 : vector<32x1xf32>
    %450 = arith.mulf %436, %449 : vector<32x1xf32>
    %451 = arith.subf %421, %450 : vector<32x1xf32>
    %452 = vector.broadcast %449 : vector<32x1xf32> to vector<32x128xf32>
    %453 = arith.mulf %413, %452 : vector<32x128xf32>
    %454 = vector.broadcast %451 : vector<32x1xf32> to vector<32x128xf32>
    %455 = arith.addf %453, %454 : vector<32x128xf32>
    %cst_219 = arith.constant 0.000000e+00 : f32
    %456 = vector.broadcast %cst_219 : f32 to vector<32x128xf32>
    %457 = arith.maximumf %455, %456 : vector<32x128xf32>
    %458 = tpu.concatenate %432, %457 in 0 : vector<32x128xf32>, vector<32x128xf32> -> vector<64x128xf32>
    %459 = arith.truncf %458 : vector<64x128xf32> to vector<64x128xbf16>
    %cst_220 = arith.constant dense<0.000000e+00> : vector<32x128xf32>
    %460 = tpu.matmul %423, %459, %cst_220 {dimension_numbers = #tpu.dot_dimension_numbers<[1], [0], [0], [1], [0, 0, 1, 1], [], []>} : vector<32x64xbf16>, vector<64x128xbf16>, vector<32x128xf32> -> vector<32x128xf32>
    %c31 = arith.constant 31 : index
    %c0_221 = arith.constant 0 : index
    %c0_222 = arith.constant 0 : index
    %461 = vector.load %arg4[%c31, %c0_221, %c0_222] : memref<41x32x1xf32, #tpu.memory_space<vmem>>, vector<1x32x1xf32>
    %462 = vector.shape_cast %461 : vector<1x32x1xf32> to vector<32x1xf32>
    %c32 = arith.constant 32 : index
    %c0_223 = arith.constant 0 : index
    %c0_224 = arith.constant 0 : index
    %463 = vector.load %arg4[%c32, %c0_223, %c0_224] : memref<41x32x1xf32, #tpu.memory_space<vmem>>, vector<1x32x1xf32>
    %464 = vector.shape_cast %463 : vector<1x32x1xf32> to vector<32x1xf32>
    %c8_225 = arith.constant 8 : index
    %c0_226 = arith.constant 0 : index
    %c0_227 = arith.constant 0 : index
    %465 = vector.load %arg5[%c8_225, %c0_226, %c0_227] : memref<11x32x32xbf16, #tpu.memory_space<vmem>>, vector<1x32x32xbf16>
    %466 = vector.shape_cast %465 : vector<1x32x32xbf16> to vector<32x32xbf16>
    %c33 = arith.constant 33 : index
    %c0_228 = arith.constant 0 : index
    %c0_229 = arith.constant 0 : index
    %467 = vector.load %arg4[%c33, %c0_228, %c0_229] : memref<41x32x1xf32, #tpu.memory_space<vmem>>, vector<1x32x1xf32>
    %468 = vector.shape_cast %467 : vector<1x32x1xf32> to vector<32x1xf32>
    %cst_230 = arith.constant dense<0.000000e+00> : vector<32xf32>
    %469 = vector.multi_reduction <add>, %460, %cst_230 [1] : vector<32x128xf32> to vector<32xf32>
    %470 = vector.shape_cast %469 : vector<32xf32> to vector<32x1xf32>
    %cst_231 = arith.constant 7.812500e-03 : f32
    %471 = vector.broadcast %cst_231 : f32 to vector<32x1xf32>
    %472 = arith.mulf %470, %471 : vector<32x1xf32>
    %473 = arith.mulf %460, %460 : vector<32x128xf32>
    %cst_232 = arith.constant dense<0.000000e+00> : vector<32xf32>
    %474 = vector.multi_reduction <add>, %473, %cst_232 [1] : vector<32x128xf32> to vector<32xf32>
    %475 = vector.shape_cast %474 : vector<32xf32> to vector<32x1xf32>
    %cst_233 = arith.constant 7.812500e-03 : f32
    %476 = vector.broadcast %cst_233 : f32 to vector<32x1xf32>
    %477 = arith.mulf %475, %476 : vector<32x1xf32>
    %478 = arith.mulf %472, %472 : vector<32x1xf32>
    %479 = arith.subf %477, %478 : vector<32x1xf32>
    %cst_234 = arith.constant 0.000000e+00 : f32
    %480 = vector.broadcast %cst_234 : f32 to vector<32x1xf32>
    %481 = arith.maximumf %479, %480 : vector<32x1xf32>
    %cst_235 = arith.constant 1.000000e-03 : f32
    %482 = vector.broadcast %cst_235 : f32 to vector<32x1xf32>
    %483 = arith.addf %481, %482 : vector<32x1xf32>
    %484 = math.rsqrt %483 : vector<32x1xf32>
    %485 = arith.mulf %462, %484 : vector<32x1xf32>
    %486 = arith.mulf %472, %485 : vector<32x1xf32>
    %487 = arith.subf %464, %486 : vector<32x1xf32>
    %488 = vector.broadcast %485 : vector<32x1xf32> to vector<32x128xf32>
    %489 = arith.mulf %460, %488 : vector<32x128xf32>
    %490 = vector.broadcast %487 : vector<32x1xf32> to vector<32x128xf32>
    %491 = arith.addf %489, %490 : vector<32x128xf32>
    %cst_236 = arith.constant 0.000000e+00 : f32
    %492 = vector.broadcast %cst_236 : f32 to vector<32x128xf32>
    %493 = arith.maximumf %491, %492 : vector<32x128xf32>
    %494 = arith.truncf %493 : vector<32x128xf32> to vector<32x128xbf16>
    %cst_237 = arith.constant dense<0.000000e+00> : vector<32x128xf32>
    %495 = tpu.matmul %466, %494, %cst_237 {dimension_numbers = #tpu.dot_dimension_numbers<[1], [0], [0], [1], [0, 0, 1, 1], [], []>} : vector<32x32xbf16>, vector<32x128xbf16>, vector<32x128xf32> -> vector<32x128xf32>
    %496 = vector.broadcast %468 : vector<32x1xf32> to vector<32x128xf32>
    %497 = arith.addf %495, %496 : vector<32x128xf32>
    %c1_238 = arith.constant 1 : index
    %c0_239 = arith.constant 0 : index
    %c0_240 = arith.constant 0 : index
    %498 = vector.load %arg10[%c1_238, %c0_239, %c0_240] : memref<2x32x64xbf16, #tpu.memory_space<vmem>>, vector<1x32x64xbf16>
    %499 = vector.shape_cast %498 : vector<1x32x64xbf16> to vector<32x64xbf16>
    %c34 = arith.constant 34 : index
    %c0_241 = arith.constant 0 : index
    %c0_242 = arith.constant 0 : index
    %500 = vector.load %arg4[%c34, %c0_241, %c0_242] : memref<41x32x1xf32, #tpu.memory_space<vmem>>, vector<1x32x1xf32>
    %501 = vector.shape_cast %500 : vector<1x32x1xf32> to vector<32x1xf32>
    %502 = tpu.concatenate %151, %413 in 0 : vector<32x128xf32>, vector<32x128xf32> -> vector<64x128xf32>
    %503 = arith.truncf %502 : vector<64x128xf32> to vector<64x128xbf16>
    %cst_243 = arith.constant dense<0.000000e+00> : vector<32x128xf32>
    %504 = tpu.matmul %499, %503, %cst_243 {dimension_numbers = #tpu.dot_dimension_numbers<[1], [0], [0], [1], [0, 0, 1, 1], [], []>} : vector<32x64xbf16>, vector<64x128xbf16>, vector<32x128xf32> -> vector<32x128xf32>
    %505 = arith.addf %497, %504 : vector<32x128xf32>
    %506 = vector.broadcast %501 : vector<32x1xf32> to vector<32x128xf32>
    %507 = arith.addf %505, %506 : vector<32x128xf32>
    %c35 = arith.constant 35 : index
    %c0_244 = arith.constant 0 : index
    %c0_245 = arith.constant 0 : index
    %508 = vector.load %arg4[%c35, %c0_244, %c0_245] : memref<41x32x1xf32, #tpu.memory_space<vmem>>, vector<1x32x1xf32>
    %509 = vector.shape_cast %508 : vector<1x32x1xf32> to vector<32x1xf32>
    %c36 = arith.constant 36 : index
    %c0_246 = arith.constant 0 : index
    %c0_247 = arith.constant 0 : index
    %510 = vector.load %arg4[%c36, %c0_246, %c0_247] : memref<41x32x1xf32, #tpu.memory_space<vmem>>, vector<1x32x1xf32>
    %511 = vector.shape_cast %510 : vector<1x32x1xf32> to vector<32x1xf32>
    %c9_248 = arith.constant 9 : index
    %c0_249 = arith.constant 0 : index
    %c0_250 = arith.constant 0 : index
    %512 = vector.load %arg5[%c9_248, %c0_249, %c0_250] : memref<11x32x32xbf16, #tpu.memory_space<vmem>>, vector<1x32x32xbf16>
    %513 = vector.shape_cast %512 : vector<1x32x32xbf16> to vector<32x32xbf16>
    %cst_251 = arith.constant dense<0.000000e+00> : vector<32xf32>
    %514 = vector.multi_reduction <add>, %507, %cst_251 [1] : vector<32x128xf32> to vector<32xf32>
    %515 = vector.shape_cast %514 : vector<32xf32> to vector<32x1xf32>
    %cst_252 = arith.constant 7.812500e-03 : f32
    %516 = vector.broadcast %cst_252 : f32 to vector<32x1xf32>
    %517 = arith.mulf %515, %516 : vector<32x1xf32>
    %518 = arith.mulf %507, %507 : vector<32x128xf32>
    %cst_253 = arith.constant dense<0.000000e+00> : vector<32xf32>
    %519 = vector.multi_reduction <add>, %518, %cst_253 [1] : vector<32x128xf32> to vector<32xf32>
    %520 = vector.shape_cast %519 : vector<32xf32> to vector<32x1xf32>
    %cst_254 = arith.constant 7.812500e-03 : f32
    %521 = vector.broadcast %cst_254 : f32 to vector<32x1xf32>
    %522 = arith.mulf %520, %521 : vector<32x1xf32>
    %523 = arith.mulf %517, %517 : vector<32x1xf32>
    %524 = arith.subf %522, %523 : vector<32x1xf32>
    %cst_255 = arith.constant 0.000000e+00 : f32
    %525 = vector.broadcast %cst_255 : f32 to vector<32x1xf32>
    %526 = arith.maximumf %524, %525 : vector<32x1xf32>
    %cst_256 = arith.constant 1.000000e-03 : f32
    %527 = vector.broadcast %cst_256 : f32 to vector<32x1xf32>
    %528 = arith.addf %526, %527 : vector<32x1xf32>
    %529 = math.rsqrt %528 : vector<32x1xf32>
    %530 = arith.mulf %509, %529 : vector<32x1xf32>
    %531 = arith.mulf %517, %530 : vector<32x1xf32>
    %532 = arith.subf %511, %531 : vector<32x1xf32>
    %533 = vector.broadcast %530 : vector<32x1xf32> to vector<32x128xf32>
    %534 = arith.mulf %507, %533 : vector<32x128xf32>
    %535 = vector.broadcast %532 : vector<32x1xf32> to vector<32x128xf32>
    %536 = arith.addf %534, %535 : vector<32x128xf32>
    %cst_257 = arith.constant 0.000000e+00 : f32
    %537 = vector.broadcast %cst_257 : f32 to vector<32x128xf32>
    %538 = arith.maximumf %536, %537 : vector<32x128xf32>
    %539 = arith.truncf %538 : vector<32x128xf32> to vector<32x128xbf16>
    %cst_258 = arith.constant dense<0.000000e+00> : vector<32x128xf32>
    %540 = tpu.matmul %513, %539, %cst_258 {dimension_numbers = #tpu.dot_dimension_numbers<[1], [0], [0], [1], [0, 0, 1, 1], [], []>} : vector<32x32xbf16>, vector<32x128xbf16>, vector<32x128xf32> -> vector<32x128xf32>
    %c37 = arith.constant 37 : index
    %c0_259 = arith.constant 0 : index
    %c0_260 = arith.constant 0 : index
    %541 = vector.load %arg4[%c37, %c0_259, %c0_260] : memref<41x32x1xf32, #tpu.memory_space<vmem>>, vector<1x32x1xf32>
    %542 = vector.shape_cast %541 : vector<1x32x1xf32> to vector<32x1xf32>
    %c38 = arith.constant 38 : index
    %c0_261 = arith.constant 0 : index
    %c0_262 = arith.constant 0 : index
    %543 = vector.load %arg4[%c38, %c0_261, %c0_262] : memref<41x32x1xf32, #tpu.memory_space<vmem>>, vector<1x32x1xf32>
    %544 = vector.shape_cast %543 : vector<1x32x1xf32> to vector<32x1xf32>
    %c10_263 = arith.constant 10 : index
    %c0_264 = arith.constant 0 : index
    %c0_265 = arith.constant 0 : index
    %545 = vector.load %arg5[%c10_263, %c0_264, %c0_265] : memref<11x32x32xbf16, #tpu.memory_space<vmem>>, vector<1x32x32xbf16>
    %546 = vector.shape_cast %545 : vector<1x32x32xbf16> to vector<32x32xbf16>
    %c39 = arith.constant 39 : index
    %c0_266 = arith.constant 0 : index
    %c0_267 = arith.constant 0 : index
    %547 = vector.load %arg4[%c39, %c0_266, %c0_267] : memref<41x32x1xf32, #tpu.memory_space<vmem>>, vector<1x32x1xf32>
    %548 = vector.shape_cast %547 : vector<1x32x1xf32> to vector<32x1xf32>
    %cst_268 = arith.constant dense<0.000000e+00> : vector<32xf32>
    %549 = vector.multi_reduction <add>, %540, %cst_268 [1] : vector<32x128xf32> to vector<32xf32>
    %550 = vector.shape_cast %549 : vector<32xf32> to vector<32x1xf32>
    %cst_269 = arith.constant 7.812500e-03 : f32
    %551 = vector.broadcast %cst_269 : f32 to vector<32x1xf32>
    %552 = arith.mulf %550, %551 : vector<32x1xf32>
    %553 = arith.mulf %540, %540 : vector<32x128xf32>
    %cst_270 = arith.constant dense<0.000000e+00> : vector<32xf32>
    %554 = vector.multi_reduction <add>, %553, %cst_270 [1] : vector<32x128xf32> to vector<32xf32>
    %555 = vector.shape_cast %554 : vector<32xf32> to vector<32x1xf32>
    %cst_271 = arith.constant 7.812500e-03 : f32
    %556 = vector.broadcast %cst_271 : f32 to vector<32x1xf32>
    %557 = arith.mulf %555, %556 : vector<32x1xf32>
    %558 = arith.mulf %552, %552 : vector<32x1xf32>
    %559 = arith.subf %557, %558 : vector<32x1xf32>
    %cst_272 = arith.constant 0.000000e+00 : f32
    %560 = vector.broadcast %cst_272 : f32 to vector<32x1xf32>
    %561 = arith.maximumf %559, %560 : vector<32x1xf32>
    %cst_273 = arith.constant 1.000000e-03 : f32
    %562 = vector.broadcast %cst_273 : f32 to vector<32x1xf32>
    %563 = arith.addf %561, %562 : vector<32x1xf32>
    %564 = math.rsqrt %563 : vector<32x1xf32>
    %565 = arith.mulf %542, %564 : vector<32x1xf32>
    %566 = arith.mulf %552, %565 : vector<32x1xf32>
    %567 = arith.subf %544, %566 : vector<32x1xf32>
    %568 = vector.broadcast %565 : vector<32x1xf32> to vector<32x128xf32>
    %569 = arith.mulf %540, %568 : vector<32x128xf32>
    %570 = vector.broadcast %567 : vector<32x1xf32> to vector<32x128xf32>
    %571 = arith.addf %569, %570 : vector<32x128xf32>
    %cst_274 = arith.constant 0.000000e+00 : f32
    %572 = vector.broadcast %cst_274 : f32 to vector<32x128xf32>
    %573 = arith.maximumf %571, %572 : vector<32x128xf32>
    %574 = arith.truncf %573 : vector<32x128xf32> to vector<32x128xbf16>
    %cst_275 = arith.constant dense<0.000000e+00> : vector<32x128xf32>
    %575 = tpu.matmul %546, %574, %cst_275 {dimension_numbers = #tpu.dot_dimension_numbers<[1], [0], [0], [1], [0, 0, 1, 1], [], []>} : vector<32x32xbf16>, vector<32x128xbf16>, vector<32x128xf32> -> vector<32x128xf32>
    %576 = vector.broadcast %548 : vector<32x1xf32> to vector<32x128xf32>
    %577 = arith.addf %575, %576 : vector<32x128xf32>
    %578 = arith.addf %577, %507 : vector<32x128xf32>
    %c40 = arith.constant 40 : index
    %c0_276 = arith.constant 0 : index
    %c0_277 = arith.constant 0 : index
    %579 = vector.load %arg4[%c40, %c0_276, %c0_277] : memref<41x32x1xf32, #tpu.memory_space<vmem>>, vector<1x32x1xf32>
    %580 = vector.shape_cast %579 : vector<1x32x1xf32> to vector<32x1xf32>
    %c0_278 = arith.constant 0 : index
    %c0_279 = arith.constant 0 : index
    %c0_280 = arith.constant 0 : index
    %581 = vector.load %arg11[%c0_278, %c0_279, %c0_280] : memref<1x1x1xf32, #tpu.memory_space<vmem>>, vector<1x1x1xf32>
    %582 = vector.shape_cast %581 : vector<1x1x1xf32> to vector<1x1xf32>
    %583 = vector.broadcast %580 : vector<32x1xf32> to vector<32x128xf32>
    %584 = arith.mulf %578, %583 : vector<32x128xf32>
    %cst_281 = arith.constant dense<0.000000e+00> : vector<128xf32>
    %585 = vector.multi_reduction <add>, %584, %cst_281 [0] : vector<32x128xf32> to vector<128xf32>
    %586 = vector.shape_cast %585 : vector<128xf32> to vector<1x128xf32>
    %587 = vector.broadcast %582 : vector<1x1xf32> to vector<1x128xf32>
    %588 = arith.addf %586, %587 : vector<1x128xf32>
    %c0_282 = arith.constant 0 : index
    %c0_283 = arith.constant 0 : index
    %c0_284 = arith.constant 0 : index
    %589 = vector.load %arg12[%c0_282, %c0_283, %c0_284] : memref<1x1x128xf32, #tpu.memory_space<vmem>>, vector<1x1x128xf32>
    %590 = vector.shape_cast %589 : vector<1x1x128xf32> to vector<1x128xf32>
    %591 = vector.shape_cast %588 : vector<1x128xf32> to vector<1x1x128xf32>
    tpu.vector_store %arg12[%c0_282, %c0_283, %c0_284], %591 {strides = array<i32>} : memref<1x1x128xf32, #tpu.memory_space<vmem>>, vector<1x1x128xf32>,
    %c0_285 = arith.constant 0 : index
    %c0_286 = arith.constant 0 : index
    %c0_287 = arith.constant 0 : index
    %592 = vector.load %arg2[%c0_285, %c0_286, %c0_287] : memref<1x4x128xf32, #tpu.memory_space<vmem>>, vector<1x4x128xf32>
    %593 = vector.shape_cast %592 : vector<1x4x128xf32> to vector<4x128xf32>
    %594 = vector.extract_strided_slice %593 {offsets = [0, 0], sizes = [1, 128], strides = [1, 1]} : vector<4x128xf32> to vector<1x128xf32>
    %595 = vector.extract_strided_slice %593 {offsets = [1, 0], sizes = [1, 128], strides = [1, 1]} : vector<4x128xf32> to vector<1x128xf32>
    %596 = vector.extract_strided_slice %593 {offsets = [2, 0], sizes = [1, 128], strides = [1, 1]} : vector<4x128xf32> to vector<1x128xf32>
    %597 = vector.extract_strided_slice %593 {offsets = [3, 0], sizes = [1, 128], strides = [1, 1]} : vector<4x128xf32> to vector<1x128xf32>
    %598 = arith.mulf %596, %594 : vector<1x128xf32>
    %599 = arith.mulf %596, %595 : vector<1x128xf32>
    %600 = arith.mulf %597, %594 : vector<1x128xf32>
    %601 = arith.mulf %597, %595 : vector<1x128xf32>
    %cst_288 = arith.constant 1.000000e+00 : f32
    %602 = vector.broadcast %cst_288 : f32 to vector<1x128xf32>
    %603 = tpu.concatenate %598, %599, %596, %600, %601, %597, %594, %595, %602 in 0 : vector<1x128xf32>, vector<1x128xf32>, vector<1x128xf32>, vector<1x128xf32>, vector<1x128xf32>, vector<1x128xf32>, vector<1x128xf32>, vector<1x128xf32>, vector<1x128xf32> -> vector<9x128xf32>
    %604 = math.tanh %588 : vector<1x128xf32>
    %cst_289 = arith.constant 0.000000e+00 : f32
    %605 = vector.broadcast %cst_289 : f32 to vector<1x128xf32>
    %606 = arith.maximumf %604, %605 : vector<1x128xf32>
    %607 = vector.broadcast %606 : vector<1x128xf32> to vector<9x128xf32>
    %608 = arith.mulf %603, %607 : vector<9x128xf32>
    %cst_290 = arith.constant dense<0.000000e+00> : vector<9x9xf32>
    %609 = tpu.matmul %608, %603, %cst_290 {dimension_numbers = #tpu.dot_dimension_numbers<[1], [1], [0], [0], [0, 0, 1, 0], [], []>} : vector<9x128xf32>, vector<9x128xf32>, vector<9x9xf32> -> vector<9x9xf32>
    %c0_291 = arith.constant 0 : index
    %c0_292 = arith.constant 0 : index
    %c0_293 = arith.constant 0 : index
    %610 = vector.load %arg13[%c0_291, %c0_292, %c0_293] : memref<1x9x9xf32, #tpu.memory_space<vmem>>, vector<1x9x9xf32>
    %611 = vector.shape_cast %610 : vector<1x9x9xf32> to vector<9x9xf32>
    %612 = vector.shape_cast %609 : vector<9x9xf32> to vector<1x9x9xf32>
    tpu.vector_store %arg13[%c0_291, %c0_292, %c0_293], %612 {strides = array<i32>} : memref<1x9x9xf32, #tpu.memory_space<vmem>>, vector<1x9x9xf32>,
    return
  }
  func.func @transform_0(%arg0: i32) -> (i32, i32, i32) {
    %c0_i32 = arith.constant 0 : i32
    %c0_i32_0 = arith.constant 0 : i32
    %c0_i32_1 = arith.constant 0 : i32
    return %arg0, %c0_i32, %c0_i32_0 : i32, i32, i32
  }
  func.func @transform_1(%arg0: i32) -> (i32, i32, i32) {
    %c0_i32 = arith.constant 0 : i32
    %c0_i32_0 = arith.constant 0 : i32
    %c0_i32_1 = arith.constant 0 : i32
    return %arg0, %c0_i32, %c0_i32_0 : i32, i32, i32
  }
  func.func @transform_2(%arg0: i32) -> (i32, i32, i32) {
    %c0_i32 = arith.constant 0 : i32
    %c0_i32_0 = arith.constant 0 : i32
    %c0_i32_1 = arith.constant 0 : i32
    %c0_i32_2 = arith.constant 0 : i32
    return %c0_i32, %c0_i32_0, %c0_i32_1 : i32, i32, i32
  }
  func.func @transform_3(%arg0: i32) -> (i32, i32, i32) {
    %c0_i32 = arith.constant 0 : i32
    %c0_i32_0 = arith.constant 0 : i32
    %c0_i32_1 = arith.constant 0 : i32
    %c0_i32_2 = arith.constant 0 : i32
    return %c0_i32, %c0_i32_0, %c0_i32_1 : i32, i32, i32
  }
  func.func @transform_4(%arg0: i32) -> (i32, i32, i32) {
    %c0_i32 = arith.constant 0 : i32
    %c0_i32_0 = arith.constant 0 : i32
    %c0_i32_1 = arith.constant 0 : i32
    %c0_i32_2 = arith.constant 0 : i32
    return %c0_i32, %c0_i32_0, %c0_i32_1 : i32, i32, i32
  }
  func.func @transform_5(%arg0: i32) -> (i32, i32, i32) {
    %c0_i32 = arith.constant 0 : i32
    %c0_i32_0 = arith.constant 0 : i32
    %c0_i32_1 = arith.constant 0 : i32
    %c0_i32_2 = arith.constant 0 : i32
    return %c0_i32, %c0_i32_0, %c0_i32_1 : i32, i32, i32
  }
  func.func @transform_6(%arg0: i32) -> (i32, i32, i32) {
    %c0_i32 = arith.constant 0 : i32
    %c0_i32_0 = arith.constant 0 : i32
    %c0_i32_1 = arith.constant 0 : i32
    %c0_i32_2 = arith.constant 0 : i32
    return %c0_i32, %c0_i32_0, %c0_i32_1 : i32, i32, i32
  }
  func.func @transform_7(%arg0: i32) -> (i32, i32, i32) {
    %c0_i32 = arith.constant 0 : i32
    %c0_i32_0 = arith.constant 0 : i32
    %c0_i32_1 = arith.constant 0 : i32
    %c0_i32_2 = arith.constant 0 : i32
    return %c0_i32, %c0_i32_0, %c0_i32_1 : i32, i32, i32
  }
  func.func @transform_8(%arg0: i32) -> (i32, i32, i32) {
    %c0_i32 = arith.constant 0 : i32
    %c0_i32_0 = arith.constant 0 : i32
    %c0_i32_1 = arith.constant 0 : i32
    %c0_i32_2 = arith.constant 0 : i32
    return %c0_i32, %c0_i32_0, %c0_i32_1 : i32, i32, i32
  }
  func.func @transform_9(%arg0: i32) -> (i32, i32, i32) {
    %c0_i32 = arith.constant 0 : i32
    %c0_i32_0 = arith.constant 0 : i32
    %c0_i32_1 = arith.constant 0 : i32
    %c0_i32_2 = arith.constant 0 : i32
    return %c0_i32, %c0_i32_0, %c0_i32_1 : i32, i32, i32
  }
  func.func @transform_10(%arg0: i32) -> (i32, i32, i32) {
    %c0_i32 = arith.constant 0 : i32
    %c0_i32_0 = arith.constant 0 : i32
    %c0_i32_1 = arith.constant 0 : i32
    %c0_i32_2 = arith.constant 0 : i32
    return %c0_i32, %c0_i32_0, %c0_i32_1 : i32, i32, i32
  }
  func.func @transform_11(%arg0: i32) -> (i32, i32, i32) {
    %c0_i32 = arith.constant 0 : i32
    %c0_i32_0 = arith.constant 0 : i32
    %c0_i32_1 = arith.constant 0 : i32
    return %arg0, %c0_i32, %c0_i32_0 : i32, i32, i32
  }
  func.func @transform_12(%arg0: i32) -> (i32, i32, i32) {
    %c0_i32 = arith.constant 0 : i32
    %c0_i32_0 = arith.constant 0 : i32
    %c0_i32_1 = arith.constant 0 : i32
    return %arg0, %c0_i32, %c0_i32_0 : i32, i32, i32
  }
}

module attributes {stable_mosaic.version = 11 : i64} {
  func.func @_episym_kernel(%arg0: i32, %arg1: memref<1x4x128xf32, #tpu.memory_space<vmem>>, %arg2: memref<2x9xf32, #tpu.memory_space<smem>>, %arg3: memref<1x1x128xf32, #tpu.memory_space<vmem>>) attributes {dimension_semantics = [#tpu.dimension_semantics<parallel>], iteration_bounds = array<i64: 2>, scalar_prefetch = 0 : i64, scratch_operands = 0 : i64, tpu.core_type = #tpu.core_type<tc>, window_params = [{transform_indices = @transform_0, window_bounds = array<i64: 1, 4, 128>}, {transform_indices = @transform_1, window_bounds = array<i64: 2, 9>}, {transform_indices = @transform_2, window_bounds = array<i64: 1, 1, 128>}]} {
    %c0 = arith.constant 0 : index
    %c0_0 = arith.constant 0 : index
    %c0_1 = arith.constant 0 : index
    %0 = vector.load %arg1[%c0, %c0_0, %c0_1] : memref<1x4x128xf32, #tpu.memory_space<vmem>>, vector<1x4x128xf32>
    %1 = vector.shape_cast %0 : vector<1x4x128xf32> to vector<4x128xf32>
    %2 = vector.extract_strided_slice %1 {offsets = [0, 0], sizes = [1, 128], strides = [1, 1]} : vector<4x128xf32> to vector<1x128xf32>
    %3 = vector.extract_strided_slice %1 {offsets = [1, 0], sizes = [1, 128], strides = [1, 1]} : vector<4x128xf32> to vector<1x128xf32>
    %4 = vector.extract_strided_slice %1 {offsets = [2, 0], sizes = [1, 128], strides = [1, 1]} : vector<4x128xf32> to vector<1x128xf32>
    %5 = vector.extract_strided_slice %1 {offsets = [3, 0], sizes = [1, 128], strides = [1, 1]} : vector<4x128xf32> to vector<1x128xf32>
    %6 = arith.index_cast %arg0 : i32 to index
    %c0_2 = arith.constant 0 : index
    %7 = memref.load %arg2[%6, %c0_2] : memref<2x9xf32, #tpu.memory_space<smem>>
    %8 = arith.index_cast %arg0 : i32 to index
    %c1 = arith.constant 1 : index
    %9 = memref.load %arg2[%8, %c1] : memref<2x9xf32, #tpu.memory_space<smem>>
    %10 = arith.index_cast %arg0 : i32 to index
    %c2 = arith.constant 2 : index
    %11 = memref.load %arg2[%10, %c2] : memref<2x9xf32, #tpu.memory_space<smem>>
    %12 = arith.index_cast %arg0 : i32 to index
    %c3 = arith.constant 3 : index
    %13 = memref.load %arg2[%12, %c3] : memref<2x9xf32, #tpu.memory_space<smem>>
    %14 = arith.index_cast %arg0 : i32 to index
    %c4 = arith.constant 4 : index
    %15 = memref.load %arg2[%14, %c4] : memref<2x9xf32, #tpu.memory_space<smem>>
    %16 = arith.index_cast %arg0 : i32 to index
    %c5 = arith.constant 5 : index
    %17 = memref.load %arg2[%16, %c5] : memref<2x9xf32, #tpu.memory_space<smem>>
    %18 = arith.index_cast %arg0 : i32 to index
    %c6 = arith.constant 6 : index
    %19 = memref.load %arg2[%18, %c6] : memref<2x9xf32, #tpu.memory_space<smem>>
    %20 = arith.index_cast %arg0 : i32 to index
    %c7 = arith.constant 7 : index
    %21 = memref.load %arg2[%20, %c7] : memref<2x9xf32, #tpu.memory_space<smem>>
    %22 = arith.index_cast %arg0 : i32 to index
    %c8 = arith.constant 8 : index
    %23 = memref.load %arg2[%22, %c8] : memref<2x9xf32, #tpu.memory_space<smem>>
    %24 = vector.broadcast %7 : f32 to vector<1x128xf32>
    %25 = arith.mulf %24, %2 : vector<1x128xf32>
    %26 = vector.broadcast %9 : f32 to vector<1x128xf32>
    %27 = arith.mulf %26, %3 : vector<1x128xf32>
    %28 = arith.addf %25, %27 : vector<1x128xf32>
    %29 = vector.broadcast %11 : f32 to vector<1x128xf32>
    %30 = arith.addf %28, %29 : vector<1x128xf32>
    %31 = vector.broadcast %13 : f32 to vector<1x128xf32>
    %32 = arith.mulf %31, %2 : vector<1x128xf32>
    %33 = vector.broadcast %15 : f32 to vector<1x128xf32>
    %34 = arith.mulf %33, %3 : vector<1x128xf32>
    %35 = arith.addf %32, %34 : vector<1x128xf32>
    %36 = vector.broadcast %17 : f32 to vector<1x128xf32>
    %37 = arith.addf %35, %36 : vector<1x128xf32>
    %38 = vector.broadcast %19 : f32 to vector<1x128xf32>
    %39 = arith.mulf %38, %2 : vector<1x128xf32>
    %40 = vector.broadcast %21 : f32 to vector<1x128xf32>
    %41 = arith.mulf %40, %3 : vector<1x128xf32>
    %42 = arith.addf %39, %41 : vector<1x128xf32>
    %43 = vector.broadcast %23 : f32 to vector<1x128xf32>
    %44 = arith.addf %42, %43 : vector<1x128xf32>
    %45 = vector.broadcast %7 : f32 to vector<1x128xf32>
    %46 = arith.mulf %45, %4 : vector<1x128xf32>
    %47 = vector.broadcast %13 : f32 to vector<1x128xf32>
    %48 = arith.mulf %47, %5 : vector<1x128xf32>
    %49 = arith.addf %46, %48 : vector<1x128xf32>
    %50 = vector.broadcast %19 : f32 to vector<1x128xf32>
    %51 = arith.addf %49, %50 : vector<1x128xf32>
    %52 = vector.broadcast %9 : f32 to vector<1x128xf32>
    %53 = arith.mulf %52, %4 : vector<1x128xf32>
    %54 = vector.broadcast %15 : f32 to vector<1x128xf32>
    %55 = arith.mulf %54, %5 : vector<1x128xf32>
    %56 = arith.addf %53, %55 : vector<1x128xf32>
    %57 = vector.broadcast %21 : f32 to vector<1x128xf32>
    %58 = arith.addf %56, %57 : vector<1x128xf32>
    %59 = arith.mulf %4, %30 : vector<1x128xf32>
    %60 = arith.mulf %5, %37 : vector<1x128xf32>
    %61 = arith.addf %59, %60 : vector<1x128xf32>
    %62 = arith.addf %61, %44 : vector<1x128xf32>
    %63 = arith.mulf %30, %30 : vector<1x128xf32>
    %64 = arith.mulf %37, %37 : vector<1x128xf32>
    %65 = arith.addf %63, %64 : vector<1x128xf32>
    %cst = arith.constant 1.000000e-15 : f32
    %66 = vector.broadcast %cst : f32 to vector<1x128xf32>
    %67 = arith.addf %65, %66 : vector<1x128xf32>
    %68 = arith.mulf %51, %51 : vector<1x128xf32>
    %69 = arith.mulf %58, %58 : vector<1x128xf32>
    %70 = arith.addf %68, %69 : vector<1x128xf32>
    %cst_3 = arith.constant 1.000000e-15 : f32
    %71 = vector.broadcast %cst_3 : f32 to vector<1x128xf32>
    %72 = arith.addf %70, %71 : vector<1x128xf32>
    %73 = arith.mulf %62, %62 : vector<1x128xf32>
    %cst_4 = arith.constant 1.000000e+00 : f32
    %74 = vector.broadcast %cst_4 : f32 to vector<1x128xf32>
    %75 = arith.divf %74, %67 : vector<1x128xf32>
    %cst_5 = arith.constant 1.000000e+00 : f32
    %76 = vector.broadcast %cst_5 : f32 to vector<1x128xf32>
    %77 = arith.divf %76, %72 : vector<1x128xf32>
    %78 = arith.addf %75, %77 : vector<1x128xf32>
    %79 = arith.mulf %73, %78 : vector<1x128xf32>
    %c0_6 = arith.constant 0 : index
    %c0_7 = arith.constant 0 : index
    %c0_8 = arith.constant 0 : index
    %80 = vector.load %arg3[%c0_6, %c0_7, %c0_8] : memref<1x1x128xf32, #tpu.memory_space<vmem>>, vector<1x1x128xf32>
    %81 = vector.shape_cast %80 : vector<1x1x128xf32> to vector<1x128xf32>
    %82 = vector.shape_cast %79 : vector<1x128xf32> to vector<1x1x128xf32>
    tpu.vector_store %arg3[%c0_6, %c0_7, %c0_8], %82 {strides = array<i32>} : memref<1x1x128xf32, #tpu.memory_space<vmem>>, vector<1x1x128xf32>,
    return
  }
  func.func @transform_0(%arg0: i32) -> (i32, i32, i32) {
    %c0_i32 = arith.constant 0 : i32
    %c0_i32_0 = arith.constant 0 : i32
    %c0_i32_1 = arith.constant 0 : i32
    return %arg0, %c0_i32, %c0_i32_0 : i32, i32, i32
  }
  func.func @transform_1(%arg0: i32) -> (i32, i32) {
    %c0_i32 = arith.constant 0 : i32
    %c0_i32_0 = arith.constant 0 : i32
    %c0_i32_1 = arith.constant 0 : i32
    return %c0_i32, %c0_i32_0 : i32, i32
  }
  func.func @transform_2(%arg0: i32) -> (i32, i32, i32) {
    %c0_i32 = arith.constant 0 : i32
    %c0_i32_0 = arith.constant 0 : i32
    %c0_i32_1 = arith.constant 0 : i32
    return %arg0, %c0_i32, %c0_i32_0 : i32, i32, i32
  }
}

</mosaic_0001>

<bundles_post_ra>
// kernel: custom-call.2
= control target key start
LH: loop header
LB: loop body
LE: loop exit
PB: predicated region body
PF: predicated region fallthrough
CT: control target
= control target key end

     0   :  { %s1724_s30 = smov 0   ;;  %s1726_s10 = smov 0   ;;  %s2057_s0 = inlined_call_operand.vmem [shape: f32[2,5,5], index: 0, kind: input, shape index: {}]   ;;  %s2058_s1 = inlined_call_operand.vmem [shape: f32[2,5,5], index: 1, kind: input, shape index: {}]   ;;  %s2059_s2 = inlined_call_operand.vmem [shape: f32[2,5,5], index: 2, kind: input, shape index: {}]   ;;  %s2060_s3 = inlined_call_operand.vmem [shape: f32[2,5,5], index: 3, kind: input, shape index: {}]   ;;  %s2061_s4 = inlined_call_operand.vmem [shape: f32[2,5], index: 4, kind: output, shape index: {0}]   ;;  %s2062_s5 = inlined_call_operand.vmem [shape: f32[2,5], index: 5, kind: output, shape index: {1}]   ;;  %s2063_s6 = inlined_call_operand.vmem [shape: f32[2,5,5], index: 6, kind: output, shape index: {2}]   ;;  %s2064_s7 = inlined_call_operand.vmem [shape: f32[2,5,5], index: 7, kind: output, shape index: {3}]   ;;  %s2065_s8 = inlined_call_operand.vmem [shape: f32[2,5,5], index: 8, kind: output, shape index: {4}]   ;;  %s2066_s9 = inlined_call_operand.vmem [shape: f32[2,5,5], index: 9, kind: output, shape index: {5}]  }
   0x1   :  { %s1728_s11 = smov 0  }
   0x2 LB: > { %s1740_s12 = sadd.s32 4294967295, %s1661_s11   ;;  %s1743_s13 = sadd.s32 1, %s1661_s11   ;;  %s1661_s11 = sphi %s1728_s11, %s2073_s11   ;;  %s1657_s10 = sphi %s1726_s10, %s2072_s10   ;;  %s1653_s30 = sphi %s1724_s30, %s2071_s30  }
   0x3   : > { %s20_s14 = sshrl.u32 %s1661_s11, 3  ;;  %s21_s15 = sshrl.u32 %s1743_s13, 3 }
   0x4   : > { %s22_s16 = ssub.s32 %s20_s14, %s21_s15  ;;  %s25_s17 = sadd.s32 1, %s1657_s10 }
   0x5   : > { %p23_p0 = scmp.eq.s32.totalorder %s22_s16, 0  ;;  %p35_p1 = scmp.ne.s32.totalorder %s1657_s10, %s1653_s30 }
   0x6   : > { %p36_p2 = scmp.eq.s32.totalorder %s1740_s12, 1  ;;  %p1522_p4 = scmp.ge.s32.totalorder %s1661_s11, 2 }
   0x7   : > { %s1752_s18 = scalar_select %p23_p0, %s1657_s10, %s25_s17  }
   0x8   : > { %p1754_p3 = por %p36_p2, %p35_p1  ;;  %86 = sbr.rel (%p1522_p4) target bundleno = 18 (0x12), region = 16 }
   0x9   : > { %2067 = sst [smem:[#allocation25_spill]] %s1752_s18  ;;  %s88_s20 = sand.u32 (!%p1522_p4), 1, %s1661_s11  }
   0xa   : > { %s1524_s21 = sshll.u32 (!%p1522_p4), %s1661_s11, 3  ;;  %s1523_s22 = sshll.u32 (!%p1522_p4), %s88_s20, 3 }
   0xb   : > { %s92_s25 = scalar_lea.vmem (!%p1522_p4), %s2057_s0, %s1524_s21  ;;  %s90_s26 = scalar_lea.vmem (!%p1522_p4), [#allocation0], %s1523_s22 }
   0xc   : > { %s131_s29 = scalar_lea.vmem (!%p1522_p4), %s2058_s1, %s1524_s21  ;;  %s170_s16 = scalar_lea.vmem (!%p1522_p4), %s2059_s2, %s1524_s21 }
   0xd   : > { %v121_v0 = vld [vmem:[%s92_s25] sm:$0xff]  ;;  %s129_s17 = scalar_lea.vmem [#allocation1], %s1523_s22  ;;  %s209_s23 = scalar_lea.vmem %s2060_s3, %s1524_s21 }
   0xe   : > { %122 = vst [vmem:[%s90_s26] sm:$0xff] %v121_v0  ;;  %v160_v1 = vld [vmem:[%s131_s29] sm:$0xff]  ;;  %s168_s24 = scalar_lea.vmem [#allocation2], %s1523_s22  ;;  %s207_s25 = scalar_lea.vmem [#allocation3], %s1523_s22 }
   0xf   : > { %161 = vst [vmem:[%s129_s17] sm:$0xff] %v160_v1  ;;  %v199_v2 = vld [vmem:[%s170_s16] sm:$0xff] }
  0x10   : > { %200 = vst [vmem:[%s168_s24] sm:$0xff] %v199_v2  ;;  %v238_v3 = vld [vmem:[%s209_s23] sm:$0xff] }
  0x11   : > { %239 = vst [vmem:[%s207_s25] sm:$0xff] %v238_v3 }
  0x12 PF: > { %p1531_p5 = scmp.ge.s32.totalorder %s1661_s11, 1  ;;  %p244_p6 = scmp.lt.s32.totalorder %s1661_s11, 3 }
  0x14   : > { %p245_p7 = pnand %p1531_p5, %p244_p6 }
  0x16   : > { %248 = sbr.rel (%p245_p7) target bundleno = 946 (0x3b2), region = 156 }
  0x1b   : > { %s251_s26 = sand.u32 1, %s1740_s12   ;;  %s285_s27 = sand.u32 1, %s1653_s30   ;;  %v329_v4 = vlaneseq  ;;  %v1671_v9 = vmov 0.0  }
  0x1c   : > { %s1777_s28 = sshll.u32 %s251_s26, 3  ;;  %s1779_s18 = sshll.u32 %s285_s27, 1 }
  0x1d   : > { %v1781_v5 = vand.u32 127, %v329_v4  ;;  %v1783_v6 = vshrl.u32 %v329_v4, 7  ;;  %s253_s11 = scalar_lea.vmem [#allocation0], %s1777_s28  ;;  %s257_s21 = scalar_lea.vmem [#allocation1], %s1777_s28 }
  0x1e   : > { %v313_v7 = vld [vmem:[%s253_s11] sm:$0xff]  ;;  %v316_v8 = vld [vmem:[%s257_s21] sm:$0xff]  ;;  %s1788_s30 = scalar_lea.vmem [#allocation8], %s1777_s28  ;;  %s312_s22 = smov [#allocation12] }
  0x1f   : > { %324 = vst [vmem:[%s1788_s30] sm:$0xff] %v1671_v9  ;;  %s315_s29 = smov [#allocation13]  ;;  %s261_s14 = scalar_lea.vmem [#allocation2], %s1777_s28  ;;  %v331_v5 = vmov %v1781_v5  ;;  %v334_v6 = vmov %v1783_v6  ;;  %vm1411_vm2 = vcmp.lt.s32.totalorder %v1781_v5, 5 }
  0x20   : > { %v319_v10 = vld [vmem:[%s261_s14] sm:$0xff]  ;;  %s1793_s15 = scalar_lea.vmem [#allocation9], %s1777_s28  ;;  %314 = vst [vmem:[%s312_s22] sm:$0xff] %v313_v7  ;;  %s318_s16 = smov [#allocation14]  ;;  %vm338_vm0 = vcmp.eq.s32.totalorder %v334_v6, %v331_v5  ;;  %v344_v5 = vmov %v1781_v5  ;;  %v347_v6 = vmov %v1783_v6 }
  0x21   : > { %325 = vst [vmem:[%s1793_s15] sm:$0xff] %v1671_v9  ;;  %s321_s17 = smov [#allocation15]  ;;  %s265_s20 = scalar_lea.vmem [#allocation3], %s1777_s28  ;;  %vm351_vm1 = vcmp.eq.s32.totalorder %v347_v6, %v344_v5  ;;  %v1403_v5 = vmov %v1781_v5  ;;  %v1406_v6 = vmov %v1783_v6 }
  0x22   : > { %v322_v11 = vld [vmem:[%s265_s20] sm:$0xff]  ;;  %317 = vst [vmem:[%s315_s29] sm:$0xff] %v316_v8  ;;  %s328_s30 = smov %s1788_s30  ;;  %s1801_s23 = scalar_lea.vmem [#allocation10], %s1777_s28  ;;  %v1420_v5 = vmov %v1781_v5  ;;  %v1423_v6 = vmov %v1783_v6  ;;  %vm1416_vm3 = vcmp.eq.s32.totalorder %v1406_v6, %v1403_v5 }
  0x23   : > { %320 = vst [vmem:[%s318_s16] sm:$0xff] %v319_v10  ;;  %s1805_s24 = scalar_lea.vmem [#allocation11], %s1777_s28  ;;  %s287_s25 = scalar_lea.vmem [#allocation5], %s1779_s18  ;;  %v1437_v5 = vmov %v1781_v5  ;;  %v1440_v6 = vmov %v1783_v6 }
  0x24   : > { %323 = vst [vmem:[%s321_s17] sm:$0xff] %v322_v11  ;;  %s293_s26 = scalar_lea.vmem [#allocation7], %s1779_s18  ;;  %s1407_s27 = smov [#allocation12]  ;;  %v1454_v5 = vmov %v1781_v5  ;;  %v1457_v6 = vmov %v1783_v6 }
  0x25   : > { %326 = vst [vmem:[%s1801_s23] sm:$0xff] %v1671_v9  ;;  %s1424_s28 = smov [#allocation13]  ;;  %s1441_s11 = smov [#allocation14]  ;;  %vm1467_vm4 = vcmp.eq.s32.totalorder %v1457_v6, %v1454_v5 }
  0x26   : > { %327 = vst [vmem:[%s1805_s24] sm:$0xff] %v1671_v9  ;;  %v335_v12 = vld [vmem:[%s328_s30] sm:$0x1f]  ;;  %s341_s24 = smov %s1805_s24  ;;  %s1458_s21 = smov [#allocation15] }
  0x27   : > { %v339_v13 = vsel %vm338_vm0, 1.0, %v335_v12  ;;  %v1413_v16 = vld [vmem:[%s1407_s27] sm:$0x1f] }
  0x28   : > { %340 = vst [vmem:[%s328_s30] sm:$0x1f] %v339_v13  ;;  %v1414_v18 = vsel %vm1411_vm2, %v1413_v16, 0.0 }
  0x29   : > { %v1430_v17 = vld [vmem:[%s1424_s28] sm:$0x1f]  ;;  %v1415_v22 = vmul.f32 %v1414_v18, %v1414_v18 }
  0x2a   : > { %v1431_v19 = vsel %vm1411_vm2, %v1430_v17, 0.0  ;;  %v1447_v20 = vld [vmem:[%s1441_s11] sm:$0x1f] }
  0x2b   : > { %v1464_v21 = vld [vmem:[%s1458_s21] sm:$0x1f]  ;;  %v1432_v23 = vmul.f32 %v1431_v19, %v1431_v19  ;;  %v1448_v24 = vsel %vm1411_vm2, %v1447_v20, 0.0  ;;  %v1417_v29 = vsel %vm1416_vm3, 0.0, %v1415_v22 }
  0x2c   : > { %v1465_v25 = vsel %vm1411_vm2, %v1464_v21, 0.0  ;;  %v1449_v26 = vmul.f32 %v1448_v24, %v1448_v24 }
  0x2d   : > { %v348_v14 = vld [vmem:[%s341_s24] sm:$0x1f]  ;;  %v1434_v27 = vadd.f32 %v1432_v23, %v1415_v22  ;;  %v1466_v28 = vmul.f32 %v1465_v25, %v1465_v25  ;;  %v1433_v31 = vadd.f32 %v1432_v23, %v1417_v29 }
  0x2e   : > { %v352_v15 = vsel %vm351_vm1, 1.0, %v348_v14 }
  0x2f   : > { %353 = vst [vmem:[%s341_s24] sm:$0x1f] %v352_v15  ;;  %v1451_v30 = vadd.f32 %v1449_v26, %v1434_v27  ;;  %v1450_v33 = vadd.f32 %v1449_v26, %v1433_v31  ;;  %v1468_v34 = vsel %vm1467_vm4, 0.0, %v1466_v28 }
  0x31   : > { %v1470_v32 = vadd.f32 %v1466_v28, %v1451_v30  ;;  %v1469_v35 = vadd.f32 %v1468_v34, %v1450_v33 }
  0x33   : > { %1471 = vadd.xlane.f32.xlu0 %v1470_v32 }
  0x3b   : > { %1479 = vadd.xlane.f32.xlu0 %v1469_v35 }
  0xa6   : > { %v1472_v36 = vpop.xlane.xlu0 %1471 }
  0xa7   : > { %v1473_v37 = vrot.slane %v1472_v36, 4 }
  0xa9   : > { %v1474_v38 = vadd.f32 %v1473_v37, %v1472_v36 }
  0xab   : > { %v1475_v39 = vrot.slane %v1474_v38, 2 }
  0xad   : > { %v1476_v43 = vadd.f32 %v1475_v39, %v1474_v38 }
  0xae   : > { %v1480_v40 = vpop.xlane.xlu0 %1479 }
  0xaf   : > { %v1481_v41 = vrot.slane %v1480_v40, 4  ;;  %v1477_v46 = vrot.slane %v1476_v43, 1 }
  0xb1   : > { %v1482_v42 = vadd.f32 %v1481_v41, %v1480_v40  ;;  %v1478_v49 = vadd.f32 %v1477_v46, %v1476_v43 }
  0xb3   : > { %v1483_v44 = vrot.slane %v1482_v42, 2 }
  0xb5   : > { %v1484_v45 = vadd.f32 %v1483_v44, %v1482_v42 }
  0xb7   : > { %v1485_v47 = vrot.slane %v1484_v45, 1 }
  0xb9   : > { %v1486_v48 = vadd.f32 %v1485_v47, %v1484_v45 }
  0xbb   : > { %1572 = vpush %v1486_v48 }
  0xbc   : > { %1574 = vpush %v1478_v49 }
  0xec   : > { %s1573_s22 = spop %1572 }
  0xed   : > { %s1575_s29 = spop %1574 }
  0xee   : > { %s1489_s14 = smul.f32 1e-10, %s1575_s29 }
  0xf0   : > { %p1490_p8 = scmp.le.f32.partialorder %s1573_s22, %s1489_s14 }
  0xf1   : > { %s1830_s16 = smov (!%p1490_p8), 0  }
  0xf2   : > { %1493 = sbr.rel (%p1490_p8) target bundleno = 900 (0x384), region = 499 }
  0xf7 LB: >> { %s1835_s17 = smov 0   ;;  %s1665_s16 = sphi %s1830_s16, %s2069_s16  }
  0xf8 LB: >>> { %s458_s20 = smov [#allocation12]  ;;  %v462_v5 = vmov %v1781_v5  ;;  %v465_v6 = vmov %v1783_v6  ;;  %s478_s27 = smov [#allocation13]  ;;  %s1669_s17 = sphi %s1835_s17, %s457_s17  }
  0xf9   : >>> { %v482_v5 = vmov %v1781_v5  ;;  %v485_v6 = vmov %v1783_v6  ;;  %v466_v50 = vld [vmem:[%s458_s20] sm:$0x1f]  ;;  %vm469_vm5 = vcmp.eq.s32.totalorder %v465_v6, %v462_v5  ;;  %s498_s28 = smov [#allocation15]  ;;  %s459_s11 = smov [#allocation16] }
  0xfa   : >>> { %vm489_vm6 = vcmp.eq.s32.totalorder %v485_v6, %v482_v5  ;;  %v502_v5 = vmov %v1781_v5  ;;  %v505_v6 = vmov %v1783_v6  ;;  %v470_v51 = vsel %vm469_vm5, %v466_v50, 0.0  ;;  %v486_v52 = vld [vmem:[%s478_s27] sm:$0x1f]  ;;  %s479_s21 = smov [#allocation17]  ;;  %s499_s22 = smov [#allocation18] }
  0xfb   : >>> { %vm509_vm7 = vcmp.eq.s32.totalorder %v505_v6, %v502_v5  ;;  %v471_v53 = vrot.slane %v470_v51, 4  ;;  %v490_v54 = vsel %vm489_vm6, %v486_v52, 0.0  ;;  %v506_v55 = vld [vmem:[%s498_s28] sm:$0x1f]  ;;  %s522_s29 = smov [#allocation17]  ;;  %s520_s14 = smov [#allocation16]  ;;  %v611_v5 = vmov %v1781_v5 }
  0xfc   : >>> { %v491_v56 = vrot.slane %v490_v54, 4  ;;  %v510_v57 = vsel %vm509_vm7, %v506_v55, 0.0  ;;  %s524_s20 = smov [#allocation18]  ;;  %s599_s27 = smov [#allocation19]  ;;  %v614_v6 = vmov %v1783_v6 }
  0xfd   : >>> { %v472_v58 = vadd.f32 %v471_v53, %v470_v51  ;;  %v511_v59 = vrot.slane %v510_v57, 4  ;;  %s601_s28 = smov [#allocation20]  ;;  %s1862_s30 = smov %s1788_s30 }
  0xfe   : >>> { %v492_v60 = vadd.f32 %v491_v56, %v490_v54  ;;  %s1865_s15 = smov %s1793_s15  ;;  %s1871_s23 = smov %s1801_s23 }
  0xff   : >>> { %v473_v61 = vrot.slane %v472_v58, 2  ;;  %v512_v62 = vadd.f32 %v511_v59, %v510_v57  ;;  %s1875_s24 = smov %s1805_s24  ;;  %s457_s17 = sadd.s32 1, %s1669_s17  }
 0x100   : >>> { %v493_v63 = vrot.slane %v492_v60, 2  ;;  %p454_p9 = scmp.ge.s32.totalorder %s457_s17, 9  }
 0x101   : >>> { %v474_v0 = vadd.f32 %v473_v61, %v472_v58  ;;  %v513_v1 = vrot.slane %v512_v62, 2 }
 0x102   : >>> { %v494_v2 = vadd.f32 %v493_v63, %v492_v60 }
 0x103   : >>> { %v475_v3 = vrot.slane %v474_v0, 1  ;;  %v514_v4 = vadd.f32 %v513_v1, %v512_v62 }
 0x104   : >>> { %v495_v7 = vrot.slane %v494_v2, 1 }
 0x105   : >>> { %v476_v8 = vadd.f32 %v475_v3, %v474_v0  ;;  %v515_v9 = vrot.slane %v514_v4, 1 }
 0x106   : >>> { %v496_v10 = vadd.f32 %v495_v7, %v494_v2 }
 0x107   : >>> { %477 = vst [vmem:[%s459_s11] sm:$0x1] %v476_v8  ;;  %v516_v11 = vadd.f32 %v515_v9, %v514_v4  ;;  %s518_s11 = smov [#allocation21] }
 0x108   : >>> { %497 = vst [vmem:[%s479_s21] sm:$0x1] %v496_v10  ;;  %s519_s21 = smov [#allocation22]  ;;  %s603_s11 = smov %s518_s11 }
 0x109   : >>> { %517 = vst [vmem:[%s499_s22] sm:$0x1] %v516_v11  ;;  %s605_s21 = smov %s519_s21  ;;  %s607_s22 = smov [#allocation21] }
 0x10e   : >>> { %v521_v19 = vld [vmem:[%s520_s14] sm:$0xff]  ;;  %s620_s14 = smov [#allocation23] }
 0x10f   : >>> { %v1846_v12 = vld [vmem:[%s522_s29] sm:$0xff]  ;;  %v575_v43 = vand.u32 2147483647, %v521_v19  ;;  %s622_s29 = smov [#allocation22] }
 0x110   : >>> { %v527_v13 = vmul.f32 2.0, %v1846_v12  ;;  %v525_v20 = vld [vmem:[%s524_s20] sm:$0xff]  ;;  %v576_v51 = vand.u32 2147483647, %v1846_v12  ;;  %s635_s20 = smov [#allocation24] }
 0x111   : >>> { %v526_v23 = vsub.f32 %v525_v20, %v521_v19  ;;  %v577_v44 = vand.u32 2147483647, %v525_v20 }
 0x112   : >>> { %1623 = vrcp.f32 %v527_v13  ;;  %v539_v16 = vand.u32 2147483648, %v527_v13  ;;  %vm533_vm8 = vweird.f32 %v527_v13  ;;  %v537_v18 = vand.u32 2147483647, %v527_v13 }
 0x113   : >>> { %v578_v46 = vmin.f32 %v575_v43, %v577_v44 }
 0x114   : >>> { %v540_v22 = vor.u32 1.1754944e-38, %v539_v16  ;;  %vm538_vm11 = vcmp.eq.f32.partialorder %v537_v18, 8.507059e+37 }
 0x115   : >>> { %v579_v52 = vmul.f32 1.1920929e-08, %v578_v46 }
 0x117   : >>> { %vm580_vm4 = vcmp.le.f32.partialorder %v576_v51, %v579_v52 }
 0x118   : >>> { %v1624_v14 = vpop.eup %1623 }
 0x119   : >>> { %v529_v15 = vmul.f32 %v1624_v14, %v527_v13  ;;  %vm534_vm9 = vweird.f32 %v1624_v14 }
 0x11a   : >>> { %vm535_vm10 = vmor %vm533_vm8, %vm534_vm9  ;;  %vm616_vm8 = vcmp.eq.s32.totalorder %v614_v6, %v611_v5  ;;  %v626_v5 = vmov %v1781_v5  ;;  %v629_v6 = vmov %v1783_v6 }
 0x11b   : >>> { %v530_v17 = vsub.f32 1.0, %v529_v15  ;;  %vm631_vm9 = vcmp.eq.s32.totalorder %v629_v6, %v626_v5  ;;  %v697_v5 = vmov %v1781_v5 }
 0x11c   : >>> { %v738_v5 = vmov %v1781_v5 }
 0x11d   : >>> { %v531_v21 = vmul.f32 %v1624_v14, %v530_v17  ;;  %v724_v5 = vmov %v1781_v5 }
 0x11f   : >>> { %v532_v24 = vadd.f32 %v1624_v14, %v531_v21 }
 0x121   : >>> { %v536_v25 = vsel %vm535_vm10, %v1624_v14, %v532_v24  ;;  %v871_v24 = vld [vmem:[%s1871_s23] sm:$0x1f]  ;;  %vm821_vm10 = vcmp.eq.s32.totalorder %v1783_v6, 0 }
 0x122   : >>> { %v541_v26 = vsel %vm538_vm11, %v540_v22, %v536_v25  ;;  %vm833_vm11 = vcmp.eq.s32.totalorder %v1783_v6, 4  ;;  %v700_v6 = vmov %v1783_v6 }
 0x123   : >>> { %v542_v27 = vmul.f32 %v541_v26, %v526_v23  ;;  %v741_v6 = vmov %v1783_v6 }
 0x124   : >>> { %v727_v6 = vmov %v1783_v6 }
 0x125   : >>> { %v544_v28 = vmul.f32 %v542_v27, %v542_v27  ;;  %vm543_vm14 = vcmp.ge.f32.partialorder %v542_v27, 0.0 }
 0x127   : >>> { %v545_v29 = vadd.f32 1.0, %v544_v28 }
 0x129   : >>> { %1625 = vrsqrt.f32 %v545_v29  ;;  %vm553_vm12 = vcmp.eq.f32.partialorder %v545_v29, inf  ;;  %v556_v36 = vand.u32 2147483648, %v545_v29  ;;  %vm555_vm13 = vcmp.eq.f32.partialorder %v545_v29, 0.0 }
 0x12f   : >>> { %v1626_v30 = vpop.eup %1625 }
 0x130   : >>> { %v547_v31 = vmul.f32 %v1626_v30, %v545_v29 }
 0x132   : >>> { %v548_v32 = vmul.f32 %v1626_v30, %v547_v31 }
 0x134   : >>> { %v549_v33 = vmul.f32 0.5, %v548_v32 }
 0x136   : >>> { %v550_v34 = vsub.f32 1.5, %v549_v33 }
 0x138   : >>> { %v551_v35 = vmul.f32 %v1626_v30, %v550_v34 }
 0x13a   : >>> { %v552_v37 = vmul.f32 %v551_v35, %v545_v29 }
 0x13c   : >>> { %v554_v38 = vsel %vm553_vm12, %v545_v29, %v552_v37  ;;  %v872_v29 = vld [vmem:[%s1875_s24] sm:$0x1f]  ;;  %vm705_vm12 = vcmp.eq.s32.totalorder %v700_v6, %v697_v5  ;;  %v711_v5 = vmov %v1781_v5  ;;  %v714_v6 = vmov %v1783_v6 }
 0x13d   : >>> { %v557_v39 = vsel %vm555_vm13, %v556_v36, %v554_v38  ;;  %vm746_vm13 = vcmp.eq.s32.totalorder %v741_v6, %v738_v5 }
 0x13e   : >>> { %v558_v40 = vxor.u32 2147483648, %v557_v39 }
 0x140   : >>> { %v559_v41 = vsel %vm543_vm14, %v557_v39, %v558_v40  ;;  %vm731_vm14 = vcmp.eq.s32.totalorder %v727_v6, %v724_v5 }
 0x141   : >>> { %v560_v42 = vadd.f32 %v559_v41, %v542_v27 }
 0x143   : >>> { %1627 = vrcp.f32 %v560_v42  ;;  %v572_v48 = vand.u32 2147483648, %v560_v42  ;;  %vm566_vm15 = vweird.f32 %v560_v42  ;;  %v570_v50 = vand.u32 2147483647, %v560_v42 }
 0x145   : >>> { %v573_v54 = vor.u32 1.1754944e-38, %v572_v48  ;;  %vm571_vm3 = vcmp.eq.f32.partialorder %v570_v50, 8.507059e+37 }
 0x149   : >>> { %v1628_v45 = vpop.eup %1627 }
 0x14a   : >>> { %v562_v47 = vmul.f32 %v1628_v45, %v560_v42  ;;  %vm567_vm0 = vweird.f32 %v1628_v45 }
 0x14b   : >>> { %vm568_vm1 = vmor %vm566_vm15, %vm567_vm0  ;;  %vm718_vm15 = vcmp.eq.s32.totalorder %v714_v6, %v711_v5  ;;  %vm777_vm0 = vcmp.eq.s32.totalorder %v1781_v5, 4  ;;  %v361_v6 = vmov (%p454_p9), %v1783_v6 }
 0x14c   : >>> { %v563_v49 = vsub.f32 1.0, %v562_v47 }
 0x14e   : >>> { %v564_v53 = vmul.f32 %v1628_v45, %v563_v49 }
 0x150   : >>> { %v565_v55 = vadd.f32 %v1628_v45, %v564_v53 }
 0x152   : >>> { %v569_v56 = vsel %vm568_vm1, %v1628_v45, %v565_v55  ;;  %vm760_vm1 = vcmp.eq.s32.totalorder %v1781_v5, 0 }
 0x153   : >>> { %v574_v57 = vsel %vm571_vm3, %v573_v54, %v569_v56  ;;  %vm764_vm3 = vcmp.eq.s32.totalorder %v1781_v5, 1  ;;  %v358_v5 = vmov (%p454_p9), %v1781_v5 }
 0x154   : >>> { %v581_v58 = vsel %vm580_vm4, 0.0, %v574_v57  ;;  %vm373_vm4 = vcmp.eq.s32.totalorder (%p454_p9), %v361_v6, %v358_v5  ;;  %v377_v5 = vmov (%p454_p9), %v1781_v5  ;;  %v380_v6 = vmov (%p454_p9), %v1783_v6 }
 0x155   : >>> { %v582_v59 = vmul.f32 %v581_v58, %v581_v58  ;;  %v595_v60 = vmul.f32 %v581_v58, %v1846_v12  ;;  %v394_v5 = vmov (%p454_p9), %v1781_v5  ;;  %v397_v6 = vmov (%p454_p9), %v1783_v6 }
 0x156   : >> { %v411_v5 = vmov (%p454_p9), %v1781_v5  ;;  %v414_v6 = vmov (%p454_p9), %v1783_v6 }
 0x157   : >>> { %v583_v61 = vadd.f32 1.0, %v582_v59  ;;  %v596_v62 = vsub.f32 %v521_v19, %v595_v60  ;;  %v598_v63 = vadd.f32 %v595_v60, %v525_v20  ;;  %v869_v19 = vld [vmem:[%s1862_s30] sm:$0x1f] }
 0x158   : >>> { %v870_v20 = vld [vmem:[%s1865_s15] sm:$0x1f] }
 0x159   : >>> { %1629 = vrsqrt.f32 %v583_v61  ;;  %600 = vst [vmem:[%s599_s27] sm:$0xff] %v596_v62  ;;  %vm590_vm5 = vweird.f32 %v583_v61  ;;  %s637_s27 = smov [#allocation23] }
 0x15a   : >>> { %602 = vst [vmem:[%s601_s28] sm:$0xff] %v598_v63  ;;  %s1855_s28 = smov [#allocation12] }
 0x15b   : >>> { %v645_v22 = vld [vmem:[%s1855_s28] sm:$0x1f] }
 0x15f   : >>> { %v1630_v0 = vpop.eup %1629 }
 0x160   : >>> { %v585_v1 = vmul.f32 %v1630_v0, %v583_v61  ;;  %vm591_vm6 = vweird.f32 %v1630_v0 }
 0x161   : >>> { %vm592_vm7 = vmor %vm590_vm5, %vm591_vm6  ;;  %vm426_vm5 = vcmp.eq.s32.totalorder (%p454_p9), %v414_v6, %v411_v5 }
 0x162   : >>> { %v586_v2 = vmul.f32 %v1630_v0, %v585_v1 }
 0x164   : >>> { %v587_v3 = vmul.f32 0.5, %v586_v2 }
 0x166   : >>> { %v588_v4 = vsub.f32 1.5, %v587_v3 }
 0x168   : >>> { %v589_v7 = vmul.f32 %v1630_v0, %v588_v4 }
 0x16a   : >>> { %v593_v8 = vsel %vm592_vm7, %v1630_v0, %v589_v7 }
 0x16b   : >>> { %604 = vst [vmem:[%s603_s11] sm:$0xff] %v593_v8  ;;  %v594_v9 = vmul.f32 %v593_v8, %v581_v58  ;;  %s1857_s11 = smov [#allocation13] }
 0x16c   : >>> { %v646_v16 = vld [vmem:[%s1857_s11] sm:$0x1f] }
 0x16d   : >>> { %606 = vst [vmem:[%s605_s21] sm:$0xff] %v594_v9  ;;  %s1859_s21 = smov [#allocation14] }
 0x16e   : >>> { %v647_v17 = vld [vmem:[%s1859_s21] sm:$0x1f] }
 0x172   : >>> { %v608_v10 = vld [vmem:[%s607_s22] ss:$0 sm:$0xff]  ;;  %s861_s22 = smov [#allocation23] }
 0x173   : >>> { %v617_v11 = vsel %vm616_vm8, %v608_v10, 0.0 }
 0x174   : >>> { %618 = vadd.xlane.f32.xlu0 %v617_v11  ;;  %v623_v12 = vld [vmem:[%s622_s29] ss:$0 sm:$0xff]  ;;  %s1867_s29 = smov [#allocation15] }
 0x175   : >>> { %v632_v13 = vsel %vm631_vm9, %v623_v12, 0.0  ;;  %v648_v23 = vld [vmem:[%s1867_s29] sm:$0x1f] }
 0x17c   : >>> { %633 = vadd.xlane.f32.xlu0 %v632_v13 }
 0x1e7   : >>> { %v619_v14 = vpop.xlane.xlu0 %618 }
 0x1e8   : >>> { %621 = vst [vmem:[%s620_s14] sm:$0xff] %v619_v14  ;;  %s639_s14 = smov [#allocation24] }
 0x1ef   : >>> { %v634_v15 = vpop.xlane.xlu0 %633  ;;  %v638_v18 = vld [vmem:[%s637_s27] sm:$0xff]  ;;  %s665_s27 = smov [#allocation21] }
 0x1f0   : >>> { %636 = vst [vmem:[%s635_s20] sm:$0xff] %v634_v15  ;;  %s863_s20 = smov [#allocation24]  ;;  %v862_v21 = vld [vmem:[%s861_s22] sm:$0xff]  ;;  %v652_v25 = vmul.f32 %v646_v16, %v638_v18  ;;  %v656_v26 = vmul.f32 %v647_v17, %v638_v18  ;;  %v649_v46 = vmul.f32 %v645_v22, %v638_v18  ;;  %v659_v48 = vmul.f32 %v648_v23, %v638_v18  ;;  %s667_s22 = smov [#allocation22] }
 0x1f1   : >>> { %v873_v30 = vmul.f32 %v869_v19, %v862_v21  ;;  %v876_v31 = vmul.f32 %v870_v20, %v862_v21  ;;  %v880_v38 = vmul.f32 %v871_v24, %v862_v21  ;;  %v883_v42 = vmul.f32 %v872_v29, %v862_v21  ;;  %v666_v52 = vld [vmem:[%s665_s27] ss:$0 sm:$0xff]  ;;  %s693_s27 = smov [#allocation12] }
 0x1f2   : >>> { %v668_v53 = vld [vmem:[%s667_s22] ss:$0 sm:$0xff]  ;;  %s734_s22 = smov [#allocation15] }
 0x1f7   : >>> { %v640_v27 = vld [vmem:[%s639_s14] sm:$0xff]  ;;  %s1889_s14 = smov [#allocation14] }
 0x1f8   : >>> { %v864_v28 = vld [vmem:[%s863_s20] sm:$0xff]  ;;  %v653_v32 = vmul.f32 %v648_v23, %v640_v27  ;;  %v655_v33 = vmul.f32 %v645_v22, %v640_v27  ;;  %v650_v39 = vmul.f32 %v647_v17, %v640_v27  ;;  %v658_v43 = vmul.f32 %v646_v16, %v640_v27  ;;  %s735_s20 = smov [#allocation20] }
 0x1f9   : >>> { %v874_v34 = vmul.f32 %v871_v24, %v864_v28  ;;  %v877_v35 = vmul.f32 %v872_v29, %v864_v28  ;;  %v879_v36 = vmul.f32 %v869_v19, %v864_v28  ;;  %v882_v37 = vmul.f32 %v870_v20, %v864_v28  ;;  %v742_v23 = vld [vmem:[%s735_s20] ss:$0 sm:$0xff]  ;;  %s1672_s20 = smov 1  }
 0x1fa   : >>> { %v654_v40 = vsub.f32 %v652_v25, %v653_v32  ;;  %v657_v41 = vadd.f32 %v656_v26, %v655_v33  ;;  %v651_v50 = vsub.f32 %v649_v46, %v650_v39  ;;  %v660_v51 = vadd.f32 %v659_v48, %v658_v43 }
 0x1fb   : >>> { %v875_v44 = vsub.f32 %v873_v30, %v874_v34  ;;  %v878_v45 = vsub.f32 %v876_v31, %v877_v35  ;;  %v881_v47 = vadd.f32 %v880_v38, %v879_v36  ;;  %v884_v49 = vadd.f32 %v883_v42, %v882_v37 }
 0x1fc   : >>> { %662 = vst [vmem:[%s1857_s11] sm:$0x1f] %v654_v40  ;;  %s1891_s11 = smov [#allocation13] }
 0x1fd   : >>> { %663 = vst [vmem:[%s1859_s21] sm:$0x1f] %v657_v41  ;;  %s1901_s21 = smov [#allocation12] }
 0x1fe   : >>> { %885 = vst [vmem:[%s1862_s30] sm:$0x1f] %v875_v44  ;;  %s889_s30 = smov %s1788_s30 }
 0x1ff   : >>> { %886 = vst [vmem:[%s1865_s15] sm:$0x1f] %v878_v45  ;;  %s1898_s15 = smov %s1793_s15 }
 0x200   : >>> { %887 = vst [vmem:[%s1871_s23] sm:$0x1f] %v881_v47  ;;  %s890_s23 = smov %s1801_s23 }
 0x201   : >>> { %888 = vst [vmem:[%s1875_s24] sm:$0x1f] %v884_v49  ;;  %s1907_s24 = smov %s1805_s24 }
 0x202   : >>> { %661 = vst [vmem:[%s1855_s28] sm:$0x1f] %v651_v50  ;;  %s672_s28 = smov [#allocation15] }
 0x203   : >>> { %664 = vst [vmem:[%s1867_s29] sm:$0x1f] %v660_v51  ;;  %v674_v55 = vld [vmem:[%s1891_s11] sm:$0x1f]  ;;  %s694_s29 = smov [#allocation19] }
 0x204   : >>> { %v675_v54 = vld [vmem:[%s1889_s14] sm:$0x1f]  ;;  %v678_v4 = vmul.f32 %v674_v55, %v668_v53  ;;  %v681_v12 = vmul.f32 %v674_v55, %v666_v52 }
 0x205   : >>> { %v891_v56 = vld [vmem:[%s889_s30] ss:$0 sm:$0xff]  ;;  %v1551_v58 = vld [vmem:[%s889_s30 + $0x4] ss:$0 sm:$0xff]  ;;  %v686_v9 = vmul.f32 %v675_v54, %v668_v53  ;;  %v683_v10 = vmul.f32 %v675_v54, %v666_v52 }
 0x206   : >>> { %v1550_v57 = vld [vmem:[%s889_s30 - $0x1] sm:$0x1e]  ;;  %v1555_v62 = vld [vmem:[%s1898_s15 + $0x4] ss:$0 sm:$0xff] }
 0x207   : >>> { %v898_v59 = vsel %vm821_vm10, %v891_v56, %v1550_v57  ;;  %v915_v60 = vld [vmem:[%s1898_s15] ss:$0 sm:$0xff]  ;;  %v1553_v0 = vld [vmem:[%s890_s23 + $0x1] sm:$0xf] }
 0x208   : >>> { %v1554_v61 = vld [vmem:[%s1898_s15 - $0x1] sm:$0x1e]  ;;  %901 = vst [vmem:[%s889_s30] sm:$0x1f] %v898_v59  ;;  %v910_v2 = vsel %vm833_vm11, %v1551_v58, %v1553_v0 }
 0x209   : >>> { %v902_v63 = vld [vmem:[%s890_s23] ss:$0 sm:$0xff]  ;;  %v922_v1 = vsel %vm821_vm10, %v915_v60, %v1554_v61  ;;  %v1557_v3 = vld [vmem:[%s1907_s24 + $0x1] sm:$0xf] }
 0x20a   : >>> { %1552 = vst [vmem:[%s889_s30 + $0x1] sm:$0x1] %v902_v63  ;;  %v926_v7 = vld [vmem:[%s1907_s24] ss:$0 sm:$0xff]  ;;  %v934_v8 = vsel %vm833_vm11, %v1555_v62, %v1557_v3 }
 0x20b   : >>> { %912 = vst [vmem:[%s890_s23] sm:$0x1f] %v910_v2  ;;  %v673_v11 = vld [vmem:[%s1901_s21] sm:$0x1f] }
 0x20c   : >>> { %925 = vst [vmem:[%s1898_s15] sm:$0x1f] %v922_v1  ;;  %v676_v13 = vld [vmem:[%s672_s28] sm:$0x1f]  ;;  %v677_v14 = vmul.f32 %v673_v11, %v666_v52  ;;  %v680_v15 = vmul.f32 %v673_v11, %v668_v53 }
 0x20d   : >>> { %1556 = vst [vmem:[%s1898_s15 + $0x1] sm:$0x1] %v926_v7  ;;  %v687_v16 = vmul.f32 %v676_v13, %v666_v52  ;;  %v684_v17 = vmul.f32 %v676_v13, %v668_v53  ;;  %v701_v22 = vld [vmem:[%s694_s29] ss:$0 sm:$0xff]  ;;  %s1941_s29 = smov [#allocation14] }
 0x20e   : >>> { %936 = vst [vmem:[%s1907_s24] sm:$0x1f] %v934_v8  ;;  %v679_v18 = vsub.f32 %v677_v14, %v678_v4  ;;  %v682_v21 = vadd.f32 %v681_v12, %v680_v15 }
 0x20f   : >>> { %v688_v19 = vadd.f32 %v687_v16, %v686_v9  ;;  %v685_v20 = vsub.f32 %v683_v10, %v684_v17 }
 0x210   : >>> { %689 = vst [vmem:[%s1901_s21] sm:$0x1f] %v679_v18  ;;  %s708_s21 = smov [#allocation13] }
 0x211   : >>> { %692 = vst [vmem:[%s672_s28] sm:$0x1f] %v688_v19  ;;  %s1939_s28 = smov [#allocation15] }
 0x212   : >>> { %691 = vst [vmem:[%s1889_s14] sm:$0x1f] %v685_v20  ;;  %s721_s14 = smov [#allocation14] }
 0x213   : >>> { %690 = vst [vmem:[%s1891_s11] sm:$0x1f] %v682_v21  ;;  %s1937_s11 = smov [#allocation12] }
 0x217   : >>> { %v702_v24 = vld [vmem:[%s693_s27] sm:$0x1f] }
 0x218   : >>> { %v743_v25 = vld [vmem:[%s734_s22] sm:$0x1f]  ;;  %v706_v26 = vsel %vm705_vm12, %v701_v22, %v702_v24 }
 0x219   : >>> { %v747_v27 = vsel %vm746_vm13, %v742_v23, %v743_v25  ;;  %v728_v28 = vld [vmem:[%s721_s14] sm:$0x1f]  ;;  %707 = vst [vmem:[%s693_s27] sm:$0x1f] %v706_v26  ;;  %s750_s27 = smov [#allocation13] }
 0x21a   : >>> { %748 = vst [vmem:[%s734_s22] sm:$0x1f] %v747_v27  ;;  %v732_v29 = vsel %vm731_vm14, 0.0, %v728_v28  ;;  %v715_v30 = vld [vmem:[%s708_s21] sm:$0x1f]  ;;  %s1673_s22 = smov 127  }
 0x21b   : >>> { %733 = vst [vmem:[%s721_s14] sm:$0x1f] %v732_v29  ;;  %v719_v31 = vsel %vm718_vm15, 0.0, %v715_v30  ;;  %s1951_s14 = smov [#allocation13] }
 0x21c   : >>> { %720 = vst [vmem:[%s708_s21] sm:$0x1f] %v719_v31  ;;  %s814_s21 = smov [#allocation14] }
 0x220   : >>> { %v755_v32 = vld [vmem:[%s1937_s11] sm:$0x1f] }
 0x221   : >>> { %v783_v33 = vld [vmem:[%s1939_s28] sm:$0x1f]  ;;  %756 = vrot.lane.b32.xlu1 %v755_v32, %s1672_s20 }
 0x222   : >>> { %784 = vrot.lane.b32.xlu0 %v783_v33, %s1672_s20  ;;  %v787_v34 = vld [vmem:[%s1941_s29] sm:$0x1f] }
 0x223   : >>> { %788 = vrot.lane.b32.xlu2 %v787_v34, %s1672_s20  ;;  %v751_v35 = vld [vmem:[%s750_s27] sm:$0x1f] }
 0x224   : >>> { %v772_v36 = vld [vmem:[%s750_s27] sm:$0x1f] }
 0x225   : >>> { %v804_v37 = vld [vmem:[%s1939_s28] sm:$0x1f] }
 0x226   : >>> { %v754_v40 = vld [vmem:[%s1937_s11] sm:$0x1f] }
 0x227   : >>> { %v786_v51 = vld [vmem:[%s1941_s29] sm:$0x1f] }
 0x229   : >>> { %752 = vrot.lane.b32.xlu1 %v751_v35, %s1672_s20  ;;  %s813_s20 = smov [#allocation12] }
 0x22b   : >>> { %773 = vrot.lane.b32.xlu2 %v772_v36, %s1673_s22 }
 0x231   : >>> { %805 = vrot.lane.b32.xlu1 %v804_v37, %s1673_s22  ;;  %s398_s22 = smov (%p454_p9), [#allocation14] }
 0x27d   : >>> { %v789_v38 = vpop.permute.xlu2 %788 }
 0x27e   : >>> { %v793_v47 = vsel %vm760_vm1, %v787_v34, %v789_v38 }
 0x285   : >>> { %v774_v39 = vpop.permute.xlu2 %773 }
 0x286   : >>> { %v778_v41 = vsel %vm777_vm0, %v754_v40, %v774_v39 }
 0x287   : >>> { %780 = vst [vmem:[%s750_s27] sm:$0x1f] %v778_v41  ;;  %s381_s27 = smov (%p454_p9), [#allocation13] }
 0x28e   : >>> { %v839_v42 = vld [vmem:[%s1951_s14] ss:$0 sm:$0xff]  ;;  %v1547_v44 = vld [vmem:[%s1951_s14 + $0x4] ss:$0 sm:$0xff] }
 0x28f   : >>> { %v1546_v43 = vld [vmem:[%s1951_s14 - $0x1] sm:$0x1e] }
 0x290   : >>> { %v846_v45 = vsel %vm821_vm10, %v839_v42, %v1546_v43 }
 0x291   : >>> { %849 = vst [vmem:[%s1951_s14] sm:$0x1f] %v846_v45 }
 0x293   : >>> { %v757_v46 = vpop.permute.xlu1 %756 }
 0x294   : >>> { %v785_v48 = vpop.permute.xlu0 %784  ;;  %v761_v52 = vsel %vm760_vm1, %v755_v32, %v757_v46 }
 0x295   : >>> { %v797_v49 = vsel %vm764_vm3, %v785_v48, %v793_v47 }
 0x296   : >>> { %v803_v50 = vsel %vm1411_vm2, %v797_v49, 0.0 }
 0x297   : >>> { %811 = vst [vmem:[%s1941_s29] sm:$0x1f] %v803_v50  ;;  %s362_s29 = smov (%p454_p9), [#allocation12] }
 0x29b   : >>> { %v753_v53 = vpop.permute.xlu1 %752 }
 0x29c   : >>> { %v765_v54 = vsel %vm764_vm3, %v753_v53, %v761_v52 }
 0x29d   : >>> { %v771_v55 = vsel %vm1411_vm2, %v765_v54, 0.0 }
 0x29e   : >>> { %779 = vst [vmem:[%s1937_s11] sm:$0x1f] %v771_v55  ;;  %v1545_v57 = vld [vmem:[%s814_s21 + $0x1] sm:$0xf]  ;;  %v826_v0 = vld [vmem:[%s814_s21] ss:$0 sm:$0xff]  ;;  %s838_s11 = smov [#allocation15] }
 0x2a3   : >>> { %v806_v56 = vpop.permute.xlu1 %805 }
 0x2a4   : >>> { %v810_v58 = vsel %vm777_vm0, %v786_v51, %v806_v56 }
 0x2a5   : >>> { %v815_v59 = vld [vmem:[%s813_s20] ss:$0 sm:$0xff]  ;;  %v1543_v61 = vld [vmem:[%s813_s20 + $0x4] ss:$0 sm:$0xff]  ;;  %812 = vst [vmem:[%s1939_s28] sm:$0x1f] %v810_v58  ;;  %s937_s28 = sadd.s32 (%p454_p9), 1, %s1665_s16  }
 0x2a6   : >>> { %v1542_v60 = vld [vmem:[%s813_s20 - $0x1] sm:$0x1e]  ;;  %v834_v63 = vsel %vm833_vm11, %v1543_v61, %v1545_v57  ;;  %p450_p10 = scmp.ge.s32.totalorder (%p454_p9), %s937_s28, 15  ;;  %s2069_s16 = smov (%p454_p9), %s937_s28 }
 0x2a7   : >>> { %v822_v62 = vsel %vm821_vm10, %v815_v59, %v1542_v60  ;;  %836 = vst [vmem:[%s814_s21] sm:$0x1f] %v834_v63 }
 0x2a8   : >>> { %825 = vst [vmem:[%s813_s20] sm:$0x1f] %v822_v62 }
 0x2a9   : >>> { %1544 = vst [vmem:[%s813_s20 + $0x1] sm:$0x1] %v826_v0 }
 0x2ac   : >>> { %v850_v1 = vld [vmem:[%s838_s11] ss:$0 sm:$0xff]  ;;  %v1549_v2 = vld [vmem:[%s838_s11 + $0x1] sm:$0xf] }
 0x2ad   : >>> { %1548 = vst [vmem:[%s1951_s14 + $0x1] sm:$0x1] %v850_v1  ;;  %v858_v3 = vsel %vm833_vm11, %v1547_v44, %v1549_v2  ;;  %456 = sbr.rel (!%p454_p9) target bundleno = 248 (0xf8), region = 494  ;;  %s415_s14 = smov (%p454_p9), [#allocation15] }
 0x2ae   : >>> { %860 = vst [vmem:[%s838_s11] sm:$0x1f] %v858_v3  ;;  %v404_v10 = vld [vmem:[%s398_s22] sm:$0x1f] (%p454_p9) }
 0x2af   : >> { %v405_v14 = vsel (%p454_p9), %vm1411_vm2, %v404_v10, 0.0 }
 0x2b0   : >> { %v368_v4 = vld [vmem:[%s362_s29] sm:$0x1f] (%p454_p9)  ;;  %v406_v16 = vmul.f32 (%p454_p9), %v405_v14, %v405_v14 }
 0x2b1   : >> { %v369_v8 = vsel (%p454_p9), %vm1411_vm2, %v368_v4, 0.0 }
 0x2b2   : >> { %v370_v12 = vmul.f32 %v369_v8, %v369_v8 }
 0x2b4   : >> { %v387_v7 = vld [vmem:[%s381_s27] sm:$0x1f]  ;;  %v374_v19 = vsel %vm373_vm4, 0.0, %v370_v12 }
 0x2b5   : >> { %v388_v9 = vsel %vm1411_vm2, %v387_v7, 0.0  ;;  %v421_v11 = vld [vmem:[%s415_s14] sm:$0x1f] }
 0x2b6   : >> { %v389_v13 = vmul.f32 %v388_v9, %v388_v9  ;;  %v422_v15 = vsel %vm1411_vm2, %v421_v11, 0.0 }
 0x2b7   : >> { %v423_v18 = vmul.f32 %v422_v15, %v422_v15 }
 0x2b8   : >> { %v391_v17 = vadd.f32 %v389_v13, %v370_v12  ;;  %v390_v21 = vadd.f32 %v389_v13, %v374_v19 }
 0x2b9   : >> { %v427_v24 = vsel %vm426_vm5, 0.0, %v423_v18 }
 0x2ba   : >> { %v408_v20 = vadd.f32 %v406_v16, %v391_v17  ;;  %v407_v23 = vadd.f32 %v406_v16, %v390_v21 }
 0x2bc   : >> { %v429_v22 = vadd.f32 %v423_v18, %v408_v20  ;;  %v428_v25 = vadd.f32 %v427_v24, %v407_v23 }
 0x2be   : >> { %430 = vadd.xlane.f32.xlu0 %v429_v22 }
 0x2c6   : >> { %438 = vadd.xlane.f32.xlu0 %v428_v25 }
 0x331   : >> { %v431_v26 = vpop.xlane.xlu0 %430 }
 0x332   : >> { %v432_v27 = vrot.slane %v431_v26, 4 }
 0x334   : >> { %v433_v28 = vadd.f32 %v432_v27, %v431_v26 }
 0x336   : >> { %v434_v29 = vrot.slane %v433_v28, 2 }
 0x338   : >> { %v435_v33 = vadd.f32 %v434_v29, %v433_v28 }
 0x339   : >> { %v439_v30 = vpop.xlane.xlu0 %438 }
 0x33a   : >> { %v440_v31 = vrot.slane %v439_v30, 4  ;;  %v436_v36 = vrot.slane %v435_v33, 1 }
 0x33c   : >> { %v441_v32 = vadd.f32 %v440_v31, %v439_v30  ;;  %v437_v39 = vadd.f32 %v436_v36, %v435_v33 }
 0x33e   : >> { %v442_v34 = vrot.slane %v441_v32, 2 }
 0x340   : >> { %v443_v35 = vadd.f32 %v442_v34, %v441_v32 }
 0x342   : >> { %v444_v37 = vrot.slane %v443_v35, 1 }
 0x344   : >> { %v445_v38 = vadd.f32 %v444_v37, %v443_v35 }
 0x346   : >> { %1576 = vpush %v445_v38 }
 0x347   : >> { %1578 = vpush %v437_v39 }
 0x377   : >> { %s1577_s17 = spop %1576 }
 0x378   : >> { %s1579_s21 = spop %1578 }
 0x379   : >> { %s448_s20 = smul.f32 1e-10, %s1579_s21 }
 0x37b   : >> { %p449_p11 = scmp.le.f32.partialorder %s1577_s17, %s448_s20 }
 0x37d   : >> { %p451_p12 = por %p450_p10, %p449_p11 }
 0x37f   : > { %939 = sbr.rel (!%p451_p12) target bundleno = 247 (0xf7), region = 505 }
 0x384 PF: > { %s944_s11 = smov [#allocation12]  ;;  %v948_v5 = vmov %v1781_v5  ;;  %v951_v6 = vmov %v1783_v6  ;;  %s964_s29 = smov [#allocation15] }
 0x385   : > { %v968_v5 = vmov %v1781_v5  ;;  %v971_v6 = vmov %v1783_v6  ;;  %v952_v40 = vld [vmem:[%s944_s11] sm:$0x1f]  ;;  %vm955_vm6 = vcmp.eq.s32.totalorder %v951_v6, %v948_v5  ;;  %s940_s16 = sand.u32 7, %s1740_s12   ;;  %s1023_s22 = sshrl.u32 (%p1754_p3), %s1740_s12, 3 }
 0x386   : > { %vm975_vm7 = vcmp.eq.s32.totalorder %v971_v6, %v968_v5  ;;  %v956_v41 = vsel %vm955_vm6, %v952_v40, 0.0  ;;  %v972_v43 = vld [vmem:[%s964_s29] sm:$0x1f]  ;;  %s941_s28 = scalar_lea.vmem [#allocation4], %s940_s16  ;;  %s943_s27 = scalar_lea.vmem [#allocation6], %s940_s16 }
 0x387   : > { %v957_v42 = vrot.slane %v956_v41, 4  ;;  %v976_v44 = vsel %vm975_vm7, %v972_v43, 0.0  ;;  %s945_s28 = smov %s941_s28  ;;  %s965_s27 = smov %s943_s27 }
 0x388   : > { %v977_v46 = vrot.slane %v976_v44, 4  ;;  %s1564_s14 = sshll.u32 (%p1754_p3), %s1023_s22, 1 }
 0x389   : > { %v958_v45 = vadd.f32 %v957_v42, %v956_v41  ;;  %s1025_s20 = scalar_lea.vmem (%p1754_p3), %s2061_s4, %s1564_s14 }
 0x38a   : > { %v978_v48 = vadd.f32 %v977_v46, %v976_v44 }
 0x38b   : > { %v959_v47 = vrot.slane %v958_v45, 2 }
 0x38c   : > { %v979_v50 = vrot.slane %v978_v48, 2 }
 0x38d   : > { %v960_v49 = vadd.f32 %v959_v47, %v958_v45 }
 0x38e   : > { %v980_v52 = vadd.f32 %v979_v50, %v978_v48 }
 0x38f   : > { %v961_v51 = vrot.slane %v960_v49, 1 }
 0x390   : > { %v981_v5 = vrot.slane %v980_v52, 1 }
 0x391   : > { %v962_v53 = vadd.f32 %v961_v51, %v960_v49 }
 0x392   : > { %v982_v6 = vadd.f32 %v981_v5, %v980_v52 }
 0x393   : > { %963 = vst [vmem:[%s945_s28] sm:$0x1] %v962_v53 }
 0x394   : > { %983 = vst [vmem:[%s965_s27] sm:$0x1] %v982_v6 }
 0x398   : > { %1022 = sbr.rel (!%p1754_p3) target bundleno = 932 (0x3a4), region = 174 }
 0x39a   : > { %v986_v54 = vld [vmem:[#allocation4] sm:$0x3] }
 0x39b   : > { %989 = vst [vmem:[%s287_s25] sm:$0x3] %v986_v54  ;;  %v992_v55 = vld [vmem:[#allocation6] sm:$0x3] }
 0x39c   : > { %995 = vst [vmem:[%s293_s26] sm:$0x3] %v992_v55 }
 0x3a2   : > { %v1042_v56 = vld [vmem:[%s287_s25] sm:$0x3] }
 0x3a3   : > { %1043 = vst [vmem:[%s1025_s20] sm:$0x3] %v1042_v56 }
 0x3a4 PF: > { %1061 = sbr.rel (!%p1754_p3) target bundleno = 940 (0x3ac), region = 208  ;;  %s1062_s11 = sshrl.u32 (%p1754_p3), %s1740_s12, 3 }
 0x3a5   : > { %s1565_s29 = sshll.u32 (%p1754_p3), %s1062_s11, 1 }
 0x3a6   : > { %s1064_s25 = scalar_lea.vmem (%p1754_p3), %s2062_s5, %s1565_s29 }
 0x3aa   : > { %v1081_v57 = vld [vmem:[%s293_s26] sm:$0x3] }
 0x3ab   : > { %1082 = vst [vmem:[%s1064_s25] sm:$0x3] %v1081_v57 }
 0x3ac PF: > { %s1566_s27 = sshll.u32 %s1740_s12, 3  ;;  %v1128_v58 = vld [vmem:[%s1788_s30] sm:$0xff]  ;;  %v1163_v59 = vld [vmem:[%s1793_s15] sm:$0xff] }
 0x3ad   : > { %s1099_s18 = scalar_lea.vmem %s2063_s6, %s1566_s27  ;;  %s1134_s17 = scalar_lea.vmem %s2064_s7, %s1566_s27  ;;  %v1198_v60 = vld [vmem:[%s1801_s23] sm:$0xff]  ;;  %v1233_v61 = vld [vmem:[%s1805_s24] sm:$0xff] }
 0x3ae   : > { %1129 = vst [vmem:[%s1099_s18] sm:$0xff] %v1128_v58  ;;  %s1169_s11 = scalar_lea.vmem %s2065_s8, %s1566_s27  ;;  %s1204_s12 = scalar_lea.vmem %s2066_s9, %s1566_s27 }
 0x3af   : > { %1164 = vst [vmem:[%s1134_s17] sm:$0xff] %v1163_v59 }
 0x3b0   : > { %1199 = vst [vmem:[%s1169_s11] sm:$0xff] %v1198_v60 }
 0x3b1   : > { %1234 = vst [vmem:[%s1204_s12] sm:$0xff] %v1233_v61 }
 0x3b2 PF: > { %s2070_s15 = sld [smem:[#allocation25_spill]]  ;;  %p13_p13 = scmp.ge.s32.totalorder %s1743_s13, 4  }
 0x3b3   : > { %s2071_s30 = smov %s1657_s10  ;;  %s2073_s11 = smov %s1743_s13 }
 0x3b4   :  { %15 = sbr.rel (!%p13_p13) target bundleno = 2 (0x2), region = 516 }
 0x3b8   : > { %s2072_s10 = smov %s2070_s15 }

// kernel: oan_block_forward.3
= control target key start
LH: loop header
LB: loop body
LE: loop exit
PB: predicated region body
PF: predicated region fallthrough
CT: control target
= control target key end

     0   :  { %s619_s0 = inlined_call_operand.vmem [shape: f32[2,4,128], index: 0, kind: input, shape index: {}]   ;;  %s620_s1 = inlined_call_operand.vmem [shape: f32[2,9], index: 1, kind: input, shape index: {}]   ;;  %s621_s2 = inlined_call_operand.hbm [shape: f32[2,1,128], index: 2, kind: output, shape index: {}]  }
   0x1   :  { %622 = sst [smem:[#allocation8_spill]] %s620_s1 }
   0x2   :  { %7 = vsyncpa [#allocation4], 0 }
   0x3   :  { %8 = vsyncpa [#allocation3], 0 }
   0x4   :  { %10 = vsyncpa [#allocation3 + $0x1], 0  ;;  %s515_s9 = smov 0   ;;  %s517_s10 = smov 0  }
   0x5   :  { %s519_s11 = smov 0   ;;  %s521_s12 = smov 0  }
   0x6 LB: > { %s536_s13 = sadd.s32 4294967295, %s497_s12   ;;  %s352_s14 = sadd.s32 4294967294, %s497_s12   ;;  %s497_s12 = sphi %s521_s12, %s629_s12   ;;  %s493_s11 = sphi %s519_s11, %s628_s11   ;;  %s489_s10 = sphi %s517_s10, %s627_s10   ;;  %s485_s9 = sphi %s515_s9, %s626_s9  }
   0x7   : > { %s540_s15 = sadd.s32 1, %s497_s12   ;;  %s70_s16 = sadd.s32 1, %s493_s11 }
   0x8   : > { %s67_s17 = ssub.s32 %s497_s12, %s540_s15  ;;  %p80_p0 = scmp.ne.s32.totalorder %s493_s11, %s489_s10 }
   0x9   : > { %p68_p1 = scmp.eq.s32.totalorder %s67_s17, 0  ;;  %p81_p2 = scmp.eq.s32.totalorder %s536_s13, 1 }
   0xa   : > { %p86_p3 = scmp.ne.s32.totalorder %s489_s10, %s485_s9  ;;  %p87_p4 = scmp.eq.s32.totalorder %s352_s14, 1 }
   0xb   : > { %s551_s18 = scalar_select %p68_p1, %s493_s11, %s70_s16  }
   0xc   : > { %p553_p5 = por %p81_p2, %p80_p0  ;;  %p557_p6 = por %p87_p4, %p86_p3 }
   0xd   : > { %p353_p7 = scmp.ge.s32.totalorder %s497_s12, 1  ;;  %p94_p8 = scmp.lt.s32.totalorder %s497_s12, 3 }
   0xe   : > { %p376_p9 = scmp.eq.s32.totalorder %s536_s13, 0  ;;  %s625_s1 = sld [smem:[#allocation8_spill]] }
   0xf   : > { %p95_p10 = pnand %p353_p7, %p94_p8  ;;  %s499_s24 = smov [#allocation2]  }
  0x11   : > { %p368_p11 = pneg %p95_p10  ;;  %126 = sbr.rel (%p95_p10) target bundleno = 82 (0x52), region = 28 }
  0x13   : > { %p369_p12 = pnand %p376_p9, %p368_p11 }
  0x14   : > { %s106_s23 = sshll.u32 %s625_s1, 4  ;;  %s107_s23 = int_to_ptr.vmem [resolvable:$true] %s106_s23 }
  0x15   : > { %371 = dma.vmem_to_smem (!%p369_p12), %s107_s23, 32, %s499_s24, [#allocation4]  }
  0x16   : > { %476 = dma.done.wait (%p376_p9), [#allocation4], 32  }
  0x17   : > { %478 = vsyncadd (%p376_p9), [#allocation4], 4294967264 }
  0x18   : > { %133 = sfence }
  0x19   : > { %p148_p13 = scmp.lt.s32.totalorder %s536_s13, 1  ;;  %s569_s25 = sshll.u32 %s536_s13, 7 }
  0x1a   : > { %s154_s27 = sld [smem:[#allocation2 + %s569_s25]]  ;;  %s155_s28 = sadd.s32 1, %s569_s25 }
  0x1b   : > { %s149_s26 = scalar_select %p148_p13, %s536_s13, 1 }
  0x1c   : > { %s156_s30 = sld [smem:[#allocation2 + %s155_s28]]  ;;  %s157_s6 = sadd.s32 2, %s569_s25 }
  0x1d   : > { %s358_s29 = sshll.u32 %s149_s26, 2  ;;  %s158_s7 = sld [smem:[#allocation2 + %s157_s6]] }
  0x1e   : > { %s151_s5 = scalar_lea.vmem %s619_s0, %s358_s29  ;;  %s159_s8 = sadd.s32 3, %s569_s25 }
  0x1f   : > { %s160_s14 = sld [smem:[#allocation2 + %s159_s8]]  ;;  %s161_s16 = sadd.s32 4, %s569_s25  ;;  %v152_v0 = vld [vmem:[%s151_s5] sm:$0xf] }
  0x20   : > { %s162_s17 = sld [smem:[#allocation2 + %s161_s16]]  ;;  %s163_s21 = sadd.s32 5, %s569_s25  ;;  %v171_v1 = vstv %s154_s27 }
  0x21   : > { %s164_s22 = sld [smem:[#allocation2 + %s163_s21]]  ;;  %s165_s23 = sadd.s32 6, %s569_s25  ;;  %v172_v4 = vmul.f32 %v171_v1, %v152_v0 }
  0x22   : > { %s582_s24 = sld [smem:[#allocation2 + %s165_s23]]  ;;  %s167_s1 = sadd.s32 7, %s569_s25  ;;  %v173_v2 = vstv %s156_s30 }
  0x23   : > { %s168_s26 = sld [smem:[#allocation2 + %s167_s1]]  ;;  %v174_v3 = vmul.f32 %v173_v2, %v152_v0  ;;  %v179_v7 = vstv %s158_s7  ;;  %s169_s1 = sadd.s32 8, %s569_s25 }
  0x24   : > { %s170_s27 = sld [smem:[#allocation2 + %s169_s1]]  ;;  %s146_s25 = sand.u32 1, %s489_s10  }
  0x25   : > { %v176_v5 = vrot.slane %v174_v3, 1  ;;  %v181_v6 = vstv %s160_s14  ;;  %s281_s30 = scalar_lea.hbm %s621_s2, %s536_s13  ;;  %s147_s3 = scalar_lea.vmem [#allocation5], %s146_s25 }
  0x26   : > { %v182_v8 = vmul.f32 %v181_v6, %v152_v0  ;;  %v183_v9 = vstv %s162_s17  ;;  %s283_s4 = sshll.u32 %s147_s3, 4  ;;  %s285_s5 = sshll.u32 %s281_s30, 4  ;;  %s284_s4 = int_to_ptr.vmem [resolvable:$true] %s283_s4  ;;  %s286_s5 = int_to_ptr.hbm [resolvable:$true] %s285_s5 }
  0x27   : > { %v178_v10 = vadd.f32 %v176_v5, %v172_v4  ;;  %v184_v11 = vmul.f32 %v183_v9, %v152_v0  ;;  %v189_v16 = vstv %s164_s22  ;;  %s273_s6 = scalar_lea.sflag [#allocation3], %s146_s25  ;;  %s445_s7 = sshra.s32 %s286_s5, 4  ;;  %s446_s7 = int_to_ptr.hbm [resolvable:$true] %s445_s7 }
  0x28   : > { %v202_v12 = vrot.slane %v182_v8, 1  ;;  %v191_v15 = vstv %s582_s24  ;;  %s447_s8 = scalar_lea.hbm %s446_s7, 1  ;;  %s451_s16 = scalar_lea.hbm %s621_s2, 2 }
  0x29   : > { %v180_v13 = vadd.f32 %v179_v7, %v178_v10  ;;  %v186_v14 = vrot.slane %v184_v11, 1  ;;  %v193_v17 = vstv %s168_s26  ;;  %v192_v33 = vmul.f32 %v191_v15, %v152_v0  ;;  %p448_p0 = scmp.ne.s32.totalorder %s446_s7, %s447_s8  ;;  %p452_p3 = scmp.lt.s32.totalorder %s446_s7, %s621_s2 }
  0x2a   : > { %v204_v18 = vadd.f32 %v202_v12, %v172_v4  ;;  %v194_v28 = vmul.f32 %v193_v17, %v152_v0  ;;  %v199_v38 = vstv %s170_s27  ;;  %p453_p4 = scmp.lt.s32.totalorder %s451_s16, %s447_s8 }
  0x2b   : > { %v188_v19 = vadd.f32 %v186_v14, %v182_v8  ;;  %v206_v20 = vadd.f32 %v186_v14, %v174_v3  ;;  %v224_v24 = vmul.f32 %v180_v13, %v180_v13  ;;  %v209_v37 = vrot.slane %v180_v13, 6  ;;  %p449_p1 = pnand %p448_p0, %p553_p5 }
  0x2c   : > { %v205_v21 = vadd.f32 %v204_v18, %v191_v15  ;;  %v196_v34 = vrot.slane %v194_v28, 1  ;;  %p454_p7 = por %p453_p4, %p452_p3 }
  0x2d   : > { %v190_v22 = vadd.f32 %v189_v16, %v188_v19  ;;  %v207_v23 = vadd.f32 %v206_v20, %v193_v17  ;;  %v211_v43 = vmul.f32 %v209_v37, %v152_v0  ;;  %p450_p2 = pneg %p449_p1 }
  0x2e   : > { %v228_v25 = vmul.f32 %v205_v21, %v205_v21  ;;  %v198_v36 = vadd.f32 %v196_v34, %v192_v33 }
  0x2f   : > { %v225_v26 = vmul.f32 %v190_v22, %v190_v22  ;;  %v229_v27 = vmul.f32 %v207_v23, %v207_v23  ;;  %v213_v35 = vrot.slane %v190_v22, 5  ;;  %p455_p8 = pnand %p454_p7, %p450_p2 }
  0x30   : > { %v200_v42 = vadd.f32 %v199_v38, %v198_v36 }
  0x31   : > { %v226_v29 = vadd.f32 %v225_v26, %v224_v24  ;;  %v230_v30 = vadd.f32 %v229_v27, %v228_v25  ;;  %v215_v39 = vmul.f32 %v213_v35, %v152_v0 }
  0x32   : > { %v221_v55 = vrot.slane %v200_v42, 6 }
  0x33   : > { %v227_v31 = vadd.f32 1e-15, %v226_v29  ;;  %v231_v32 = vadd.f32 1e-15, %v230_v30  ;;  %v217_v45 = vrot.slane %v215_v39, 1 }
  0x35   : > { %412 = vrcp.f32 %v227_v31  ;;  %vm238_vm0 = vweird.f32 %v227_v31  ;;  %v242_v46 = vand.u32 2147483647, %v227_v31  ;;  %v244_v49 = vand.u32 2147483648, %v227_v31 }
  0x36   : > { %414 = vrcp.f32 %v231_v32  ;;  %v259_v50 = vand.u32 2147483648, %v231_v32  ;;  %vm253_vm2 = vweird.f32 %v231_v32  ;;  %v257_v52 = vand.u32 2147483647, %v231_v32 }
  0x37   : > { %v219_v54 = vadd.f32 %v217_v45, %v211_v43  ;;  %v245_v58 = vor.u32 1.1754944e-38, %v244_v49  ;;  %vm243_vm6 = vcmp.eq.f32.partialorder %v242_v46, 8.507059e+37 }
  0x38   : > { %v260_v59 = vor.u32 1.1754944e-38, %v259_v50  ;;  %vm258_vm7 = vcmp.eq.f32.partialorder %v257_v52, 8.507059e+37 }
  0x39   : > { %v223_v62 = vadd.f32 %v221_v55, %v219_v54 }
  0x3b   : > { %v413_v40 = vpop.eup %412  ;;  %v232_v3 = vmul.f32 %v223_v62, %v223_v62 }
  0x3c   : > { %v415_v41 = vpop.eup %414  ;;  %v234_v44 = vmul.f32 %v413_v40, %v227_v31  ;;  %vm239_vm1 = vweird.f32 %v413_v40 }
  0x3d   : > { %v249_v47 = vmul.f32 %v415_v41, %v231_v32  ;;  %vm254_vm3 = vweird.f32 %v415_v41  ;;  %vm240_vm4 = vmor %vm238_vm0, %vm239_vm1 }
  0x3e   : > { %v235_v48 = vsub.f32 1.0, %v234_v44  ;;  %vm255_vm5 = vmor %vm253_vm2, %vm254_vm3 }
  0x3f   : > { %v250_v51 = vsub.f32 1.0, %v249_v47 }
  0x40   : > { %v236_v53 = vmul.f32 %v413_v40, %v235_v48 }
  0x41   : > { %v251_v56 = vmul.f32 %v415_v41, %v250_v51 }
  0x42   : > { %v237_v57 = vadd.f32 %v413_v40, %v236_v53 }
  0x43   : > { %v252_v60 = vadd.f32 %v415_v41, %v251_v56 }
  0x44   : > { %v241_v61 = vsel %vm240_vm4, %v413_v40, %v237_v57 }
  0x45   : > { %v256_v63 = vsel %vm255_vm5, %v415_v41, %v252_v60  ;;  %v246_v0 = vsel %vm243_vm6, %v245_v58, %v241_v61 }
  0x46   : > { %v261_v1 = vsel %vm258_vm7, %v260_v59, %v256_v63 }
  0x47   : > { %v264_v2 = vrot.slane %v261_v1, 2 }
  0x49   : > { %v266_v4 = vadd.f32 %v264_v2, %v246_v0 }
  0x4b   : > { %v268_v5 = vrot.slane %v266_v4, 6 }
  0x4d   : > { %v270_v6 = vmul.f32 %v268_v5, %v232_v3 }
  0x4f   : > { %271 = vst [vmem:[%s147_s3 - $0x2] sm:$0x4] %v270_v6 }
  0x50   : > { %458 = shalt.err (!%p455_p8)
}
  0x51   : > { %366 = dma.vmem_to_hbm [thread:$0]  (%p553_p5), %s284_s4, 16, %s286_s5, %s273_s6  }
  0x52 PF: > { %p378_p9 = scmp.ge.s32.totalorder %s497_s12, 2  ;;  %s297_s22 = sand.u32 1, %s485_s9  }
  0x53   : > { %s298_s23 = scalar_lea.sflag [#allocation3], %s297_s22 }
  0x54   : > { %p373_p10 = pnand %p378_p9, %p557_p6 }
  0x56   : > { %p374_p11 = pneg %p373_p10 }
  0x58   : > { %480 = dma.done.wait (%p374_p11), %s298_s23, 16  }
  0x59   : > { %482 = vsyncadd (%p374_p11), %s298_s23, 4294967280  ;;  %p13_p12 = scmp.ge.s32.totalorder %s540_s15, 4   ;;  %s626_s9 = smov %s489_s10 }
  0x5a   : > { %s627_s10 = smov %s493_s11  ;;  %s628_s11 = smov %s551_s18 }
  0x5b   : > { %s629_s12 = smov %s540_s15  ;;  %15 = sbr.rel (!%p13_p12) target bundleno = 6 (0x6), region = 68 }
  0x60   :  { %303 = vsyncpa [#allocation3], 1 }
  0x61   :  { %305 = vsyncpa [#allocation3 + $0x1], 1 }
  0x62   :  { %306 = vsyncpa [#allocation4], 1 }
  0x63   :  { %308 = vsyncpa [#allocation4 + $0x1], 1 }

// kernel: oan_block_forward.2
= control target key start
LH: loop header
LB: loop body
LE: loop exit
PB: predicated region body
PF: predicated region fallthrough
CT: control target
= control target key end

     0   :  { %s6168_s0 = inlined_call_operand.hbm [shape: f32[2,4,128], index: 0, kind: input, shape index: {}]   ;;  %s6169_s1 = inlined_call_operand.hbm [shape: f32[2,4,128], index: 1, kind: input, shape index: {}]   ;;  %s6170_s2 = inlined_call_operand.hbm [shape: bf16[1,32,4], index: 2, kind: input, shape index: {}]   ;;  %s6171_s3 = inlined_call_operand.hbm [shape: f32[41,32,1], index: 3, kind: input, shape index: {}]   ;;  %s6172_s4 = inlined_call_operand.hbm [shape: bf16[11,32,32], index: 4, kind: input, shape index: {}]   ;;  %s6173_s5 = inlined_call_operand.vmem [shape: bf16[2,8,32], index: 5, kind: input, shape index: {}]   ;;  %s6174_s6 = inlined_call_operand.hbm [shape: f32[6,1,8], index: 6, kind: input, shape index: {}]   ;;  %s6175_s7 = inlined_call_operand.hbm [shape: bf16[2,8,8], index: 7, kind: input, shape index: {}]   ;;  %s6176_s8 = inlined_call_operand.hbm [shape: f32[1,8,1], index: 8, kind: input, shape index: {}]   ;;  %s6177_s9 = inlined_call_operand.hbm [shape: bf16[2,32,64], index: 9, kind: input, shape index: {}]   ;;  %s6178_s10 = inlined_call_operand.<no memory space> [shape: f32[1,1,1], index: 10, kind: input, shape index: {}]   ;;  %s6179_s11 = inlined_call_operand.hbm [shape: f32[2,1,128], index: 11, kind: output, shape index: {0}]   ;;  %s6180_s12 = inlined_call_operand.vmem [shape: f32[2,9,9], index: 12, kind: output, shape index: {1}]  }
   0x1   :  { %6182 = sst [smem:[#allocation27_spill]] %s6170_s2  ;;  %v18_v0 = vstv %s6178_s10 }
   0x2   :  { %6183 = sst [smem:[#allocation28_spill]] %s6171_s3  ;;  %19 = vst [vmem:[#allocation2] sm:$0x1] %v18_v0 }
   0x3   :  { %6184 = sst [smem:[#allocation29_spill]] %s6172_s4 }
   0x4   :  { %6185 = sst [smem:[#allocation30_spill]] %s6174_s6 }
   0x5   :  { %6186 = sst [smem:[#allocation31_spill]] %s6175_s7 }
   0x6   :  { %6187 = sst [smem:[#allocation32_spill]] %s6176_s8 }
   0x7   :  { %6188 = sst [smem:[#allocation33_spill]] %s6177_s9 }
   0x8   :  { %6189 = sst [smem:[#allocation34_spill]] %s6179_s11 }
   0x9   :  { %6190 = sst [smem:[#allocation35_spill]] %s6180_s12 }
   0xa   :  { %20 = vsyncpa [#allocation4], 0 }
   0xb   :  { %22 = vsyncpa [#allocation4 + $0x1], 0 }
   0xc   :  { %23 = vsyncpa [#allocation7], 0 }
   0xd   :  { %25 = vsyncpa [#allocation7 + $0x1], 0 }
   0xe   :  { %26 = vsyncpa [#allocation10], 0 }
   0xf   :  { %27 = vsyncpa [#allocation13], 0 }
  0x10   :  { %28 = vsyncpa [#allocation16], 0 }
  0x11   :  { %29 = vsyncpa [#allocation5], 0 }
  0x12   :  { %31 = vsyncpa [#allocation5 + $0x1], 0  ;;  %s5211_s23 = smov 0   ;;  %s5213_s24 = smov 0  }
  0x13   :  { %s5215_s25 = smov 0   ;;  %s5217_s26 = smov 0  }
  0x14 LB: > { %s6191_s2 = sld [smem:[#allocation27_spill]]  ;;  %s5235_s29 = sadd.s32 4294967295, %s5126_s26   ;;  %s5126_s26 = sphi %s5217_s26, %s6215_s26   ;;  %s5122_s25 = sphi %s5215_s25, %s6214_s25   ;;  %s5118_s24 = sphi %s5213_s24, %s6213_s24   ;;  %s5114_s23 = sphi %s5211_s23, %s6212_s23  }
  0x15   : > { %p4310_p0 = scmp.ge.s32.totalorder %s5126_s26, 1  ;;  %p58_p1 = scmp.eq.s32.totalorder %s5235_s29, 0 }
  0x16   : > { %p335_p2 = scmp.lt.s32.totalorder %s5126_s26, 3  ;;  %s5128_s13 = smov [#allocation8]  }
  0x17   : > { %s348_s14 = sshll.u32 %s5128_s13, 4  ;;  %s6193_s3 = sld [smem:[#allocation28_spill]]  ;;  %s349_s14 = int_to_ptr.vmem [resolvable:$true] %s348_s14 }
  0x18   : > { %p5240_p3 = pnand %p4310_p0, %p335_p2  ;;  %s5129_s19 = smov [#allocation9]  }
  0x19   : > { %s362_s20 = sshll.u32 %s5129_s19, 4  ;;  %s5130_s21 = smov 64   ;;  %s363_s20 = int_to_ptr.vmem [resolvable:$true] %s362_s20 }
  0x1a   : > { %s346_s28 = sshll.u32 %s6191_s2, 4  ;;  %p4551_p4 = pneg %p5240_p3  ;;  %s347_s28 = int_to_ptr.hbm [resolvable:$true] %s346_s28 }
  0x1b   : > { %s5131_s22 = smov 4   ;;  %s5132_s10 = smov 128  }
  0x1c   : > { %p5252_p6 = pnand %p4551_p4, %p58_p1  ;;  %s5133_s27 = smov 8  }
  0x1d   : > { %s360_s17 = sshll.u32 %s6193_s3, 4  ;;  %s6195_s6 = sld [smem:[#allocation30_spill]]  ;;  %s361_s17 = int_to_ptr.hbm [resolvable:$true] %s360_s17 }
  0x1e   : > { %4554 = dma.hbm_to_vmem [thread:$0]  (!%p5252_p6), %s347_s28, 256, %s349_s14, [#allocation7], %s5130_s21, %s5130_s21, %s5131_s22  }
  0x1f   : > { %4557 = dma.hbm_to_vmem [thread:$0]  (!%p5252_p6), %s361_s17, 20992, %s363_s20, [#allocation10], %s5132_s10, %s5132_s10, %s5133_s27  }
  0x20   : > { %s5134_s19 = smov [#allocation12]   ;;  %s6196_s8 = sld [smem:[#allocation32_spill]] }
  0x21   : > { %s393_s2 = sshll.u32 %s5134_s19, 4  ;;  %s5135_s28 = smov 16   ;;  %s394_s2 = int_to_ptr.vmem [resolvable:$true] %s393_s2 }
  0x22   : > { %s5136_s14 = smov 1   ;;  %s5137_s17 = smov [#allocation15]  }
  0x23   : > { %s391_s16 = sshll.u32 %s6195_s6, 4  ;;  %s422_s20 = sshll.u32 %s5137_s17, 4  ;;  %s392_s16 = int_to_ptr.hbm [resolvable:$true] %s391_s16  ;;  %s423_s20 = int_to_ptr.vmem [resolvable:$true] %s422_s20 }
  0x24   : > { %4563 = dma.hbm_to_vmem [thread:$0]  (!%p5252_p6), %s392_s16, 96, %s394_s2, [#allocation13], %s5135_s28, %s5135_s28, %s5136_s14  }
  0x25   : > { %s6197_s4 = sld [smem:[#allocation29_spill]]  ;;  %s5138_s19 = smov [#allocation11]  }
  0x26   : > { %s420_s11 = sshll.u32 %s6196_s8, 4  ;;  %s6198_s7 = sld [smem:[#allocation31_spill]]  ;;  %s421_s11 = int_to_ptr.hbm [resolvable:$true] %s420_s11 }
  0x27   : > { %4569 = dma.hbm_to_vmem [thread:$0]  (!%p5252_p6), %s421_s11, 128, %s423_s20, [#allocation16]  }
  0x28   : > { %s376_s2 = sshll.u32 %s5138_s19, 4  ;;  %s5139_s11 = smov [#allocation14]   ;;  %s377_s2 = int_to_ptr.vmem [resolvable:$true] %s376_s2 }
  0x29   : > { %s407_s16 = sshll.u32 %s5139_s11, 4  ;;  %s6199_s9 = sld [smem:[#allocation33_spill]]  ;;  %s408_s16 = int_to_ptr.vmem [resolvable:$true] %s407_s16 }
  0x2a   : > { %s5140_s20 = smov [#allocation17]   ;;  %s4309_s27 = sadd.s32 4294967294, %s5126_s26  }
  0x2b   : > { %s374_s13 = sshll.u32 %s6197_s4, 4  ;;  %s433_s10 = sshll.u32 %s5140_s20, 4  ;;  %s375_s13 = int_to_ptr.hbm [resolvable:$true] %s374_s13  ;;  %s434_s10 = int_to_ptr.vmem [resolvable:$true] %s433_s10 }
  0x2c   : > { %s405_s12 = sshll.u32 %s6198_s7, 4  ;;  %s44_s15 = sadd.s32 1, %s5122_s25  ;;  %s406_s12 = int_to_ptr.hbm [resolvable:$true] %s405_s12 }
  0x2d   : > { %4560 = dma.hbm_to_vmem [thread:$0]  (!%p5252_p6), %s375_s13, 2816, %s377_s2, [#allocation10], %s5130_s21, %s5130_s21, %s5131_s22  }
  0x2e   : > { %4566 = dma.hbm_to_vmem [thread:$0]  (!%p5252_p6), %s406_s12, 128, %s408_s16, [#allocation13], %s5130_s21, %s5130_s21, %s5131_s22  }
  0x2f   : > { %s431_s17 = sshll.u32 %s6199_s9, 4  ;;  %s5299_s13 = sadd.s32 1, %s5126_s26   ;;  %s432_s17 = int_to_ptr.hbm [resolvable:$true] %s431_s17 }
  0x30   : > { %4572 = dma.hbm_to_vmem [thread:$0]  (!%p5252_p6), %s432_s17, 512, %s434_s10, [#allocation16], %s5130_s21, %s5130_s21, %s5131_s22  }
  0x31   : > { %s41_s3 = ssub.s32 %s5126_s26, %s5299_s13  ;;  %p51_p7 = scmp.ne.s32.totalorder %s5122_s25, %s5118_s24 }
  0x32   : > { %p42_p8 = scmp.eq.s32.totalorder %s41_s3, 0  ;;  %p52_p9 = scmp.eq.s32.totalorder %s5126_s26, 0 }
  0x33   : > { %p57_p10 = scmp.ne.s32.totalorder %s5118_s24, %s5114_s23  ;;  %p296_p11 = scmp.eq.s32.totalorder %s5235_s29, 1 }
  0x34   : > { %s5311_s12 = scalar_select %p42_p8, %s5122_s25, %s44_s15  }
  0x35   : > { %p5313_p12 = por %p52_p9, %p51_p7  ;;  %p5319_p13 = por %p58_p1, %p57_p10 }
  0x36   : > { %6200 = sst [smem:[#allocation26_spill]] %s5311_s12  ;;  %p5323_p0 = por %p296_p11, %p51_p7 }
  0x37   : > { %p302_p2 = scmp.eq.s32.totalorder %s4309_s27, 1  ;;  %p4591_p4 = scmp.lt.s32.totalorder %s5126_s26, 2 }
  0x38   : > { %s450_s19 = sand.u32 1, %s5122_s25   ;;  %s4320_s16 = sshll.u32 %s5126_s26, 2 }
  0x39   : > { %p5329_p6 = por %p302_p2, %p57_p10  ;;  %s4319_s11 = sshll.u32 %s450_s19, 2 }
  0x3a   : > { %s458_s17 = scalar_lea.hbm %s6168_s0, %s4320_s16  ;;  %s454_s10 = scalar_lea.vmem [#allocation3], %s4319_s11 }
  0x3b   : > { %s460_s20 = sshll.u32 %s458_s17, 4  ;;  %s462_s15 = sshll.u32 %s454_s10, 4  ;;  %s461_s20 = int_to_ptr.hbm [resolvable:$true] %s460_s20  ;;  %s463_s15 = int_to_ptr.vmem [resolvable:$true] %s462_s15 }
  0x3c   : > { %p5339_p7 = pnand %p4591_p4, %p5313_p12  ;;  %s477_s6 = scalar_lea.hbm %s6169_s1, %s4320_s16 }
  0x3d   : > { %s469_s7 = sand.u32 1, %s5126_s26   ;;  %s451_s8 = scalar_lea.sflag [#allocation4], %s450_s19 }
  0x3e   : > { %s4980_s28 = sshra.s32 %s461_s20, 4  ;;  %p4984_p9 = pneg %p5339_p7  ;;  %s4981_s28 = int_to_ptr.hbm [resolvable:$true] %s4980_s28 }
  0x3f   : > { %s4982_s14 = scalar_lea.hbm %s4981_s28, 4  ;;  %s4987_s10 = scalar_lea.hbm %s6168_s0, 8 }
  0x40   : > { %p4983_p8 = scmp.ne.s32.totalorder %s4981_s28, %s4982_s14  ;;  %p4988_p12 = scmp.lt.s32.totalorder %s4981_s28, %s6168_s0 }
  0x41   : > { %p4989_p2 = scmp.lt.s32.totalorder %s4987_s10, %s4982_s14 }
  0x42   : > { %p4985_p10 = pnand %p4984_p9, %p4983_p8 }
  0x43   : > { %p4990_p4 = por %p4989_p2, %p4988_p12 }
  0x44   : > { %p4986_p11 = pneg %p4985_p10 }
  0x46   : > { %p4991_p5 = pnand %p4990_p4, %p4986_p11 }
  0x48   : > { %4994 = shalt.err (!%p4991_p5)
}
  0x49   : > { %4576 = dma.hbm_to_vmem [thread:$0]  (!%p5339_p7), %s461_s20, 64, %s463_s15, %s451_s8  }
  0x4a   : > { %s479_s19 = sshll.u32 %s477_s6, 4  ;;  %s473_s16 = scalar_lea.vmem [#allocation6], %s4319_s11  ;;  %s480_s19 = int_to_ptr.hbm [resolvable:$true] %s479_s19 }
  0x4b   : > { %s481_s9 = sshll.u32 %s473_s16, 4  ;;  %s470_s12 = scalar_lea.sflag [#allocation7], %s469_s7  ;;  %s482_s9 = int_to_ptr.vmem [resolvable:$true] %s481_s9 }
  0x4c   : > { %s5010_s18 = sshra.s32 %s480_s19, 4  ;;  %s5017_s10 = scalar_lea.hbm %s6169_s1, 8  ;;  %s5011_s18 = int_to_ptr.hbm [resolvable:$true] %s5010_s18 }
  0x4d   : > { %s5012_s17 = scalar_lea.hbm %s5011_s18, 4  ;;  %p5018_p5 = scmp.lt.s32.totalorder %s5011_s18, %s6169_s1 }
  0x4e   : > { %p5013_p8 = scmp.ne.s32.totalorder %s5011_s18, %s5012_s17  ;;  %p5019_p11 = scmp.lt.s32.totalorder %s5017_s10, %s5012_s17 }
  0x50   : > { %p5015_p10 = pnand %p5013_p8, %p4984_p9  ;;  %p5020_p2 = por %p5019_p11, %p5018_p5 }
  0x52   : > { %p5016_p12 = pneg %p5015_p10 }
  0x54   : > { %p5021_p4 = pnand %p5020_p2, %p5016_p12 }
  0x56   : > { %5024 = shalt.err (!%p5021_p4)
}
  0x57   : > { %4579 = dma.hbm_to_vmem [thread:$0]  (!%p5339_p7), %s480_s19, 64, %s482_s9, %s470_s12  }
  0x58   : > { %490 = sbr.rel (%p5240_p3) target bundleno = 7077 (0x1ba5), region = 64  ;;  %s5374_s6 = sand.u32 (!%p5240_p3), 1, %s5118_s24  }
  0x59   : > { %s4324_s7 = sshll.u32 (!%p5240_p3), %s5374_s6, 2  ;;  %s493_s11 = scalar_lea.sflag (!%p5240_p3), [#allocation4], %s5374_s6 }
  0x5a   : > { %s496_s20 = scalar_lea.vmem (!%p5240_p3), [#allocation3], %s4324_s7 }
  0x5d   : > { %5085 = dma.done.wait (%p5319_p13), %s493_s11, 64  }
  0x5e   : > { %5087 = vsyncadd (%p5319_p13), %s493_s11, 4294967232  ;;  %s502_s9 = sand.u32 1, %s5235_s29   ;;  %s5383_s30 = scalar_lea.vmem [#allocation6], %s4324_s7 }
  0x5f   : > { %s503_s12 = scalar_lea.sflag [#allocation7], %s502_s9 }
  0x60   : > { %5089 = dma.done.wait (%p5319_p13), %s503_s12, 64  }
  0x61   : > { %5091 = vsyncadd (%p5319_p13), %s503_s12, 4294967232 }
  0x62   : > { %5093 = dma.done.wait (%p58_p1), [#allocation7], 256  }
  0x63   : > { %5095 = vsyncadd (%p58_p1), [#allocation7], 4294967040 }
  0x64   : > { %5097 = dma.done.wait (%p58_p1), [#allocation10], 23808  }
  0x65   : > { %5099 = vsyncadd (%p58_p1), [#allocation10], 4294943488 }
  0x66   : > { %5101 = dma.done.wait (%p58_p1), [#allocation13], 224  }
  0x67   : > { %5103 = vsyncadd (%p58_p1), [#allocation13], 4294967072 }
  0x68   : > { %5105 = dma.done.wait (%p58_p1), [#allocation16], 640  }
  0x69   : > { %5107 = vsyncadd (%p58_p1), [#allocation16], 4294966656  ;;  %v5141_v1 = vmov 0   ;;  %v606_v2 = vld [vmem:[%s496_s20] sm:$0xf]  ;;  %vm645_vm0 = vcmask 1041408  }
  0x6a   : > { %4648 = vset.pattern.permute.xlu1 %v5141_v1  ;;  %4647 = vset.pattern.permute.xlu0 %v5141_v1  ;;  %v607_v3 = vpack.c.bf16 %v606_v2, %v606_v2  ;;  %v602_v4 = vld [vmem:[#allocation9] sm:$0xff]  ;;  %v604_v5 = vld [vmem:[#allocation9 + $0x10] sm:$0xff]  ;;  %vm638_vm1 = vcmask 31744   ;;  %v603_v8 = vld [vmem:[#allocation9 + $0x8] sm:$0xff]  ;;  %vm842_vm14 = vcmask 261120   ;;  %s584_s19 = scalar_lea.vmem [#allocation18], %s5374_s6 }
  0x6b   : > { %4649 = vset.pattern.permute.xlu2 %v5141_v1  ;;  %610 = vperm.xlu1 %4648, %v602_v4   ;;  %v4489_v7 = vld [vmem:[#allocation8] sm:$0xff]  ;;  %v605_v9 = vld [vmem:[#allocation9 + $0x18] sm:$0xff]  ;;  %s6208_s17 = sld [smem:[#allocation34_spill]]  ;;  %s4124_s14 = sshll.u32 %s584_s19, 4  ;;  %s4125_s14 = int_to_ptr.vmem [resolvable:$true] %s4124_s14 }
  0x6c   : > { %620 = vperm.xlu0 %4647, %v604_v5   ;;  %v647_v6 = vsel %vm645_vm0, %v607_v3, 0  ;;  %v4490_v10 = vld [vmem:[#allocation8 + $0x8] sm:$0xff]  ;;  %v671_v52 = vld [vmem:[#allocation9 + $0x30] sm:$0xff]  ;;  %s4109_s4 = scalar_lea.sflag [#allocation5], %s5374_s6 }
  0x6d   : > { %656 = vmatpush.bf16.msra.mxu0 %v647_v6  ;;  %v676_v59 = vld [vmem:[#allocation9 + $0x50] sm:$0xff]  ;;  %v672_v2 = vld [vmem:[#allocation9 + $0x38] sm:$0xff] }
  0x70   : > { %4343 = vmatmul.msk.bf16.vlgmr.msra.gmra.mxu0 %vm638_vm1, %v4489_v7 }
  0x71   : > { %s4122_s28 = scalar_lea.hbm %s6208_s17, %s5235_s29  ;;  %s5060_s9 = scalar_lea.hbm %s6208_s17, 2 }
  0x72   : > { %s4126_s10 = sshll.u32 %s4122_s28, 4  ;;  %s4127_s10 = int_to_ptr.hbm [resolvable:$true] %s4126_s10 }
  0x73   : > { %615 = vperm.xlu1 %4648, %v603_v8   ;;  %s5054_s8 = sshra.s32 %s4127_s10, 4  ;;  %s5055_s8 = int_to_ptr.hbm [resolvable:$true] %s5054_s8 }
  0x74   : > { %625 = vperm.xlu0 %4647, %v605_v9   ;;  %v677_v9 = vld [vmem:[#allocation9 + $0x58] sm:$0xff]  ;;  %s5056_s7 = scalar_lea.hbm %s5055_s8, 1  ;;  %p5061_p7 = scmp.lt.s32.totalorder %s5055_s8, %s6208_s17 }
  0x75   : > { %p5057_p1 = scmp.ne.s32.totalorder %s5055_s8, %s5056_s7  ;;  %p5062_p9 = scmp.lt.s32.totalorder %s5060_s9, %s5056_s7 }
  0x77   : > { %p5058_p3 = pnand %p5057_p1, %p5323_p0  ;;  %p5063_p8 = por %p5062_p9, %p5061_p7 }
  0x79   : > { %p5059_p13 = pneg %p5058_p3 }
  0x7b   : > { %p5064_p10 = pnand %p5063_p8, %p5059_p13 }
  0x80   : > { %4344 = vmatmul.msk.bf16.gmra.mxu0 %vm638_vm1, %v4490_v10 }
  0xdd   : > { %v611_v21 = vpop.permute.xlu1 %610 }
  0xde   : > { %v621_v13 = vpop.permute.xlu0 %620 }
  0xe5   : > { %v616_v23 = vpop.permute.xlu1 %615 }
  0xe6   : > { %v626_v17 = vpop.permute.xlu0 %625 }
  0xed   : > { %v658_v11 = vpop.f32.mrf.mxu0 }
  0xee   : > { %v5416_v22 = vadd.f32 %v658_v11, %v611_v21 }
  0xf0   : > { %v694_v25 = vmul.f32 %v5416_v22, %v5416_v22 }
  0xf5   : > { %v660_v12 = vpop.f32.mrf.mxu0 }
  0xf6   : > { %v5419_v24 = vadd.f32 %v660_v12, %v616_v23 }
  0xf8   : > { %v695_v26 = vmul.f32 %v5419_v24, %v5419_v24 }
  0xfd   : > { %v663_v14 = vpop.f32.mrf.mxu0 }
  0xfe   : > { %v5406_v15 = vadd.f32 %v663_v14, %v621_v13 }
 0x100   : > { %686 = vadd.xlane.f32.xlu2 %v5406_v15  ;;  %v696_v16 = vmul.f32 %v5406_v15, %v5406_v15 }
 0x102   : > { %702 = vadd.xlane.f32.xlu0 %v696_v16 }
 0x105   : > { %v665_v18 = vpop.f32.mrf.mxu0 }
 0x106   : > { %v5411_v19 = vadd.f32 %v665_v18, %v626_v17 }
 0x108   : > { %688 = vadd.xlane.f32.xlu2 %v5411_v19  ;;  %v697_v20 = vmul.f32 %v5411_v19, %v5411_v19 }
 0x10a   : > { %704 = vadd.xlane.f32.xlu1 %v697_v20 }
 0x110   : > { %682 = vadd.xlane.f32.xlu2 %v5416_v22 }
 0x118   : > { %684 = vadd.xlane.f32.xlu2 %v5419_v24 }
 0x120   : > { %698 = vadd.xlane.f32.xlu2 %v694_v25 }
 0x128   : > { %700 = vadd.xlane.f32.xlu2 %v695_v26 }
 0x173   : > { %v687_v27 = vpop.xlane.xlu2 %686 }
 0x174   : > { %v692_v28 = vmul.f32 0.0078125, %v687_v27 }
 0x175   : > { %v703_v29 = vpop.xlane.xlu0 %702 }
 0x176   : > { %v712_v30 = vmul.f32 %v692_v28, %v692_v28  ;;  %v708_v31 = vmul.f32 0.0078125, %v703_v29 }
 0x178   : > { %v716_v32 = vsub.f32 %v708_v31, %v712_v30  ;;  %v669_v30 = vld [vmem:[#allocation9 + $0x20] sm:$0xff] }
 0x17a   : > { %v720_v33 = vmax.f32 %v716_v32, 0.0 }
 0x17b   : > { %v689_v34 = vpop.xlane.xlu2 %688 }
 0x17c   : > { %v724_v35 = vadd.f32 0.001, %v720_v33  ;;  %v693_v36 = vmul.f32 0.0078125, %v689_v34 }
 0x17d   : > { %v705_v37 = vpop.xlane.xlu1 %704 }
 0x17e   : > { %4656 = vrsqrt.f32 %v724_v35  ;;  %v713_v38 = vmul.f32 %v693_v36, %v693_v36  ;;  %v709_v39 = vmul.f32 0.0078125, %v705_v37  ;;  %vm752_vm3 = vweird.f32 %v724_v35 }
 0x180   : > { %v717_v40 = vsub.f32 %v709_v39, %v713_v38 }
 0x182   : > { %v721_v41 = vmax.f32 %v717_v40, 0.0  ;;  %v670_v40 = vld [vmem:[#allocation9 + $0x28] sm:$0xff] }
 0x183   : > { %v683_v42 = vpop.xlane.xlu2 %682 }
 0x184   : > { %v4657_v43 = vpop.eup %4656  ;;  %v725_v44 = vadd.f32 0.001, %v721_v41  ;;  %v690_v56 = vmul.f32 0.0078125, %v683_v42 }
 0x185   : > { %v747_v45 = vmul.f32 %v4657_v43, %v724_v35  ;;  %vm753_vm2 = vweird.f32 %v4657_v43 }
 0x186   : > { %4658 = vrsqrt.f32 %v725_v44  ;;  %vm754_vm4 = vmor %vm752_vm3, %vm753_vm2  ;;  %v710_v63 = vmul.f32 %v690_v56, %v690_v56  ;;  %vm762_vm6 = vweird.f32 %v725_v44 }
 0x187   : > { %v748_v46 = vmul.f32 %v4657_v43, %v747_v45  ;;  %v675_v45 = vld [vmem:[#allocation9 + $0x48] sm:$0xff] }
 0x189   : > { %v749_v47 = vmul.f32 0.5, %v748_v46 }
 0x18b   : > { %v685_v48 = vpop.xlane.xlu2 %684  ;;  %v750_v49 = vsub.f32 1.5, %v749_v47 }
 0x18c   : > { %v4659_v50 = vpop.eup %4658  ;;  %v691_v6 = vmul.f32 0.0078125, %v685_v48 }
 0x18d   : > { %v757_v51 = vmul.f32 %v4659_v50, %v725_v44  ;;  %v751_v53 = vmul.f32 %v4657_v43, %v750_v49  ;;  %vm763_vm5 = vweird.f32 %v4659_v50 }
 0x18e   : > { %vm764_vm7 = vmor %vm762_vm6, %vm763_vm5  ;;  %v711_v13 = vmul.f32 %v691_v6, %v691_v6 }
 0x18f   : > { %v758_v54 = vmul.f32 %v4659_v50, %v757_v51  ;;  %v755_v55 = vsel %vm754_vm4, %v4657_v43, %v751_v53 }
 0x190   : > { %v768_v57 = vmul.f32 %v755_v55, %v671_v52 }
 0x191   : > { %v759_v58 = vmul.f32 0.5, %v758_v54 }
 0x192   : > { %790 = vperm.xlu2 %4649, %v768_v57   ;;  %v772_v60 = vmul.f32 %v768_v57, %v692_v28 }
 0x193   : > { %v760_v61 = vsub.f32 1.5, %v759_v58  ;;  %v699_v62 = vpop.xlane.xlu2 %698 }
 0x194   : > { %v706_v0 = vmul.f32 0.0078125, %v699_v62  ;;  %v776_v1 = vsub.f32 %v676_v59, %v772_v60 }
 0x195   : > { %v761_v3 = vmul.f32 %v4659_v50, %v760_v61 }
 0x196   : > { %v714_v4 = vsub.f32 %v706_v0, %v710_v63  ;;  %814 = vperm.xlu1 %4648, %v776_v1  }
 0x197   : > { %v765_v5 = vsel %vm764_vm7, %v4659_v50, %v761_v3 }
 0x198   : > { %v718_v7 = vmax.f32 %v714_v4, 0.0  ;;  %v769_v8 = vmul.f32 %v765_v5, %v672_v2  ;;  %v4491_v5 = vld [vmem:[#allocation11] sm:$0xff] }
 0x19a   : > { %v722_v10 = vadd.f32 0.001, %v718_v7  ;;  %v773_v11 = vmul.f32 %v769_v8, %v693_v36  ;;  %v674_v36 = vld [vmem:[#allocation9 + $0x40] sm:$0xff] }
 0x19b   : > { %v701_v12 = vpop.xlane.xlu2 %700 }
 0x19c   : > { %4660 = vrsqrt.f32 %v722_v10  ;;  %v707_v14 = vmul.f32 0.0078125, %v701_v12  ;;  %v777_v16 = vsub.f32 %v677_v9, %v773_v11  ;;  %vm732_vm9 = vweird.f32 %v722_v10 }
 0x19e   : > { %v715_v17 = vsub.f32 %v707_v14, %v711_v13  ;;  %819 = vperm.xlu2 %4649, %v777_v16  }
 0x1a0   : > { %v719_v18 = vmax.f32 %v715_v17, 0.0 }
 0x1a2   : > { %v4661_v20 = vpop.eup %4660  ;;  %v723_v21 = vadd.f32 0.001, %v719_v18 }
 0x1a3   : > { %v727_v23 = vmul.f32 %v4661_v20, %v722_v10  ;;  %vm733_vm8 = vweird.f32 %v4661_v20 }
 0x1a4   : > { %4662 = vrsqrt.f32 %v723_v21  ;;  %vm734_vm10 = vmor %vm732_vm9, %vm733_vm8  ;;  %vm742_vm12 = vweird.f32 %v723_v21 }
 0x1a5   : > { %v728_v25 = vmul.f32 %v4661_v20, %v727_v23 }
 0x1a7   : > { %v729_v26 = vmul.f32 0.5, %v728_v25 }
 0x1a9   : > { %v730_v27 = vsub.f32 1.5, %v729_v26 }
 0x1aa   : > { %v4663_v28 = vpop.eup %4662 }
 0x1ab   : > { %v737_v29 = vmul.f32 %v4663_v28, %v723_v21  ;;  %v731_v31 = vmul.f32 %v4661_v20, %v730_v27  ;;  %vm743_vm11 = vweird.f32 %v4663_v28 }
 0x1ac   : > { %vm744_vm13 = vmor %vm742_vm12, %vm743_vm11 }
 0x1ad   : > { %v738_v32 = vmul.f32 %v4663_v28, %v737_v29  ;;  %v735_v33 = vsel %vm734_vm10, %v4661_v20, %v731_v31 }
 0x1ae   : > { %v766_v34 = vmul.f32 %v735_v33, %v669_v30 }
 0x1af   : > { %v739_v35 = vmul.f32 0.5, %v738_v32 }
 0x1b0   : > { %780 = vperm.xlu0 %4647, %v766_v34   ;;  %v770_v37 = vmul.f32 %v766_v34, %v690_v56 }
 0x1b1   : > { %v740_v38 = vsub.f32 1.5, %v739_v35 }
 0x1b2   : > { %v774_v39 = vsub.f32 %v674_v36, %v770_v37 }
 0x1b3   : > { %v741_v41 = vmul.f32 %v4663_v28, %v740_v38 }
 0x1b4   : > { %804 = vperm.xlu1 %4648, %v774_v39  }
 0x1b5   : > { %v745_v42 = vsel %vm744_vm13, %v4663_v28, %v741_v41 }
 0x1b6   : > { %v767_v43 = vmul.f32 %v745_v42, %v670_v40 }
 0x1b8   : > { %795 = vperm.xlu0 %4647, %v769_v8   ;;  %785 = vperm.xlu2 %4649, %v767_v43   ;;  %v771_v44 = vmul.f32 %v767_v43, %v691_v6  ;;  %v4492_v6 = vld [vmem:[#allocation11 + $0x8] sm:$0xff] }
 0x1ba   : > { %v775_v46 = vsub.f32 %v675_v45, %v771_v44 }
 0x1c0   : > { %809 = vperm.xlu0 %4647, %v775_v46  }
 0x1ec   : > { %v791_v47 = vpop.permute.xlu2 %790 }
 0x1ed   : > { %v800_v51 = vmul.f32 %v791_v47, %v5406_v15 }
 0x1f8   : > { %v820_v49 = vpop.permute.xlu2 %819 }
 0x208   : > { %v815_v50 = vpop.permute.xlu1 %814 }
 0x209   : > { %v824_v53 = vadd.f32 %v815_v50, %v800_v51 }
 0x20b   : > { %v828_v59 = vmax.f32 %v824_v53, 0.0 }
 0x212   : > { %v786_v56 = vpop.permute.xlu2 %785 }
 0x213   : > { %v799_v61 = vmul.f32 %v786_v56, %v5419_v24 }
 0x222   : > { %v781_v48 = vpop.permute.xlu0 %780 }
 0x223   : > { %v798_v58 = vmul.f32 %v781_v48, %v5416_v22 }
 0x226   : > { %v805_v57 = vpop.permute.xlu1 %804 }
 0x227   : > { %v822_v62 = vadd.f32 %v805_v57, %v798_v58  ;;  %v871_v58 = vld [vmem:[#allocation9 + $0x70] sm:$0xff] }
 0x229   : > { %v826_v2 = vmax.f32 %v822_v62, 0.0 }
 0x22a   : > { %v796_v52 = vpop.permute.xlu0 %795 }
 0x22b   : > { %v801_v54 = vmul.f32 %v796_v52, %v5411_v19 }
 0x22d   : > { %v825_v55 = vadd.f32 %v820_v49, %v801_v54 }
 0x22f   : > { %v829_v60 = vmax.f32 %v825_v55, 0.0 }
 0x231   : > { %v831_v63 = vpack.c.bf16 %v829_v60, %v828_v59 }
 0x232   : > { %v810_v0 = vpop.permute.xlu0 %809 }
 0x233   : > { %v823_v1 = vadd.f32 %v810_v0, %v799_v61  ;;  %855 = vmatpush.bf16.msra.mxu1 %v831_v63  ;;  %v876_v0 = vld [vmem:[#allocation9 + $0x90] sm:$0xff] }
 0x235   : > { %v827_v3 = vmax.f32 %v823_v1, 0.0 }
 0x237   : > { %v830_v4 = vpack.c.bf16 %v827_v3, %v826_v2 }
 0x239   : > { %856 = vmatpush.bf16.msra.mxu1 %v830_v4 }
 0x23c   : > { %4353 = vmatmul.msk.bf16.vlgmr.msra.gmra.mxu1 %vm842_vm14, %v4491_v5 }
 0x24c   : > { %4354 = vmatmul.msk.bf16.gmra.mxu1 %vm842_vm14, %v4492_v6 }
 0x2b9   : > { %v5432_v7 = vpop.f32.mrf.mxu1 }
 0x2ba   : > { %888 = vadd.xlane.f32.xlu1 %v5432_v7  ;;  %v900_v14 = vmul.f32 %v5432_v7, %v5432_v7 }
 0x2c1   : > { %v5435_v8 = vpop.f32.mrf.mxu1 }
 0x2c2   : > { %v901_v13 = vmul.f32 %v5435_v8, %v5435_v8 }
 0x2c9   : > { %v5437_v9 = vpop.f32.mrf.mxu1 }
 0x2ca   : > { %892 = vadd.xlane.f32.xlu2 %v5437_v9  ;;  %v902_v10 = vmul.f32 %v5437_v9, %v5437_v9 }
 0x2cc   : > { %908 = vadd.xlane.f32.xlu0 %v902_v10 }
 0x2d1   : > { %v5442_v11 = vpop.f32.mrf.mxu1 }
 0x2d2   : > { %894 = vadd.xlane.f32.xlu1 %v5442_v11  ;;  %v903_v12 = vmul.f32 %v5442_v11, %v5442_v11 }
 0x2d4   : > { %890 = vadd.xlane.f32.xlu0 %v5435_v8  ;;  %910 = vadd.xlane.f32.xlu2 %v903_v12 }
 0x2da   : > { %906 = vadd.xlane.f32.xlu1 %v901_v13  ;;  %v872_v13 = vld [vmem:[#allocation9 + $0x78] sm:$0xff] }
 0x2dc   : > { %904 = vadd.xlane.f32.xlu2 %v900_v14 }
 0x32d   : > { %v889_v16 = vpop.xlane.xlu1 %888 }
 0x32e   : > { %v5458_v36 = vmul.f32 0.0078125, %v889_v16 }
 0x330   : > { %v916_v45 = vmul.f32 %v5458_v36, %v5458_v36 }
 0x33d   : > { %v893_v17 = vpop.xlane.xlu2 %892 }
 0x33e   : > { %v898_v18 = vmul.f32 0.0078125, %v893_v17 }
 0x33f   : > { %v909_v20 = vpop.xlane.xlu0 %908 }
 0x340   : > { %v918_v21 = vmul.f32 %v898_v18, %v898_v18  ;;  %v914_v23 = vmul.f32 0.0078125, %v909_v20 }
 0x342   : > { %v922_v25 = vsub.f32 %v914_v23, %v918_v21 }
 0x344   : > { %v926_v26 = vmax.f32 %v922_v25, 0.0  ;;  %v877_v25 = vld [vmem:[#allocation9 + $0x98] sm:$0xff] }
 0x345   : > { %v895_v27 = vpop.xlane.xlu1 %894 }
 0x346   : > { %v930_v28 = vadd.f32 0.001, %v926_v26  ;;  %v5452_v29 = vmul.f32 0.0078125, %v895_v27 }
 0x347   : > { %v891_v30 = vpop.xlane.xlu0 %890  ;;  %v911_v31 = vpop.xlane.xlu2 %910 }
 0x348   : > { %4664 = vrsqrt.f32 %v930_v28  ;;  %v919_v32 = vmul.f32 %v5452_v29, %v5452_v29  ;;  %v915_v33 = vmul.f32 0.0078125, %v911_v31  ;;  %v5456_v34 = vmul.f32 0.0078125, %v891_v30  ;;  %v869_v30 = vld [vmem:[#allocation9 + $0x60] sm:$0xff] }
 0x349   : > { %vm958_vm1 = vweird.f32 %v930_v28 }
 0x34a   : > { %v923_v35 = vsub.f32 %v915_v33, %v919_v32  ;;  %v917_v40 = vmul.f32 %v5456_v34, %v5456_v34 }
 0x34c   : > { %v927_v37 = vmax.f32 %v923_v35, 0.0 }
 0x34d   : > { %v907_v38 = vpop.xlane.xlu1 %906 }
 0x34e   : > { %v4665_v39 = vpop.eup %4664  ;;  %v931_v41 = vadd.f32 0.001, %v927_v37  ;;  %v913_v42 = vmul.f32 0.0078125, %v907_v38  ;;  %v870_v37 = vld [vmem:[#allocation9 + $0x68] sm:$0xff] }
 0x34f   : > { %v953_v43 = vmul.f32 %v4665_v39, %v930_v28  ;;  %v905_v44 = vpop.xlane.xlu2 %904  ;;  %vm959_vm15 = vweird.f32 %v4665_v39 }
 0x350   : > { %4666 = vrsqrt.f32 %v931_v41  ;;  %v921_v46 = vsub.f32 %v913_v42, %v917_v40  ;;  %v912_v47 = vmul.f32 0.0078125, %v905_v44  ;;  %vm960_vm2 = vmor %vm958_vm1, %vm959_vm15  ;;  %vm968_vm4 = vweird.f32 %v931_v41  ;;  %v886_v42 = vld [vmem:[#allocation9 + $0xb0] sm:$0xff] }
 0x351   : > { %v954_v48 = vmul.f32 %v4665_v39, %v953_v43  ;;  %v887_v43 = vld [vmem:[#allocation9 + $0xb8] sm:$0xff] }
 0x352   : > { %v925_v49 = vmax.f32 %v921_v46, 0.0  ;;  %v920_v50 = vsub.f32 %v912_v47, %v916_v45  ;;  %v875_v45 = vld [vmem:[#allocation9 + $0x88] sm:$0xff] }
 0x353   : > { %v955_v51 = vmul.f32 0.5, %v954_v48  ;;  %v885_v47 = vld [vmem:[#allocation9 + $0xa8] sm:$0xff]  ;;  %v884_v48 = vld [vmem:[#allocation9 + $0xa0] sm:$0xff] }
 0x354   : > { %v929_v52 = vadd.f32 0.001, %v925_v49  ;;  %v924_v53 = vmax.f32 %v920_v50, 0.0 }
 0x355   : > { %v956_v54 = vsub.f32 1.5, %v955_v51 }
 0x356   : > { %v4667_v55 = vpop.eup %4666  ;;  %4668 = vrsqrt.f32 %v929_v52  ;;  %v928_v56 = vadd.f32 0.001, %v924_v53  ;;  %vm948_vm10 = vweird.f32 %v929_v52 }
 0x357   : > { %v963_v57 = vmul.f32 %v4667_v55, %v931_v41  ;;  %v957_v59 = vmul.f32 %v4665_v39, %v956_v54  ;;  %vm969_vm3 = vweird.f32 %v4667_v55 }
 0x358   : > { %4670 = vrsqrt.f32 %v928_v56  ;;  %vm970_vm5 = vmor %vm968_vm4, %vm969_vm3  ;;  %vm938_vm7 = vweird.f32 %v928_v56 }
 0x359   : > { %v964_v60 = vmul.f32 %v4667_v55, %v963_v57  ;;  %v961_v61 = vsel %vm960_vm2, %v4665_v39, %v957_v59  ;;  %v874_v39 = vld [vmem:[#allocation9 + $0x80] sm:$0xff] }
 0x35a   : > { %v974_v62 = vmul.f32 %v961_v61, %v871_v58 }
 0x35b   : > { %v965_v63 = vmul.f32 0.5, %v964_v60 }
 0x35c   : > { %v4669_v1 = vpop.eup %4668  ;;  %996 = vperm.xlu0 %4647, %v974_v62   ;;  %v978_v2 = vmul.f32 %v974_v62, %v898_v18 }
 0x35d   : > { %v966_v3 = vsub.f32 1.5, %v965_v63  ;;  %v943_v4 = vmul.f32 %v4669_v1, %v929_v52  ;;  %vm949_vm8 = vweird.f32 %v4669_v1 }
 0x35e   : > { %v4671_v5 = vpop.eup %4670  ;;  %v982_v6 = vsub.f32 %v876_v0, %v978_v2  ;;  %vm950_vm11 = vmor %vm948_vm10, %vm949_vm8 }
 0x35f   : > { %v944_v10 = vmul.f32 %v4669_v1, %v943_v4  ;;  %v933_v12 = vmul.f32 %v4671_v5, %v928_v56  ;;  %v967_v14 = vmul.f32 %v4667_v55, %v966_v3  ;;  %vm939_vm6 = vweird.f32 %v4671_v5  ;;  %v4494_v4 = vld [vmem:[#allocation11 + $0x18] sm:$0xff] }
 0x360   : > { %1020 = vperm.xlu1 %4648, %v982_v6   ;;  %vm940_vm9 = vmor %vm938_vm7, %vm939_vm6 }
 0x361   : > { %v945_v16 = vmul.f32 0.5, %v944_v10  ;;  %v934_v17 = vmul.f32 %v4671_v5, %v933_v12  ;;  %v971_v20 = vsel %vm970_vm5, %v4667_v55, %v967_v14 }
 0x362   : > { %v975_v21 = vmul.f32 %v971_v20, %v872_v13 }
 0x363   : > { %v935_v23 = vmul.f32 0.5, %v934_v17  ;;  %v946_v26 = vsub.f32 1.5, %v945_v16 }
 0x364   : > { %v979_v18 = vmul.f32 %v975_v21, %v5452_v29 }
 0x365   : > { %v936_v27 = vsub.f32 1.5, %v935_v23  ;;  %v947_v32 = vmul.f32 %v4669_v1, %v946_v26 }
 0x366   : > { %v983_v28 = vsub.f32 %v877_v25, %v979_v18 }
 0x367   : > { %v937_v31 = vmul.f32 %v4671_v5, %v936_v27  ;;  %v951_v38 = vsel %vm950_vm11, %v4669_v1, %v947_v32 }
 0x368   : > { %1025 = vperm.xlu0 %4647, %v983_v28   ;;  %v973_v40 = vmul.f32 %v951_v38, %v870_v37 }
 0x369   : > { %v941_v33 = vsel %vm940_vm9, %v4671_v5, %v937_v31 }
 0x36a   : > { %v972_v35 = vmul.f32 %v941_v33, %v869_v30  ;;  %v977_v44 = vmul.f32 %v973_v40, %v5456_v34 }
 0x36c   : > { %986 = vperm.xlu2 %4649, %v972_v35   ;;  %v976_v29 = vmul.f32 %v972_v35, %v5458_v36  ;;  %v981_v46 = vsub.f32 %v875_v45, %v977_v44 }
 0x36e   : > { %v980_v41 = vsub.f32 %v874_v39, %v976_v29 }
 0x370   : > { %991 = vperm.xlu0 %4647, %v973_v40   ;;  %1010 = vperm.xlu1 %4648, %v980_v41  }
 0x374   : > { %1001 = vperm.xlu2 %4649, %v975_v21  }
 0x378   : > { %1050 = vperm.xlu0 %4647, %v886_v42   ;;  %1055 = vperm.xlu1 %4648, %v887_v43  }
 0x37c   : > { %1015 = vperm.xlu2 %4649, %v981_v46  }
 0x380   : > { %1045 = vperm.xlu0 %4647, %v885_v47  }
 0x384   : > { %1040 = vperm.xlu2 %4649, %v884_v48  }
 0x3c6   : > { %v987_v49 = vpop.permute.xlu2 %986 }
 0x3c7   : > { %v1004_v59 = vmul.f32 %v987_v49, %v5432_v7 }
 0x3ce   : > { %v997_v36 = vpop.permute.xlu0 %996  ;;  %v1002_v50 = vpop.permute.xlu2 %1001 }
 0x3cf   : > { %v1006_v52 = vmul.f32 %v997_v36, %v5437_v9  ;;  %v1007_v53 = vmul.f32 %v1002_v50, %v5442_v11  ;;  %v4493_v11 = vld [vmem:[#allocation11 + $0x10] sm:$0xff] }
 0x3d2   : > { %v1021_v51 = vpop.permute.xlu1 %1020 }
 0x3d3   : > { %v1030_v54 = vadd.f32 %v1021_v51, %v1006_v52 }
 0x3d5   : > { %v1034_v56 = vmax.f32 %v1030_v54, 0.0 }
 0x3d6   : > { %v1016_v0 = vpop.permute.xlu2 %1015 }
 0x3da   : > { %v1026_v55 = vpop.permute.xlu0 %1025 }
 0x3db   : > { %v1031_v34 = vadd.f32 %v1026_v55, %v1007_v53 }
 0x3dd   : > { %v1035_v57 = vmax.f32 %v1031_v34, 0.0 }
 0x3de   : > { %v1041_v5 = vpop.permute.xlu2 %1040 }
 0x3df   : > { %v1037_v58 = vpack.c.bf16 %v1035_v57, %v1034_v56 }
 0x3e1   : > { %1080 = vmatpush.bf16.msra.mxu2 %v1037_v58 }
 0x3e2   : > { %v992_v60 = vpop.permute.xlu0 %991  ;;  %v1011_v61 = vpop.permute.xlu1 %1010 }
 0x3e3   : > { %v1005_v62 = vmul.f32 %v992_v60, %v5435_v8  ;;  %v1028_v63 = vadd.f32 %v1011_v61, %v1004_v59 }
 0x3e5   : > { %v1029_v1 = vadd.f32 %v1016_v0, %v1005_v62  ;;  %v1032_v2 = vmax.f32 %v1028_v63, 0.0 }
 0x3e7   : > { %v1033_v9 = vmax.f32 %v1029_v1, 0.0 }
 0x3e9   : > { %v1036_v3 = vpack.c.bf16 %v1033_v9, %v1032_v2  ;;  %v1100_v2 = vld [vmem:[#allocation9 + $0xd0] sm:$0xff] }
 0x3ea   : > { %v1051_v12 = vpop.permute.xlu0 %1050  ;;  %v1056_v20 = vpop.permute.xlu1 %1055 }
 0x3eb   : > { %1081 = vmatpush.bf16.msra.mxu2 %v1036_v3 }
 0x3ee   : > { %4363 = vmatmul.msk.bf16.vlgmr.msra.gmra.mxu2 %vm842_vm14, %v4493_v11 }
 0x3f2   : > { %v1046_v21 = vpop.permute.xlu0 %1045 }
 0x3fe   : > { %4364 = vmatmul.msk.bf16.gmra.mxu2 %vm842_vm14, %v4494_v4 }
 0x471   : > { %v1083_v7 = vpop.f32.mrf.mxu2 }
 0x472   : > { %v1084_v6 = vadd.f32 %v1083_v7, %v1041_v5  ;;  %v1105_v7 = vld [vmem:[#allocation9 + $0xf0] sm:$0xff] }
 0x474   : > { %v5474_v10 = vadd.f32 %v1084_v6, %v5416_v22 }
 0x476   : > { %1112 = vadd.xlane.f32.xlu2 %v5474_v10  ;;  %v1124_v28 = vmul.f32 %v5474_v10, %v5474_v10 }
 0x479   : > { %v1085_v8 = vpop.f32.mrf.mxu2 }
 0x47a   : > { %v1086_v22 = vadd.f32 %v1085_v8, %v1046_v21 }
 0x47c   : > { %v5487_v18 = vadd.f32 %v1086_v22, %v5419_v24 }
 0x47e   : > { %v1125_v27 = vmul.f32 %v5487_v18, %v5487_v18 }
 0x481   : > { %v1088_v13 = vpop.f32.mrf.mxu2 }
 0x482   : > { %v1089_v14 = vadd.f32 %v1088_v13, %v1051_v12 }
 0x484   : > { %v5478_v16 = vadd.f32 %v1089_v14, %v5406_v15 }
 0x486   : > { %1116 = vadd.xlane.f32.xlu1 %v5478_v16  ;;  %v1126_v17 = vmul.f32 %v5478_v16, %v5478_v16 }
 0x488   : > { %1132 = vadd.xlane.f32.xlu0 %v1126_v17 }
 0x489   : > { %v1090_v23 = vpop.f32.mrf.mxu2 }
 0x48a   : > { %v1091_v25 = vadd.f32 %v1090_v23, %v1056_v20  ;;  %v1101_v23 = vld [vmem:[#allocation9 + $0xd8] sm:$0xff] }
 0x48c   : > { %v5484_v26 = vadd.f32 %v1091_v25, %v5411_v19 }
 0x48e   : > { %1118 = vadd.xlane.f32.xlu2 %v5484_v26  ;;  %v1127_v15 = vmul.f32 %v5484_v26, %v5484_v26 }
 0x490   : > { %1114 = vadd.xlane.f32.xlu0 %v5487_v18  ;;  %1134 = vadd.xlane.f32.xlu1 %v1127_v15 }
 0x496   : > { %1130 = vadd.xlane.f32.xlu2 %v1125_v27 }
 0x498   : > { %1128 = vadd.xlane.f32.xlu1 %v1124_v28 }
 0x4e9   : > { %v1113_v19 = vpop.xlane.xlu2 %1112 }
 0x4ea   : > { %v5503_v46 = vmul.f32 0.0078125, %v1113_v19 }
 0x4ec   : > { %v1140_v54 = vmul.f32 %v5503_v46, %v5503_v46 }
 0x4f9   : > { %v1117_v30 = vpop.xlane.xlu1 %1116 }
 0x4fa   : > { %v1122_v24 = vmul.f32 0.0078125, %v1117_v30  ;;  %v1106_v30 = vld [vmem:[#allocation9 + $0xf8] sm:$0xff] }
 0x4fb   : > { %v1133_v31 = vpop.xlane.xlu0 %1132 }
 0x4fc   : > { %v1142_v32 = vmul.f32 %v1122_v24, %v1122_v24  ;;  %v1138_v33 = vmul.f32 0.0078125, %v1133_v31 }
 0x4fe   : > { %v1146_v35 = vsub.f32 %v1138_v33, %v1142_v32 }
 0x500   : > { %v1150_v37 = vmax.f32 %v1146_v35, 0.0  ;;  %v1098_v35 = vld [vmem:[#allocation9 + $0xc0] sm:$0xff] }
 0x501   : > { %v1119_v38 = vpop.xlane.xlu2 %1118 }
 0x502   : > { %v1154_v39 = vadd.f32 0.001, %v1150_v37  ;;  %v5497_v29 = vmul.f32 0.0078125, %v1119_v38 }
 0x503   : > { %v1115_v40 = vpop.xlane.xlu0 %1114  ;;  %v1135_v41 = vpop.xlane.xlu1 %1134 }
 0x504   : > { %4672 = vrsqrt.f32 %v1154_v39  ;;  %v1143_v42 = vmul.f32 %v5497_v29, %v5497_v29  ;;  %v1139_v43 = vmul.f32 0.0078125, %v1135_v41  ;;  %v5501_v44 = vmul.f32 0.0078125, %v1115_v40  ;;  %v1099_v41 = vld [vmem:[#allocation9 + $0xc8] sm:$0xff] }
 0x505   : > { %vm1182_vm13 = vweird.f32 %v1154_v39 }
 0x506   : > { %v1147_v45 = vsub.f32 %v1139_v43, %v1143_v42  ;;  %v1141_v36 = vmul.f32 %v5501_v44, %v5501_v44  ;;  %v1103_v43 = vld [vmem:[#allocation9 + $0xe0] sm:$0xff] }
 0x508   : > { %v1151_v47 = vmax.f32 %v1147_v45, 0.0 }
 0x509   : > { %v1131_v48 = vpop.xlane.xlu2 %1130 }
 0x50a   : > { %v4673_v49 = vpop.eup %4672  ;;  %v1155_v50 = vadd.f32 0.001, %v1151_v47  ;;  %v1137_v51 = vmul.f32 0.0078125, %v1131_v48 }
 0x50b   : > { %v1177_v52 = vmul.f32 %v4673_v49, %v1154_v39  ;;  %v1129_v53 = vpop.xlane.xlu1 %1128  ;;  %vm1183_vm12 = vweird.f32 %v4673_v49 }
 0x50c   : > { %4674 = vrsqrt.f32 %v1155_v50  ;;  %v1145_v55 = vsub.f32 %v1137_v51, %v1141_v36  ;;  %v1136_v34 = vmul.f32 0.0078125, %v1129_v53  ;;  %vm1184_vm15 = vmor %vm1182_vm13, %vm1183_vm12  ;;  %vm1192_vm2 = vweird.f32 %v1155_v50 }
 0x50d   : > { %v1178_v56 = vmul.f32 %v4673_v49, %v1177_v52 }
 0x50e   : > { %v1149_v57 = vmax.f32 %v1145_v55, 0.0  ;;  %v1144_v58 = vsub.f32 %v1136_v34, %v1140_v54 }
 0x50f   : > { %v1179_v59 = vmul.f32 0.5, %v1178_v56 }
 0x510   : > { %v1153_v60 = vadd.f32 0.001, %v1149_v57  ;;  %v1148_v61 = vmax.f32 %v1144_v58, 0.0 }
 0x511   : > { %v1180_v62 = vsub.f32 1.5, %v1179_v59 }
 0x512   : > { %v4675_v63 = vpop.eup %4674  ;;  %4676 = vrsqrt.f32 %v1153_v60  ;;  %v1152_v0 = vadd.f32 0.001, %v1148_v61  ;;  %vm1172_vm8 = vweird.f32 %v1153_v60 }
 0x513   : > { %v1187_v1 = vmul.f32 %v4675_v63, %v1155_v50  ;;  %v1181_v9 = vmul.f32 %v4673_v49, %v1180_v62  ;;  %vm1193_vm1 = vweird.f32 %v4675_v63 }
 0x514   : > { %4678 = vrsqrt.f32 %v1152_v0  ;;  %vm1194_vm3 = vmor %vm1192_vm2, %vm1193_vm1  ;;  %vm1162_vm5 = vweird.f32 %v1152_v0 }
 0x515   : > { %v1188_v3 = vmul.f32 %v4675_v63, %v1187_v1  ;;  %v1185_v11 = vsel %vm1184_vm15, %v4673_v49, %v1181_v9  ;;  %v1104_v49 = vld [vmem:[#allocation9 + $0xe8] sm:$0xff] }
 0x516   : > { %v1198_v4 = vmul.f32 %v1185_v11, %v1100_v2  ;;  %v4495_v11 = vld [vmem:[#allocation11 + $0x20] sm:$0xff] }
 0x517   : > { %v1189_v5 = vmul.f32 0.5, %v1188_v3 }
 0x518   : > { %v4677_v6 = vpop.eup %4676  ;;  %1220 = vperm.xlu0 %4647, %v1198_v4   ;;  %v1202_v8 = vmul.f32 %v1198_v4, %v1122_v24  ;;  %v4496_v4 = vld [vmem:[#allocation11 + $0x28] sm:$0xff] }
 0x519   : > { %v1190_v12 = vsub.f32 1.5, %v1189_v5  ;;  %v1167_v13 = vmul.f32 %v4677_v6, %v1153_v60  ;;  %vm1173_vm6 = vweird.f32 %v4677_v6 }
 0x51a   : > { %v4679_v14 = vpop.eup %4678  ;;  %v1206_v17 = vsub.f32 %v1105_v7, %v1202_v8  ;;  %vm1174_vm9 = vmor %vm1172_vm8, %vm1173_vm6 }
 0x51b   : > { %v1168_v20 = vmul.f32 %v4677_v6, %v1167_v13  ;;  %v1157_v21 = vmul.f32 %v4679_v14, %v1152_v0  ;;  %v1191_v22 = vmul.f32 %v4675_v63, %v1190_v12  ;;  %vm1163_vm4 = vweird.f32 %v4679_v14 }
 0x51c   : > { %1244 = vperm.xlu2 %4649, %v1206_v17   ;;  %vm1164_vm7 = vmor %vm1162_vm5, %vm1163_vm4 }
 0x51d   : > { %v1169_v25 = vmul.f32 0.5, %v1168_v20  ;;  %v1158_v15 = vmul.f32 %v4679_v14, %v1157_v21  ;;  %v1195_v27 = vsel %vm1194_vm3, %v4675_v63, %v1191_v22 }
 0x51e   : > { %v1199_v28 = vmul.f32 %v1195_v27, %v1101_v23 }
 0x51f   : > { %v1159_v19 = vmul.f32 0.5, %v1158_v15  ;;  %v1170_v31 = vsub.f32 1.5, %v1169_v25 }
 0x520   : > { %v1203_v24 = vmul.f32 %v1199_v28, %v5497_v29 }
 0x521   : > { %v1160_v32 = vsub.f32 1.5, %v1159_v19  ;;  %v1171_v38 = vmul.f32 %v4677_v6, %v1170_v31 }
 0x522   : > { %v1207_v33 = vsub.f32 %v1106_v30, %v1203_v24 }
 0x523   : > { %v1161_v37 = vmul.f32 %v4679_v14, %v1160_v32  ;;  %v1175_v42 = vsel %vm1174_vm9, %v4677_v6, %v1171_v38 }
 0x524   : > { %1249 = vperm.xlu0 %4647, %v1207_v33   ;;  %v1197_v45 = vmul.f32 %v1175_v42, %v1099_v41 }
 0x525   : > { %v1165_v39 = vsel %vm1164_vm7, %v4679_v14, %v1161_v37 }
 0x526   : > { %v1196_v40 = vmul.f32 %v1165_v39, %v1098_v35  ;;  %v1201_v48 = vmul.f32 %v1197_v45, %v5501_v44 }
 0x528   : > { %1210 = vperm.xlu1 %4648, %v1196_v40   ;;  %v1200_v29 = vmul.f32 %v1196_v40, %v5503_v46  ;;  %v1205_v36 = vsub.f32 %v1104_v49, %v1201_v48 }
 0x52a   : > { %v1204_v47 = vsub.f32 %v1103_v43, %v1200_v29 }
 0x52c   : > { %1215 = vperm.xlu0 %4647, %v1197_v45   ;;  %1234 = vperm.xlu2 %4649, %v1204_v47  }
 0x530   : > { %1225 = vperm.xlu1 %4648, %v1199_v28  }
 0x538   : > { %1239 = vperm.xlu1 %4648, %v1205_v36  }
 0x576   : > { %v1245_v54 = vpop.permute.xlu2 %1244 }
 0x586   : > { %v1235_v44 = vpop.permute.xlu2 %1234 }
 0x58a   : > { %v1221_v50 = vpop.permute.xlu0 %1220 }
 0x58b   : > { %v1230_v53 = vmul.f32 %v1221_v50, %v5478_v16 }
 0x58d   : > { %v1254_v46 = vadd.f32 %v1245_v54, %v1230_v53 }
 0x58f   : > { %v1258_v59 = vmax.f32 %v1254_v46, 0.0 }
 0x596   : > { %v1250_v52 = vpop.permute.xlu0 %1249 }
 0x59a   : > { %v1211_v51 = vpop.permute.xlu1 %1210 }
 0x59b   : > { %v1228_v56 = vmul.f32 %v1211_v51, %v5474_v10 }
 0x59d   : > { %v1252_v61 = vadd.f32 %v1235_v44, %v1228_v56 }
 0x59e   : > { %v1216_v58 = vpop.permute.xlu0 %1215 }
 0x59f   : > { %v1229_v62 = vmul.f32 %v1216_v58, %v5487_v18  ;;  %v1256_v9 = vmax.f32 %v1252_v61, 0.0 }
 0x5a2   : > { %v1226_v55 = vpop.permute.xlu1 %1225 }
 0x5a3   : > { %v1231_v34 = vmul.f32 %v1226_v55, %v5484_v26 }
 0x5a5   : > { %v1255_v57 = vadd.f32 %v1250_v52, %v1231_v34  ;;  %v1300_v34 = vld [vmem:[#allocation9 + $0x110] sm:$0xff] }
 0x5a7   : > { %v1259_v60 = vmax.f32 %v1255_v57, 0.0 }
 0x5a9   : > { %v1261_v63 = vpack.c.bf16 %v1259_v60, %v1258_v59 }
 0x5aa   : > { %v1240_v0 = vpop.permute.xlu1 %1239 }
 0x5ab   : > { %v1253_v1 = vadd.f32 %v1240_v0, %v1229_v62  ;;  %1284 = vmatpush.bf16.msra.mxu3 %v1261_v63  ;;  %v1305_v62 = vld [vmem:[#allocation9 + $0x130] sm:$0xff] }
 0x5ad   : > { %v1257_v2 = vmax.f32 %v1253_v1, 0.0 }
 0x5af   : > { %v1260_v3 = vpack.c.bf16 %v1257_v2, %v1256_v9 }
 0x5b1   : > { %1285 = vmatpush.bf16.msra.mxu3 %v1260_v3 }
 0x5b4   : > { %4373 = vmatmul.msk.bf16.vlgmr.msra.gmra.mxu3 %vm842_vm14, %v4495_v11 }
 0x5c4   : > { %4374 = vmatmul.msk.bf16.gmra.mxu3 %vm842_vm14, %v4496_v4 }
 0x637   : > { %v5518_v5 = vpop.f32.mrf.mxu3 }
 0x638   : > { %1317 = vadd.xlane.f32.xlu0 %v5518_v5  ;;  %v1329_v17 = vmul.f32 %v5518_v5, %v5518_v5 }
 0x63f   : > { %v5521_v7 = vpop.f32.mrf.mxu3 }
 0x640   : > { %v1330_v12 = vmul.f32 %v5521_v7, %v5521_v7 }
 0x647   : > { %v5523_v6 = vpop.f32.mrf.mxu3 }
 0x648   : > { %1321 = vadd.xlane.f32.xlu0 %v5523_v6  ;;  %v1331_v8 = vmul.f32 %v5523_v6, %v5523_v6 }
 0x64a   : > { %1337 = vadd.xlane.f32.xlu1 %v1331_v8  ;;  %v1299_v8 = vld [vmem:[#allocation9 + $0x108] sm:$0xff] }
 0x64f   : > { %v5530_v13 = vpop.f32.mrf.mxu3 }
 0x650   : > { %1335 = vadd.xlane.f32.xlu0 %v1330_v12  ;;  %1323 = vadd.xlane.f32.xlu2 %v5530_v13  ;;  %v1332_v14 = vmul.f32 %v5530_v13, %v5530_v13 }
 0x652   : > { %1319 = vadd.xlane.f32.xlu1 %v5521_v7 }
 0x658   : > { %1339 = vadd.xlane.f32.xlu2 %v1332_v14 }
 0x660   : > { %1333 = vadd.xlane.f32.xlu2 %v1329_v17 }
 0x6ab   : > { %v1318_v20 = vpop.xlane.xlu0 %1317 }
 0x6ac   : > { %v5546_v49 = vmul.f32 0.0078125, %v1318_v20 }
 0x6ae   : > { %v1345_v54 = vmul.f32 %v5546_v49, %v5546_v49 }
 0x6bb   : > { %v1322_v21 = vpop.xlane.xlu0 %1321 }
 0x6bc   : > { %v1327_v23 = vmul.f32 0.0078125, %v1322_v21 }
 0x6bd   : > { %v1338_v22 = vpop.xlane.xlu1 %1337 }
 0x6be   : > { %v1347_v25 = vmul.f32 %v1327_v23, %v1327_v23  ;;  %v1343_v15 = vmul.f32 0.0078125, %v1338_v22 }
 0x6c0   : > { %v1351_v27 = vsub.f32 %v1343_v15, %v1347_v25  ;;  %v1301_v25 = vld [vmem:[#allocation9 + $0x118] sm:$0xff] }
 0x6c2   : > { %v1355_v28 = vmax.f32 %v1351_v27, 0.0 }
 0x6c3   : > { %v1324_v19 = vpop.xlane.xlu2 %1323  ;;  %v1336_v31 = vpop.xlane.xlu0 %1335 }
 0x6c4   : > { %v1359_v30 = vadd.f32 0.001, %v1355_v28  ;;  %v1342_v33 = vmul.f32 0.0078125, %v1336_v31  ;;  %v5540_v35 = vmul.f32 0.0078125, %v1324_v19  ;;  %v1306_v31 = vld [vmem:[#allocation9 + $0x138] sm:$0xff] }
 0x6c5   : > { %v1320_v24 = vpop.xlane.xlu1 %1319 }
 0x6c6   : > { %4680 = vrsqrt.f32 %v1359_v30  ;;  %v5538_v32 = vmul.f32 0.0078125, %v1320_v24  ;;  %v1348_v41 = vmul.f32 %v5540_v35, %v5540_v35  ;;  %vm1387_vm11 = vweird.f32 %v1359_v30 }
 0x6c8   : > { %v1346_v37 = vmul.f32 %v5538_v32, %v5538_v32 }
 0x6ca   : > { %v1350_v38 = vsub.f32 %v1342_v33, %v1346_v37  ;;  %v1315_v33 = vld [vmem:[#allocation9 + $0x150] sm:$0xff] }
 0x6cb   : > { %v1340_v39 = vpop.xlane.xlu2 %1339 }
 0x6cc   : > { %v4681_v40 = vpop.eup %4680  ;;  %v1354_v42 = vmax.f32 %v1350_v38, 0.0  ;;  %v1344_v43 = vmul.f32 0.0078125, %v1340_v39  ;;  %v1298_v39 = vld [vmem:[#allocation9 + $0x100] sm:$0xff] }
 0x6cd   : > { %v1382_v29 = vmul.f32 %v4681_v40, %v1359_v30  ;;  %vm1388_vm10 = vweird.f32 %v4681_v40 }
 0x6ce   : > { %v1358_v45 = vadd.f32 0.001, %v1354_v42  ;;  %v1352_v47 = vsub.f32 %v1344_v43, %v1348_v41  ;;  %vm1389_vm12 = vmor %vm1387_vm11, %vm1388_vm10  ;;  %v1303_v43 = vld [vmem:[#allocation9 + $0x120] sm:$0xff] }
 0x6cf   : > { %v1383_v48 = vmul.f32 %v4681_v40, %v1382_v29 }
 0x6d0   : > { %4682 = vrsqrt.f32 %v1358_v45  ;;  %v1356_v36 = vmax.f32 %v1352_v47, 0.0  ;;  %vm1377_vm15 = vweird.f32 %v1358_v45 }
 0x6d1   : > { %v1384_v50 = vmul.f32 0.5, %v1383_v48 }
 0x6d2   : > { %v1360_v51 = vadd.f32 0.001, %v1356_v36  ;;  %v1304_v36 = vld [vmem:[#allocation9 + $0x128] sm:$0xff] }
 0x6d3   : > { %v1334_v52 = vpop.xlane.xlu2 %1333  ;;  %v1385_v53 = vsub.f32 1.5, %v1384_v50 }
 0x6d4   : > { %4684 = vrsqrt.f32 %v1360_v51  ;;  %v1341_v55 = vmul.f32 0.0078125, %v1334_v52  ;;  %vm1397_vm3 = vweird.f32 %v1360_v51 }
 0x6d5   : > { %v1386_v46 = vmul.f32 %v4681_v40, %v1385_v53 }
 0x6d6   : > { %v4683_v56 = vpop.eup %4682  ;;  %v1349_v57 = vsub.f32 %v1341_v55, %v1345_v54 }
 0x6d7   : > { %v1372_v58 = vmul.f32 %v4683_v56, %v1358_v45  ;;  %v1390_v59 = vsel %vm1389_vm12, %v4681_v40, %v1386_v46  ;;  %vm1378_vm13 = vweird.f32 %v4683_v56  ;;  %v1314_v45 = vld [vmem:[#allocation9 + $0x148] sm:$0xff] }
 0x6d8   : > { %v1353_v60 = vmax.f32 %v1349_v57, 0.0  ;;  %v1403_v44 = vmul.f32 %v1390_v59, %v1300_v34  ;;  %vm1379_vm1 = vmor %vm1377_vm15, %vm1378_vm13 }
 0x6d9   : > { %v1373_v61 = vmul.f32 %v4683_v56, %v1372_v58 }
 0x6da   : > { %v4685_v63 = vpop.eup %4684  ;;  %v1357_v0 = vadd.f32 0.001, %v1353_v60  ;;  %1425 = vperm.xlu1 %4648, %v1403_v44   ;;  %v1407_v1 = vmul.f32 %v1403_v44, %v1327_v23 }
 0x6db   : > { %v1374_v2 = vmul.f32 0.5, %v1373_v61  ;;  %v1392_v9 = vmul.f32 %v4685_v63, %v1360_v51  ;;  %vm1398_vm2 = vweird.f32 %v4685_v63  ;;  %v1313_v51 = vld [vmem:[#allocation9 + $0x140] sm:$0xff] }
 0x6dc   : > { %4686 = vrsqrt.f32 %v1357_v0  ;;  %v1411_v3 = vsub.f32 %v1305_v62, %v1407_v1  ;;  %vm1399_vm4 = vmor %vm1397_vm3, %vm1398_vm2  ;;  %vm1367_vm6 = vweird.f32 %v1357_v0 }
 0x6dd   : > { %v1375_v11 = vsub.f32 1.5, %v1374_v2  ;;  %v1393_v4 = vmul.f32 %v4685_v63, %v1392_v9 }
 0x6de   : > { %1449 = vperm.xlu0 %4647, %v1411_v3   ;;  %v4497_v3 = vld [vmem:[#allocation11 + $0x30] sm:$0xff] }
 0x6df   : > { %v1376_v12 = vmul.f32 %v4683_v56, %v1375_v11  ;;  %v1394_v14 = vmul.f32 0.5, %v1393_v4 }
 0x6e1   : > { %v1380_v17 = vsel %vm1379_vm1, %v4683_v56, %v1376_v12  ;;  %v1395_v20 = vsub.f32 1.5, %v1394_v14 }
 0x6e2   : > { %v4687_v21 = vpop.eup %4686  ;;  %v1402_v22 = vmul.f32 %v1380_v17, %v1299_v8 }
 0x6e3   : > { %v1362_v23 = vmul.f32 %v4687_v21, %v1357_v0  ;;  %v1396_v15 = vmul.f32 %v4685_v63, %v1395_v20  ;;  %vm1368_vm5 = vweird.f32 %v4687_v21 }
 0x6e4   : > { %1420 = vperm.xlu1 %4648, %v1402_v22   ;;  %vm1369_vm7 = vmor %vm1367_vm6, %vm1368_vm5  ;;  %v1406_v48 = vmul.f32 %v1402_v22, %v5538_v32 }
 0x6e5   : > { %v1363_v27 = vmul.f32 %v4687_v21, %v1362_v23  ;;  %v1400_v28 = vsel %vm1399_vm4, %v4685_v63, %v1396_v15 }
 0x6e6   : > { %v1404_v19 = vmul.f32 %v1400_v28, %v1301_v25  ;;  %v1410_v50 = vsub.f32 %v1304_v36, %v1406_v48 }
 0x6e7   : > { %v1364_v30 = vmul.f32 0.5, %v1363_v27 }
 0x6e8   : > { %v1408_v24 = vmul.f32 %v1404_v19, %v5540_v35  ;;  %v1316_v35 = vld [vmem:[#allocation9 + $0x158] sm:$0xff] }
 0x6e9   : > { %v1365_v37 = vsub.f32 1.5, %v1364_v30 }
 0x6ea   : > { %v1412_v38 = vsub.f32 %v1306_v31, %v1408_v24 }
 0x6eb   : > { %v1366_v40 = vmul.f32 %v4687_v21, %v1365_v37 }
 0x6ec   : > { %1479 = vperm.xlu1 %4648, %v1315_v33   ;;  %1454 = vperm.xlu0 %4647, %v1412_v38  }
 0x6ed   : > { %v1370_v41 = vsel %vm1369_vm7, %v4687_v21, %v1366_v40 }
 0x6ee   : > { %v1401_v42 = vmul.f32 %v1370_v41, %v1298_v39 }
 0x6f0   : > { %1415 = vperm.xlu2 %4649, %v1401_v42   ;;  %v1405_v29 = vmul.f32 %v1401_v42, %v5546_v49 }
 0x6f2   : > { %v1409_v47 = vsub.f32 %v1303_v43, %v1405_v29 }
 0x6f4   : > { %1474 = vperm.xlu1 %4648, %v1314_v45   ;;  %1439 = vperm.xlu0 %4647, %v1409_v47  }
 0x6f8   : > { %1430 = vperm.xlu2 %4649, %v1404_v19  }
 0x6fc   : > { %1484 = vperm.xlu0 %4647, %v1316_v35  }
 0x700   : > { %1444 = vperm.xlu2 %4649, %v1410_v50  }
 0x708   : > { %1469 = vperm.xlu2 %4649, %v1313_v51  }
 0x74a   : > { %v1416_v52 = vpop.permute.xlu2 %1415 }
 0x74b   : > { %v1433_v62 = vmul.f32 %v1416_v52, %v5518_v5 }
 0x74c   : > { %v1426_v54 = vpop.permute.xlu1 %1425 }
 0x74d   : > { %v1435_v49 = vmul.f32 %v1426_v54, %v5523_v6 }
 0x750   : > { %v1450_v53 = vpop.permute.xlu0 %1449 }
 0x751   : > { %v1459_v34 = vadd.f32 %v1450_v53, %v1435_v49 }
 0x752   : > { %v1431_v55 = vpop.permute.xlu2 %1430 }
 0x753   : > { %v1436_v46 = vmul.f32 %v1431_v55, %v5530_v13  ;;  %v1463_v59 = vmax.f32 %v1459_v34, 0.0  ;;  %v4498_v13 = vld [vmem:[#allocation11 + $0x38] sm:$0xff] }
 0x756   : > { %v1421_v58 = vpop.permute.xlu1 %1420 }
 0x757   : > { %v1434_v44 = vmul.f32 %v1421_v58, %v5521_v7 }
 0x75a   : > { %v1445_v60 = vpop.permute.xlu2 %1444 }
 0x75b   : > { %v1458_v63 = vadd.f32 %v1445_v60, %v1434_v44 }
 0x75d   : > { %v1462_v2 = vmax.f32 %v1458_v63, 0.0 }
 0x75e   : > { %v1455_v56 = vpop.permute.xlu0 %1454  ;;  %v1480_v12 = vpop.permute.xlu1 %1479 }
 0x75f   : > { %v1460_v57 = vadd.f32 %v1455_v56, %v1436_v46 }
 0x761   : > { %v1464_v32 = vmax.f32 %v1460_v57, 0.0 }
 0x762   : > { %v1470_v11 = vpop.permute.xlu2 %1469 }
 0x763   : > { %v1466_v61 = vpack.c.bf16 %v1464_v32, %v1463_v59 }
 0x765   : > { %1509 = vmatpush.bf16.msrb.mxu0 %v1466_v61 }
 0x766   : > { %v1440_v0 = vpop.permute.xlu0 %1439  ;;  %v1475_v22 = vpop.permute.xlu1 %1474 }
 0x767   : > { %v1457_v1 = vadd.f32 %v1440_v0, %v1433_v62 }
 0x769   : > { %v1461_v6 = vmax.f32 %v1457_v1, 0.0 }
 0x76b   : > { %v1465_v9 = vpack.c.bf16 %v1462_v2, %v1461_v6  ;;  %v1613_v2 = vld [vmem:[#allocation9 + $0x170] sm:$0xff] }
 0x76c   : > { %v2822_v6 = vld [vmem:[#allocation9 + $0x330] sm:$0xff] }
 0x76d   : > { %1510 = vmatpush.bf16.msrb.mxu0 %v1465_v9 }
 0x76e   : > { %v1485_v23 = vpop.permute.xlu0 %1484 }
 0x770   : > { %4383 = vmatmul.msk.bf16.vlgmr.msrb.gmra.mxu0 %vm842_vm14, %v4497_v3 }
 0x780   : > { %4384 = vmatmul.msk.bf16.gmra.mxu0 %vm842_vm14, %v4498_v13 }
 0x7ed   : > { %v1512_v4 = vpop.f32.mrf.mxu0 }
 0x7ee   : > { %v1513_v7 = vadd.f32 %v1512_v4, %v1470_v11 }
 0x7f0   : > { %v5560_v8 = vadd.f32 %v1513_v7, %v5474_v10  ;;  %v1618_v7 = vld [vmem:[#allocation9 + $0x190] sm:$0xff] }
 0x7f2   : > { %1526 = vadd.xlane.f32.xlu2 %v5560_v8  ;;  %v1538_v30 = vmul.f32 %v5560_v8, %v5560_v8 }
 0x7f5   : > { %v1514_v5 = vpop.f32.mrf.mxu0 }
 0x7f6   : > { %v1515_v10 = vadd.f32 %v1514_v5, %v1475_v22 }
 0x7f8   : > { %v5573_v28 = vadd.f32 %v1515_v10, %v5487_v18 }
 0x7fa   : > { %v1539_v19 = vmul.f32 %v5573_v28, %v5573_v28 }
 0x7fd   : > { %v1517_v14 = vpop.f32.mrf.mxu0 }
 0x7fe   : > { %v1518_v17 = vadd.f32 %v1517_v14, %v1480_v12 }
 0x800   : > { %v5564_v20 = vadd.f32 %v1518_v17, %v5478_v16 }
 0x802   : > { %1530 = vadd.xlane.f32.xlu0 %v5564_v20  ;;  %v1540_v21 = vmul.f32 %v5564_v20, %v5564_v20 }
 0x804   : > { %1546 = vadd.xlane.f32.xlu1 %v1540_v21 }
 0x805   : > { %v1519_v25 = vpop.f32.mrf.mxu0 }
 0x806   : > { %v1520_v15 = vadd.f32 %v1519_v25, %v1485_v23 }
 0x808   : > { %v5570_v27 = vadd.f32 %v1520_v15, %v5484_v26 }
 0x80a   : > { %1532 = vadd.xlane.f32.xlu2 %v5570_v27  ;;  %v1541_v16 = vmul.f32 %v5570_v27, %v5570_v27 }
 0x80c   : > { %1528 = vadd.xlane.f32.xlu1 %v5573_v28  ;;  %1548 = vadd.xlane.f32.xlu0 %v1541_v16 }
 0x812   : > { %1544 = vadd.xlane.f32.xlu2 %v1539_v19  ;;  %v1614_v19 = vld [vmem:[#allocation9 + $0x178] sm:$0xff] }
 0x814   : > { %1542 = vadd.xlane.f32.xlu0 %v1538_v30  ;;  %v2823_v30 = vld [vmem:[#allocation9 + $0x338] sm:$0xff] }
 0x865   : > { %v1527_v26 = vpop.xlane.xlu2 %1526 }
 0x866   : > { %v5593_v36 = vmul.f32 0.0078125, %v1527_v26 }
 0x868   : > { %v1554_v56 = vmul.f32 %v5593_v36, %v5593_v36 }
 0x875   : > { %v1531_v31 = vpop.xlane.xlu0 %1530 }
 0x876   : > { %v5583_v18 = vmul.f32 0.0078125, %v1531_v31 }
 0x877   : > { %v1547_v24 = vpop.xlane.xlu1 %1546 }
 0x878   : > { %v1552_v33 = vmul.f32 0.0078125, %v1547_v24  ;;  %v1556_v37 = vmul.f32 %v5583_v18, %v5583_v18 }
 0x87a   : > { %v1560_v38 = vsub.f32 %v1552_v33, %v1556_v37 }
 0x87c   : > { %v1564_v39 = vmax.f32 %v1560_v38, 0.0 }
 0x87d   : > { %v1533_v40 = vpop.xlane.xlu2 %1532 }
 0x87e   : > { %v1568_v41 = vadd.f32 0.001, %v1564_v39  ;;  %v5587_v42 = vmul.f32 0.0078125, %v1533_v40 }
 0x87f   : > { %v1529_v43 = vpop.xlane.xlu1 %1528  ;;  %v1549_v29 = vpop.xlane.xlu0 %1548 }
 0x880   : > { %4688 = vrsqrt.f32 %v1568_v41  ;;  %v1557_v45 = vmul.f32 %v5587_v42, %v5587_v42  ;;  %v1553_v47 = vmul.f32 0.0078125, %v1549_v29  ;;  %v5591_v35 = vmul.f32 0.0078125, %v1529_v43  ;;  %v1612_v43 = vld [vmem:[#allocation9 + $0x168] sm:$0xff] }
 0x881   : > { %vm1596_vm9 = vweird.f32 %v1568_v41  ;;  %v2992_v29 = vld [vmem:[#allocation9 + $0x368] sm:$0xff] }
 0x882   : > { %v1561_v48 = vsub.f32 %v1553_v47, %v1557_v45  ;;  %v1555_v53 = vmul.f32 %v5591_v35, %v5591_v35  ;;  %v2821_v47 = vld [vmem:[#allocation9 + $0x328] sm:$0xff] }
 0x884   : > { %v1565_v50 = vmax.f32 %v1561_v48, 0.0 }
 0x885   : > { %v1545_v51 = vpop.xlane.xlu2 %1544 }
 0x886   : > { %v4689_v52 = vpop.eup %4688  ;;  %v1551_v54 = vmul.f32 0.0078125, %v1545_v51  ;;  %v1569_v49 = vadd.f32 0.001, %v1565_v50 }
 0x887   : > { %v1591_v55 = vmul.f32 %v4689_v52, %v1568_v41  ;;  %v1543_v34 = vpop.xlane.xlu0 %1542  ;;  %vm1597_vm8 = vweird.f32 %v4689_v52 }
 0x888   : > { %v1559_v46 = vsub.f32 %v1551_v54, %v1555_v53  ;;  %v1550_v57 = vmul.f32 0.0078125, %v1543_v34  ;;  %4690 = vrsqrt.f32 %v1569_v49  ;;  %vm1598_vm10 = vmor %vm1596_vm9, %vm1597_vm8  ;;  %vm1606_vm12 = vweird.f32 %v1569_v49  ;;  %v2991_v34 = vld [vmem:[#allocation9 + $0x360] sm:$0xff] }
 0x889   : > { %v1592_v58 = vmul.f32 %v4689_v52, %v1591_v55  ;;  %v1619_v55 = vld [vmem:[#allocation9 + $0x198] sm:$0xff] }
 0x88a   : > { %v1563_v59 = vmax.f32 %v1559_v46, 0.0  ;;  %v1558_v32 = vsub.f32 %v1550_v57, %v1554_v56 }
 0x88b   : > { %v1593_v60 = vmul.f32 0.5, %v1592_v58 }
 0x88c   : > { %v1567_v44 = vadd.f32 0.001, %v1563_v59  ;;  %v1562_v61 = vmax.f32 %v1558_v32, 0.0 }
 0x88d   : > { %v1594_v62 = vsub.f32 1.5, %v1593_v60 }
 0x88e   : > { %4692 = vrsqrt.f32 %v1567_v44  ;;  %v1566_v63 = vadd.f32 0.001, %v1562_v61  ;;  %v4691_v0 = vpop.eup %4690  ;;  %vm1586_vm1 = vweird.f32 %v1567_v44  ;;  %v1616_v61 = vld [vmem:[#allocation9 + $0x180] sm:$0xff] }
 0x88f   : > { %v1595_v1 = vmul.f32 %v4689_v52, %v1594_v62  ;;  %v1601_v9 = vmul.f32 %v4691_v0, %v1569_v49  ;;  %vm1607_vm11 = vweird.f32 %v4691_v0 }
 0x890   : > { %4694 = vrsqrt.f32 %v1566_v63  ;;  %vm1608_vm13 = vmor %vm1606_vm12, %vm1607_vm11  ;;  %vm1576_vm4 = vweird.f32 %v1566_v63 }
 0x891   : > { %v5599_v3 = vsel %vm1598_vm10, %v4689_v52, %v1595_v1  ;;  %v1602_v13 = vmul.f32 %v4691_v0, %v1601_v9  ;;  %v1611_v52 = vld [vmem:[#allocation9 + $0x160] sm:$0xff]  ;;  %vm1774_vm10 = vcmask 64512  }
 0x892   : > { %v1623_v11 = vmul.f32 %v1613_v2, %v5599_v3  ;;  %v5603_v4 = vmul.f32 %v2822_v6, %v5599_v3 }
 0x893   : > { %v1603_v12 = vmul.f32 0.5, %v1602_v13 }
 0x894   : > { %v4693_v5 = vpop.eup %4692  ;;  %v1627_v14 = vmul.f32 %v1623_v11, %v5583_v18  ;;  %v5608_v17 = vmul.f32 %v5603_v4, %v5583_v18 }
 0x895   : > { %v1581_v21 = vmul.f32 %v4693_v5, %v1567_v44  ;;  %v1604_v23 = vsub.f32 1.5, %v1603_v12  ;;  %vm1587_vm15 = vweird.f32 %v4693_v5 }
 0x896   : > { %v4695_v22 = vpop.eup %4694  ;;  %v1631_v25 = vsub.f32 %v1618_v7, %v1627_v14  ;;  %vm1588_vm3 = vmor %vm1586_vm1, %vm1587_vm15 }
 0x897   : > { %v1582_v10 = vmul.f32 %v4693_v5, %v1581_v21  ;;  %v1571_v15 = vmul.f32 %v4695_v22, %v1566_v63  ;;  %v1605_v16 = vmul.f32 %v4691_v0, %v1604_v23  ;;  %vm1577_vm2 = vweird.f32 %v4695_v22 }
 0x898   : > { %1669 = vperm.xlu2 %4649, %v1631_v25   ;;  %vm1578_vm5 = vmor %vm1576_vm4, %vm1577_vm2 }
 0x899   : > { %v1583_v26 = vmul.f32 0.5, %v1582_v10  ;;  %v1572_v31 = vmul.f32 %v4695_v22, %v1571_v15  ;;  %v5610_v24 = vsel %vm1608_vm13, %v4691_v0, %v1605_v16  ;;  %v1617_v0 = vld [vmem:[#allocation9 + $0x188] sm:$0xff] }
 0x89a   : > { %v1624_v38 = vmul.f32 %v1614_v19, %v5610_v24  ;;  %v5614_v39 = vmul.f32 %v2823_v30, %v5610_v24 }
 0x89b   : > { %v1584_v33 = vsub.f32 1.5, %v1583_v26  ;;  %v1573_v37 = vmul.f32 0.5, %v1572_v31 }
 0x89c   : > { %1650 = vperm.xlu0 %4647, %v1624_v38   ;;  %v5618_v45 = vmul.f32 %v5614_v39, %v5587_v42  ;;  %v1628_v50 = vmul.f32 %v1624_v38, %v5587_v42 }
 0x89d   : > { %v1574_v40 = vsub.f32 1.5, %v1573_v37  ;;  %v1585_v41 = vmul.f32 %v4693_v5, %v1584_v33  ;;  %v1620_v37 = vld [vmem:[%s6173_s5] sm:$0xf] }
 0x89e   : > { %v1632_v58 = vsub.f32 %v1619_v55, %v1628_v50 }
 0x89f   : > { %v1589_v48 = vsel %vm1588_vm3, %v4693_v5, %v1585_v41  ;;  %v1575_v51 = vmul.f32 %v4695_v22, %v1574_v40 }
 0x8a0   : > { %v1622_v53 = vmul.f32 %v1612_v43, %v1589_v48  ;;  %v5621_v54 = vmul.f32 %v2992_v29, %v1589_v48  ;;  %v5623_v49 = vmul.f32 %v2821_v47, %v1589_v48 }
 0x8a1   : > { %v5625_v46 = vsel %vm1578_vm5, %v4695_v22, %v1575_v51 }
 0x8a2   : > { %1640 = vperm.xlu2 %4649, %v1622_v53   ;;  %v1621_v56 = vmul.f32 %v1611_v52, %v5625_v46  ;;  %v5630_v57 = vmul.f32 %v5623_v49, %v5591_v35  ;;  %v5633_v59 = vmul.f32 %v2991_v34, %v5625_v46  ;;  %v5637_v32 = vmul.f32 %v5621_v54, %v5591_v35 }
 0x8a3   : > { %v1626_v63 = vmul.f32 %v1622_v53, %v5591_v35 }
 0x8a4   : > { %1635 = vperm.xlu1 %4648, %v1621_v56   ;;  %1674 = vperm.xlu0 %4647, %v1632_v58   ;;  %v5641_v60 = vmul.f32 %v5633_v59, %v5593_v36  ;;  %v1625_v44 = vmul.f32 %v1621_v56, %v5593_v36 }
 0x8a5   : > { %v1630_v1 = vsub.f32 %v1617_v0, %v1626_v63 }
 0x8a6   : > { %v1629_v62 = vsub.f32 %v1616_v61, %v1625_v44 }
 0x8ac   : > { %1645 = vperm.xlu1 %4648, %v1623_v11   ;;  %1659 = vperm.xlu0 %4647, %v1629_v62  }
 0x8b4   : > { %1664 = vperm.xlu1 %4648, %v1630_v1  }
 0x8f2   : > { %v1670_v13 = vpop.permute.xlu2 %1669 }
 0x8fc   : > { %v1641_v22 = vpop.permute.xlu2 %1640 }
 0x8fd   : > { %v1654_v10 = vmul.f32 %v1641_v22, %v5573_v28 }
 0x90e   : > { %v1651_v2 = vpop.permute.xlu0 %1650 }
 0x90f   : > { %v1656_v7 = vmul.f32 %v1651_v2, %v5570_v27 }
 0x916   : > { %v1636_v6 = vpop.permute.xlu1 %1635  ;;  %v1675_v9 = vpop.permute.xlu0 %1674 }
 0x917   : > { %v1680_v12 = vadd.f32 %v1675_v9, %v1656_v7  ;;  %v1653_v11 = vmul.f32 %v1636_v6, %v5560_v8 }
 0x919   : > { %v1684_v25 = vmax.f32 %v1680_v12, 0.0 }
 0x91e   : > { %v1646_v5 = vpop.permute.xlu1 %1645  ;;  %v1660_v23 = vpop.permute.xlu0 %1659 }
 0x91f   : > { %v1655_v14 = vmul.f32 %v1646_v5, %v5564_v20  ;;  %v1677_v15 = vadd.f32 %v1660_v23, %v1653_v11 }
 0x921   : > { %v1679_v21 = vadd.f32 %v1670_v13, %v1655_v14  ;;  %v1681_v26 = vmax.f32 %v1677_v15, 0.0 }
 0x923   : > { %v1683_v35 = vmax.f32 %v1679_v21, 0.0 }
 0x925   : > { %v1686_v16 = vpack.c.bf16 %v1684_v25, %v1683_v35 }
 0x926   : > { %v1665_v19 = vpop.permute.xlu1 %1664 }
 0x927   : > { %v1678_v30 = vadd.f32 %v1665_v19, %v1654_v10  ;;  %1696 = vmatpush.bf16.msrb.mxu1 %v1686_v16 }
 0x929   : > { %v1682_v31 = vmax.f32 %v1678_v30, 0.0 }
 0x92b   : > { %v1685_v33 = vpack.c.bf16 %v1682_v31, %v1681_v26 }
 0x92d   : > { %1697 = vmatpush.bf16.msrb.mxu1 %v1685_v33 }
 0x930   : > { %4385 = vmatmul.msk.bf16.vlgmr.msrb.gmra.mxu1 %vm842_vm14, %v1620_v37 }
 0x9ad   : > { %v1699_v38 = vpop.f32.mrf.mxu1 }
 0x9ae   : > { %1703 = vmax.xlane.f32.xlu2 %v1699_v38 }
 0x9b5   : > { %v1701_v40 = vpop.f32.mrf.mxu1 }
 0xa21   : > { %v1704_v41 = vpop.xlane.xlu2 %1703 }
 0xa22   : > { %v1705_v43 = vsub.f32 %v1699_v38, %v1704_v41 }
 0xa24   : > { %v1706_v29 = vmul.f32 1.442695, %v1705_v43 }
 0xa26   : > { %4696 = vpow2.f32 %v1706_v29 }
 0xa2c   : > { %v4697_v47 = vpop.eup %4696 }
 0xa2d   : > { %1708 = vadd.xlane.f32.xlu0 %v4697_v47 }
 0xaa0   : > { %v1709_v48 = vpop.xlane.xlu0 %1708 }
 0xaa1   : > { %4698 = vrcp.f32 %v1709_v48  ;;  %v1721_v53 = vand.u32 2147483648, %v1709_v48  ;;  %v1719_v34 = vand.u32 2147483647, %v1709_v48  ;;  %vm1715_vm7 = vweird.f32 %v1709_v48 }
 0xaa3   : > { %v1722_v58 = vor.u32 1.1754944e-38, %v1721_v53  ;;  %vm1720_vm9 = vcmp.eq.f32.partialorder %v1719_v34, 8.507059e+37 }
 0xaa7   : > { %v4699_v50 = vpop.eup %4698 }
 0xaa8   : > { %v1711_v51 = vmul.f32 %v4699_v50, %v1709_v48  ;;  %vm1716_vm6 = vweird.f32 %v4699_v50 }
 0xaa9   : > { %vm1717_vm8 = vmor %vm1715_vm7, %vm1716_vm6 }
 0xaaa   : > { %v1712_v52 = vsub.f32 1.0, %v1711_v51 }
 0xaac   : > { %v1713_v55 = vmul.f32 %v4699_v50, %v1712_v52 }
 0xaae   : > { %v1714_v56 = vadd.f32 %v4699_v50, %v1713_v55 }
 0xab0   : > { %v1718_v44 = vsel %vm1717_vm8, %v4699_v50, %v1714_v56 }
 0xab1   : > { %v1723_v61 = vsel %vm1720_vm9, %v1722_v58, %v1718_v44 }
 0xab2   : > { %v1724_v62 = vmul.f32 %v4697_v47, %v1723_v61 }
 0xab4   : > { %1740 = vmatpush.xpose.msrb.mxu2 %v1724_v62 }
 0xab7   : > { %1741 = vmatmul.f32.vlgmr.msrb.gmra.mxu2 %v5560_v8 }
 0xabf   : > { %1744 = vmatmul.f32.gmra.mxu2 %v5573_v28 }
 0xac7   : > { %1747 = vmatmul.f32.gmra.mxu2 %v5564_v20 }
 0xacf   : > { %1750 = vmatmul.f32.gmra.mxu2 %v5570_v27 }
 0xb3a   : > { %v5657_v63 = vpop.f32.mrf.mxu2 }
 0xb3b   : > { %v1775_v0 = vsel %vm1774_vm10, %v5657_v63, 0.0  ;;  %v1791_v23 = vmul.f32 %v5657_v63, %v5657_v63 }
 0xb3c   : > { %1776 = vadd.xlane.f32.xlu2 %v1775_v0 }
 0xb3d   : > { %v1795_v25 = vsel %vm1774_vm10, %v1791_v23, 0.0 }
 0xb42   : > { %v5661_v1 = vpop.f32.mrf.mxu2 }
 0xb43   : > { %v1778_v14 = vsel %vm1774_vm10, %v5661_v1, 0.0  ;;  %v1792_v22 = vmul.f32 %v5661_v1, %v5661_v1 }
 0xb45   : > { %v1798_v11 = vsel %vm1774_vm10, %v1792_v22, 0.0 }
 0xb4a   : > { %v5663_v2 = vpop.f32.mrf.mxu2 }
 0xb4b   : > { %v1781_v6 = vsel %vm1774_vm10, %v5663_v2, 0.0  ;;  %v1793_v9 = vmul.f32 %v5663_v2, %v5663_v2 }
 0xb4c   : > { %1782 = vadd.xlane.f32.xlu1 %v1781_v6 }
 0xb4d   : > { %v1801_v13 = vsel %vm1774_vm10, %v1793_v9, 0.0 }
 0xb4e   : > { %1802 = vadd.xlane.f32.xlu0 %v1801_v13 }
 0xb52   : > { %v5670_v7 = vpop.f32.mrf.mxu2 }
 0xb53   : > { %v1784_v5 = vsel %vm1774_vm10, %v5670_v7, 0.0  ;;  %v1794_v12 = vmul.f32 %v5670_v7, %v5670_v7 }
 0xb54   : > { %1785 = vadd.xlane.f32.xlu2 %v1784_v5 }
 0xb55   : > { %v1804_v21 = vsel %vm1774_vm10, %v1794_v12, 0.0 }
 0xb56   : > { %1779 = vadd.xlane.f32.xlu0 %v1778_v14  ;;  %1805 = vadd.xlane.f32.xlu1 %v1804_v21 }
 0xb5c   : > { %1799 = vadd.xlane.f32.xlu2 %v1798_v11 }
 0xb5e   : > { %1796 = vadd.xlane.f32.xlu1 %v1795_v25  ;;  %v1757_v25 = vld [vmem:[#allocation9 + $0x1b0] sm:$0xff] }
 0xbaf   : > { %v1777_v35 = vpop.xlane.xlu2 %1776 }
 0xbb0   : > { %v5691_v50 = vmul.f32 0.125, %v1777_v35 }
 0xbb2   : > { %v1811_v61 = vmul.f32 %v5691_v50, %v5691_v50 }
 0xbbf   : > { %v1783_v10 = vpop.xlane.xlu1 %1782 }
 0xbc0   : > { %v1789_v15 = vmul.f32 0.125, %v1783_v10 }
 0xbc1   : > { %v1803_v16 = vpop.xlane.xlu0 %1802 }
 0xbc2   : > { %v1813_v19 = vmul.f32 %v1789_v15, %v1789_v15  ;;  %v1809_v30 = vmul.f32 0.125, %v1803_v16 }
 0xbc4   : > { %v1817_v26 = vsub.f32 %v1809_v30, %v1813_v19 }
 0xbc6   : > { %v1821_v31 = vmax.f32 %v1817_v26, 0.0  ;;  %v1762_v26 = vld [vmem:[#allocation9 + $0x1d0] sm:$0xff] }
 0xbc7   : > { %v1786_v33 = vpop.xlane.xlu2 %1785 }
 0xbc8   : > { %v1825_v37 = vadd.f32 0.001, %v1821_v31  ;;  %v5685_v38 = vmul.f32 0.125, %v1786_v33 }
 0xbc9   : > { %v1780_v40 = vpop.xlane.xlu0 %1779  ;;  %v1806_v41 = vpop.xlane.xlu1 %1805 }
 0xbca   : > { %4700 = vrsqrt.f32 %v1825_v37  ;;  %v1814_v43 = vmul.f32 %v5685_v38, %v5685_v38  ;;  %v1810_v29 = vmul.f32 0.125, %v1806_v41  ;;  %v5689_v47 = vmul.f32 0.125, %v1780_v40 }
 0xbcb   : > { %vm1853_vm12 = vweird.f32 %v1825_v37 }
 0xbcc   : > { %v1818_v48 = vsub.f32 %v1810_v29, %v1814_v43  ;;  %v1812_v55 = vmul.f32 %v5689_v47, %v5689_v47 }
 0xbce   : > { %v1822_v51 = vmax.f32 %v1818_v48, 0.0 }
 0xbcf   : > { %v1800_v52 = vpop.xlane.xlu2 %1799 }
 0xbd0   : > { %v4701_v53 = vpop.eup %4700  ;;  %v1826_v34 = vadd.f32 0.001, %v1822_v51  ;;  %v1808_v56 = vmul.f32 0.125, %v1800_v52  ;;  %v1758_v52 = vld [vmem:[#allocation9 + $0x1b8] sm:$0xff] }
 0xbd1   : > { %v1848_v58 = vmul.f32 %v4701_v53, %v1825_v37  ;;  %v1797_v44 = vpop.xlane.xlu1 %1796  ;;  %vm1854_vm11 = vweird.f32 %v4701_v53 }
 0xbd2   : > { %4702 = vrsqrt.f32 %v1826_v34  ;;  %v1816_v62 = vsub.f32 %v1808_v56, %v1812_v55  ;;  %v1807_v0 = vmul.f32 0.125, %v1797_v44  ;;  %vm1855_vm13 = vmor %vm1853_vm12, %vm1854_vm11  ;;  %vm1863_vm1 = vweird.f32 %v1826_v34 }
 0xbd3   : > { %v1849_v6 = vmul.f32 %v4701_v53, %v1848_v58 }
 0xbd4   : > { %v1820_v9 = vmax.f32 %v1816_v62, 0.0  ;;  %v1815_v13 = vsub.f32 %v1807_v0, %v1811_v61  ;;  %v1763_v61 = vld [vmem:[#allocation9 + $0x1d8] sm:$0xff] }
 0xbd5   : > { %v1850_v5 = vmul.f32 0.5, %v1849_v6 }
 0xbd6   : > { %v1824_v12 = vadd.f32 0.001, %v1820_v9  ;;  %v1819_v14 = vmax.f32 %v1815_v13, 0.0  ;;  %v1755_v9 = vld [vmem:[#allocation9 + $0x1a0] sm:$0xff] }
 0xbd7   : > { %v1851_v21 = vsub.f32 1.5, %v1850_v5 }
 0xbd8   : > { %v4703_v22 = vpop.eup %4702  ;;  %4704 = vrsqrt.f32 %v1824_v12  ;;  %v1823_v23 = vadd.f32 0.001, %v1819_v14  ;;  %vm1843_vm7 = vweird.f32 %v1824_v12 }
 0xbd9   : > { %v1858_v11 = vmul.f32 %v4703_v22, %v1826_v34  ;;  %v1852_v35 = vmul.f32 %v4701_v53, %v1851_v21  ;;  %vm1864_vm15 = vweird.f32 %v4703_v22  ;;  %v1760_v21 = vld [vmem:[#allocation9 + $0x1c0] sm:$0xff] }
 0xbda   : > { %4706 = vrsqrt.f32 %v1823_v23  ;;  %vm1865_vm2 = vmor %vm1863_vm1, %vm1864_vm15  ;;  %vm1833_vm4 = vweird.f32 %v1823_v23 }
 0xbdb   : > { %v1859_v10 = vmul.f32 %v4703_v22, %v1858_v11  ;;  %v1856_v16 = vsel %vm1855_vm13, %v4701_v53, %v1852_v35 }
 0xbdc   : > { %v1869_v19 = vmul.f32 %v1856_v16, %v1757_v25 }
 0xbdd   : > { %v1860_v30 = vmul.f32 0.5, %v1859_v10  ;;  %v1770_v10 = vld [vmem:[#allocation9 + $0x1e0] sm:$0xff] }
 0xbde   : > { %v4705_v31 = vpop.eup %4704  ;;  %1891 = vperm.xlu0 %4647, %v1869_v19   ;;  %v1873_v33 = vmul.f32 %v1869_v19, %v1789_v15  ;;  %v1761_v19 = vld [vmem:[#allocation9 + $0x1c8] sm:$0xff] }
 0xbdf   : > { %v1861_v40 = vsub.f32 1.5, %v1860_v30  ;;  %v1838_v41 = vmul.f32 %v4705_v31, %v1824_v12  ;;  %vm1844_vm5 = vweird.f32 %v4705_v31  ;;  %v1773_v30 = vld [vmem:[#allocation9 + $0x1f8] sm:$0xff] }
 0xbe0   : > { %v4707_v43 = vpop.eup %4706  ;;  %v1877_v29 = vsub.f32 %v1762_v26, %v1873_v33  ;;  %vm1845_vm8 = vmor %vm1843_vm7, %vm1844_vm5  ;;  %v1772_v26 = vld [vmem:[#allocation9 + $0x1f0] sm:$0xff] }
 0xbe1   : > { %v1839_v48 = vmul.f32 %v4705_v31, %v1838_v41  ;;  %v1828_v51 = vmul.f32 %v4707_v43, %v1823_v23  ;;  %v1862_v37 = vmul.f32 %v4703_v22, %v1861_v40  ;;  %vm1834_vm3 = vweird.f32 %v4707_v43  ;;  %v1771_v23 = vld [vmem:[#allocation9 + $0x1e8] sm:$0xff] }
 0xbe2   : > { %1915 = vperm.xlu2 %4649, %v1877_v29   ;;  %vm1835_vm6 = vmor %vm1833_vm4, %vm1834_vm3 }
 0xbe3   : > { %v1840_v55 = vmul.f32 0.5, %v1839_v48  ;;  %v1829_v53 = vmul.f32 %v4707_v43, %v1828_v51  ;;  %v1866_v56 = vsel %vm1865_vm2, %v4703_v22, %v1862_v37  ;;  %v1756_v22 = vld [vmem:[#allocation9 + $0x1a8] sm:$0xff] }
 0xbe4   : > { %v1870_v58 = vmul.f32 %v1866_v56, %v1758_v52 }
 0xbe5   : > { %v1830_v44 = vmul.f32 0.5, %v1829_v53  ;;  %v1841_v62 = vsub.f32 1.5, %v1840_v55 }
 0xbe6   : > { %v1874_v15 = vmul.f32 %v1870_v58, %v5685_v38 }
 0xbe7   : > { %v1831_v0 = vsub.f32 1.5, %v1830_v44  ;;  %v1842_v13 = vmul.f32 %v4705_v31, %v1841_v62 }
 0xbe8   : > { %v1878_v6 = vsub.f32 %v1763_v61, %v1874_v15 }
 0xbe9   : > { %v1832_v34 = vmul.f32 %v4707_v43, %v1831_v0  ;;  %v1846_v11 = vsel %vm1845_vm8, %v4705_v31, %v1842_v13  ;;  %v1991_v13 = vld [vmem:[#allocation14] sm:$0xf] }
 0xbea   : > { %1920 = vperm.xlu0 %4647, %v1878_v6   ;;  %v1868_v35 = vmul.f32 %v1846_v11, %v1756_v22  ;;  %v4650_v11 = vld [vmem:[#allocation12] ss:$0 sm:$0xff] }
 0xbeb   : > { %v1836_v5 = vsel %vm1835_vm6, %v4707_v43, %v1832_v34  ;;  %v4500_v34 = vld [vmem:[#allocation11 + $0x48] sm:$0xff] }
 0xbec   : > { %v1867_v14 = vmul.f32 %v1836_v5, %v1755_v9  ;;  %v1872_v16 = vmul.f32 %v1868_v35, %v5689_v47  ;;  %v4499_v9 = vld [vmem:[#allocation11 + $0x40] sm:$0xff]  ;;  %v2024_v5 = vsel %vm1774_vm10, %v1991_v13, 0 }
 0xbed   : > { %2033 = vmatpush.bf16.xpose.msra.mxu1 %v2024_v5 }
 0xbee   : > { %1881 = vperm.xlu1 %4648, %v1867_v14   ;;  %v1871_v38 = vmul.f32 %v1867_v14, %v5691_v50  ;;  %v1876_v12 = vsub.f32 %v1761_v19, %v1872_v16 }
 0xbf0   : > { %v1875_v25 = vsub.f32 %v1760_v21, %v1871_v38 }
 0xbf2   : > { %1905 = vperm.xlu2 %4649, %v1875_v25   ;;  %1886 = vperm.xlu0 %4647, %v1868_v35   ;;  %v4651_v25 = vld [vmem:[#allocation12 + $0x1] ss:$0 sm:$0xff] }
 0xbf6   : > { %1896 = vperm.xlu1 %4648, %v1870_v58  }
 0xbfa   : > { %1940 = vperm.xlu2 %4649, %v1771_v23   ;;  %1935 = vperm.xlu0 %4647, %v1770_v10  }
 0xbfe   : > { %1910 = vperm.xlu1 %4648, %v1876_v12  }
 0xc02   : > { %1950 = vperm.xlu0 %4647, %v1773_v30  }
 0xc06   : > { %1945 = vperm.xlu1 %4648, %v1772_v26  }
 0xc3c   : > { %v1916_v41 = vpop.permute.xlu2 %1915 }
 0xc4c   : > { %v1906_v53 = vpop.permute.xlu2 %1905 }
 0xc50   : > { %v1892_v31 = vpop.permute.xlu0 %1891 }
 0xc51   : > { %v1901_v40 = vmul.f32 %v1892_v31, %v5663_v2 }
 0xc53   : > { %v1925_v29 = vadd.f32 %v1916_v41, %v1901_v40 }
 0xc54   : > { %v1941_v35 = vpop.permute.xlu2 %1940 }
 0xc55   : > { %v1929_v37 = vmax.f32 %v1925_v29, 0.0 }
 0xc5c   : > { %v1921_v33 = vpop.permute.xlu0 %1920 }
 0xc60   : > { %v1882_v50 = vpop.permute.xlu1 %1881 }
 0xc61   : > { %v1899_v47 = vmul.f32 %v1882_v50, %v5657_v63 }
 0xc63   : > { %v1923_v56 = vadd.f32 %v1906_v53, %v1899_v47 }
 0xc64   : > { %v1887_v52 = vpop.permute.xlu0 %1886 }
 0xc65   : > { %v1900_v58 = vmul.f32 %v1887_v52, %v5661_v1  ;;  %v1927_v0 = vmax.f32 %v1923_v56, 0.0  ;;  %v4652_v56 = vld [vmem:[#allocation12 + $0x2] ss:$0 sm:$0xff] }
 0xc68   : > { %v1897_v43 = vpop.permute.xlu1 %1896 }
 0xc69   : > { %v1902_v48 = vmul.f32 %v1897_v43, %v5670_v7 }
 0xc6b   : > { %v1926_v51 = vadd.f32 %v1921_v33, %v1902_v48 }
 0xc6c   : > { %v1936_v21 = vpop.permute.xlu0 %1935 }
 0xc6d   : > { %v1930_v55 = vmax.f32 %v1926_v51, 0.0 }
 0xc6f   : > { %v1932_v44 = vpack.c.bf16 %v1930_v55, %v1929_v37 }
 0xc70   : > { %v1911_v61 = vpop.permute.xlu1 %1910 }
 0xc71   : > { %v1924_v62 = vadd.f32 %v1911_v61, %v1900_v58  ;;  %1975 = vmatpush.bf16.msrb.mxu3 %v1932_v44 }
 0xc73   : > { %v1928_v15 = vmax.f32 %v1924_v62, 0.0 }
 0xc74   : > { %v1951_v43 = vpop.permute.xlu0 %1950 }
 0xc75   : > { %v1931_v6 = vpack.c.bf16 %v1928_v15, %v1927_v0 }
 0xc77   : > { %1976 = vmatpush.bf16.msrb.mxu3 %v1931_v6 }
 0xc78   : > { %v1946_v33 = vpop.permute.xlu1 %1945 }
 0xc7a   : > { %4394 = vmatmul.msk.bf16.vlgmr.msrb.gmra.mxu3 %vm842_vm14, %v4499_v9 }
 0xc8a   : > { %4395 = vmatmul.msk.bf16.gmra.mxu3 %vm842_vm14, %v4500_v34 }
 0xcfd   : > { %v1978_v14 = vpop.f32.mrf.mxu3 }
 0xcfe   : > { %v1979_v22 = vadd.f32 %v1978_v14, %v1936_v21 }
 0xd00   : > { %v1997_v38 = vmul.f32 %v4650_v11, %v1979_v22 }
 0xd02   : > { %v2004_v16 = vadd.f32 %v4651_v25, %v1997_v38 }
 0xd04   : > { %v2008_v30 = vmax.f32 %v2004_v16, 0.0 }
 0xd05   : > { %v1980_v23 = vpop.f32.mrf.mxu3 }
 0xd06   : > { %v1981_v10 = vadd.f32 %v1980_v23, %v1941_v35 }
 0xd08   : > { %v1998_v19 = vmul.f32 %v4650_v11, %v1981_v10 }
 0xd0a   : > { %v2005_v12 = vadd.f32 %v4651_v25, %v1998_v19 }
 0xd0c   : > { %v2009_v26 = vmax.f32 %v2005_v12, 0.0 }
 0xd0d   : > { %v1983_v31 = vpop.f32.mrf.mxu3 }
 0xd0e   : > { %v2012_v50 = vpack.c.bf16 %v2009_v26, %v2008_v30  ;;  %v1984_v40 = vadd.f32 %v1983_v31, %v1946_v33 }
 0xd10   : > { %4396 = vmatmul.msk.bf16.vlgmr.msra.gmra.mxu1 %vm1774_vm10, %v2012_v50  ;;  %v1999_v41 = vmul.f32 %v4650_v11, %v1984_v40 }
 0xd12   : > { %v2006_v47 = vadd.f32 %v4651_v25, %v1999_v41 }
 0xd14   : > { %v2010_v37 = vmax.f32 %v2006_v47, 0.0 }
 0xd15   : > { %v1985_v29 = vpop.f32.mrf.mxu3 }
 0xd16   : > { %v1986_v48 = vadd.f32 %v1985_v29, %v1951_v43 }
 0xd18   : > { %v2000_v51 = vmul.f32 %v4650_v11, %v1986_v48 }
 0xd1a   : > { %v2007_v52 = vadd.f32 %v4651_v25, %v2000_v51 }
 0xd1c   : > { %v2011_v55 = vmax.f32 %v2007_v52, 0.0 }
 0xd1e   : > { %v2013_v53 = vpack.c.bf16 %v2011_v55, %v2010_v37 }
 0xd20   : > { %4397 = vmatmul.msk.bf16.gmra.mxu1 %vm1774_vm10, %v2013_v53 }
 0xd8d   : > { %v2035_v58 = vpop.f32.mrf.mxu1 }
 0xd8e   : > { %v2036_v44 = vadd.f32 %v4652_v56, %v2035_v58 }
 0xd90   : > { %v5709_v61 = vadd.f32 %v2036_v44, %v1979_v22 }
 0xd92   : > { %v2069_v62 = vsel %vm1774_vm10, %v5709_v61, 0.0  ;;  %v2085_v19 = vmul.f32 %v5709_v61, %v5709_v61 }
 0xd93   : > { %2070 = vadd.xlane.f32.xlu1 %v2069_v62 }
 0xd94   : > { %v2089_v30 = vsel %vm1774_vm10, %v2085_v19, 0.0 }
 0xd95   : > { %v2037_v15 = vpop.f32.mrf.mxu1 }
 0xd96   : > { %v2038_v5 = vadd.f32 %v4652_v56, %v2037_v15 }
 0xd98   : > { %v5720_v11 = vadd.f32 %v2038_v5, %v1981_v10 }
 0xd9a   : > { %v2072_v16 = vsel %vm1774_vm10, %v5720_v11, 0.0  ;;  %v2086_v10 = vmul.f32 %v5720_v11, %v5720_v11 }
 0xd9c   : > { %v2092_v12 = vsel %vm1774_vm10, %v2086_v10, 0.0 }
 0xd9d   : > { %v2040_v0 = vpop.f32.mrf.mxu1 }
 0xd9e   : > { %v2041_v6 = vadd.f32 %v4652_v56, %v2040_v0 }
 0xda0   : > { %v5713_v9 = vadd.f32 %v2041_v6, %v1984_v40 }
 0xda2   : > { %v2075_v34 = vsel %vm1774_vm10, %v5713_v9, 0.0  ;;  %v2087_v13 = vmul.f32 %v5713_v9, %v5713_v9 }
 0xda3   : > { %2076 = vadd.xlane.f32.xlu2 %v2075_v34 }
 0xda4   : > { %v2095_v14 = vsel %vm1774_vm10, %v2087_v13, 0.0 }
 0xda5   : > { %v2042_v21 = vpop.f32.mrf.mxu1  ;;  %2096 = vadd.xlane.f32.xlu0 %v2095_v14 }
 0xda6   : > { %v2043_v22 = vadd.f32 %v4652_v56, %v2042_v21 }
 0xda8   : > { %v5722_v38 = vadd.f32 %v2043_v22, %v1986_v48 }
 0xdaa   : > { %v2078_v25 = vsel %vm1774_vm10, %v5722_v38, 0.0  ;;  %v2088_v35 = vmul.f32 %v5722_v38, %v5722_v38 }
 0xdab   : > { %2079 = vadd.xlane.f32.xlu1 %v2078_v25 }
 0xdac   : > { %v2098_v23 = vsel %vm1774_vm10, %v2088_v35, 0.0 }
 0xdad   : > { %2099 = vadd.xlane.f32.xlu2 %v2098_v23  ;;  %2073 = vadd.xlane.f32.xlu0 %v2072_v16 }
 0xdb3   : > { %2093 = vadd.xlane.f32.xlu1 %v2092_v12 }
 0xdb5   : > { %2090 = vadd.xlane.f32.xlu2 %v2089_v30 }
 0xe06   : > { %v2071_v26 = vpop.xlane.xlu1 %2070 }
 0xe07   : > { %v5743_v44 = vmul.f32 0.125, %v2071_v26 }
 0xe09   : > { %v2105_v21 = vmul.f32 %v5743_v44, %v5743_v44 }
 0xe16   : > { %v2077_v31 = vpop.xlane.xlu2 %2076 }
 0xe17   : > { %v2083_v50 = vmul.f32 0.125, %v2077_v31 }
 0xe18   : > { %v2097_v33 = vpop.xlane.xlu0 %2096 }
 0xe19   : > { %v2107_v40 = vmul.f32 %v2083_v50, %v2083_v50  ;;  %v2103_v41 = vmul.f32 0.125, %v2097_v33 }
 0xe1b   : > { %v2111_v43 = vsub.f32 %v2103_v41, %v2107_v40  ;;  %v2052_v40 = vld [vmem:[#allocation9 + $0x210] sm:$0xff] }
 0xe1d   : > { %v2115_v29 = vmax.f32 %v2111_v43, 0.0 }
 0xe1e   : > { %v2080_v48 = vpop.xlane.xlu1 %2079 }
 0xe1f   : > { %v2119_v47 = vadd.f32 0.001, %v2115_v29  ;;  %v5737_v51 = vmul.f32 0.125, %v2080_v48 }
 0xe20   : > { %v2100_v52 = vpop.xlane.xlu2 %2099  ;;  %v2074_v37 = vpop.xlane.xlu0 %2073 }
 0xe21   : > { %4708 = vrsqrt.f32 %v2119_v47  ;;  %v2108_v55 = vmul.f32 %v5737_v51, %v5737_v51  ;;  %v2104_v53 = vmul.f32 0.125, %v2100_v52  ;;  %v5741_v58 = vmul.f32 0.125, %v2074_v37  ;;  %v2057_v37 = vld [vmem:[#allocation9 + $0x230] sm:$0xff] }
 0xe22   : > { %vm2147_vm11 = vweird.f32 %v2119_v47 }
 0xe23   : > { %v2112_v56 = vsub.f32 %v2104_v53, %v2108_v55  ;;  %v2106_v34 = vmul.f32 %v5741_v58, %v5741_v58 }
 0xe25   : > { %v2116_v62 = vmax.f32 %v2112_v56, 0.0 }
 0xe26   : > { %v2094_v15 = vpop.xlane.xlu1 %2093 }
 0xe27   : > { %v4709_v0 = vpop.eup %4708  ;;  %v2120_v6 = vadd.f32 0.001, %v2116_v62  ;;  %v2102_v13 = vmul.f32 0.125, %v2094_v15 }
 0xe28   : > { %v2142_v5 = vmul.f32 %v4709_v0, %v2119_v47  ;;  %v2091_v14 = vpop.xlane.xlu2 %2090  ;;  %vm2148_vm9 = vweird.f32 %v4709_v0 }
 0xe29   : > { %4710 = vrsqrt.f32 %v2120_v6  ;;  %v2110_v22 = vsub.f32 %v2102_v13, %v2106_v34  ;;  %v2101_v25 = vmul.f32 0.125, %v2091_v14  ;;  %vm2149_vm12 = vmor %vm2147_vm11, %vm2148_vm9  ;;  %vm2157_vm15 = vweird.f32 %v2120_v6  ;;  %v2053_v14 = vld [vmem:[#allocation9 + $0x218] sm:$0xff] }
 0xe2a   : > { %v2143_v35 = vmul.f32 %v4709_v0, %v2142_v5 }
 0xe2b   : > { %v2114_v23 = vmax.f32 %v2110_v22, 0.0  ;;  %v2109_v16 = vsub.f32 %v2101_v25, %v2105_v21 }
 0xe2c   : > { %v2144_v10 = vmul.f32 0.5, %v2143_v35 }
 0xe2d   : > { %v2118_v19 = vadd.f32 0.001, %v2114_v23  ;;  %v2113_v12 = vmax.f32 %v2109_v16, 0.0  ;;  %v2058_v16 = vld [vmem:[#allocation9 + $0x238] sm:$0xff] }
 0xe2e   : > { %v2145_v30 = vsub.f32 1.5, %v2144_v10 }
 0xe2f   : > { %v4711_v26 = vpop.eup %4710  ;;  %4712 = vrsqrt.f32 %v2118_v19  ;;  %v2117_v31 = vadd.f32 0.001, %v2113_v12  ;;  %vm2137_vm6 = vweird.f32 %v2118_v19 }
 0xe30   : > { %v2152_v33 = vmul.f32 %v4711_v26, %v2120_v6  ;;  %v2146_v41 = vmul.f32 %v4709_v0, %v2145_v30  ;;  %vm2158_vm13 = vweird.f32 %v4711_v26  ;;  %v2050_v30 = vld [vmem:[#allocation9 + $0x200] sm:$0xff] }
 0xe31   : > { %4714 = vrsqrt.f32 %v2117_v31  ;;  %vm2159_vm1 = vmor %vm2157_vm15, %vm2158_vm13  ;;  %vm2127_vm3 = vweird.f32 %v2117_v31 }
 0xe32   : > { %v2153_v43 = vmul.f32 %v4711_v26, %v2152_v33  ;;  %v2150_v29 = vsel %vm2149_vm12, %v4709_v0, %v2146_v41 }
 0xe33   : > { %v2163_v48 = vmul.f32 %v2150_v29, %v2052_v40 }
 0xe34   : > { %v2154_v52 = vmul.f32 0.5, %v2153_v43  ;;  %v2051_v43 = vld [vmem:[#allocation9 + $0x208] sm:$0xff] }
 0xe35   : > { %v4713_v55 = vpop.eup %4712  ;;  %2185 = vperm.xlu0 %4647, %v2163_v48   ;;  %v2167_v53 = vmul.f32 %v2163_v48, %v2083_v50 }
 0xe36   : > { %v2155_v56 = vsub.f32 1.5, %v2154_v52  ;;  %v2132_v62 = vmul.f32 %v4713_v55, %v2118_v19  ;;  %vm2138_vm4 = vweird.f32 %v4713_v55 }
 0xe37   : > { %v4715_v15 = vpop.eup %4714  ;;  %v2171_v34 = vsub.f32 %v2057_v37, %v2167_v53  ;;  %vm2139_vm7 = vmor %vm2137_vm6, %vm2138_vm4  ;;  %v2067_v37 = vld [vmem:[#allocation9 + $0x250] sm:$0xff] }
 0xe38   : > { %v2133_v13 = vmul.f32 %v4713_v55, %v2132_v62  ;;  %v2122_v5 = vmul.f32 %v4715_v15, %v2117_v31  ;;  %v2156_v47 = vmul.f32 %v4711_v26, %v2155_v56  ;;  %vm2128_vm2 = vweird.f32 %v4715_v15  ;;  %v2068_v31 = vld [vmem:[#allocation9 + $0x258] sm:$0xff]  ;;  %v2056_v56 = vld [vmem:[#allocation9 + $0x228] sm:$0xff] }
 0xe39   : > { %2209 = vperm.xlu1 %4648, %v2171_v34   ;;  %vm2129_vm5 = vmor %vm2127_vm3, %vm2128_vm2  ;;  %v2066_v62 = vld [vmem:[#allocation9 + $0x248] sm:$0xff] }
 0xe3a   : > { %v2134_v21 = vmul.f32 0.5, %v2133_v13  ;;  %v2123_v0 = vmul.f32 %v4715_v15, %v2122_v5  ;;  %v2160_v22 = vsel %vm2159_vm1, %v4711_v26, %v2156_v47  ;;  %v2055_v26 = vld [vmem:[#allocation9 + $0x220] sm:$0xff] }
 0xe3b   : > { %v2164_v25 = vmul.f32 %v2160_v22, %v2053_v14 }
 0xe3c   : > { %v2135_v35 = vsub.f32 1.5, %v2134_v21  ;;  %v2124_v23 = vmul.f32 0.5, %v2123_v0 }
 0xe3d   : > { %v2168_v50 = vmul.f32 %v2164_v25, %v5737_v51 }
 0xe3e   : > { %v2125_v10 = vsub.f32 1.5, %v2124_v23  ;;  %v2136_v33 = vmul.f32 %v4713_v55, %v2135_v35 }
 0xe3f   : > { %v2172_v12 = vsub.f32 %v2058_v16, %v2168_v50 }
 0xe40   : > { %v2126_v6 = vmul.f32 %v4715_v15, %v2125_v10  ;;  %v2140_v29 = vsel %vm2139_vm7, %v4713_v55, %v2136_v33  ;;  %v2065_v55 = vld [vmem:[#allocation9 + $0x240] sm:$0xff] }
 0xe41   : > { %2214 = vperm.xlu0 %4647, %v2172_v12   ;;  %v2162_v52 = vmul.f32 %v2140_v29, %v2051_v43 }
 0xe42   : > { %v2130_v40 = vsel %vm2129_vm5, %v4715_v15, %v2126_v6 }
 0xe43   : > { %v2161_v41 = vmul.f32 %v2130_v40, %v2050_v30  ;;  %v2166_v53 = vmul.f32 %v2162_v52, %v5741_v58  ;;  %v4502_v40 = vld [vmem:[#allocation11 + $0x58] sm:$0xff] }
 0xe45   : > { %2175 = vperm.xlu2 %4649, %v2161_v41   ;;  %v2165_v51 = vmul.f32 %v2161_v41, %v5743_v44  ;;  %v2170_v19 = vsub.f32 %v2056_v56, %v2166_v53 }
 0xe47   : > { %v2169_v48 = vsub.f32 %v2055_v26, %v2165_v51 }
 0xe49   : > { %2199 = vperm.xlu1 %4648, %v2169_v48   ;;  %2180 = vperm.xlu0 %4647, %v2162_v52  }
 0xe4d   : > { %2190 = vperm.xlu2 %4649, %v2164_v25  }
 0xe51   : > { %2244 = vperm.xlu1 %4648, %v2068_v31   ;;  %2239 = vperm.xlu0 %4647, %v2067_v37  }
 0xe55   : > { %2204 = vperm.xlu2 %4649, %v2170_v19  }
 0xe59   : > { %2234 = vperm.xlu0 %4647, %v2066_v62  }
 0xe5d   : > { %2229 = vperm.xlu2 %4649, %v2065_v55  }
 0xe9f   : > { %v2176_v15 = vpop.permute.xlu2 %2175 }
 0xea0   : > { %v2193_v35 = vmul.f32 %v2176_v15, %v5709_v61 }
 0xea7   : > { %v2186_v44 = vpop.permute.xlu0 %2185  ;;  %v2191_v34 = vpop.permute.xlu2 %2190 }
 0xea8   : > { %v2195_v5 = vmul.f32 %v2186_v44, %v5713_v9  ;;  %v2196_v14 = vmul.f32 %v2191_v34, %v5722_v38  ;;  %v4501_v38 = vld [vmem:[#allocation11 + $0x50] sm:$0xff] }
 0xeab   : > { %v2210_v13 = vpop.permute.xlu1 %2209 }
 0xeac   : > { %v2219_v47 = vadd.f32 %v2210_v13, %v2195_v5 }
 0xeae   : > { %v2223_v0 = vmax.f32 %v2219_v47, 0.0 }
 0xeaf   : > { %v2205_v12 = vpop.permute.xlu2 %2204 }
 0xeb3   : > { %v2215_v21 = vpop.permute.xlu0 %2214 }
 0xeb4   : > { %v2220_v58 = vadd.f32 %v2215_v21, %v2196_v14 }
 0xeb6   : > { %v2224_v22 = vmax.f32 %v2220_v58, 0.0 }
 0xeb7   : > { %v2230_v41 = vpop.permute.xlu2 %2229 }
 0xeb8   : > { %v2226_v25 = vpack.c.bf16 %v2224_v22, %v2223_v0 }
 0xeba   : > { %2269 = vmatpush.bf16.msra.mxu0 %v2226_v25 }
 0xebb   : > { %v2181_v23 = vpop.permute.xlu0 %2180  ;;  %v2200_v16 = vpop.permute.xlu1 %2199 }
 0xebc   : > { %v2194_v50 = vmul.f32 %v2181_v23, %v5720_v11  ;;  %v2217_v10 = vadd.f32 %v2200_v16, %v2193_v35 }
 0xebe   : > { %v2218_v30 = vadd.f32 %v2205_v12, %v2194_v50  ;;  %v2221_v9 = vmax.f32 %v2217_v10, 0.0 }
 0xec0   : > { %v2222_v6 = vmax.f32 %v2218_v30, 0.0 }
 0xec2   : > { %v2225_v33 = vpack.c.bf16 %v2222_v6, %v2221_v9 }
 0xec3   : > { %v2240_v51 = vpop.permute.xlu0 %2239  ;;  %v2245_v62 = vpop.permute.xlu1 %2244 }
 0xec4   : > { %2270 = vmatpush.bf16.msra.mxu0 %v2225_v33 }
 0xec7   : > { %4406 = vmatmul.msk.bf16.vlgmr.msra.gmra.mxu0 %vm842_vm14, %v4501_v38 }
 0xecb   : > { %v2235_v56 = vpop.permute.xlu0 %2234 }
 0xed7   : > { %4407 = vmatmul.msk.bf16.gmra.mxu0 %vm842_vm14, %v4502_v40 }
 0xf44   : > { %v2272_v61 = vpop.f32.mrf.mxu0 }
 0xf45   : > { %v2273_v26 = vadd.f32 %v2272_v61, %v2230_v41 }
 0xf47   : > { %v5759_v43 = vadd.f32 %v2273_v26, %v5657_v63 }
 0xf49   : > { %v2306_v11 = vsel %vm1774_vm10, %v5759_v43, 0.0 }
 0xf4a   : > { %2307 = vadd.xlane.f32.xlu2 %v2306_v11 }
 0xf4c   : > { %v2274_v29 = vpop.f32.mrf.mxu0 }
 0xf4d   : > { %v2275_v63 = vadd.f32 %v2274_v29, %v2235_v56 }
 0xf4f   : > { %v5772_v44 = vadd.f32 %v2275_v63, %v5661_v1 }
 0xf51   : > { %v2309_v5 = vsel %vm1774_vm10, %v5772_v44, 0.0  ;;  %v2323_v1 = vmul.f32 %v5772_v44, %v5772_v44 }
 0xf53   : > { %v2329_v47 = vsel %vm1774_vm10, %v2323_v1, 0.0 }
 0xf54   : > { %v2277_v48 = vpop.f32.mrf.mxu0 }
 0xf55   : > { %v2278_v52 = vadd.f32 %v2277_v48, %v2240_v51 }
 0xf57   : > { %v5764_v31 = vadd.f32 %v2278_v52, %v5663_v2 }
 0xf59   : > { %v2312_v37 = vsel %vm1774_vm10, %v5764_v31, 0.0  ;;  %v2324_v53 = vmul.f32 %v5764_v31, %v5764_v31 }
 0xf5a   : > { %2313 = vadd.xlane.f32.xlu1 %v2312_v37 }
 0xf5b   : > { %v2332_v19 = vsel %vm1774_vm10, %v2324_v53, 0.0 }
 0xf5c   : > { %v2279_v55 = vpop.f32.mrf.mxu0  ;;  %2333 = vadd.xlane.f32.xlu0 %v2332_v19 }
 0xf5d   : > { %v2280_v15 = vadd.f32 %v2279_v55, %v2245_v62 }
 0xf5f   : > { %v5775_v2 = vadd.f32 %v2280_v15, %v5670_v7  ;;  %v2322_v7 = vmul.f32 %v5759_v43, %v5759_v43 }
 0xf61   : > { %v2315_v34 = vsel %vm1774_vm10, %v5775_v2, 0.0  ;;  %v2325_v13 = vmul.f32 %v5775_v2, %v5775_v2  ;;  %v2326_v21 = vsel %vm1774_vm10, %v2322_v7, 0.0 }
 0xf62   : > { %2316 = vadd.xlane.f32.xlu2 %v2315_v34 }
 0xf63   : > { %v2335_v14 = vsel %vm1774_vm10, %v2325_v13, 0.0 }
 0xf64   : > { %2310 = vadd.xlane.f32.xlu0 %v2309_v5  ;;  %2336 = vadd.xlane.f32.xlu1 %v2335_v14 }
 0xf6a   : > { %2330 = vadd.xlane.f32.xlu2 %v2329_v47  ;;  %v2289_v47 = vld [vmem:[#allocation9 + $0x270] sm:$0xff] }
 0xf6c   : > { %2327 = vadd.xlane.f32.xlu1 %v2326_v21 }
 0xfbd   : > { %v2308_v58 = vpop.xlane.xlu2 %2307 }
 0xfbe   : > { %v5800_v61 = vmul.f32 0.125, %v2308_v58 }
 0xfc0   : > { %v2342_v56 = vmul.f32 %v5800_v61, %v5800_v61 }
 0xfcd   : > { %v2314_v0 = vpop.xlane.xlu1 %2313 }
 0xfce   : > { %v5790_v22 = vmul.f32 0.125, %v2314_v0 }
 0xfcf   : > { %v2334_v25 = vpop.xlane.xlu0 %2333 }
 0xfd0   : > { %v2344_v35 = vmul.f32 %v5790_v22, %v5790_v22  ;;  %v2340_v23 = vmul.f32 0.125, %v2334_v25 }
 0xfd2   : > { %v2348_v16 = vsub.f32 %v2340_v23, %v2344_v35 }
 0xfd4   : > { %v2352_v50 = vmax.f32 %v2348_v16, 0.0 }
 0xfd5   : > { %v2317_v10 = vpop.xlane.xlu2 %2316 }
 0xfd6   : > { %v2356_v12 = vadd.f32 0.001, %v2352_v50  ;;  %v5794_v30 = vmul.f32 0.125, %v2317_v10 }
 0xfd7   : > { %v2311_v6 = vpop.xlane.xlu0 %2310  ;;  %v2337_v9 = vpop.xlane.xlu1 %2336 }
 0xfd8   : > { %4716 = vrsqrt.f32 %v2356_v12  ;;  %v2345_v33 = vmul.f32 %v5794_v30, %v5794_v30  ;;  %v2341_v38 = vmul.f32 0.125, %v2337_v9  ;;  %v5798_v40 = vmul.f32 0.125, %v2311_v6 }
 0xfd9   : > { %vm2384_vm9 = vweird.f32 %v2356_v12 }
 0xfda   : > { %v2349_v41 = vsub.f32 %v2341_v38, %v2345_v33  ;;  %v2343_v51 = vmul.f32 %v5798_v40, %v5798_v40  ;;  %v2290_v38 = vld [vmem:[#allocation9 + $0x278] sm:$0xff] }
 0xfdc   : > { %v2353_v26 = vmax.f32 %v2349_v41, 0.0 }
 0xfdd   : > { %v2331_v11 = vpop.xlane.xlu2 %2330 }
 0xfde   : > { %v4717_v29 = vpop.eup %4716  ;;  %v2339_v48 = vmul.f32 0.125, %v2331_v11  ;;  %v2357_v37 = vadd.f32 0.001, %v2353_v26 }
 0xfdf   : > { %v2379_v52 = vmul.f32 %v4717_v29, %v2356_v12  ;;  %v2328_v53 = vpop.xlane.xlu1 %2327  ;;  %vm2385_vm8 = vweird.f32 %v4717_v29 }
 0xfe0   : > { %v2347_v63 = vsub.f32 %v2339_v48, %v2343_v51  ;;  %v2338_v19 = vmul.f32 0.125, %v2328_v53  ;;  %4718 = vrsqrt.f32 %v2357_v37  ;;  %vm2386_vm11 = vmor %vm2384_vm9, %vm2385_vm8  ;;  %vm2394_vm13 = vweird.f32 %v2357_v37 }
 0xfe1   : > { %v2380_v62 = vmul.f32 %v4717_v29, %v2379_v52  ;;  %v2295_v52 = vld [vmem:[#allocation9 + $0x298] sm:$0xff] }
 0xfe2   : > { %v2351_v55 = vmax.f32 %v2347_v63, 0.0  ;;  %v2346_v15 = vsub.f32 %v2338_v19, %v2342_v56  ;;  %v2287_v19 = vld [vmem:[#allocation9 + $0x260] sm:$0xff] }
 0xfe3   : > { %v2381_v34 = vmul.f32 0.5, %v2380_v62 }
 0xfe4   : > { %v2355_v13 = vadd.f32 0.001, %v2351_v55  ;;  %v2350_v5 = vmax.f32 %v2346_v15, 0.0 }
 0xfe5   : > { %v2382_v14 = vsub.f32 1.5, %v2381_v34  ;;  %v2292_v34 = vld [vmem:[#allocation9 + $0x280] sm:$0xff] }
 0xfe6   : > { %4720 = vrsqrt.f32 %v2355_v13  ;;  %v2354_v1 = vadd.f32 0.001, %v2350_v5  ;;  %v4719_v7 = vpop.eup %4718  ;;  %vm2374_vm5 = vweird.f32 %v2355_v13  ;;  %v2288_v5 = vld [vmem:[#allocation9 + $0x268] sm:$0xff] }
 0xfe7   : > { %v2383_v21 = vmul.f32 %v4717_v29, %v2382_v14  ;;  %v2389_v58 = vmul.f32 %v4719_v7, %v2357_v37  ;;  %vm2395_vm12 = vweird.f32 %v4719_v7 }
 0xfe8   : > { %4722 = vrsqrt.f32 %v2354_v1  ;;  %vm2396_vm15 = vmor %vm2394_vm13, %vm2395_vm12  ;;  %vm2364_vm2 = vweird.f32 %v2354_v1 }
 0xfe9   : > { %v2387_v0 = vsel %vm2386_vm11, %v4717_v29, %v2383_v21  ;;  %v2390_v25 = vmul.f32 %v4719_v7, %v2389_v58  ;;  %v2294_v21 = vld [vmem:[#allocation9 + $0x290] sm:$0xff] }
 0xfea   : > { %v2400_v35 = vmul.f32 %v2387_v0, %v2289_v47  ;;  %v2303_v0 = vld [vmem:[#allocation9 + $0x2a8] sm:$0xff] }
 0xfeb   : > { %v2391_v16 = vmul.f32 0.5, %v2390_v25  ;;  %v2302_v25 = vld [vmem:[#allocation9 + $0x2a0] sm:$0xff] }
 0xfec   : > { %v4721_v23 = vpop.eup %4720  ;;  %2422 = vperm.xlu0 %4647, %v2400_v35  }
 0xfed   : > { %v2369_v50 = vmul.f32 %v4721_v23, %v2355_v13  ;;  %v2392_v6 = vsub.f32 1.5, %v2391_v16  ;;  %vm2375_vm3 = vweird.f32 %v4721_v23  ;;  %v2293_v16 = vld [vmem:[#allocation9 + $0x288] sm:$0xff] }
 0xfee   : > { %v4723_v10 = vpop.eup %4722  ;;  %vm2376_vm6 = vmor %vm2374_vm5, %vm2375_vm3 }
 0xfef   : > { %v2370_v9 = vmul.f32 %v4721_v23, %v2369_v50  ;;  %v2359_v33 = vmul.f32 %v4723_v10, %v2354_v1  ;;  %v2393_v12 = vmul.f32 %v4719_v7, %v2392_v6  ;;  %vm2365_vm1 = vweird.f32 %v4723_v10  ;;  %v2828_v6 = vld [vmem:[#allocation9 + $0x358] sm:$0xff] }
 0xff0   : > { %vm2366_vm4 = vmor %vm2364_vm2, %vm2365_vm1 }
 0xff1   : > { %v2371_v41 = vmul.f32 0.5, %v2370_v9  ;;  %v2360_v26 = vmul.f32 %v4723_v10, %v2359_v33  ;;  %v2397_v11 = vsel %vm2396_vm15, %v4719_v7, %v2393_v12  ;;  %v2843_v9 = vsub.f32 %v2828_v6, %v5618_v45 }
 0xff2   : > { %v2401_v29 = vmul.f32 %v2397_v11, %v2290_v38 }
 0xff3   : > { %v2361_v51 = vmul.f32 0.5, %v2360_v26  ;;  %v2372_v48 = vsub.f32 1.5, %v2371_v41 }
 0xff4   : > { %2427 = vperm.xlu1 %4648, %v2401_v29   ;;  %v2405_v56 = vmul.f32 %v2401_v29, %v5794_v30  ;;  %v2404_v30 = vmul.f32 %v2400_v35, %v5790_v22  ;;  %v2304_v22 = vld [vmem:[#allocation9 + $0x2b0] sm:$0xff] }
 0xff5   : > { %v2362_v53 = vsub.f32 1.5, %v2361_v51  ;;  %v2373_v37 = vmul.f32 %v4721_v23, %v2372_v48 }
 0xff6   : > { %v2409_v63 = vsub.f32 %v2295_v52, %v2405_v56  ;;  %v2408_v58 = vsub.f32 %v2294_v21, %v2404_v30 }
 0xff7   : > { %v2363_v62 = vmul.f32 %v4723_v10, %v2362_v53  ;;  %v2377_v14 = vsel %vm2376_vm6, %v4721_v23, %v2373_v37  ;;  %v2305_v23 = vld [vmem:[#allocation9 + $0x2b8] sm:$0xff] }
 0xff8   : > { %2451 = vperm.xlu0 %4647, %v2409_v63   ;;  %v2399_v47 = vmul.f32 %v2377_v14, %v2288_v5 }
 0xff9   : > { %v2367_v55 = vsel %vm2366_vm4, %v4723_v10, %v2363_v62  ;;  %v2827_v10 = vld [vmem:[#allocation9 + $0x350] sm:$0xff] }
 0xffa   : > { %v2398_v15 = vmul.f32 %v2367_v55, %v2287_v19  ;;  %v2403_v13 = vmul.f32 %v2399_v47, %v5798_v40  ;;  %v2842_v40 = vsub.f32 %v2827_v10, %v5608_v17 }
 0xffc   : > { %2412 = vperm.xlu2 %4649, %v2398_v15   ;;  %v2402_v7 = vmul.f32 %v2398_v15, %v5800_v61  ;;  %v2407_v50 = vsub.f32 %v2293_v16, %v2403_v13  ;;  %v2820_v61 = vld [vmem:[#allocation9 + $0x320] sm:$0xff] }
 0xffd   : > { %v5812_v35 = vmul.f32 %v2820_v61, %v5625_v46  ;;  %v2524_v61 = vld [vmem:[#allocation14 + $0x4] sm:$0xf] }
 0xffe   : > { %v2406_v1 = vsub.f32 %v2292_v34, %v2402_v7  ;;  %v4503_v34 = vld [vmem:[#allocation11 + $0x60] sm:$0xff]  ;;  %v2557_v10 = vsel %vm1774_vm10, %v2524_v61, 0 }
 0xfff   : > { %2566 = vmatpush.bf16.xpose.msra.mxu3 %v2557_v10 }
0x1000   : > { %2436 = vperm.xlu1 %4648, %v2406_v1   ;;  %2417 = vperm.xlu0 %4647, %v2399_v47   ;;  %v4504_v1 = vld [vmem:[#allocation11 + $0x68] sm:$0xff] }
0x1004   : > { %2446 = vperm.xlu2 %4649, %v2408_v58  }
0x1008   : > { %2471 = vperm.xlu1 %4648, %v2303_v0   ;;  %2466 = vperm.xlu0 %4647, %v2302_v25  }
0x100c   : > { %2441 = vperm.xlu2 %4649, %v2407_v50  }
0x1010   : > { %2861 = vperm.xlu1 %4648, %v5614_v39   ;;  %2481 = vperm.xlu0 %4647, %v2305_v23  }
0x1014   : > { %2476 = vperm.xlu2 %4649, %v2304_v22  }
0x1018   : > { %2846 = vperm.xlu1 %4648, %v5812_v35   ;;  %2856 = vperm.xlu0 %4647, %v5603_v4  }
0x101c   : > { %2880 = vperm.xlu2 %4649, %v2842_v40  }
0x1020   : > { %2885 = vperm.xlu0 %4647, %v2843_v9   ;;  %v4653_v9 = vld [vmem:[#allocation12 + $0x3] ss:$0 sm:$0xff] }
0x1056   : > { %v2413_v39 = vpop.permute.xlu2 %2412 }
0x1057   : > { %v2430_v17 = vmul.f32 %v2413_v39, %v5759_v43 }
0x105e   : > { %v2423_v33 = vpop.permute.xlu0 %2422  ;;  %v2447_v41 = vpop.permute.xlu2 %2446 }
0x105f   : > { %v2432_v38 = vmul.f32 %v2423_v33, %v5764_v31  ;;  %v4654_v33 = vld [vmem:[#allocation12 + $0x4] ss:$0 sm:$0xff] }
0x1061   : > { %v2456_v46 = vadd.f32 %v2447_v41, %v2432_v38 }
0x1063   : > { %v2460_v29 = vmax.f32 %v2456_v46, 0.0 }
0x1066   : > { %v2428_v12 = vpop.permute.xlu1 %2427  ;;  %v2442_v63 = vpop.permute.xlu2 %2441 }
0x1067   : > { %v2433_v26 = vmul.f32 %v2428_v12, %v5775_v2 }
0x106a   : > { %v2452_v11 = vpop.permute.xlu0 %2451 }
0x106b   : > { %v2457_v51 = vadd.f32 %v2452_v11, %v2433_v26 }
0x106d   : > { %v2461_v4 = vmax.f32 %v2457_v51, 0.0 }
0x106e   : > { %v2477_v7 = vpop.permute.xlu2 %2476 }
0x106f   : > { %v2463_v48 = vpack.c.bf16 %v2461_v4, %v2460_v29 }
0x1071   : > { %2506 = vmatpush.bf16.msra.mxu2 %v2463_v48 }
0x1072   : > { %v2437_v52 = vpop.permute.xlu1 %2436  ;;  %v2418_v45 = vpop.permute.xlu0 %2417 }
0x1073   : > { %v2431_v53 = vmul.f32 %v2418_v45, %v5772_v44  ;;  %v2454_v56 = vadd.f32 %v2437_v52, %v2430_v17 }
0x1075   : > { %v2455_v19 = vadd.f32 %v2442_v63, %v2431_v53  ;;  %v2458_v37 = vmax.f32 %v2454_v56, 0.0 }
0x1076   : > { %v2881_v58 = vpop.permute.xlu2 %2880 }
0x1077   : > { %v2459_v62 = vmax.f32 %v2455_v19, 0.0 }
0x1079   : > { %v2462_v55 = vpack.c.bf16 %v2459_v62, %v2458_v37 }
0x107a   : > { %v2467_v15 = vpop.permute.xlu0 %2466  ;;  %v2472_v14 = vpop.permute.xlu1 %2471 }
0x107b   : > { %2507 = vmatpush.bf16.msra.mxu2 %v2462_v55  ;;  %v4655_v55 = vld [vmem:[#allocation12 + $0x5] ss:$0 sm:$0xff] }
0x107e   : > { %4416 = vmatmul.msk.bf16.vlgmr.msra.gmra.mxu2 %vm842_vm14, %v4503_v34 }
0x1082   : > { %v2482_v5 = vpop.permute.xlu0 %2481  ;;  %v2862_v21 = vpop.permute.xlu1 %2861 }
0x1083   : > { %v2867_v0 = vmul.f32 %v2862_v21, %v5570_v27 }
0x108a   : > { %v2857_v30 = vpop.permute.xlu0 %2856 }
0x108b   : > { %v2866_v47 = vmul.f32 %v2857_v30, %v5564_v20 }
0x108d   : > { %v2890_v25 = vadd.f32 %v2881_v58, %v2866_v47 }
0x108e   : > { %4417 = vmatmul.msk.bf16.gmra.mxu2 %vm842_vm14, %v4504_v1 }
0x108f   : > { %v2894_v50 = vmax.f32 %v2890_v25, 0.0 }
0x1092   : > { %v2886_v13 = vpop.permute.xlu0 %2885 }
0x1093   : > { %v2891_v16 = vadd.f32 %v2886_v13, %v2867_v0 }
0x1095   : > { %v2895_v23 = vmax.f32 %v2891_v16, 0.0 }
0x1097   : > { %v2897_v22 = vpack.c.bf16 %v2895_v23, %v2894_v50 }
0x1099   : > { %2912 = vmatpush.bf16.msrb.mxu0 %v2897_v22 }
0x1101   : > { %v2509_v40 = vpop.f32.mrf.mxu2 }
0x1102   : > { %v2510_v6 = vadd.f32 %v2509_v40, %v2467_v15 }
0x1104   : > { %v2530_v39 = vmul.f32 %v4653_v9, %v2510_v6 }
0x1106   : > { %v2537_v41 = vadd.f32 %v4654_v33, %v2530_v39 }
0x1108   : > { %v2541_v11 = vmax.f32 %v2537_v41, 0.0 }
0x1109   : > { %v2511_v38 = vpop.f32.mrf.mxu2 }
0x110a   : > { %v2512_v12 = vadd.f32 %v2511_v38, %v2472_v14  ;;  %v2836_v38 = vmul.f32 %v5812_v35, %v5593_v36 }
0x110c   : > { %v2531_v46 = vmul.f32 %v4653_v9, %v2512_v12 }
0x110e   : > { %v2538_v26 = vadd.f32 %v4654_v33, %v2531_v46  ;;  %v2826_v46 = vld [vmem:[#allocation9 + $0x348] sm:$0xff] }
0x1110   : > { %v2542_v51 = vmax.f32 %v2538_v26, 0.0  ;;  %v2841_v26 = vsub.f32 %v2826_v46, %v5630_v57 }
0x1111   : > { %v2514_v29 = vpop.f32.mrf.mxu2 }
0x1112   : > { %v2545_v4 = vpack.c.bf16 %v2542_v51, %v2541_v11  ;;  %v2515_v48 = vadd.f32 %v2514_v29, %v2477_v7  ;;  %v5861_v11 = vpop.permute.xlu1 %2846 }
0x1114   : > { %4418 = vmatmul.msk.bf16.vlgmr.msra.gmra.mxu3 %vm1774_vm10, %v2545_v4  ;;  %v2532_v17 = vmul.f32 %v4653_v9, %v2515_v48 }
0x1116   : > { %v2539_v53 = vadd.f32 %v4654_v33, %v2532_v17 }
0x1118   : > { %v2543_v19 = vmax.f32 %v2539_v53, 0.0 }
0x1119   : > { %v2516_v52 = vpop.f32.mrf.mxu2 }
0x111a   : > { %v2517_v45 = vadd.f32 %v2516_v52, %v2482_v5 }
0x111c   : > { %v2533_v56 = vmul.f32 %v4653_v9, %v2517_v45 }
0x111e   : > { %v2540_v63 = vadd.f32 %v4654_v33, %v2533_v56 }
0x1120   : > { %v2544_v62 = vmax.f32 %v2540_v63, 0.0 }
0x1122   : > { %v2546_v37 = vpack.c.bf16 %v2544_v62, %v2543_v19 }
0x1124   : > { %4419 = vmatmul.msk.bf16.gmra.mxu3 %vm1774_vm10, %v2546_v37 }
0x1197   : > { %v2568_v15 = vpop.f32.mrf.mxu3 }
0x1198   : > { %v2569_v34 = vadd.f32 %v4655_v55, %v2568_v15 }
0x119a   : > { %v5829_v14 = vadd.f32 %v2569_v34, %v2510_v6 }
0x119c   : > { %v2602_v7 = vsel %vm1774_vm10, %v5829_v14, 0.0  ;;  %v2618_v30 = vmul.f32 %v5829_v14, %v5829_v14 }
0x119d   : > { %2603 = vadd.xlane.f32.xlu2 %v2602_v7 }
0x119e   : > { %v2622_v5 = vsel %vm1774_vm10, %v2618_v30, 0.0 }
0x119f   : > { %v2570_v1 = vpop.f32.mrf.mxu3  ;;  %2623 = vadd.xlane.f32.xlu1 %v2622_v5 }
0x11a0   : > { %v2571_v47 = vadd.f32 %v4655_v55, %v2570_v1 }
0x11a2   : > { %v5836_v21 = vadd.f32 %v2571_v47, %v2512_v12  ;;  %v2825_v12 = vld [vmem:[#allocation9 + $0x340] sm:$0xff] }
0x11a3   : > { %v2840_v41 = vsub.f32 %v2825_v12, %v2836_v38 }
0x11a4   : > { %v2605_v58 = vsel %vm1774_vm10, %v5836_v21, 0.0  ;;  %v2619_v0 = vmul.f32 %v5836_v21, %v5836_v21 }
0x11a5   : > { %2606 = vadd.xlane.f32.xlu0 %v2605_v58 }
0x11a6   : > { %v2625_v25 = vsel %vm1774_vm10, %v2619_v0, 0.0 }
0x11a7   : > { %v2573_v13 = vpop.f32.mrf.mxu3  ;;  %2626 = vadd.xlane.f32.xlu2 %v2625_v25 }
0x11a8   : > { %v2574_v16 = vadd.f32 %v4655_v55, %v2573_v13 }
0x11aa   : > { %v5843_v50 = vadd.f32 %v2574_v16, %v2515_v48 }
0x11ac   : > { %v2608_v23 = vsel %vm1774_vm10, %v5843_v50, 0.0  ;;  %v2620_v22 = vmul.f32 %v5843_v50, %v5843_v50 }
0x11ad   : > { %2609 = vadd.xlane.f32.xlu1 %v2608_v23 }
0x11ae   : > { %v2628_v61 = vsel %vm1774_vm10, %v2620_v22, 0.0 }
0x11af   : > { %v2575_v10 = vpop.f32.mrf.mxu3  ;;  %2629 = vadd.xlane.f32.xlu0 %v2628_v61  ;;  %v2583_v61 = vld [vmem:[#allocation9 + $0x2c0] sm:$0xff] }
0x11b0   : > { %v2576_v40 = vadd.f32 %v4655_v55, %v2575_v10 }
0x11b2   : > { %v5850_v6 = vadd.f32 %v2576_v40, %v2517_v45 }
0x11b4   : > { %v2611_v9 = vsel %vm1774_vm10, %v5850_v6, 0.0  ;;  %v2621_v39 = vmul.f32 %v5850_v6, %v5850_v6 }
0x11b5   : > { %2612 = vadd.xlane.f32.xlu2 %v2611_v9 }
0x11b6   : > { %v2631_v33 = vsel %vm1774_vm10, %v2621_v39, 0.0 }
0x11b7   : > { %2632 = vadd.xlane.f32.xlu1 %v2631_v33 }
0x11c3   : > { %2851 = vperm.xlu0 %4647, %v5623_v49  }
0x11cd   : > { %2870 = vperm.xlu2 %4649, %v2840_v41  }
0x11d0   : > { %2875 = vperm.xlu1 %4648, %v2841_v26  }
0x1210   : > { %v2604_v51 = vpop.xlane.xlu2 %2603 }
0x1211   : > { %v5863_v29 = vmul.f32 0.125, %v2604_v51 }
0x1212   : > { %v2624_v4 = vpop.xlane.xlu1 %2623 }
0x1213   : > { %v2638_v48 = vmul.f32 %v5863_v29, %v5863_v29  ;;  %v2634_v49 = vmul.f32 0.125, %v2624_v4 }
0x1215   : > { %v2642_v17 = vsub.f32 %v2634_v49, %v2638_v48 }
0x1217   : > { %v2646_v52 = vmax.f32 %v2642_v17, 0.0 }
0x1218   : > { %v2607_v36 = vpop.xlane.xlu0 %2606 }
0x1219   : > { %v2650_v35 = vadd.f32 0.001, %v2646_v52  ;;  %v5867_v45 = vmul.f32 0.125, %v2607_v36 }
0x121a   : > { %v2627_v53 = vpop.xlane.xlu2 %2626 }
0x121b   : > { %4724 = vrsqrt.f32 %v2650_v35  ;;  %v2639_v57 = vmul.f32 %v5867_v45, %v5867_v45  ;;  %v2635_v56 = vmul.f32 0.125, %v2627_v53  ;;  %vm2660_vm8 = vweird.f32 %v2650_v35 }
0x121d   : > { %v2643_v63 = vsub.f32 %v2635_v56, %v2639_v57  ;;  %v2585_v56 = vld [vmem:[#allocation9 + $0x2d0] sm:$0xff] }
0x121f   : > { %v2647_v19 = vmax.f32 %v2643_v63, 0.0 }
0x1220   : > { %v2610_v62 = vpop.xlane.xlu1 %2609 }
0x1221   : > { %v4725_v37 = vpop.eup %4724  ;;  %v5871_v55 = vadd.f32 0.001, %v2647_v19  ;;  %v2616_v15 = vmul.f32 0.125, %v2610_v62 }
0x1222   : > { %v2655_v34 = vmul.f32 %v4725_v37, %v2650_v35  ;;  %v2630_v7 = vpop.xlane.xlu0 %2629  ;;  %vm2661_vm7 = vweird.f32 %v4725_v37 }
0x1223   : > { %v2640_v30 = vmul.f32 %v2616_v15, %v2616_v15  ;;  %v2636_v5 = vmul.f32 0.125, %v2630_v7  ;;  %4726 = vrsqrt.f32 %v5871_v55  ;;  %vm2662_vm9 = vmor %vm2660_vm8, %vm2661_vm7  ;;  %vm2670_vm1 = vweird.f32 %v5871_v55 }
0x1224   : > { %v2656_v1 = vmul.f32 %v4725_v37, %v2655_v34 }
0x1225   : > { %v2644_v47 = vsub.f32 %v2636_v5, %v2640_v30  ;;  %v2590_v5 = vld [vmem:[#allocation9 + $0x2f0] sm:$0xff] }
0x1226   : > { %v2657_v58 = vmul.f32 0.5, %v2656_v1 }
0x1227   : > { %v2648_v0 = vmax.f32 %v2644_v47, 0.0  ;;  %v2864_v47 = vmul.f32 %v5861_v11, %v5560_v8 }
0x1228   : > { %v2658_v25 = vsub.f32 1.5, %v2657_v58  ;;  %v2613_v13 = vpop.xlane.xlu2 %2612 }
0x1229   : > { %v2652_v16 = vadd.f32 0.001, %v2648_v0  ;;  %v5874_v23 = vmul.f32 0.125, %v2613_v13  ;;  %v4727_v40 = vpop.eup %4726 }
0x122a   : > { %v2633_v22 = vpop.xlane.xlu1 %2632  ;;  %v2659_v10 = vmul.f32 %v4725_v37, %v2658_v25  ;;  %v2665_v41 = vmul.f32 %v4727_v40, %v5871_v55  ;;  %vm2671_vm15 = vweird.f32 %v4727_v40 }
0x122b   : > { %4728 = vrsqrt.f32 %v2652_v16  ;;  %v2641_v9 = vmul.f32 %v5874_v23, %v5874_v23  ;;  %v2637_v39 = vmul.f32 0.125, %v2633_v22  ;;  %vm2680_vm12 = vweird.f32 %v2652_v16  ;;  %vm5885_vm3 = vmor %vm2670_vm1, %vm2671_vm15 }
0x122c   : > { %v2663_v33 = vsel %vm2662_vm9, %v4725_v37, %v2659_v10  ;;  %v2666_v4 = vmul.f32 %v4727_v40, %v2665_v41  ;;  %v2586_v10 = vld [vmem:[#allocation9 + $0x2d8] sm:$0xff] }
0x122d   : > { %v2645_v38 = vsub.f32 %v2637_v39, %v2641_v9  ;;  %v5878_v12 = vmul.f32 %v2663_v33, %v2583_v61  ;;  %v2584_v39 = vld [vmem:[#allocation9 + $0x2c8] sm:$0xff] }
0x122e   : > { %v2667_v17 = vmul.f32 0.5, %v2666_v4 }
0x122f   : > { %v2649_v46 = vmax.f32 %v2645_v38, 0.0  ;;  %2708 = vperm.xlu2 %4649, %v5878_v12  }
0x1230   : > { %v2668_v53 = vsub.f32 1.5, %v2667_v17  ;;  %v2871_v7 = vpop.permute.xlu2 %2870  ;;  %v2589_v17 = vld [vmem:[#allocation9 + $0x2e8] sm:$0xff] }
0x1231   : > { %v4729_v26 = vpop.eup %4728  ;;  %v2653_v51 = vadd.f32 0.001, %v2649_v46  ;;  %v2888_v13 = vadd.f32 %v2871_v7, %v2864_v47 }
0x1232   : > { %v2675_v48 = vmul.f32 %v4729_v26, %v2652_v16  ;;  %vm2681_vm11 = vweird.f32 %v4729_v26  ;;  %v2669_v1 = vmul.f32 %v4727_v40, %v2668_v53 }
0x1233   : > { %4730 = vrsqrt.f32 %v2653_v51  ;;  %vm2682_vm13 = vmor %vm2680_vm12, %vm2681_vm11  ;;  %vm2690_vm4 = vweird.f32 %v2653_v51  ;;  %v2892_v33 = vmax.f32 %v2888_v13, 0.0 }
0x1234   : > { %v2676_v49 = vmul.f32 %v4729_v26, %v2675_v48  ;;  %v2673_v11 = vsel %vm5885_vm3, %v4727_v40, %v2669_v1 }
0x1235   : > { %v2852_v30 = vpop.permute.xlu0 %2851  ;;  %v2695_v46 = vmul.f32 %v2673_v11, %v2584_v39 }
0x1236   : > { %v2677_v52 = vmul.f32 0.5, %v2676_v49  ;;  %v2865_v16 = vmul.f32 %v2852_v30, %v5573_v28  ;;  %v4430_v49 = vld [vmem:[%s6173_s5 + $0x4] sm:$0xf] }
0x1237   : > { %v2699_v40 = vmul.f32 %v2695_v46, %v5867_v45  ;;  %v2601_v45 = vld [vmem:[#allocation9 + $0x318] sm:$0xff] }
0x1238   : > { %v2678_v36 = vsub.f32 1.5, %v2677_v52 }
0x1239   : > { %v4731_v35 = vpop.eup %4730  ;;  %v2703_v52 = vsub.f32 %v2589_v17, %v2699_v40 }
0x123a   : > { %v2685_v57 = vmul.f32 %v4731_v35, %v2653_v51  ;;  %v2679_v63 = vmul.f32 %v4729_v26, %v2678_v36  ;;  %vm2691_vm2 = vweird.f32 %v4731_v35  ;;  %v2698_v36 = vmul.f32 %v5878_v12, %v5863_v29 }
0x123b   : > { %vm2692_vm5 = vmor %vm2690_vm4, %vm2691_vm2 }
0x123c   : > { %v2686_v19 = vmul.f32 %v4731_v35, %v2685_v57  ;;  %v2683_v62 = vsel %vm2682_vm13, %v4729_v26, %v2679_v63  ;;  %v2591_v26 = vld [vmem:[#allocation9 + $0x2f8] sm:$0xff]  ;;  %v2599_v57 = vld [vmem:[#allocation9 + $0x308] sm:$0xff]  ;;  %v2598_v63 = vld [vmem:[#allocation9 + $0x300] sm:$0xff] }
0x123d   : > { %v2696_v37 = vmul.f32 %v2683_v62, %v2585_v56  ;;  %v2600_v56 = vld [vmem:[#allocation9 + $0x310] sm:$0xff] }
0x123e   : > { %v2687_v34 = vmul.f32 0.5, %v2686_v19 }
0x123f   : > { %2718 = vperm.xlu0 %4647, %v2696_v37   ;;  %v2700_v58 = vmul.f32 %v2696_v37, %v2616_v15 }
0x1240   : > { %v2688_v0 = vsub.f32 1.5, %v2687_v34 }
0x1241   : > { %v2704_v22 = vsub.f32 %v2590_v5, %v2700_v58 }
0x1242   : > { %v2876_v61 = vpop.permute.xlu1 %2875  ;;  %v2689_v9 = vmul.f32 %v4731_v35, %v2688_v0 }
0x1243   : > { %v2889_v55 = vadd.f32 %v2876_v61, %v2865_v16  ;;  %2742 = vperm.xlu1 %4648, %v2704_v22  }
0x1244   : > { %v2693_v15 = vsel %vm2692_vm5, %v4731_v35, %v2689_v9  ;;  %v2588_v35 = vld [vmem:[#allocation9 + $0x2e0] sm:$0xff] }
0x1245   : > { %v2893_v38 = vmax.f32 %v2889_v55, 0.0  ;;  %v2697_v41 = vmul.f32 %v2693_v15, %v2586_v10  ;;  %v2702_v53 = vsub.f32 %v2588_v35, %v2698_v36  ;;  %v4505_v15 = vld [vmem:[#allocation11 + $0x70] sm:$0xff] }
0x1247   : > { %v2896_v4 = vpack.c.bf16 %v2893_v38, %v2892_v33  ;;  %2723 = vperm.xlu2 %4649, %v2697_v41   ;;  %v2701_v51 = vmul.f32 %v2697_v41, %v5874_v23  ;;  %v2831_v23 = vld [vmem:[#allocation15] sm:$0xff] }
0x1249   : > { %2913 = vmatpush.bf16.msrb.mxu0 %v2896_v4  ;;  %v2705_v48 = vsub.f32 %v2591_v26, %v2701_v51 }
0x124b   : > { %2713 = vperm.xlu1 %4648, %v2695_v46   ;;  %2747 = vperm.xlu0 %4647, %v2705_v48   ;;  %v4506_v48 = vld [vmem:[#allocation11 + $0x78] sm:$0xff] }
0x124c   : > { %4431 = vmatmul.msk.bf16.vlgmr.msrb.gmra.mxu0 %vm842_vm14, %v4430_v49 }
0x124f   : > { %2737 = vperm.xlu2 %4649, %v2703_v52  }
0x1253   : > { %2900 = vperm.xlu1 %4648, %v2831_v23   ;;  %2732 = vperm.xlu0 %4647, %v2702_v53  }
0x1257   : > { %2767 = vperm.xlu2 %4649, %v2599_v57  }
0x125b   : > { %2772 = vperm.xlu1 %4648, %v2600_v56   ;;  %2762 = vperm.xlu0 %4647, %v2598_v63  }
0x1263   : > { %2777 = vperm.xlu0 %4647, %v2601_v45  }
0x1289   : > { %v2709_v19 = vpop.permute.xlu2 %2708 }
0x128a   : > { %v2726_v16 = vmul.f32 %v2709_v19, %v5829_v14 }
0x12a1   : > { %v2724_v34 = vpop.permute.xlu2 %2723 }
0x12a2   : > { %v2729_v12 = vmul.f32 %v2724_v34, %v5850_v6 }
0x12a9   : > { %v2738_v13 = vpop.permute.xlu2 %2737 }
0x12b1   : > { %v2719_v62 = vpop.permute.xlu0 %2718 }
0x12b2   : > { %v2728_v29 = vmul.f32 %v2719_v62, %v5843_v50 }
0x12b5   : > { %v2743_v37 = vpop.permute.xlu1 %2742 }
0x12b6   : > { %v2752_v7 = vadd.f32 %v2743_v37, %v2728_v29 }
0x12b8   : > { %v2756_v47 = vmax.f32 %v2752_v7, 0.0 }
0x12bd   : > { %v2748_v30 = vpop.permute.xlu0 %2747  ;;  %v2714_v5 = vpop.permute.xlu1 %2713 }
0x12be   : > { %v2753_v1 = vadd.f32 %v2748_v30, %v2729_v12  ;;  %v2727_v0 = vmul.f32 %v2714_v5, %v5836_v21 }
0x12c0   : > { %v2757_v58 = vmax.f32 %v2753_v1, 0.0  ;;  %v2751_v22 = vadd.f32 %v2738_v13, %v2727_v0 }
0x12c2   : > { %v2759_v25 = vpack.c.bf16 %v2757_v58, %v2756_v47  ;;  %v2755_v9 = vmax.f32 %v2751_v22, 0.0  ;;  %v2768_v47 = vpop.permute.xlu2 %2767 }
0x12c4   : > { %2802 = vmatpush.bf16.msrb.mxu1 %v2759_v25 }
0x12c5   : > { %v2733_v61 = vpop.permute.xlu0 %2732  ;;  %v2901_v39 = vpop.permute.xlu1 %2900 }
0x12c6   : > { %v2750_v10 = vadd.f32 %v2733_v61, %v2726_v16 }
0x12c8   : > { %v2754_v50 = vmax.f32 %v2750_v10, 0.0 }
0x12c9   : > { %v2915_v6 = vpop.f32.mrf.mxu0 }
0x12ca   : > { %v2758_v11 = vpack.c.bf16 %v2755_v9, %v2754_v50  ;;  %v2916_v55 = vadd.f32 %v2915_v6, %v2901_v39 }
0x12cc   : > { %v2919_v33 = vrot.slane %v2916_v55, 4  ;;  %2803 = vmatpush.bf16.msrb.mxu1 %v2758_v11 }
0x12cd   : > { %v2763_v7 = vpop.permute.xlu0 %2762  ;;  %v2773_v13 = vpop.permute.xlu1 %2772 }
0x12ce   : > { %v2920_v38 = vmax.f32 %v2916_v55, %v2919_v33 }
0x12cf   : > { %4428 = vmatmul.msk.bf16.vlgmr.msrb.gmra.mxu1 %vm842_vm14, %v4505_v15 }
0x12d0   : > { %v2921_v21 = vrot.slane %v2920_v38, 2 }
0x12d1   : > { %v2917_v41 = vpop.f32.mrf.mxu0 }
0x12d2   : > { %v2922_v46 = vmax.f32 %v2920_v38, %v2921_v21  ;;  %v3502_v38 = vpack.c.bf16 %v5570_v27, %v5564_v20  ;;  %v3501_v41 = vpack.c.bf16 %v5573_v28, %v5560_v8 }
0x12d4   : > { %v2923_v14 = vrot.slane %v2922_v46, 1 }
0x12d5   : > { %v2778_v10 = vpop.permute.xlu0 %2777 }
0x12d6   : > { %v2924_v26 = vmax.f32 %v2922_v46, %v2923_v14  ;;  %v2993_v46 = vld [vmem:[#allocation9 + $0x370] sm:$0xff] }
0x12d7   : > { %v5943_v14 = vmul.f32 %v2993_v46, %v5599_v3 }
0x12d8   : > { %v2925_v4 = vsub.f32 %v2916_v55, %v2924_v26  ;;  %v2994_v26 = vld [vmem:[#allocation9 + $0x378] sm:$0xff] }
0x12da   : > { %v2926_v51 = vmul.f32 1.442695, %v2925_v4  ;;  %v5947_v4 = vmul.f32 %v2994_v26, %v5610_v24 }
0x12dc   : > { %4732 = vpow2.f32 %v2926_v51 }
0x12df   : > { %4429 = vmatmul.msk.bf16.gmra.mxu1 %vm842_vm14, %v4506_v48 }
0x12e2   : > { %v4733_v49 = vpop.eup %4732 }
0x12e3   : > { %v2928_v40 = vrot.slane %v4733_v49, 4 }
0x12e5   : > { %v2929_v17 = vadd.f32 %v4733_v49, %v2928_v40 }
0x12e7   : > { %v2930_v52 = vrot.slane %v2929_v17, 2 }
0x12e9   : > { %v2931_v36 = vadd.f32 %v2930_v52, %v2929_v17 }
0x12eb   : > { %v2932_v35 = vrot.slane %v2931_v36, 1 }
0x12ed   : > { %v2933_v23 = vadd.f32 %v2932_v35, %v2931_v36 }
0x12ef   : > { %4734 = vrcp.f32 %v2933_v23  ;;  %v2945_v63 = vand.u32 2147483648, %v2933_v23  ;;  %v2943_v19 = vand.u32 2147483647, %v2933_v23  ;;  %vm2939_vm7 = vweird.f32 %v2933_v23 }
0x12f1   : > { %v2946_v37 = vor.u32 1.1754944e-38, %v2945_v63  ;;  %vm2944_vm9 = vcmp.eq.f32.partialorder %v2943_v19, 8.507059e+37 }
0x12f5   : > { %v4735_v53 = vpop.eup %4734 }
0x12f6   : > { %v2935_v57 = vmul.f32 %v4735_v53, %v2933_v23  ;;  %vm2940_vm6 = vweird.f32 %v4735_v53 }
0x12f7   : > { %vm2941_vm8 = vmor %vm2939_vm7, %vm2940_vm6 }
0x12f8   : > { %v2936_v56 = vsub.f32 1.0, %v2935_v57 }
0x12fa   : > { %v2937_v45 = vmul.f32 %v4735_v53, %v2936_v56 }
0x12fc   : > { %v2938_v62 = vadd.f32 %v4735_v53, %v2937_v45 }
0x12fe   : > { %v2942_v34 = vsel %vm2941_vm8, %v4735_v53, %v2938_v62  ;;  %vm3240_vm8 = vcmask 523264  }
0x12ff   : > { %v2947_v29 = vsel %vm2944_vm9, %v2946_v37, %v2942_v34 }
0x1300   : > { %v2948_v12 = vmul.f32 %v4733_v49, %v2947_v29 }
0x1302   : > { %2976 = vmatpush.msrb.mxu2 %v2948_v12 }
0x134c   : > { %v2805_v30 = vpop.f32.mrf.mxu1 }
0x134d   : > { %v2806_v5 = vadd.f32 %v2805_v30, %v2763_v7 }
0x134f   : > { %v2815_v1 = vadd.f32 %v2806_v5, %v5759_v43 }
0x1351   : > { %4432 = vmatmul.msk.f32.vlgmr.msrb.gmra.mxu2 %vm1774_vm10, %v2815_v1 }
0x1354   : > { %v2807_v58 = vpop.f32.mrf.mxu1 }
0x1355   : > { %v2808_v0 = vadd.f32 %v2807_v58, %v2768_v47 }
0x1357   : > { %v2816_v25 = vadd.f32 %v2808_v0, %v5772_v44 }
0x1359   : > { %4433 = vmatmul.msk.f32.gmra.mxu2 %vm1774_vm10, %v2816_v25 }
0x135c   : > { %v2810_v16 = vpop.f32.mrf.mxu1 }
0x135d   : > { %v2811_v22 = vadd.f32 %v2810_v16, %v2773_v13 }
0x135f   : > { %v2817_v61 = vadd.f32 %v2811_v22, %v5764_v31 }
0x1361   : > { %4434 = vmatmul.msk.f32.gmra.mxu2 %vm1774_vm10, %v2817_v61 }
0x1364   : > { %v2812_v9 = vpop.f32.mrf.mxu1 }
0x1365   : > { %v2813_v50 = vadd.f32 %v2812_v9, %v2778_v10 }
0x1367   : > { %v2818_v43 = vadd.f32 %v2813_v50, %v5775_v2 }
0x1369   : > { %4435 = vmatmul.msk.f32.gmra.mxu2 %vm1774_vm10, %v2818_v43 }
0x13d4   : > { %v5914_v39 = vpop.f32.mrf.mxu2 }
0x13d5   : > { %3078 = vadd.xlane.f32.xlu1 %v5914_v39  ;;  %v3090_v21 = vmul.f32 %v5914_v39, %v5914_v39 }
0x13dc   : > { %v5917_v44 = vpop.f32.mrf.mxu2 }
0x13dd   : > { %v3503_v15 = vpack.c.bf16 %v5917_v44, %v5914_v39  ;;  %v3091_v33 = vmul.f32 %v5917_v44, %v5917_v44 }
0x13e4   : > { %v5919_v6 = vpop.f32.mrf.mxu2 }
0x13e5   : > { %3082 = vadd.xlane.f32.xlu2 %v5919_v6  ;;  %v3092_v31 = vmul.f32 %v5919_v6, %v5919_v6 }
0x13e7   : > { %3098 = vadd.xlane.f32.xlu0 %v3092_v31 }
0x13ec   : > { %v5924_v11 = vpop.f32.mrf.mxu2 }
0x13ed   : > { %v3504_v2 = vpack.c.bf16 %v5924_v11, %v5919_v6  ;;  %3084 = vadd.xlane.f32.xlu1 %v5924_v11  ;;  %v3093_v55 = vmul.f32 %v5924_v11, %v5924_v11 }
0x13ef   : > { %3080 = vadd.xlane.f32.xlu0 %v5917_v44  ;;  %3525 = vmatpush.bf16.msra.mxu1 %v3504_v2 }
0x13f0   : > { %3100 = vadd.xlane.f32.xlu2 %v3093_v55 }
0x13f3   : > { %3526 = vmatpush.bf16.msra.mxu1 %v3503_v15 }
0x13f5   : > { %3096 = vadd.xlane.f32.xlu1 %v3091_v33 }
0x13f7   : > { %3527 = vmatpush.bf16.msra.mxu1 %v3502_v38 }
0x13f8   : > { %3094 = vadd.xlane.f32.xlu2 %v3090_v21 }
0x13fb   : > { %3528 = vmatpush.bf16.msra.mxu1 %v3501_v41 }
0x1403   : > { %3038 = vperm.xlu0 %4647, %v5943_v14  }
0x140e   : > { %3043 = vperm.xlu1 %4648, %v5947_v4  }
0x1448   : > { %v3079_v51 = vpop.xlane.xlu1 %3078 }
0x1449   : > { %v5960_v62 = vmul.f32 0.0078125, %v3079_v51 }
0x144b   : > { %v3106_v1 = vmul.f32 %v5960_v62, %v5960_v62 }
0x1458   : > { %v3083_v48 = vpop.xlane.xlu2 %3082 }
0x1459   : > { %v5950_v49 = vmul.f32 0.0078125, %v3083_v48 }
0x145a   : > { %v3099_v40 = vpop.xlane.xlu0 %3098 }
0x145b   : > { %v3108_v17 = vmul.f32 %v5950_v49, %v5950_v49  ;;  %v3104_v52 = vmul.f32 0.0078125, %v3099_v40 }
0x145d   : > { %v3112_v36 = vsub.f32 %v3104_v52, %v3108_v17  ;;  %v3002_v17 = vld [vmem:[#allocation9 + $0x3a8] sm:$0xff] }
0x145f   : > { %v3116_v23 = vmax.f32 %v3112_v36, 0.0 }
0x1460   : > { %v3085_v3 = vpop.xlane.xlu1 %3084 }
0x1461   : > { %v5954_v35 = vmul.f32 0.0078125, %v3085_v3  ;;  %v3120_v45 = vadd.f32 0.001, %v3116_v23 }
0x1462   : > { %v3081_v53 = vpop.xlane.xlu0 %3080 }
0x1463   : > { %v3109_v24 = vmul.f32 %v5954_v35, %v5954_v35  ;;  %v3101_v57 = vpop.xlane.xlu2 %3100  ;;  %v5958_v63 = vmul.f32 0.0078125, %v3081_v53  ;;  %4736 = vrsqrt.f32 %v3120_v45  ;;  %v3001_v53 = vld [vmem:[#allocation9 + $0x3a0] sm:$0xff]  ;;  %vm3148_vm4 = vweird.f32 %v3120_v45 }
0x1464   : > { %v3105_v56 = vmul.f32 0.0078125, %v3101_v57 }
0x1465   : > { %v3107_v29 = vmul.f32 %v5958_v63, %v5958_v63 }
0x1466   : > { %v3113_v19 = vsub.f32 %v3105_v56, %v3109_v24 }
0x1468   : > { %v3117_v37 = vmax.f32 %v3113_v19, 0.0  ;;  %v3097_v34 = vpop.xlane.xlu1 %3096 }
0x1469   : > { %v3103_v12 = vmul.f32 0.0078125, %v3097_v34  ;;  %v4737_v13 = vpop.eup %4736  ;;  %v3006_v34 = vld [vmem:[#allocation9 + $0x3c0] sm:$0xff] }
0x146a   : > { %v3121_v7 = vadd.f32 0.001, %v3117_v37  ;;  %v3143_v10 = vmul.f32 %v4737_v13, %v3120_v45  ;;  %vm3149_vm15 = vweird.f32 %v4737_v13 }
0x146b   : > { %v3111_v30 = vsub.f32 %v3103_v12, %v3107_v29  ;;  %v3095_v5 = vpop.xlane.xlu2 %3094  ;;  %vm3150_vm5 = vmor %vm3148_vm4, %vm3149_vm15  ;;  %v3003_v29 = vld [vmem:[#allocation9 + $0x3b0] sm:$0xff] }
0x146c   : > { %4738 = vrsqrt.f32 %v3121_v7  ;;  %v3102_v47 = vmul.f32 0.0078125, %v3095_v5  ;;  %v3144_v43 = vmul.f32 %v4737_v13, %v3143_v10  ;;  %vm3158_vm6 = vweird.f32 %v3121_v7 }
0x146d   : > { %v3115_v58 = vmax.f32 %v3111_v30, 0.0 }
0x146e   : > { %v3110_v0 = vsub.f32 %v3102_v47, %v3106_v1  ;;  %v3145_v33 = vmul.f32 0.5, %v3144_v43  ;;  %v3004_v1 = vld [vmem:[#allocation9 + $0x3b8] sm:$0xff] }
0x146f   : > { %v3119_v25 = vadd.f32 0.001, %v3115_v58 }
0x1470   : > { %v3114_v16 = vmax.f32 %v3110_v0, 0.0  ;;  %v3146_v51 = vsub.f32 1.5, %v3145_v33 }
0x1471   : > { %4740 = vrsqrt.f32 %v3119_v25  ;;  %vm3138_vm11 = vweird.f32 %v3119_v25 }
0x1472   : > { %v4739_v22 = vpop.eup %4738  ;;  %v3118_v61 = vadd.f32 0.001, %v3114_v16  ;;  %v3147_v57 = vmul.f32 %v4737_v13, %v3146_v51 }
0x1473   : > { %v3153_v9 = vmul.f32 %v4739_v22, %v3121_v7  ;;  %vm3159_vm2 = vweird.f32 %v4739_v22 }
0x1474   : > { %4742 = vrsqrt.f32 %v3118_v61  ;;  %vm3128_vm1 = vweird.f32 %v3118_v61  ;;  %vm3160_vm7 = vmor %vm3158_vm6, %vm3159_vm2  ;;  %v3151_v12 = vsel %vm3150_vm5, %v4737_v13, %v3147_v57  ;;  %v3009_v13 = vld [vmem:[#allocation9 + $0x3d8] sm:$0xff] }
0x1475   : > { %v3154_v31 = vmul.f32 %v4739_v22, %v3153_v9  ;;  %v3164_v58 = vmul.f32 %v3151_v12, %v3003_v29 }
0x1477   : > { %v4741_v50 = vpop.eup %4740  ;;  %v3155_v21 = vmul.f32 0.5, %v3154_v31  ;;  %v3168_v7 = vmul.f32 %v3164_v58, %v5950_v49  ;;  %v2998_v31 = vld [vmem:[#allocation9 + $0x390] sm:$0xff] }
0x1478   : > { %v3133_v2 = vmul.f32 %v4741_v50, %v3119_v25  ;;  %vm3139_vm10 = vweird.f32 %v4741_v50  ;;  %v3007_v25 = vld [vmem:[#allocation9 + $0x3c8] sm:$0xff] }
0x1479   : > { %v3156_v40 = vsub.f32 1.5, %v3155_v21  ;;  %vm3140_vm12 = vmor %vm3138_vm11, %vm3139_vm10 }
0x147a   : > { %v4743_v55 = vpop.eup %4742  ;;  %v3134_v15 = vmul.f32 %v4741_v50, %v3133_v2  ;;  %v2996_v2 = vld [vmem:[#allocation9 + $0x380] sm:$0xff] }
0x147b   : > { %v3123_v38 = vmul.f32 %v4743_v55, %v3118_v61  ;;  %vm3129_vm13 = vweird.f32 %v4743_v55  ;;  %v3157_v56 = vmul.f32 %v4739_v22, %v3156_v40  ;;  %v3008_v61 = vld [vmem:[#allocation9 + $0x3d0] sm:$0xff] }
0x147c   : > { %v3135_v41 = vmul.f32 0.5, %v3134_v15  ;;  %vm3130_vm3 = vmor %vm3128_vm1, %vm3129_vm13  ;;  %v3022_v15 = vsub.f32 %v2996_v2, %v5641_v60 }
0x147d   : > { %v3124_v46 = vmul.f32 %v4743_v55, %v3123_v38  ;;  %v3161_v30 = vsel %vm3160_vm7, %v4739_v22, %v3157_v56  ;;  %v3172_v22 = vsub.f32 %v3008_v61, %v3168_v7 }
0x147e   : > { %v3136_v26 = vsub.f32 1.5, %v3135_v41  ;;  %v3165_v45 = vmul.f32 %v3161_v30, %v3004_v1 }
0x147f   : > { %v3125_v48 = vmul.f32 0.5, %v3124_v46 }
0x1480   : > { %v3137_v52 = vmul.f32 %v4741_v50, %v3136_v26  ;;  %v3169_v10 = vmul.f32 %v3165_v45, %v5954_v35  ;;  %v2997_v35 = vld [vmem:[#allocation9 + $0x388] sm:$0xff] }
0x1481   : > { %v3126_v36 = vsub.f32 1.5, %v3125_v48 }
0x1482   : > { %v3141_v3 = vsel %vm3140_vm12, %v4741_v50, %v3137_v52  ;;  %v3173_v9 = vsub.f32 %v3009_v13, %v3169_v10  ;;  %v3020_v50 = vmul.f32 %v5943_v14, %v5583_v18  ;;  %v3044_v14 = vpop.permute.xlu1 %3043 }
0x1483   : > { %v3163_v23 = vmul.f32 %v3141_v3, %v3002_v17  ;;  %v3127_v24 = vmul.f32 %v4743_v55, %v3126_v36 }
0x1484   : > { %v3024_v49 = vsub.f32 %v2998_v31, %v3020_v50 }
0x1485   : > { %3181 = vperm.xlu0 %4647, %v3163_v23   ;;  %v3131_v19 = vsel %vm3130_vm3, %v4743_v55, %v3127_v24  ;;  %v3167_v0 = vmul.f32 %v3163_v23, %v5958_v63  ;;  %v2999_v63 = vld [vmem:[#allocation9 + $0x398] sm:$0xff]  ;;  %v3023_v55 = vsub.f32 %v2997_v35, %v5637_v32 }
0x1486   : > { %v3162_v37 = vmul.f32 %v3131_v19, %v3001_v53 }
0x1487   : > { %v3171_v16 = vsub.f32 %v3007_v25, %v3167_v0 }
0x1488   : > { %3176 = vperm.xlu2 %4649, %v3162_v37   ;;  %v3166_v5 = vmul.f32 %v3162_v37, %v5960_v62  ;;  %v3021_v62 = vmul.f32 %v5947_v4, %v5587_v42  ;;  %v3039_v4 = vpop.permute.xlu0 %3038 }
0x1489   : > { %v3048_v23 = vmul.f32 %v3039_v4, %v5564_v20 }
0x148a   : > { %v3170_v47 = vsub.f32 %v3006_v34, %v3166_v5  ;;  %v3025_v43 = vsub.f32 %v2999_v63, %v3021_v62 }
0x148c   : > { %3200 = vperm.xlu1 %4648, %v3170_v47  }
0x148d   : > { %3186 = vperm.xlu0 %4647, %v3164_v58  }
0x1490   : > { %3205 = vperm.xlu2 %4649, %v3171_v16   ;;  %v4508_v16 = vld [vmem:[#allocation17 + $0x8] sm:$0xff] }
0x1494   : > { %3210 = vperm.xlu1 %4648, %v3172_v22  }
0x1495   : > { %3215 = vperm.xlu0 %4647, %v3173_v9  }
0x1498   : > { %3191 = vperm.xlu2 %4649, %v3165_v45   ;;  %v4507_v45 = vld [vmem:[#allocation17] sm:$0xff] }
0x149c   : > { %3028 = vperm.xlu1 %4648, %v5633_v59  }
0x149d   : > { %3067 = vperm.xlu0 %4647, %v3025_v43  }
0x14a0   : > { %3062 = vperm.xlu2 %4649, %v3024_v49  }
0x14a4   : > { %3057 = vperm.xlu1 %4648, %v3023_v55  }
0x14a5   : > { %3052 = vperm.xlu0 %4647, %v3022_v15  }
0x14a8   : > { %3033 = vperm.xlu2 %4649, %v5621_v54  }
0x14e2   : > { %v3177_v42 = vpop.permute.xlu2 %3176 }
0x14e3   : > { %v3194_v46 = vmul.f32 %v3177_v42, %v5914_v39 }
0x14ea   : > { %v3206_v18 = vpop.permute.xlu2 %3205 }
0x14f2   : > { %v3192_v38 = vpop.permute.xlu2 %3191 }
0x14f3   : > { %v3197_v32 = vmul.f32 %v3192_v38, %v5924_v11 }
0x14f7   : > { %v3182_v33 = vpop.permute.xlu0 %3181 }
0x14f8   : > { %v3195_v60 = vmul.f32 %v3182_v33, %v5917_v44 }
0x14fa   : > { %v3063_v54 = vpop.permute.xlu2 %3062  ;;  %v3219_v52 = vadd.f32 %v3206_v18, %v3195_v60 }
0x14fb   : > { %v3072_v57 = vadd.f32 %v3063_v54, %v3048_v23 }
0x14fc   : > { %v3223_v39 = vmax.f32 %v3219_v52, 0.0 }
0x14fd   : > { %v3076_v37 = vmax.f32 %v3072_v57, 0.0 }
0x14fe   : > { %v3201_v59 = vpop.permute.xlu1 %3200 }
0x14ff   : > { %v3187_v21 = vpop.permute.xlu0 %3186  ;;  %v3218_v40 = vadd.f32 %v3201_v59, %v3194_v46 }
0x1500   : > { %v3196_v41 = vmul.f32 %v3187_v21, %v5919_v6  ;;  %v3049_v6 = vmul.f32 %v3044_v14, %v5570_v27 }
0x1501   : > { %v3222_v53 = vmax.f32 %v3218_v40, 0.0 }
0x1502   : > { %v3034_v34 = vpop.permute.xlu2 %3033 }
0x1503   : > { %v3228_v56 = vpack.c.bf16 %v3223_v39, %v3222_v53  ;;  %v3047_v30 = vmul.f32 %v3034_v34, %v5573_v28 }
0x1506   : > { %v3211_v26 = vpop.permute.xlu1 %3210 }
0x1507   : > { %v3220_v51 = vadd.f32 %v3211_v26, %v3196_v41  ;;  %v3216_v48 = vpop.permute.xlu0 %3215 }
0x1508   : > { %v3221_v17 = vadd.f32 %v3216_v48, %v3197_v32 }
0x1509   : > { %v3224_v36 = vmax.f32 %v3220_v51, 0.0 }
0x150a   : > { %v3225_v3 = vmax.f32 %v3221_v17, 0.0 }
0x150c   : > { %v3229_v24 = vpack.c.bf16 %v3225_v3, %v3224_v36 }
0x150e   : > { %v3029_v11 = vpop.permute.xlu1 %3028  ;;  %3251 = vmatpush.bf16.msrb.mxu3 %v3229_v24 }
0x150f   : > { %v3068_v44 = vpop.permute.xlu0 %3067  ;;  %v3046_v20 = vmul.f32 %v3029_v11, %v5560_v8 }
0x1510   : > { %v3073_v19 = vadd.f32 %v3068_v44, %v3049_v6  ;;  %v3269_v44 = vld [vmem:[#allocation9 + $0x3f0] sm:$0xff] }
0x1512   : > { %v3077_v29 = vmax.f32 %v3073_v19, 0.0  ;;  %3252 = vmatpush.bf16.msrb.mxu3 %v3228_v56 }
0x1514   : > { %v3227_v12 = vpack.c.bf16 %v3077_v29, %v3076_v37 }
0x1516   : > { %v3058_v5 = vpop.permute.xlu1 %3057  ;;  %3253 = vmatpush.bf16.msrb.mxu3 %v3227_v12 }
0x1517   : > { %v3071_v1 = vadd.f32 %v3058_v5, %v3047_v30  ;;  %v3053_v27 = vpop.permute.xlu0 %3052 }
0x1518   : > { %v3070_v47 = vadd.f32 %v3053_v27, %v3046_v20 }
0x1519   : > { %v3075_v58 = vmax.f32 %v3071_v1, 0.0 }
0x151a   : > { %v3074_v0 = vmax.f32 %v3070_v47, 0.0 }
0x151c   : > { %v3226_v25 = vpack.c.bf16 %v3075_v58, %v3074_v0  ;;  %v3270_v58 = vld [vmem:[#allocation9 + $0x3f8] sm:$0xff] }
0x151e   : > { %3254 = vmatpush.bf16.msrb.mxu3 %v3226_v25 }
0x1521   : > { %4444 = vmatmul.msk.bf16.vlgmr.msrb.gmra.mxu3 %vm3240_vm8, %v4507_v45 }
0x1531   : > { %4445 = vmatmul.msk.bf16.gmra.mxu3 %vm3240_vm8, %v4508_v16 }
0x15a4   : > { %v5988_v7 = vpop.f32.mrf.mxu3 }
0x15a5   : > { %3286 = vadd.xlane.f32.xlu0 %v5988_v7  ;;  %v3298_v9 = vmul.f32 %v5988_v7, %v5988_v7 }
0x15ac   : > { %v5991_v8 = vpop.f32.mrf.mxu3 }
0x15ad   : > { %v3299_v22 = vmul.f32 %v5991_v8, %v5991_v8 }
0x15b4   : > { %v5993_v28 = vpop.f32.mrf.mxu3 }
0x15b5   : > { %v3300_v61 = vmul.f32 %v5993_v28, %v5993_v28  ;;  %3290 = vadd.xlane.f32.xlu2 %v5993_v28 }
0x15b7   : > { %3306 = vadd.xlane.f32.xlu1 %v3300_v61 }
0x15bc   : > { %v5998_v10 = vpop.f32.mrf.mxu3 }
0x15bd   : > { %v3301_v13 = vmul.f32 %v5998_v10, %v5998_v10  ;;  %3292 = vadd.xlane.f32.xlu0 %v5998_v10 }
0x15bf   : > { %3288 = vadd.xlane.f32.xlu1 %v5991_v8  ;;  %3308 = vadd.xlane.f32.xlu2 %v3301_v13 }
0x15c5   : > { %3304 = vadd.xlane.f32.xlu0 %v3299_v22 }
0x15c7   : > { %3302 = vadd.xlane.f32.xlu2 %v3298_v9  ;;  %v3275_v9 = vld [vmem:[#allocation9 + $0x418] sm:$0xff] }
0x1618   : > { %v3287_v62 = vpop.xlane.xlu0 %3286 }
0x1619   : > { %v6018_v21 = vmul.f32 0.0078125, %v3287_v62 }
0x161b   : > { %v3314_v40 = vmul.f32 %v6018_v21, %v6018_v21 }
0x1628   : > { %v3291_v63 = vpop.xlane.xlu2 %3290 }
0x1629   : > { %v6008_v50 = vmul.f32 0.0078125, %v3291_v63 }
0x162a   : > { %v3307_v43 = vpop.xlane.xlu1 %3306 }
0x162b   : > { %v3316_v31 = vmul.f32 %v6008_v50, %v6008_v50  ;;  %v3312_v49 = vmul.f32 0.0078125, %v3307_v43 }
0x162d   : > { %v3320_v35 = vsub.f32 %v3312_v49, %v3316_v31  ;;  %v3267_v49 = vld [vmem:[#allocation9 + $0x3e0] sm:$0xff] }
0x162f   : > { %v3324_v2 = vmax.f32 %v3320_v35, 0.0 }
0x1630   : > { %v3293_v55 = vpop.xlane.xlu0 %3292 }
0x1631   : > { %v3328_v15 = vadd.f32 0.001, %v3324_v2  ;;  %v6012_v42 = vmul.f32 0.0078125, %v3293_v55  ;;  %v3268_v2 = vld [vmem:[#allocation9 + $0x3e8] sm:$0xff] }
0x1632   : > { %v3289_v4 = vpop.xlane.xlu1 %3288  ;;  %v3309_v18 = vpop.xlane.xlu2 %3308 }
0x1633   : > { %4744 = vrsqrt.f32 %v3328_v15  ;;  %v3317_v14 = vmul.f32 %v6012_v42, %v6012_v42  ;;  %v3313_v33 = vmul.f32 0.0078125, %v3309_v18  ;;  %v6016_v38 = vmul.f32 0.0078125, %v3289_v4 }
0x1634   : > { %vm3356_vm10 = vweird.f32 %v3328_v15 }
0x1635   : > { %v3321_v59 = vsub.f32 %v3313_v33, %v3317_v14  ;;  %v3315_v60 = vmul.f32 %v6016_v38, %v6016_v38  ;;  %v3272_v14 = vld [vmem:[#allocation9 + $0x400] sm:$0xff] }
0x1637   : > { %v3325_v41 = vmax.f32 %v3321_v59, 0.0 }
0x1638   : > { %v3305_v46 = vpop.xlane.xlu0 %3304 }
0x1639   : > { %v4745_v32 = vpop.eup %4744  ;;  %v3311_v26 = vmul.f32 0.0078125, %v3305_v46  ;;  %v3329_v48 = vadd.f32 0.001, %v3325_v41  ;;  %v3274_v41 = vld [vmem:[#allocation9 + $0x410] sm:$0xff] }
0x163a   : > { %v3351_v51 = vmul.f32 %v4745_v32, %v3328_v15  ;;  %v3303_v54 = vpop.xlane.xlu2 %3302  ;;  %vm3357_vm9 = vweird.f32 %v4745_v32  ;;  %v3284_v46 = vld [vmem:[#allocation9 + $0x430] sm:$0xff] }
0x163b   : > { %v3319_v17 = vsub.f32 %v3311_v26, %v3315_v60  ;;  %v3310_v52 = vmul.f32 0.0078125, %v3303_v54  ;;  %4746 = vrsqrt.f32 %v3329_v48  ;;  %vm3358_vm11 = vmor %vm3356_vm10, %vm3357_vm9  ;;  %vm3366_vm13 = vweird.f32 %v3329_v48  ;;  %v3285_v60 = vld [vmem:[#allocation9 + $0x438] sm:$0xff] }
0x163c   : > { %v3352_v36 = vmul.f32 %v4745_v32, %v3351_v51  ;;  %v3273_v51 = vld [vmem:[#allocation9 + $0x408] sm:$0xff] }
0x163d   : > { %v3323_v3 = vmax.f32 %v3319_v17, 0.0  ;;  %v3318_v23 = vsub.f32 %v3310_v52, %v3314_v40  ;;  %v3282_v40 = vld [vmem:[#allocation9 + $0x420] sm:$0xff]  ;;  %v3500_v52 = vld [vmem:[#allocation9 + $0x458] sm:$0xff] }
0x163e   : > { %v3353_v53 = vmul.f32 0.5, %v3352_v36  ;;  %v3497_v17 = vld [vmem:[#allocation9 + $0x440] sm:$0xff]  ;;  %v4511_v36 = vld [vmem:[#allocation17 + $0x10] sm:$0xff] }
0x163f   : > { %v3327_v24 = vadd.f32 0.001, %v3323_v3  ;;  %v3322_v6 = vmax.f32 %v3318_v23, 0.0  ;;  %4464 = vmatmul.msk.bf16.vlgmr.msra.gmra.mxu1 %vm3240_vm8, %v4511_v36 }
0x1640   : > { %v3354_v39 = vsub.f32 1.5, %v3353_v53 }
0x1641   : > { %4748 = vrsqrt.f32 %v3327_v24  ;;  %v3326_v57 = vadd.f32 0.001, %v3322_v6  ;;  %v4747_v11 = vpop.eup %4746  ;;  %vm3346_vm3 = vweird.f32 %v3327_v24 }
0x1642   : > { %v3355_v56 = vmul.f32 %v4745_v32, %v3354_v39  ;;  %v3361_v19 = vmul.f32 %v4747_v11, %v3329_v48  ;;  %vm3367_vm12 = vweird.f32 %v4747_v11  ;;  %v3283_v48 = vld [vmem:[#allocation9 + $0x428] sm:$0xff] }
0x1643   : > { %4750 = vrsqrt.f32 %v3326_v57  ;;  %vm3368_vm15 = vmor %vm3366_vm13, %vm3367_vm12  ;;  %vm3336_vm5 = vweird.f32 %v3326_v57 }
0x1644   : > { %v3359_v37 = vsel %vm3358_vm11, %v4745_v32, %v3355_v56  ;;  %v3362_v34 = vmul.f32 %v4747_v11, %v3361_v19 }
0x1645   : > { %v3372_v29 = vmul.f32 %v3359_v37, %v3269_v44 }
0x1646   : > { %v3363_v30 = vmul.f32 0.5, %v3362_v34 }
0x1647   : > { %v4749_v12 = vpop.eup %4748  ;;  %3394 = vperm.xlu1 %4648, %v3372_v29   ;;  %v3376_v59 = vmul.f32 %v3372_v29, %v6008_v50  ;;  %v3498_v50 = vld [vmem:[#allocation9 + $0x448] sm:$0xff] }
0x1648   : > { %v3341_v20 = vmul.f32 %v4749_v12, %v3327_v24  ;;  %v3364_v1 = vsub.f32 1.5, %v3363_v30  ;;  %vm3347_vm1 = vweird.f32 %v4749_v12  ;;  %v4512_v24 = vld [vmem:[#allocation17 + $0x18] sm:$0xff] }
0x1649   : > { %v4751_v5 = vpop.eup %4750  ;;  %vm3348_vm4 = vmor %vm3346_vm3, %vm3347_vm1  ;;  %v3380_v32 = vsub.f32 %v3274_v41, %v3376_v59 }
0x164a   : > { %v3342_v27 = vmul.f32 %v4749_v12, %v3341_v20  ;;  %v3331_v47 = vmul.f32 %v4751_v5, %v3326_v57  ;;  %v3365_v0 = vmul.f32 %v4747_v11, %v3364_v1  ;;  %vm3337_vm2 = vweird.f32 %v4751_v5 }
0x164b   : > { %vm3338_vm6 = vmor %vm3336_vm5, %vm3337_vm2 }
0x164c   : > { %v3343_v25 = vmul.f32 0.5, %v3342_v27  ;;  %v3332_v45 = vmul.f32 %v4751_v5, %v3331_v47  ;;  %v3369_v16 = vsel %vm3368_vm15, %v4747_v11, %v3365_v0 }
0x164d   : > { %v3373_v22 = vmul.f32 %v3369_v16, %v3270_v58  ;;  %v4510_v58 = vld [vmem:[#allocation11 + $0x88] sm:$0xff] }
0x164e   : > { %v3344_v61 = vsub.f32 1.5, %v3343_v25  ;;  %v3333_v13 = vmul.f32 0.5, %v3332_v45 }
0x164f   : > { %3399 = vperm.xlu2 %4649, %v3373_v22   ;;  %v3377_v63 = vmul.f32 %v3373_v22, %v6012_v42  ;;  %4465 = vmatmul.msk.bf16.gmra.mxu1 %vm3240_vm8, %v4512_v24 }
0x1650   : > { %v3334_v62 = vsub.f32 1.5, %v3333_v13  ;;  %v3345_v43 = vmul.f32 %v4749_v12, %v3344_v61 }
0x1651   : > { %v3381_v31 = vsub.f32 %v3275_v9, %v3377_v63 }
0x1652   : > { %v3335_v35 = vmul.f32 %v4751_v5, %v3334_v62  ;;  %v3349_v55 = vsel %vm3348_vm4, %v4749_v12, %v3345_v43 }
0x1653   : > { %3423 = vperm.xlu1 %4648, %v3381_v31   ;;  %v3371_v18 = vmul.f32 %v3349_v55, %v3268_v2 }
0x1654   : > { %v3339_v15 = vsel %vm3338_vm6, %v4751_v5, %v3335_v35 }
0x1655   : > { %v3370_v4 = vmul.f32 %v3339_v15, %v3267_v49  ;;  %v3375_v26 = vmul.f32 %v3371_v18, %v6016_v38 }
0x1657   : > { %3384 = vperm.xlu0 %4647, %v3370_v4   ;;  %v3374_v33 = vmul.f32 %v3370_v4, %v6018_v21  ;;  %3389 = vperm.xlu2 %4649, %v3371_v18   ;;  %v3379_v54 = vsub.f32 %v3273_v51, %v3375_v26  ;;  %v3499_v21 = vld [vmem:[#allocation9 + $0x450] sm:$0xff] }
0x1659   : > { %v3378_v42 = vsub.f32 %v3272_v14, %v3374_v33 }
0x165b   : > { %3408 = vperm.xlu1 %4648, %v3378_v42  }
0x165f   : > { %3418 = vperm.xlu0 %4647, %v3380_v32   ;;  %3448 = vperm.xlu2 %4649, %v3284_v46  }
0x1663   : > { %3453 = vperm.xlu1 %4648, %v3285_v60  }
0x1667   : > { %3413 = vperm.xlu0 %4647, %v3379_v54   ;;  %3443 = vperm.xlu2 %4649, %v3283_v48  }
0x166b   : > { %3556 = vperm.xlu1 %4648, %v3499_v21  }
0x166f   : > { %3438 = vperm.xlu0 %4647, %v3282_v40   ;;  %3546 = vperm.xlu2 %4649, %v3497_v17  }
0x1673   : > { %3551 = vperm.xlu1 %4648, %v3498_v50  }
0x1677   : > { %3561 = vperm.xlu0 %4647, %v3500_v52  }
0x16a9   : > { %v3400_v23 = vpop.permute.xlu2 %3399 }
0x16aa   : > { %v3405_v6 = vmul.f32 %v3400_v23, %v5998_v10 }
0x16b1   : > { %v3390_v37 = vpop.permute.xlu2 %3389 }
0x16b2   : > { %v3403_v30 = vmul.f32 %v3390_v37, %v5991_v8 }
0x16b9   : > { %v3395_v38 = vpop.permute.xlu1 %3394  ;;  %v3449_v0 = vpop.permute.xlu2 %3448 }
0x16ba   : > { %v3404_v39 = vmul.f32 %v3395_v38, %v5993_v28  ;;  %v4509_v28 = vld [vmem:[#allocation11 + $0x80] sm:$0xff] }
0x16c1   : > { %v3444_v25 = vpop.permute.xlu2 %3443 }
0x16c5   : > { %v3424_v53 = vpop.permute.xlu1 %3423 }
0x16c6   : > { %v3429_v57 = vadd.f32 %v3424_v53, %v3405_v6 }
0x16c8   : > { %v3433_v56 = vmax.f32 %v3429_v57, 0.0 }
0x16c9   : > { %v3385_v3 = vpop.permute.xlu0 %3384  ;;  %v3547_v13 = vpop.permute.xlu2 %3546 }
0x16ca   : > { %v3402_v29 = vmul.f32 %v3385_v3, %v5988_v7  ;;  %v3530_v7 = vpop.f32.mrf.mxu1 }
0x16cd   : > { %v3409_v34 = vpop.permute.xlu1 %3408 }
0x16ce   : > { %v3426_v20 = vadd.f32 %v3409_v34, %v3402_v29 }
0x16d0   : > { %v3430_v1 = vmax.f32 %v3426_v20, 0.0 }
0x16d1   : > { %v3419_v11 = vpop.permute.xlu0 %3418 }
0x16d2   : > { %v3428_v44 = vadd.f32 %v3419_v11, %v3404_v39  ;;  %v3532_v62 = vpop.f32.mrf.mxu1 }
0x16d4   : > { %v3432_v19 = vmax.f32 %v3428_v44, 0.0 }
0x16d5   : > { %v3454_v22 = vpop.permute.xlu1 %3453 }
0x16d6   : > { %v3435_v12 = vpack.c.bf16 %v3433_v56, %v3432_v19 }
0x16d8   : > { %3478 = vmatpush.bf16.msra.mxu0 %v3435_v12 }
0x16d9   : > { %v3414_v5 = vpop.permute.xlu0 %3413 }
0x16da   : > { %v3427_v10 = vadd.f32 %v3414_v5, %v3403_v30  ;;  %v3535_v49 = vpop.f32.mrf.mxu1 }
0x16dc   : > { %v3431_v27 = vmax.f32 %v3427_v10, 0.0 }
0x16dd   : > { %v3557_v43 = vpop.permute.xlu1 %3556 }
0x16de   : > { %v3434_v47 = vpack.c.bf16 %v3431_v27, %v3430_v1 }
0x16e0   : > { %3479 = vmatpush.bf16.msra.mxu0 %v3434_v47 }
0x16e1   : > { %v3439_v45 = vpop.permute.xlu0 %3438 }
0x16e2   : > { %v3537_v41 = vpop.f32.mrf.mxu1 }
0x16e3   : > { %4454 = vmatmul.msk.bf16.vlgmr.msra.gmra.mxu0 %vm842_vm14, %v4509_v28 }
0x16e5   : > { %v3552_v14 = vpop.permute.xlu1 %3551 }
0x16e9   : > { %v3562_v32 = vpop.permute.xlu0 %3561 }
0x16f3   : > { %4455 = vmatmul.msk.bf16.gmra.mxu0 %vm842_vm14, %v4510_v58 }
0x1760   : > { %v3481_v16 = vpop.f32.mrf.mxu0 }
0x1761   : > { %v3482_v8 = vadd.f32 %v3481_v16, %v3439_v45 }
0x1763   : > { %v3540_v61 = vadd.f32 %v3530_v7, %v3482_v8  ;;  %v3571_v7 = vld [vmem:[#allocation9 + $0x470] sm:$0xff] }
0x1765   : > { %v6036_v9 = vadd.f32 %v3547_v13, %v3540_v61 }
0x1767   : > { %3583 = vadd.xlane.f32.xlu0 %v6036_v9  ;;  %v3595_v48 = vmul.f32 %v6036_v9, %v6036_v9 }
0x1768   : > { %v3483_v63 = vpop.f32.mrf.mxu0 }
0x1769   : > { %v3484_v35 = vadd.f32 %v3483_v63, %v3444_v25 }
0x176b   : > { %v3541_v15 = vadd.f32 %v3532_v62, %v3484_v35 }
0x176d   : > { %v6044_v42 = vadd.f32 %v3552_v14, %v3541_v15 }
0x176f   : > { %v3596_v26 = vmul.f32 %v6044_v42, %v6044_v42 }
0x1770   : > { %v3486_v31 = vpop.f32.mrf.mxu0 }
0x1771   : > { %v3487_v2 = vadd.f32 %v3486_v31, %v3449_v0 }
0x1773   : > { %v3542_v55 = vadd.f32 %v3535_v49, %v3487_v2 }
0x1775   : > { %v6039_v4 = vadd.f32 %v3557_v43, %v3542_v55  ;;  %v3576_v43 = vld [vmem:[#allocation9 + $0x490] sm:$0xff] }
0x1777   : > { %3587 = vadd.xlane.f32.xlu0 %v6039_v4  ;;  %v3597_v18 = vmul.f32 %v6039_v4, %v6039_v4 }
0x1778   : > { %v3488_v33 = vpop.f32.mrf.mxu0 }
0x1779   : > { %v3489_v59 = vadd.f32 %v3488_v33, %v3454_v22  ;;  %3603 = vadd.xlane.f32.xlu1 %v3597_v18  ;;  %v3570_v33 = vld [vmem:[#allocation9 + $0x468] sm:$0xff] }
0x177b   : > { %v3543_v46 = vadd.f32 %v3537_v41, %v3489_v59 }
0x177d   : > { %v6046_v60 = vadd.f32 %v3562_v32, %v3543_v46 }
0x177f   : > { %3589 = vadd.xlane.f32.xlu2 %v6046_v60  ;;  %3601 = vadd.xlane.f32.xlu0 %v3596_v26  ;;  %v3598_v51 = vmul.f32 %v6046_v60, %v6046_v60 }
0x1781   : > { %3585 = vadd.xlane.f32.xlu1 %v6044_v42 }
0x1787   : > { %3605 = vadd.xlane.f32.xlu2 %v3598_v51 }
0x178f   : > { %3599 = vadd.xlane.f32.xlu2 %v3595_v48 }
0x17da   : > { %v3584_v54 = vpop.xlane.xlu0 %3583 }
0x17db   : > { %v6064_v10 = vmul.f32 0.0078125, %v3584_v54 }
0x17dd   : > { %v3611_v0 = vmul.f32 %v6064_v10, %v6064_v10 }
0x17ea   : > { %v3588_v21 = vpop.xlane.xlu0 %3587 }
0x17eb   : > { %v3593_v40 = vmul.f32 0.0078125, %v3588_v21  ;;  %v3572_v21 = vld [vmem:[#allocation9 + $0x478] sm:$0xff] }
0x17ec   : > { %v3604_v17 = vpop.xlane.xlu1 %3603 }
0x17ed   : > { %v3613_v50 = vmul.f32 %v3593_v40, %v3593_v40  ;;  %v3609_v52 = vmul.f32 0.0078125, %v3604_v17 }
0x17ef   : > { %v3617_v36 = vsub.f32 %v3609_v52, %v3613_v50 }
0x17f1   : > { %v3621_v38 = vmax.f32 %v3617_v36, 0.0  ;;  %v3577_v36 = vld [vmem:[#allocation9 + $0x498] sm:$0xff] }
0x17f2   : > { %v3590_v3 = vpop.xlane.xlu2 %3589  ;;  %v3602_v53 = vpop.xlane.xlu0 %3601 }
0x17f3   : > { %v3625_v23 = vadd.f32 0.001, %v3621_v38  ;;  %v3608_v39 = vmul.f32 0.0078125, %v3602_v53  ;;  %v6058_v57 = vmul.f32 0.0078125, %v3590_v3  ;;  %v3569_v53 = vld [vmem:[#allocation9 + $0x460] sm:$0xff] }
0x17f4   : > { %v3586_v24 = vpop.xlane.xlu1 %3585 }
0x17f5   : > { %4752 = vrsqrt.f32 %v3625_v23  ;;  %v6056_v6 = vmul.f32 0.0078125, %v3586_v24  ;;  %v3614_v37 = vmul.f32 %v6058_v57, %v6058_v57  ;;  %vm3653_vm8 = vweird.f32 %v3625_v23 }
0x17f7   : > { %v3612_v11 = vmul.f32 %v6056_v6, %v6056_v6 }
0x17f9   : > { %v3616_v44 = vsub.f32 %v3608_v39, %v3612_v11 }
0x17fa   : > { %v3606_v56 = vpop.xlane.xlu2 %3605 }
0x17fb   : > { %v4753_v19 = vpop.eup %4752  ;;  %v3620_v34 = vmax.f32 %v3616_v44, 0.0  ;;  %v3610_v29 = vmul.f32 0.0078125, %v3606_v56  ;;  %v3574_v44 = vld [vmem:[#allocation9 + $0x480] sm:$0xff] }
0x17fc   : > { %v3648_v12 = vmul.f32 %v4753_v19, %v3625_v23  ;;  %vm3654_vm7 = vweird.f32 %v4753_v19 }
0x17fd   : > { %v3624_v30 = vadd.f32 0.001, %v3620_v34  ;;  %v3618_v20 = vsub.f32 %v3610_v29, %v3614_v37  ;;  %vm3655_vm9 = vmor %vm3653_vm8, %vm3654_vm7 }
0x17fe   : > { %v3649_v5 = vmul.f32 %v4753_v19, %v3648_v12 }
0x17ff   : > { %4754 = vrsqrt.f32 %v3624_v30  ;;  %v3622_v1 = vmax.f32 %v3618_v20, 0.0  ;;  %vm3643_vm11 = vweird.f32 %v3624_v30 }
0x1800   : > { %v3650_v27 = vmul.f32 0.5, %v3649_v5 }
0x1801   : > { %v3626_v47 = vadd.f32 0.001, %v3622_v1 }
0x1802   : > { %v3651_v28 = vsub.f32 1.5, %v3650_v27  ;;  %v3600_v58 = vpop.xlane.xlu2 %3599 }
0x1803   : > { %4756 = vrsqrt.f32 %v3626_v47  ;;  %v3607_v25 = vmul.f32 0.0078125, %v3600_v58  ;;  %vm3663_vm15 = vweird.f32 %v3626_v47 }
0x1804   : > { %v3652_v45 = vmul.f32 %v4753_v19, %v3651_v28 }
0x1805   : > { %v4755_v16 = vpop.eup %4754  ;;  %v3615_v8 = vsub.f32 %v3607_v25, %v3611_v0 }
0x1806   : > { %v3638_v61 = vmul.f32 %v4755_v16, %v3624_v30  ;;  %v3656_v13 = vsel %vm3655_vm9, %v4753_v19, %v3652_v45  ;;  %vm3644_vm10 = vweird.f32 %v4755_v16 }
0x1807   : > { %v3619_v22 = vmax.f32 %v3615_v8, 0.0  ;;  %v3669_v62 = vmul.f32 %v3656_v13, %v3571_v7  ;;  %vm3645_vm12 = vmor %vm3643_vm11, %vm3644_vm10 }
0x1808   : > { %v3639_v63 = vmul.f32 %v4755_v16, %v3638_v61 }
0x1809   : > { %v4757_v31 = vpop.eup %4756  ;;  %v3623_v49 = vadd.f32 0.001, %v3619_v22  ;;  %3691 = vperm.xlu1 %4648, %v3669_v62   ;;  %v3673_v35 = vmul.f32 %v3669_v62, %v3593_v40 }
0x180a   : > { %v3640_v2 = vmul.f32 0.5, %v3639_v63  ;;  %v3658_v55 = vmul.f32 %v4757_v31, %v3626_v47  ;;  %vm3664_vm13 = vweird.f32 %v4757_v31  ;;  %v4513_v63 = vld [vmem:[#allocation11 + $0x90] sm:$0xff] }
0x180b   : > { %4758 = vrsqrt.f32 %v3623_v49  ;;  %v3677_v15 = vsub.f32 %v3576_v43, %v3673_v35  ;;  %vm3665_vm1 = vmor %vm3663_vm15, %vm3664_vm13  ;;  %vm3633_vm3 = vweird.f32 %v3623_v49  ;;  %v4514_v43 = vld [vmem:[#allocation11 + $0x98] sm:$0xff] }
0x180c   : > { %v3641_v18 = vsub.f32 1.5, %v3640_v2  ;;  %v3659_v14 = vmul.f32 %v4757_v31, %v3658_v55 }
0x180d   : > { %3715 = vperm.xlu0 %4647, %v3677_v15  }
0x180e   : > { %v3642_v59 = vmul.f32 %v4755_v16, %v3641_v18  ;;  %v3660_v41 = vmul.f32 0.5, %v3659_v14 }
0x1810   : > { %v3646_v46 = vsel %vm3645_vm12, %v4755_v16, %v3642_v59  ;;  %v3661_v32 = vsub.f32 1.5, %v3660_v41 }
0x1811   : > { %v4759_v26 = vpop.eup %4758  ;;  %v3668_v51 = vmul.f32 %v3646_v46, %v3570_v33 }
0x1812   : > { %v3662_v48 = vmul.f32 %v4757_v31, %v3661_v32  ;;  %v3628_v54 = vmul.f32 %v4759_v26, %v3623_v49  ;;  %vm3634_vm2 = vweird.f32 %v4759_v26 }
0x1813   : > { %3686 = vperm.xlu1 %4648, %v3668_v51   ;;  %vm3635_vm4 = vmor %vm3633_vm3, %vm3634_vm2  ;;  %v3672_v37 = vmul.f32 %v3668_v51, %v6056_v6  ;;  %vm4065_vm3 = vcmask 1040384  }
0x1814   : > { %v3666_v40 = vsel %vm3665_vm1, %v4757_v31, %v3662_v48  ;;  %v3629_v17 = vmul.f32 %v4759_v26, %v3628_v54 }
0x1815   : > { %v3670_v50 = vmul.f32 %v3666_v40, %v3572_v21 }
0x1816   : > { %v3630_v52 = vmul.f32 0.5, %v3629_v17 }
0x1817   : > { %v3674_v38 = vmul.f32 %v3670_v50, %v6058_v57  ;;  %v3575_v57 = vld [vmem:[#allocation9 + $0x488] sm:$0xff] }
0x1818   : > { %v3631_v3 = vsub.f32 1.5, %v3630_v52  ;;  %v3676_v34 = vsub.f32 %v3575_v57, %v3672_v37 }
0x1819   : > { %v3678_v23 = vsub.f32 %v3577_v36, %v3674_v38 }
0x181a   : > { %v3632_v24 = vmul.f32 %v4759_v26, %v3631_v3 }
0x181b   : > { %3720 = vperm.xlu0 %4647, %v3678_v23  }
0x181c   : > { %v3636_v39 = vsel %vm3635_vm4, %v4759_v26, %v3632_v24  ;;  %vm4068_vm4 = vcmask 1042432  }
0x181d   : > { %v3667_v11 = vmul.f32 %v3636_v39, %v3569_v53 }
0x181f   : > { %3681 = vperm.xlu2 %4649, %v3667_v11   ;;  %v3671_v56 = vmul.f32 %v3667_v11, %v6064_v10 }
0x1821   : > { %v3675_v19 = vsub.f32 %v3574_v44, %v3671_v56 }
0x1823   : > { %3705 = vperm.xlu0 %4647, %v3675_v19  }
0x1827   : > { %3696 = vperm.xlu2 %4649, %v3670_v50  }
0x182f   : > { %3710 = vperm.xlu2 %4649, %v3676_v34  }
0x1879   : > { %v3682_v29 = vpop.permute.xlu2 %3681 }
0x187a   : > { %v3699_v45 = vmul.f32 %v3682_v29, %v6036_v9 }
0x187b   : > { %v3692_v30 = vpop.permute.xlu1 %3691 }
0x187c   : > { %v3701_v5 = vmul.f32 %v3692_v30, %v6039_v4 }
0x187f   : > { %v3716_v12 = vpop.permute.xlu0 %3715 }
0x1880   : > { %v3725_v1 = vadd.f32 %v3716_v12, %v3701_v5 }
0x1881   : > { %v3697_v20 = vpop.permute.xlu2 %3696 }
0x1882   : > { %v3702_v27 = vmul.f32 %v3697_v20, %v6046_v60  ;;  %v3729_v58 = vmax.f32 %v3725_v1, 0.0 }
0x1885   : > { %v3687_v10 = vpop.permute.xlu1 %3686 }
0x1886   : > { %v3700_v6 = vmul.f32 %v3687_v10, %v6044_v42 }
0x1889   : > { %v3711_v25 = vpop.permute.xlu2 %3710 }
0x188a   : > { %v3724_v16 = vadd.f32 %v3711_v25, %v3700_v6 }
0x188c   : > { %v3728_v13 = vmax.f32 %v3724_v16, 0.0 }
0x188d   : > { %v3721_v47 = vpop.permute.xlu0 %3720 }
0x188e   : > { %v3726_v28 = vadd.f32 %v3721_v47, %v3702_v27 }
0x1890   : > { %v3730_v0 = vmax.f32 %v3726_v28, 0.0 }
0x1892   : > { %v3732_v7 = vpack.c.bf16 %v3730_v0, %v3729_v58  ;;  %v3771_v58 = vld [vmem:[#allocation9 + $0x4b0] sm:$0xff] }
0x1894   : > { %3755 = vmatpush.bf16.msra.mxu2 %v3732_v7 }
0x1895   : > { %v3706_v8 = vpop.permute.xlu0 %3705 }
0x1896   : > { %v3723_v61 = vadd.f32 %v3706_v8, %v3699_v45 }
0x1898   : > { %v3727_v22 = vmax.f32 %v3723_v61, 0.0 }
0x189a   : > { %v3731_v62 = vpack.c.bf16 %v3728_v13, %v3727_v22 }
0x189c   : > { %3756 = vmatpush.bf16.msra.mxu2 %v3731_v62 }
0x189f   : > { %4474 = vmatmul.msk.bf16.vlgmr.msra.gmra.mxu2 %vm842_vm14, %v4513_v63 }
0x18af   : > { %4475 = vmatmul.msk.bf16.gmra.mxu2 %vm842_vm14, %v4514_v43  ;;  %v3772_v43 = vld [vmem:[#allocation9 + $0x4b8] sm:$0xff] }
0x1922   : > { %v6077_v31 = vpop.f32.mrf.mxu2 }
0x1923   : > { %3788 = vadd.xlane.f32.xlu0 %v6077_v31  ;;  %v3800_v14 = vmul.f32 %v6077_v31, %v6077_v31 }
0x192a   : > { %v6080_v49 = vpop.f32.mrf.mxu2 }
0x192b   : > { %v3801_v18 = vmul.f32 %v6080_v49, %v6080_v49 }
0x1932   : > { %v6082_v35 = vpop.f32.mrf.mxu2 }
0x1933   : > { %v3802_v2 = vmul.f32 %v6082_v35, %v6082_v35  ;;  %3792 = vadd.xlane.f32.xlu1 %v6082_v35 }
0x1935   : > { %3808 = vadd.xlane.f32.xlu2 %v3802_v2 }
0x193a   : > { %v6087_v55 = vpop.f32.mrf.mxu2 }
0x193b   : > { %v3803_v15 = vmul.f32 %v6087_v55, %v6087_v55  ;;  %3794 = vadd.xlane.f32.xlu0 %v6087_v55 }
0x193d   : > { %3790 = vadd.xlane.f32.xlu2 %v6080_v49  ;;  %3810 = vadd.xlane.f32.xlu1 %v3803_v15 }
0x1943   : > { %3806 = vadd.xlane.f32.xlu0 %v3801_v18 }
0x1945   : > { %3804 = vadd.xlane.f32.xlu1 %v3800_v14 }
0x1996   : > { %v3789_v33 = vpop.xlane.xlu0 %3788 }
0x1997   : > { %v6107_v23 = vmul.f32 0.0078125, %v3789_v33 }
0x1999   : > { %v3816_v57 = vmul.f32 %v6107_v23, %v6107_v23 }
0x19a6   : > { %v3793_v59 = vpop.xlane.xlu1 %3792 }
0x19a7   : > { %v6097_v41 = vmul.f32 0.0078125, %v3793_v59 }
0x19a8   : > { %v3809_v46 = vpop.xlane.xlu2 %3808 }
0x19a9   : > { %v3818_v32 = vmul.f32 %v6097_v41, %v6097_v41  ;;  %v3814_v26 = vmul.f32 0.0078125, %v3809_v46 }
0x19ab   : > { %v3822_v51 = vsub.f32 %v3814_v26, %v3818_v32  ;;  %v3777_v32 = vld [vmem:[#allocation9 + $0x4d8] sm:$0xff] }
0x19ad   : > { %v3826_v48 = vmax.f32 %v3822_v51, 0.0 }
0x19ae   : > { %v3795_v54 = vpop.xlane.xlu0 %3794 }
0x19af   : > { %v3830_v21 = vadd.f32 0.001, %v3826_v48  ;;  %v6101_v40 = vmul.f32 0.0078125, %v3795_v54 }
0x19b0   : > { %v3791_v17 = vpop.xlane.xlu2 %3790  ;;  %v3811_v50 = vpop.xlane.xlu1 %3810 }
0x19b1   : > { %4760 = vrsqrt.f32 %v3830_v21  ;;  %v3819_v52 = vmul.f32 %v6101_v40, %v6101_v40  ;;  %v3815_v36 = vmul.f32 0.0078125, %v3811_v50  ;;  %v6105_v38 = vmul.f32 0.0078125, %v3791_v17  ;;  %v3770_v50 = vld [vmem:[#allocation9 + $0x4a8] sm:$0xff] }
0x19b2   : > { %vm3858_vm6 = vweird.f32 %v3830_v21 }
0x19b3   : > { %v3823_v3 = vsub.f32 %v3815_v36, %v3819_v52  ;;  %v3817_v11 = vmul.f32 %v6105_v38, %v6105_v38 }
0x19b5   : > { %v3827_v53 = vmax.f32 %v3823_v3, 0.0 }
0x19b6   : > { %v3807_v24 = vpop.xlane.xlu0 %3806 }
0x19b7   : > { %v4761_v39 = vpop.eup %4760  ;;  %v3813_v44 = vmul.f32 0.0078125, %v3807_v24  ;;  %v3831_v19 = vadd.f32 0.001, %v3827_v53  ;;  %v3774_v24 = vld [vmem:[#allocation9 + $0x4c0] sm:$0xff] }
0x19b8   : > { %v3853_v56 = vmul.f32 %v4761_v39, %v3830_v21  ;;  %v3805_v37 = vpop.xlane.xlu1 %3804  ;;  %vm3859_vm5 = vweird.f32 %v4761_v39  ;;  %v3769_v21 = vld [vmem:[#allocation9 + $0x4a0] sm:$0xff] }
0x19b9   : > { %v3821_v34 = vsub.f32 %v3813_v44, %v3817_v11  ;;  %v3812_v29 = vmul.f32 0.0078125, %v3805_v37  ;;  %4762 = vrsqrt.f32 %v3831_v19  ;;  %vm3860_vm7 = vmor %vm3858_vm6, %vm3859_vm5  ;;  %vm3868_vm9 = vweird.f32 %v3831_v19  ;;  %v3776_v44 = vld [vmem:[#allocation9 + $0x4d0] sm:$0xff]  ;;  %v3785_v37 = vld [vmem:[#allocation9 + $0x4e8] sm:$0xff] }
0x19ba   : > { %v3854_v12 = vmul.f32 %v4761_v39, %v3853_v56  ;;  %v3784_v56 = vld [vmem:[#allocation9 + $0x4e0] sm:$0xff]  ;;  %vm4070_vm5 = vcmask 1043456   ;;  %vm4074_vm6 = vcmask 1045504  }
0x19bb   : > { %v3825_v30 = vmax.f32 %v3821_v34, 0.0  ;;  %v3820_v20 = vsub.f32 %v3812_v29, %v3816_v57  ;;  %v3775_v34 = vld [vmem:[#allocation9 + $0x4c8] sm:$0xff]  ;;  %v3787_v29 = vld [vmem:[#allocation9 + $0x4f8] sm:$0xff] }
0x19bc   : > { %v3855_v5 = vmul.f32 0.5, %v3854_v12 }
0x19bd   : > { %v3829_v1 = vadd.f32 0.001, %v3825_v30  ;;  %v3824_v27 = vmax.f32 %v3820_v20, 0.0  ;;  %v3786_v30 = vld [vmem:[#allocation9 + $0x4f0] sm:$0xff] }
0x19be   : > { %v3856_v47 = vsub.f32 1.5, %v3855_v5  ;;  %v4000_v20 = vld [vmem:[#allocation9 + $0x510] sm:$0xff]  ;;  %v3999_v5 = vld [vmem:[#allocation9 + $0x508] sm:$0xff] }
0x19bf   : > { %4764 = vrsqrt.f32 %v3829_v1  ;;  %v3828_v28 = vadd.f32 0.001, %v3824_v27  ;;  %v4763_v10 = vpop.eup %4762  ;;  %vm3848_vm13 = vweird.f32 %v3829_v1 }
0x19c0   : > { %v3857_v0 = vmul.f32 %v4761_v39, %v3856_v47  ;;  %v3863_v25 = vmul.f32 %v4763_v10, %v3831_v19  ;;  %vm3869_vm8 = vweird.f32 %v4763_v10 }
0x19c1   : > { %4766 = vrsqrt.f32 %v3828_v28  ;;  %vm3870_vm10 = vmor %vm3868_vm9, %vm3869_vm8  ;;  %vm3838_vm1 = vweird.f32 %v3828_v28 }
0x19c2   : > { %v3861_v6 = vsel %vm3860_vm7, %v4761_v39, %v3857_v0  ;;  %v3864_v7 = vmul.f32 %v4763_v10, %v3863_v25  ;;  %vm4076_vm7 = vcmask 1046528  }
0x19c3   : > { %v3874_v45 = vmul.f32 %v3861_v6, %v3771_v58 }
0x19c4   : > { %v3865_v8 = vmul.f32 0.5, %v3864_v7 }
0x19c5   : > { %v4765_v16 = vpop.eup %4764  ;;  %3896 = vperm.xlu2 %4649, %v3874_v45   ;;  %v3878_v11 = vmul.f32 %v3874_v45, %v6097_v41  ;;  %v4001_v41 = vld [vmem:[#allocation9 + $0x518] sm:$0xff] }
0x19c6   : > { %v3843_v61 = vmul.f32 %v4765_v16, %v3829_v1  ;;  %v3866_v22 = vsub.f32 1.5, %v3865_v8  ;;  %vm3849_vm11 = vweird.f32 %v4765_v16  ;;  %v4002_v1 = vld [vmem:[#allocation2] sm:$0x1] }
0x19c7   : > { %v4767_v13 = vpop.eup %4766  ;;  %vm3850_vm15 = vmor %vm3848_vm13, %vm3849_vm11  ;;  %v3882_v19 = vsub.f32 %v3776_v44, %v3878_v11 }
0x19c8   : > { %v3844_v62 = vmul.f32 %v4765_v16, %v3843_v61  ;;  %v3833_v63 = vmul.f32 %v4767_v13, %v3828_v28  ;;  %v3867_v2 = vmul.f32 %v4763_v10, %v3866_v22  ;;  %vm3839_vm12 = vweird.f32 %v4767_v13 }
0x19c9   : > { %vm3840_vm2 = vmor %vm3838_vm1, %vm3839_vm12 }
0x19ca   : > { %v3845_v15 = vmul.f32 0.5, %v3844_v62  ;;  %v3834_v18 = vmul.f32 %v4767_v13, %v3833_v63  ;;  %v3871_v14 = vsel %vm3870_vm10, %v4763_v10, %v3867_v2 }
0x19cb   : > { %v3875_v46 = vmul.f32 %v3871_v14, %v3772_v43 }
0x19cc   : > { %v3846_v33 = vsub.f32 1.5, %v3845_v15  ;;  %v3835_v59 = vmul.f32 0.5, %v3834_v18  ;;  %v4515_v15 = vld [vmem:[#allocation11 + $0xa0] sm:$0xff]  ;;  %v4516_v18 = vld [vmem:[#allocation11 + $0xa8] sm:$0xff] }
0x19cd   : > { %3901 = vperm.xlu1 %4648, %v3875_v46   ;;  %v3879_v51 = vmul.f32 %v3875_v46, %v6101_v40 }
0x19ce   : > { %v3836_v26 = vsub.f32 1.5, %v3835_v59  ;;  %v3847_v48 = vmul.f32 %v4765_v16, %v3846_v33 }
0x19cf   : > { %v3883_v54 = vsub.f32 %v3777_v32, %v3879_v51 }
0x19d0   : > { %v3837_v17 = vmul.f32 %v4767_v13, %v3836_v26  ;;  %v3851_v52 = vsel %vm3850_vm15, %v4765_v16, %v3847_v48 }
0x19d1   : > { %3925 = vperm.xlu2 %4649, %v3883_v54   ;;  %v3873_v53 = vmul.f32 %v3851_v52, %v3770_v50 }
0x19d2   : > { %v3841_v36 = vsel %vm3840_vm2, %v4767_v13, %v3837_v17 }
0x19d3   : > { %v3872_v3 = vmul.f32 %v3841_v36, %v3769_v21  ;;  %v3877_v57 = vmul.f32 %v3873_v53, %v6105_v38 }
0x19d5   : > { %3886 = vperm.xlu0 %4647, %v3872_v3   ;;  %v3876_v39 = vmul.f32 %v3872_v3, %v6107_v23  ;;  %3891 = vperm.xlu1 %4648, %v3873_v53   ;;  %v3881_v12 = vsub.f32 %v3775_v34, %v3877_v57  ;;  %v3998_v23 = vld [vmem:[#allocation9 + $0x500] sm:$0xff]  ;;  %v5142_v53 = vmov 1.0  }
0x19d6   : > { %4095 = vmatpush.xpose.msrb.mxu0 %v5142_v53 }
0x19d7   : > { %v3880_v40 = vsub.f32 %v3774_v24, %v3876_v39 }
0x19d9   : > { %3910 = vperm.xlu2 %4649, %v3880_v40  }
0x19dd   : > { %3920 = vperm.xlu0 %4647, %v3882_v19   ;;  %3940 = vperm.xlu1 %4648, %v3784_v56  }
0x19e1   : > { %3945 = vperm.xlu2 %4649, %v3785_v37  }
0x19e5   : > { %3915 = vperm.xlu0 %4647, %v3881_v12   ;;  %3955 = vperm.xlu1 %4648, %v3787_v29  }
0x19e9   : > { %4005 = vperm.xlu2 %4649, %v3998_v23  }
0x19ed   : > { %3950 = vperm.xlu0 %4647, %v3786_v30   ;;  %4015 = vperm.xlu1 %4648, %v4000_v20  }
0x19f1   : > { %4020 = vperm.xlu2 %4649, %v4001_v41  }
0x19f5   : > { %4010 = vperm.xlu0 %4647, %v3999_v5  }
0x19fd   : > { %4038 = vperm.xlu0 %4647, %v4002_v1  }
0x1a1f   : > { %v3897_v27 = vpop.permute.xlu2 %3896 }
0x1a20   : > { %v3906_v58 = vmul.f32 %v3897_v27, %v6082_v35 }
0x1a2b   : > { %v3926_v10 = vpop.permute.xlu2 %3925 }
0x1a33   : > { %v3911_v13 = vpop.permute.xlu2 %3910 }
0x1a3b   : > { %v3946_v36 = vpop.permute.xlu2 %3945 }
0x1a3f   : > { %v3902_v38 = vpop.permute.xlu1 %3901 }
0x1a40   : > { %v3907_v28 = vmul.f32 %v3902_v38, %v6087_v55 }
0x1a42   : > { %v3931_v0 = vadd.f32 %v3926_v10, %v3907_v28 }
0x1a43   : > { %v4006_v12 = vpop.permute.xlu2 %4005 }
0x1a44   : > { %v3935_v7 = vmax.f32 %v3931_v0, 0.0 }
0x1a47   : > { %v3887_v47 = vpop.permute.xlu0 %3886  ;;  %v3892_v8 = vpop.permute.xlu1 %3891 }
0x1a48   : > { %v3904_v45 = vmul.f32 %v3887_v47, %v6077_v31  ;;  %v3905_v62 = vmul.f32 %v3892_v8, %v6080_v49  ;;  %v4044_v31 = vld [vmem:[%s5383_s30] sm:$0xf] }
0x1a49   : > { %v4046_v14 = vrot.slane %v4044_v31, 6  ;;  %v4049_v33 = vrot.slane %v4044_v31, 7  ;;  %v4052_v26 = vrot.slane %v4044_v31, 5  ;;  %v4063_v40 = vrot.slane %v4044_v31, 2 }
0x1a4a   : > { %v3928_v22 = vadd.f32 %v3911_v13, %v3904_v45 }
0x1a4b   : > { %v4048_v59 = vmul.f32 %v4046_v14, %v4044_v31  ;;  %v4051_v46 = vmul.f32 %v4049_v33, %v4044_v31  ;;  %v4054_v54 = vmul.f32 %v4052_v26, %v4044_v31  ;;  %v4021_v0 = vpop.permute.xlu2 %4020 }
0x1a4c   : > { %v3932_v43 = vmax.f32 %v3928_v22, 0.0 }
0x1a4d   : > { %v4056_v32 = vrot.slane %v4048_v59, 2  ;;  %v4059_v49 = vrot.slane %v4051_v46, 1  ;;  %v4061_v50 = vrot.slane %v4048_v59, 7 }
0x1a4f   : > { %v3921_v25 = vpop.permute.xlu0 %3920  ;;  %v4066_v48 = vsel %vm4065_vm3, %v4056_v32, %v4059_v49  ;;  %v3941_v21 = vpop.permute.xlu1 %3940 }
0x1a50   : > { %v3930_v6 = vadd.f32 %v3921_v25, %v3906_v58  ;;  %v4067_v17 = vsel %vm645_vm0, %v4066_v48, %v4044_v31 }
0x1a51   : > { %v4069_v52 = vsel %vm4068_vm4, %v4067_v17, %v4054_v54 }
0x1a52   : > { %v3934_v16 = vmax.f32 %v3930_v6, 0.0  ;;  %v4071_v24 = vsel %vm4070_vm5, %v4069_v52, %v4061_v50 }
0x1a54   : > { %v3937_v61 = vpack.c.bf16 %v3935_v7, %v3934_v16 }
0x1a56   : > { %3980 = vmatpush.bf16.msra.mxu3 %v3937_v61 }
0x1a57   : > { %v3916_v63 = vpop.permute.xlu0 %3915  ;;  %v3956_v11 = vpop.permute.xlu1 %3955 }
0x1a58   : > { %v3929_v55 = vadd.f32 %v3916_v63, %v3905_v62 }
0x1a5a   : > { %v3933_v2 = vmax.f32 %v3929_v55, 0.0 }
0x1a5c   : > { %v3936_v35 = vpack.c.bf16 %v3933_v2, %v3932_v43 }
0x1a5e   : > { %3981 = vmatpush.bf16.msra.mxu3 %v3936_v35 }
0x1a5f   : > { %v3951_v39 = vpop.permute.xlu0 %3950  ;;  %v4016_v1 = vpop.permute.xlu1 %4015 }
0x1a61   : > { %4484 = vmatmul.msk.bf16.vlgmr.msra.gmra.mxu3 %vm842_vm14, %v4515_v15 }
0x1a67   : > { %v4011_v41 = vpop.permute.xlu0 %4010 }
0x1a6f   : > { %v4039_v16 = vpop.permute.xlu0 %4038 }
0x1a70   : > { %v4041_v61 = vperm.slane %v4039_v16, 0 }
0x1a71   : > { %4485 = vmatmul.msk.bf16.gmra.mxu3 %vm842_vm14, %v4516_v18  ;;  %vm4072_vm14 = vcmask 1044480  }
0x1a72   : > { %v4073_v44 = vsel %vm4072_vm14, %v4071_v24, %v4046_v14 }
0x1a73   : > { %v4075_v19 = vsel %vm4074_vm6, %v4073_v44, %v4063_v40 }
0x1a74   : > { %v4077_v57 = vsel %vm4076_vm7, %v4075_v19, %v4063_v40 }
0x1a75   : > { %4096 = vmatpush.xpose.msrb.mxu0 %v4077_v57 }
0x1ae4   : > { %v3983_v51 = vpop.f32.mrf.mxu3 }
0x1ae5   : > { %v3984_v34 = vadd.f32 %v3983_v51, %v3941_v21 }
0x1ae7   : > { %v3993_v30 = vadd.f32 %v3984_v34, %v6036_v9 }
0x1ae9   : > { %v4023_v38 = vmul.f32 %v4006_v12, %v3993_v30 }
0x1aec   : > { %v3985_v3 = vpop.f32.mrf.mxu3 }
0x1aed   : > { %v3986_v56 = vadd.f32 %v3985_v3, %v3946_v36 }
0x1aef   : > { %v3994_v23 = vadd.f32 %v3986_v56, %v6044_v42 }
0x1af1   : > { %v4024_v5 = vmul.f32 %v4011_v41, %v3994_v23 }
0x1af3   : > { %v4027_v10 = vadd.f32 %v4024_v5, %v4023_v38 }
0x1af4   : > { %v3988_v37 = vpop.f32.mrf.mxu3 }
0x1af5   : > { %v3989_v29 = vadd.f32 %v3988_v37, %v3951_v39 }
0x1af7   : > { %v3995_v20 = vadd.f32 %v3989_v29, %v6039_v4 }
0x1af9   : > { %v4025_v47 = vmul.f32 %v4016_v1, %v3995_v20 }
0x1afb   : > { %v4028_v25 = vadd.f32 %v4027_v10, %v4025_v47 }
0x1afc   : > { %v3990_v27 = vpop.f32.mrf.mxu3 }
0x1afd   : > { %v3991_v28 = vadd.f32 %v3990_v27, %v3956_v11 }
0x1aff   : > { %v3996_v58 = vadd.f32 %v3991_v28, %v6046_v60 }
0x1b01   : > { %v4026_v6 = vmul.f32 %v4021_v0, %v3996_v58 }
0x1b03   : > { %v4029_v7 = vadd.f32 %v4028_v25, %v4026_v6 }
0x1b05   : > { %v4030_v42 = vrot.slane %v4029_v7, 4 }
0x1b07   : > { %v4031_v9 = vadd.f32 %v4030_v42, %v4029_v7 }
0x1b09   : > { %v4032_v45 = vrot.slane %v4031_v9, 2 }
0x1b0b   : > { %v4033_v4 = vadd.f32 %v4032_v45, %v4031_v9 }
0x1b0d   : > { %v4034_v8 = vrot.slane %v4033_v4, 1 }
0x1b0f   : > { %v4035_v13 = vadd.f32 %v4034_v8, %v4033_v4 }
0x1b11   : > { %v4042_v22 = vadd.f32 %v4041_v61, %v4035_v13 }
0x1b13   : > { %4768 = vtanh.f32 %v4042_v22  ;;  %4043 = vst [vmem:[%s584_s19] sm:$0x1] %v4042_v22 }
0x1b19   : > { %v4769_v60 = vpop.eup %4768 }
0x1b1a   : > { %v4079_v62 = vmax.f32 %v4769_v60, 0.0 }
0x1b1c   : > { %v4080_v63 = vmul.f32 %v4079_v62, %v4077_v57 }
0x1b1e   : > { %4097 = vmatmul.f32.vlgmr.msrb.gmra.mxu0 %v4080_v63 }
0x1b26   : > { %4100 = vmatmul.f32.gmra.mxu0 %v4079_v62 }
0x1b27   : > { %5067 = shalt.err (!%p5064_p10)
}
0x1b28   : > { %4549 = dma.vmem_to_hbm [thread:$0]  (%p5323_p0), %s4125_s14, 16, %s4127_s10, %s4109_s4   ;;  %vm4104_vm0 = vcmask 72704   ;;  %vm4106_vm8 = vcmask 65536  }
0x1b29   : > { %p592_p12 = scmp.lt.s32.totalorder %s5235_s29, 1  ;;  %s6209_s27 = sld [smem:[#allocation35_spill]] }
0x1b2b   : > { %s6217_s29 = smov (!%p592_p12, %s5235_s29), 1 }
0x1b2c   : > { %s4488_s6 = sshll.u32 %s6217_s29, 4 }
0x1b2f   : > { %s596_s3 = scalar_lea.vmem %s6209_s27, %s4488_s6 }
0x1b9b   : > { %v4098_v55 = vpop.f32.mrf.mxu0 }
0x1b9c   : > { %4105 = vst.msk [vmem:[%s596_s3] sm:$0xff] %vm4104_vm0, %v4098_v55 }
0x1ba3   : > { %v4101_v43 = vpop.f32.mrf.mxu0 }
0x1ba4   : > { %4107 = vst.msk [vmem:[%s596_s3 + $0x8] sm:$0x1] %vm4106_vm8, %v4101_v43 }
0x1ba5 PF: > { %s4141_s22 = sand.u32 1, %s5114_s23   ;;  %p6210_p0 = scmp.ge.s32.totalorder %s5126_s26, 2 }
0x1ba6   : > { %s4142_s29 = scalar_lea.sflag [#allocation5], %s4141_s22 }
0x1ba7   : > { %p4581_p5 = pnand %p6210_p0, %p5329_p6 }
0x1ba9   : > { %p4582_p11 = pneg %p4581_p5 }
0x1bab   : > { %5109 = dma.done.wait (%p4582_p11), %s4142_s29, 16  }
0x1bac   : > { %5111 = vsyncadd (%p4582_p11), %s4142_s29, 4294967280  ;;  %s6211_s19 = sld [smem:[#allocation26_spill]]  ;;  %p34_p2 = scmp.ge.s32.totalorder %s5299_s13, 4  }
0x1bad   : > { %s6212_s23 = smov %s5118_s24  ;;  %s6213_s24 = smov %s5122_s25 }
0x1bae   : > { %s6215_s26 = smov %s5299_s13  ;;  %36 = sbr.rel (!%p34_p2) target bundleno = 20 (0x14), region = 220 }
0x1bb2   : > { %s6214_s25 = smov %s6211_s19 }
0x1bb3   :  { %4155 = vsyncpa [#allocation4], 1 }
0x1bb4   :  { %4157 = vsyncpa [#allocation4 + $0x1], 1 }
0x1bb5   :  { %4158 = vsyncpa [#allocation7], 1 }
0x1bb6   :  { %4160 = vsyncpa [#allocation7 + $0x1], 1 }
0x1bb7   :  { %4161 = vsyncpa [#allocation10], 1 }
0x1bb8   :  { %4162 = vsyncpa [#allocation13], 1 }
0x1bb9   :  { %4163 = vsyncpa [#allocation16], 1 }
0x1bba   :  { %4164 = vsyncpa [#allocation5], 1 }
0x1bbb   :  { %4166 = vsyncpa [#allocation5 + $0x1], 1 }

</bundles_post_ra>
